<compile_context>
chip_gen: v7x
topology: tpu7x:2x2x1
jax: 0.10.0
libtpu: 0.0.40
codegen_flags: <defaults>
</compile_context>

<pallas_src>
import functools
import math

import jax
import jax.numpy as jnp
import numpy as np
from jax.experimental import pallas as pl
from jax.experimental.pallas import tpu as pltpu


def _mha_kernel(q_ref, k_ref, v_ref, qm_ref, km_ref, *rest, h, dk, has_att_mas):
    if has_att_mas:
        am_ref, wq_ref, wk_ref, wv_ref, wo_ref, o_ref = rest
    else:
        wq_ref, wk_ref, wv_ref, wo_ref, o_ref = rest

    cd = jnp.bfloat16  # MXU operand dtype (fp32 accumulate)

    xq = q_ref[0]                      # (tq, d)   fp32 activations
    xk = k_ref[0]                      # (nk, d)
    xv = v_ref[0]
    qm = qm_ref[0]                     # (tq, 1)   query token mask (column vector)
    km = km_ref[0]                     # (1, nk)   key token mask (row vector, pre-laid-out)

    # --- Q/K/V projections: bf16 operands, fp32 MXU accumulate ---
    qp = jnp.dot(xq.astype(cd), wq_ref[...], preferred_element_type=jnp.float32)
    kp = jnp.dot(xk.astype(cd), wk_ref[...], preferred_element_type=jnp.float32)
    vp = jnp.dot(xv.astype(cd), wv_ref[...], preferred_element_type=jnp.float32)

    tq = qp.shape[0]
    nk = kp.shape[0]

    # --- mask built in-kernel from the 1-D token masks (no (n,n) HBM DMA) ---
    mas = qm * km                                     # (tq, nk)
    if has_att_mas:
        mas = mas * am_ref[0]                         # user-supplied attention mask
    scale = 1.0 / math.sqrt(dk)
    bias = (1.0 - mas) * (-10000.0 * scale)           # additive bias, pre-scaled by 1/sqrt(dk)

    # --- all heads batched into single dots (better MXU fill than per-head slices) ---
    qh = (qp * scale).reshape(tq, h, dk)              # fold 1/sqrt(dk) into Q once
    kh = kp.reshape(nk, h, dk)
    vh = vp.reshape(nk, h, dk)

    s = jnp.einsum("qhd,khd->hqk", qh.astype(cd), kh.astype(cd),
                   preferred_element_type=jnp.float32)            # (h, tq, nk)
    s = s + bias[None, :, :]

    m = jnp.max(s, axis=-1, keepdims=True)
    p = jnp.exp(s - m)
    denom = jnp.sum(p, axis=-1, keepdims=True)
    p = p * pl.reciprocal(denom, approx=True)                     # EUP reciprocal
    p = p * mas[None, :, :]                                       # matches module: softmax(...) * mas

    y = jnp.einsum("hqk,khd->qhd", p.astype(cd), vh.astype(cd),
                   preferred_element_type=jnp.float32)            # (tq, h, dk)
    y = y.reshape(tq, h * dk)

    out = jnp.dot(y.astype(cd), wo_ref[...], preferred_element_type=jnp.float32)
    o_ref[0] = (out * qm).astype(o_ref.dtype)                     # final * q_mas


def multi_head_attention(Q, K, V, q_mas, params, k_mas=None, att_mas=None, tq=None):
    """Q: (bs,nq,d); K,V: (bs,nk,d); q_mas: (bs,nq); k_mas: (bs,nk); att_mas: (bs,nq,nk)."""
    bs, nq, d = Q.shape
    nk = K.shape[1]
    h = params["h"]
    dk = d // h
    if k_mas is None:
        k_mas = q_mas

    qm = q_mas.reshape(bs, nq, 1).astype(jnp.float32)     # column-oriented for the q tile
    km = k_mas.reshape(bs, 1, nk).astype(jnp.float32)     # row-oriented (lane-dense) for the kernel

    if tq is None:
        tq = nq if nq <= 128 else 128
    assert nq % tq == 0 and (tq == nq or tq % 8 == 0), "q tile must be full or a multiple of 8"
    grid = (bs, nq // tq)

    has_att = att_mas is not None
    kernel = functools.partial(_mha_kernel, h=h, dk=dk, has_att_mas=has_att)

    def wspec():
        # constant block index: weights stay resident across the whole grid
        return pl.BlockSpec((d, d), lambda b, qi: (0, 0))

    in_specs = [
        pl.BlockSpec((1, tq, d), lambda b, qi: (b, qi, 0)),   # Q tile
        pl.BlockSpec((1, nk, d), lambda b, qi: (b, 0, 0)),    # K (resident across q tiles)
        pl.BlockSpec((1, nk, d), lambda b, qi: (b, 0, 0)),    # V
        pl.BlockSpec((1, tq, 1), lambda b, qi: (b, qi, 0)),   # q mask (tq, 1)
        pl.BlockSpec((1, 1, nk), lambda b, qi: (b, 0, 0)),    # k mask (1, nk)
    ]
    args = [Q.astype(jnp.float32), K.astype(jnp.float32), V.astype(jnp.float32), qm, km]
    if has_att:
        in_specs.append(pl.BlockSpec((1, tq, nk), lambda b, qi: (b, qi, 0)))
        args.append(att_mas.reshape(bs, nq, nk).astype(jnp.float32))
    in_specs += [wspec(), wspec(), wspec(), wspec()]
    args += [params["WQ"], params["WK"], params["WV"], params["WO"]]

    out_spec = pl.BlockSpec((1, tq, d), lambda b, qi: (b, qi, 0))

    return pl.pallas_call(
        kernel,
        out_shape=jax.ShapeDtypeStruct((bs, nq, d), jnp.float32),
        grid=grid,
        in_specs=in_specs,
        out_specs=out_spec,
        compiler_params=pltpu.CompilerParams(
            dimension_semantics=("parallel", "parallel"),
            vmem_limit_bytes=64 * 1024 * 1024),
    )(*args)


# -------------------- pure-JAX reference (mirrors the PyTorch module) --------------------
def mha_reference(Q, K, V, q_mas, params, k_mas=None, att_mas=None):
    bs, nq, d = Q.shape
    nk = K.shape[1]
    h = params["h"]
    dk = d // h
    qm = q_mas.reshape(bs, 1, nq, 1).astype(jnp.float32)
    km = qm if k_mas is None else k_mas.reshape(bs, 1, nk, 1).astype(jnp.float32)
    WQ = params["WQ"].astype(jnp.float32)
    WK = params["WK"].astype(jnp.float32)
    WV = params["WV"].astype(jnp.float32)
    WO = params["WO"].astype(jnp.float32)

    Qp = qm * (Q @ WQ).reshape(bs, nq, h, dk).transpose(0, 2, 1, 3)
    Kp = km * (K @ WK).reshape(bs, nk, h, dk).transpose(0, 2, 1, 3)
    Vp = km * (V @ WV).reshape(bs, nk, h, dk).transpose(0, 2, 1, 3)

    s = Qp @ jnp.swapaxes(Kp, -1, -2)
    mas = qm * jnp.swapaxes(km, -1, -2)
    if att_mas is not None:
        mas = mas * att_mas.reshape(bs, 1, nq, nk).astype(jnp.float32)
    s = s + (1.0 - mas) * (-10000.0)
    p = jax.nn.softmax(s / math.sqrt(dk), axis=-1) * mas
    y = (p @ Vp) * qm
    y = y.transpose(0, 2, 1, 3).reshape(bs, nq, d)
    return (y @ WO) * q_mas.reshape(bs, nq, 1).astype(jnp.float32)


def init_params(key, d_model, h):
    keys = jax.random.split(key, 4)
    scale = 1.0 / math.sqrt(d_model)

    def w(k):  # stored as (in, out) so the kernel computes x @ W; bf16 halves DMA/VMEM
        return (scale * jax.random.normal(k, (d_model, d_model), jnp.float32)).astype(jnp.bfloat16)

    return {"h": h, "WQ": w(keys[0]), "WK": w(keys[1]), "WV": w(keys[2]), "WO": w(keys[3])}


if __name__ == "__main__":
    bs, nq, nk, d_model, h = 2, 16, 8, 512, 4   # module defaults: h=4, d_model=512 -> dk=128

    key = jax.random.PRNGKey(0)
    kq, kk, kv, kw = jax.random.split(key, 4)
    params = init_params(kw, d_model, h)

    Q = jax.random.normal(kq, (bs, nq, d_model), jnp.float32)
    K = jax.random.normal(kk, (bs, nk, d_model), jnp.float32)
    V = jax.random.normal(kv, (bs, nk, d_model), jnp.float32)

    q_len = jnp.array([nq, 11], jnp.int32)
    k_len = jnp.array([nk, 6], jnp.int32)
    q_mas = (jnp.arange(nq)[None, :] < q_len[:, None]).astype(jnp.float32)   # (bs, nq)
    k_mas = (jnp.arange(nk)[None, :] < k_len[:, None]).astype(jnp.float32)   # (bs, nk)

    # 1) cross-attention style: nq != nk, separate k mask, q dimension tiled (grid = (2, 2))
    out1 = jax.block_until_ready(
        multi_head_attention(Q, K, V, q_mas, params, k_mas=k_mas, tq=8))
    ref1 = mha_reference(Q, K, V, q_mas, params, k_mas=k_mas)
    np.testing.assert_allclose(np.asarray(out1), np.asarray(ref1), rtol=2e-2, atol=2e-2)

    # 2) self-attention with an explicit (causal) att_mas
    att = jnp.broadcast_to(jnp.tril(jnp.ones((nq, nq), jnp.float32)), (bs, nq, nq))
    out2 = jax.block_until_ready(
        multi_head_attention(Q, Q, Q, q_mas, params, att_mas=att, tq=8))
    ref2 = mha_reference(Q, Q, Q, q_mas, params, att_mas=att)
    np.testing.assert_allclose(np.asarray(out2), np.asarray(ref2), rtol=2e-2, atol=2e-2)

    print("KERNEL_OK")
</pallas_src>

<mosaic_0001>
module attributes {stable_mosaic.version = 11 : i64} {
  func.func @_mha_kernel(%arg0: i32, %arg1: i32, %arg2: memref<1x8x512xf32, #tpu.memory_space<vmem>>, %arg3: memref<1x8x512xf32, #tpu.memory_space<vmem>>, %arg4: memref<1x8x512xf32, #tpu.memory_space<vmem>>, %arg5: memref<1x8x1xf32, #tpu.memory_space<vmem>>, %arg6: memref<1x1x8xf32, #tpu.memory_space<vmem>>, %arg7: memref<512x512xbf16, #tpu.memory_space<vmem>>, %arg8: memref<512x512xbf16, #tpu.memory_space<vmem>>, %arg9: memref<512x512xbf16, #tpu.memory_space<vmem>>, %arg10: memref<512x512xbf16, #tpu.memory_space<vmem>>, %arg11: memref<1x8x512xf32, #tpu.memory_space<vmem>>) attributes {dimension_semantics = [#tpu.dimension_semantics<parallel>, #tpu.dimension_semantics<parallel>], iteration_bounds = array<i64: 2, 2>, scalar_prefetch = 0 : i64, scratch_operands = 0 : i64, tpu.core_type = #tpu.core_type<tc>, window_params = [{transform_indices = @transform_0, window_bounds = array<i64: 1, 8, 512>}, {transform_indices = @transform_1, window_bounds = array<i64: 1, 8, 512>}, {transform_indices = @transform_2, window_bounds = array<i64: 1, 8, 512>}, {transform_indices = @transform_3, window_bounds = array<i64: 1, 8, 1>}, {transform_indices = @transform_4, window_bounds = array<i64: 1, 1, 8>}, {pipeline_mode = #tpu.pipeline_mode<synchronous>, transform_indices = @transform_5, window_bounds = array<i64: 512, 512>}, {pipeline_mode = #tpu.pipeline_mode<synchronous>, transform_indices = @transform_6, window_bounds = array<i64: 512, 512>}, {pipeline_mode = #tpu.pipeline_mode<synchronous>, transform_indices = @transform_7, window_bounds = array<i64: 512, 512>}, {pipeline_mode = #tpu.pipeline_mode<synchronous>, transform_indices = @transform_8, window_bounds = array<i64: 512, 512>}, {transform_indices = @transform_9, window_bounds = array<i64: 1, 8, 512>}]} {
    %c0 = arith.constant 0 : index
    %c0_0 = arith.constant 0 : index
    %c0_1 = arith.constant 0 : index
    %0 = vector.load %arg2[%c0, %c0_0, %c0_1] : memref<1x8x512xf32, #tpu.memory_space<vmem>>, vector<1x8x512xf32>
    %1 = vector.shape_cast %0 : vector<1x8x512xf32> to vector<8x512xf32>
    %c0_2 = arith.constant 0 : index
    %c0_3 = arith.constant 0 : index
    %c0_4 = arith.constant 0 : index
    %2 = vector.load %arg3[%c0_2, %c0_3, %c0_4] : memref<1x8x512xf32, #tpu.memory_space<vmem>>, vector<1x8x512xf32>
    %3 = vector.shape_cast %2 : vector<1x8x512xf32> to vector<8x512xf32>
    %c0_5 = arith.constant 0 : index
    %c0_6 = arith.constant 0 : index
    %c0_7 = arith.constant 0 : index
    %4 = vector.load %arg4[%c0_5, %c0_6, %c0_7] : memref<1x8x512xf32, #tpu.memory_space<vmem>>, vector<1x8x512xf32>
    %5 = vector.shape_cast %4 : vector<1x8x512xf32> to vector<8x512xf32>
    %c0_8 = arith.constant 0 : index
    %c0_9 = arith.constant 0 : index
    %c0_10 = arith.constant 0 : index
    %6 = vector.load %arg5[%c0_8, %c0_9, %c0_10] : memref<1x8x1xf32, #tpu.memory_space<vmem>>, vector<1x8x1xf32>
    %7 = vector.shape_cast %6 : vector<1x8x1xf32> to vector<8x1xf32>
    %c0_11 = arith.constant 0 : index
    %c0_12 = arith.constant 0 : index
    %c0_13 = arith.constant 0 : index
    %8 = vector.load %arg6[%c0_11, %c0_12, %c0_13] : memref<1x1x8xf32, #tpu.memory_space<vmem>>, vector<1x1x8xf32>
    %9 = vector.shape_cast %8 : vector<1x1x8xf32> to vector<1x8xf32>
    %10 = arith.truncf %1 : vector<8x512xf32> to vector<8x512xbf16>
    %c0_14 = arith.constant 0 : index
    %c0_15 = arith.constant 0 : index
    %11 = vector.load %arg7[%c0_14, %c0_15] : memref<512x512xbf16, #tpu.memory_space<vmem>>, vector<512x512xbf16>
    %cst = arith.constant dense<0.000000e+00> : vector<8x512xf32>
    %12 = tpu.matmul %10, %11, %cst {dimension_numbers = #tpu.dot_dimension_numbers<[1], [0], [0], [1], [0, 0, 1, 1], [], []>} : vector<8x512xbf16>, vector<512x512xbf16>, vector<8x512xf32> -> vector<8x512xf32>
    %13 = arith.truncf %3 : vector<8x512xf32> to vector<8x512xbf16>
    %c0_16 = arith.constant 0 : index
    %c0_17 = arith.constant 0 : index
    %14 = vector.load %arg8[%c0_16, %c0_17] : memref<512x512xbf16, #tpu.memory_space<vmem>>, vector<512x512xbf16>
    %cst_18 = arith.constant dense<0.000000e+00> : vector<8x512xf32>
    %15 = tpu.matmul %13, %14, %cst_18 {dimension_numbers = #tpu.dot_dimension_numbers<[1], [0], [0], [1], [0, 0, 1, 1], [], []>} : vector<8x512xbf16>, vector<512x512xbf16>, vector<8x512xf32> -> vector<8x512xf32>
    %16 = arith.truncf %5 : vector<8x512xf32> to vector<8x512xbf16>
    %c0_19 = arith.constant 0 : index
    %c0_20 = arith.constant 0 : index
    %17 = vector.load %arg9[%c0_19, %c0_20] : memref<512x512xbf16, #tpu.memory_space<vmem>>, vector<512x512xbf16>
    %cst_21 = arith.constant dense<0.000000e+00> : vector<8x512xf32>
    %18 = tpu.matmul %16, %17, %cst_21 {dimension_numbers = #tpu.dot_dimension_numbers<[1], [0], [0], [1], [0, 0, 1, 1], [], []>} : vector<8x512xbf16>, vector<512x512xbf16>, vector<8x512xf32> -> vector<8x512xf32>
    %19 = vector.broadcast %7 : vector<8x1xf32> to vector<8x8xf32>
    %20 = vector.broadcast %9 : vector<1x8xf32> to vector<8x8xf32>
    %21 = arith.mulf %19, %20 : vector<8x8xf32>
    %cst_22 = arith.constant 1.000000e+00 : f32
    %22 = vector.broadcast %cst_22 : f32 to vector<8x8xf32>
    %23 = arith.subf %22, %21 : vector<8x8xf32>
    %cst_23 = arith.constant -883.883483 : f32
    %24 = vector.broadcast %cst_23 : f32 to vector<8x8xf32>
    %25 = arith.mulf %23, %24 : vector<8x8xf32>
    %cst_24 = arith.constant 0.0883883461 : f32
    %26 = vector.broadcast %cst_24 : f32 to vector<8x512xf32>
    %27 = arith.mulf %12, %26 : vector<8x512xf32>
    %28 = vector.shape_cast %27 : vector<8x512xf32> to vector<8x4x128xf32>
    %29 = vector.shape_cast %15 : vector<8x512xf32> to vector<8x4x128xf32>
    %30 = vector.shape_cast %18 : vector<8x512xf32> to vector<8x4x128xf32>
    %31 = arith.truncf %28 : vector<8x4x128xf32> to vector<8x4x128xbf16>
    %32 = arith.truncf %29 : vector<8x4x128xf32> to vector<8x4x128xbf16>
    "tpu.trace_start"() <{level = 10 : i32, message = "qhd,khd->hqk"}> : () -> ()
    %cst_25 = arith.constant dense<0.000000e+00> : vector<4x8x8xf32>
    %33 = tpu.matmul %31, %32, %cst_25 {dimension_numbers = #tpu.dot_dimension_numbers<[2], [2], [0], [0], [0, 1, 0, 0, 1, 0], [1], [1]>} : vector<8x4x128xbf16>, vector<8x4x128xbf16>, vector<4x8x8xf32> -> vector<4x8x8xf32>
    "tpu.trace_stop"() : () -> ()
    %34 = vector.shape_cast %25 : vector<8x8xf32> to vector<1x8x8xf32>
    %35 = vector.broadcast %34 : vector<1x8x8xf32> to vector<4x8x8xf32>
    %36 = arith.addf %33, %35 : vector<4x8x8xf32>
    %cst_26 = arith.constant dense<0xFF800000> : vector<4x8xf32>
    %37 = vector.multi_reduction <maximumf>, %36, %cst_26 [2] : vector<4x8x8xf32> to vector<4x8xf32>
    %38 = vector.shape_cast %37 : vector<4x8xf32> to vector<4x8x1xf32>
    %39 = vector.broadcast %38 : vector<4x8x1xf32> to vector<4x8x8xf32>
    %40 = arith.subf %36, %39 : vector<4x8x8xf32>
    %41 = math.exp %40 : vector<4x8x8xf32>
    %cst_27 = arith.constant dense<0.000000e+00> : vector<4x8xf32>
    %42 = vector.multi_reduction <add>, %41, %cst_27 [2] : vector<4x8x8xf32> to vector<4x8xf32>
    %43 = vector.shape_cast %42 : vector<4x8xf32> to vector<4x8x1xf32>
    %44 = tpu.reciprocal %43 {approx = true} : vector<4x8x1xf32> -> vector<4x8x1xf32>
    %45 = vector.broadcast %44 : vector<4x8x1xf32> to vector<4x8x8xf32>
    %46 = arith.mulf %41, %45 : vector<4x8x8xf32>
    %47 = vector.shape_cast %21 : vector<8x8xf32> to vector<1x8x8xf32>
    %48 = vector.broadcast %47 : vector<1x8x8xf32> to vector<4x8x8xf32>
    %49 = arith.mulf %46, %48 : vector<4x8x8xf32>
    %50 = arith.truncf %49 : vector<4x8x8xf32> to vector<4x8x8xbf16>
    %51 = arith.truncf %30 : vector<8x4x128xf32> to vector<8x4x128xbf16>
    "tpu.trace_start"() <{level = 10 : i32, message = "hqk,khd->qhd"}> : () -> ()
    %cst_28 = arith.constant dense<0.000000e+00> : vector<4x128x8xf32>
    %52 = tpu.matmul %51, %50, %cst_28 {dimension_numbers = #tpu.dot_dimension_numbers<[0], [2], [2], [1], [0, 1, 0, 2, 1, 1], [1], [0]>} : vector<8x4x128xbf16>, vector<4x8x8xbf16>, vector<4x128x8xf32> -> vector<4x128x8xf32>
    %53 = tpu.transpose %52, [2, 0, 1] : vector<4x128x8xf32> -> vector<8x4x128xf32>
    "tpu.trace_stop"() : () -> ()
    %54 = vector.shape_cast %53 : vector<8x4x128xf32> to vector<8x512xf32>
    %55 = arith.truncf %54 : vector<8x512xf32> to vector<8x512xbf16>
    %c0_29 = arith.constant 0 : index
    %c0_30 = arith.constant 0 : index
    %56 = vector.load %arg10[%c0_29, %c0_30] : memref<512x512xbf16, #tpu.memory_space<vmem>>, vector<512x512xbf16>
    %cst_31 = arith.constant dense<0.000000e+00> : vector<8x512xf32>
    %57 = tpu.matmul %55, %56, %cst_31 {dimension_numbers = #tpu.dot_dimension_numbers<[1], [0], [0], [1], [0, 0, 1, 1], [], []>} : vector<8x512xbf16>, vector<512x512xbf16>, vector<8x512xf32> -> vector<8x512xf32>
    %58 = vector.broadcast %7 : vector<8x1xf32> to vector<8x512xf32>
    %59 = arith.mulf %57, %58 : vector<8x512xf32>
    %c0_32 = arith.constant 0 : index
    %c0_33 = arith.constant 0 : index
    %c0_34 = arith.constant 0 : index
    %60 = vector.load %arg11[%c0_32, %c0_33, %c0_34] : memref<1x8x512xf32, #tpu.memory_space<vmem>>, vector<1x8x512xf32>
    %61 = vector.shape_cast %60 : vector<1x8x512xf32> to vector<8x512xf32>
    %62 = vector.shape_cast %59 : vector<8x512xf32> to vector<1x8x512xf32>
    tpu.vector_store %arg11[%c0_32, %c0_33, %c0_34], %62 {strides = array<i32>} : memref<1x8x512xf32, #tpu.memory_space<vmem>>, vector<1x8x512xf32>,
    return
  }
  func.func @transform_0(%arg0: i32, %arg1: i32) -> (i32, i32, i32) {
    %c0_i32 = arith.constant 0 : i32
    %c0_i32_0 = arith.constant 0 : i32
    return %arg0, %arg1, %c0_i32 : i32, i32, i32
  }
  func.func @transform_1(%arg0: i32, %arg1: i32) -> (i32, i32, i32) {
    %c0_i32 = arith.constant 0 : i32
    %c0_i32_0 = arith.constant 0 : i32
    %c0_i32_1 = arith.constant 0 : i32
    return %arg0, %c0_i32, %c0_i32_0 : i32, i32, i32
  }
  func.func @transform_2(%arg0: i32, %arg1: i32) -> (i32, i32, i32) {
    %c0_i32 = arith.constant 0 : i32
    %c0_i32_0 = arith.constant 0 : i32
    %c0_i32_1 = arith.constant 0 : i32
    return %arg0, %c0_i32, %c0_i32_0 : i32, i32, i32
  }
  func.func @transform_3(%arg0: i32, %arg1: i32) -> (i32, i32, i32) {
    %c0_i32 = arith.constant 0 : i32
    %c0_i32_0 = arith.constant 0 : i32
    return %arg0, %arg1, %c0_i32 : i32, i32, i32
  }
  func.func @transform_4(%arg0: i32, %arg1: i32) -> (i32, i32, i32) {
    %c0_i32 = arith.constant 0 : i32
    %c0_i32_0 = arith.constant 0 : i32
    %c0_i32_1 = arith.constant 0 : i32
    return %arg0, %c0_i32, %c0_i32_0 : i32, i32, i32
  }
  func.func @transform_5(%arg0: i32, %arg1: i32) -> (i32, i32) {
    %c0_i32 = arith.constant 0 : i32
    %c0_i32_0 = arith.constant 0 : i32
    %c0_i32_1 = arith.constant 0 : i32
    return %c0_i32, %c0_i32_0 : i32, i32
  }
  func.func @transform_6(%arg0: i32, %arg1: i32) -> (i32, i32) {
    %c0_i32 = arith.constant 0 : i32
    %c0_i32_0 = arith.constant 0 : i32
    %c0_i32_1 = arith.constant 0 : i32
    return %c0_i32, %c0_i32_0 : i32, i32
  }
  func.func @transform_7(%arg0: i32, %arg1: i32) -> (i32, i32) {
    %c0_i32 = arith.constant 0 : i32
    %c0_i32_0 = arith.constant 0 : i32
    %c0_i32_1 = arith.constant 0 : i32
    return %c0_i32, %c0_i32_0 : i32, i32
  }
  func.func @transform_8(%arg0: i32, %arg1: i32) -> (i32, i32) {
    %c0_i32 = arith.constant 0 : i32
    %c0_i32_0 = arith.constant 0 : i32
    %c0_i32_1 = arith.constant 0 : i32
    return %c0_i32, %c0_i32_0 : i32, i32
  }
  func.func @transform_9(%arg0: i32, %arg1: i32) -> (i32, i32, i32) {
    %c0_i32 = arith.constant 0 : i32
    %c0_i32_0 = arith.constant 0 : i32
    return %arg0, %arg1, %c0_i32 : i32, i32, i32
  }
}

</mosaic_0001>

<bundles_post_ra>
// kernel: tpu_custom_call.1
= control target key start
LH: loop header
LB: loop body
LE: loop exit
PB: predicated region body
PF: predicated region fallthrough
CT: control target
= control target key end

     0   :  { %s19728_s0 = inlined_call_operand.hbm [shape: f32[2,16,512], index: 0, kind: input, shape index: {}]   ;;  %s19729_s1 = inlined_call_operand.hbm [shape: f32[2,8,512], index: 1, kind: input, shape index: {}]   ;;  %s19730_s2 = inlined_call_operand.hbm [shape: f32[2,8,512], index: 2, kind: input, shape index: {}]   ;;  %s19731_s3 = inlined_call_operand.hbm [shape: f32[2,16,1], index: 3, kind: input, shape index: {}]   ;;  %s19732_s4 = inlined_call_operand.hbm [shape: f32[2,1,8], index: 4, kind: input, shape index: {}]   ;;  %s19733_s5 = inlined_call_operand.hbm [shape: bf16[512,512], index: 5, kind: input, shape index: {}]   ;;  %s19734_s6 = inlined_call_operand.hbm [shape: bf16[512,512], index: 6, kind: input, shape index: {}]   ;;  %s19735_s7 = inlined_call_operand.hbm [shape: bf16[512,512], index: 7, kind: input, shape index: {}]   ;;  %s19736_s8 = inlined_call_operand.hbm [shape: bf16[512,512], index: 8, kind: input, shape index: {}]   ;;  %s19737_s9 = inlined_call_operand.hbm [shape: f32[2,16,512], index: 9, kind: output, shape index: {}]  }
   0x1   :  { %19829 = sst [smem:[#allocation64_spill]] %s19728_s0 }
   0x2   :  { %19830 = sst [smem:[#allocation65_spill]] %s19729_s1 }
   0x3   :  { %19831 = sst [smem:[#allocation66_spill]] %s19731_s3 }
   0x4   :  { %19832 = sst [smem:[#allocation67_spill]] %s19732_s4 }
   0x5   :  { %19833 = sst [smem:[#allocation68_spill]] %s19733_s5 }
   0x6   :  { %19834 = sst [smem:[#allocation69_spill]] %s19735_s7 }
   0x7   :  { %19835 = sst [smem:[#allocation70_spill]] %s19736_s8 }
   0x8   :  { %19836 = sst [smem:[#allocation71_spill]] %s19737_s9 }
   0x9   :  { %14 = vsyncpa [#allocation3], 0 }
   0xa   :  { %16 = vsyncpa [#allocation3 + $0x1], 0 }
   0xb   :  { %17 = vsyncpa [#allocation6], 0 }
   0xc   :  { %19 = vsyncpa [#allocation6 + $0x1], 0 }
   0xd   :  { %20 = vsyncpa [#allocation9], 0 }
   0xe   :  { %22 = vsyncpa [#allocation9 + $0x1], 0 }
   0xf   :  { %23 = vsyncpa [#allocation12], 0 }
  0x10   :  { %24 = vsyncpa [#allocation15], 0 }
  0x11   :  { %25 = vsyncpa [#allocation4], 0 }
  0x12   :  { %27 = vsyncpa [#allocation4 + $0x1], 0  ;;  %s16992_s30 = smov 0   ;;  %s16994_s10 = smov 0  }
  0x13   :  { %s16996_s11 = smov 0   ;;  %s16998_s12 = smov 0  }
  0x14   :  { %s17000_s13 = smov 0   ;;  %s17002_s14 = smov 0  }
  0x15   :  { %s17004_s15 = smov 0   ;;  %s17006_s16 = smov 0  }
  0x16   :  { %s17008_s17 = smov 0   ;;  %s17010_s18 = smov 0  }
  0x17   :  { %s17012_s19 = smov 0  }
  0x18 LB: > { %19837 = sst [smem:[#allocation25_spill]] %s16887_s10  ;;  %s17048_s20 = sadd.s32 4294967295, %s16923_s19   ;;  %s16923_s19 = sphi %s17012_s19, %s33_s19   ;;  %s16919_s18 = sphi %s17010_s18, %s20048_s18   ;;  %s16915_s17 = sphi %s17008_s17, %s20047_s17   ;;  %s16911_s16 = sphi %s17006_s16, %s20046_s16   ;;  %s16907_s15 = sphi %s17004_s15, %s20045_s15   ;;  %s16903_s14 = sphi %s17002_s14, %s20038_s14   ;;  %s16899_s13 = sphi %s17000_s13, %s20044_s13   ;;  %s16895_s12 = sphi %s16998_s12, %s20043_s12   ;;  %s16891_s11 = sphi %s16996_s11, %s20042_s11   ;;  %s16887_s10 = sphi %s16994_s10, %s20041_s10   ;;  %s16883_s30 = sphi %s16992_s30, %s20035_s30  }
  0x19   : > { %19838 = sst [smem:[#allocation26_spill]] %s16895_s12  ;;  %p14715_p0 = scmp.ge.s32.totalorder %s16923_s19, 1 }
  0x1a   : > { %19839 = sst [smem:[#allocation27_spill]] %s16903_s14  ;;  %p19739_p1 = scmp.eq.s32.totalorder %s17048_s20, 0 }
  0x1b   : > { %19840 = sst [smem:[#allocation28_spill]] %s16907_s15  ;;  %p296_p2 = scmp.lt.s32.totalorder %s16923_s19, 5 }
  0x1c   : > { %19841 = sst [smem:[#allocation29_spill]] %s16911_s16  ;;  %s16925_s22 = smov [#allocation11]  }
  0x1d   : > { %19842 = sst [smem:[#allocation30_spill]] %s16923_s19  ;;  %p17053_p3 = pnand %p14715_p0, %p296_p2 }
  0x1e   : > { %19843 = sst [smem:[#allocation31_spill]] %s17048_s20  ;;  %s308_s23 = sshll.u32 %s16925_s22, 4  ;;  %s309_s23 = int_to_ptr.vmem [resolvable:$true] %s308_s23 }
  0x1f   : > { %s19844_s21 = scalar_select %p17053_p3, 1, 0 }
  0x20   : > { %p15592_p4 = pneg %p17053_p3  ;;  %s16926_s25 = smov [#allocation14]  }
  0x21   : > { %19845 = sst [smem:[#allocation32_spill]] %s19844_s21  ;;  %s334_s26 = sshll.u32 %s16926_s25, 4  ;;  %s17065_s26 = int_to_ptr.vmem [resolvable:$true] %s334_s26 }
  0x22   : > { %p17061_p5 = pnand %p15592_p4, %p19739_p1  ;;  %s19847_s5 = sld [smem:[#allocation68_spill]] }
  0x24   : > { %s19846_s24 = scalar_select %p17061_p5, 1, 0 }
  0x25   : > { %p17075_p7 = pneg %p17061_p5 }
  0x27   : > { %s19848_s22 = scalar_select %p17075_p7, 1, 0 }
  0x28   : > { %s16519_s29 = scalar_lea.hbm %s19847_s5, 16384 }
  0x29   : > { %p16520_p6 = scmp.ne.s32.totalorder %s19847_s5, %s16519_s29  ;;  %p16526_p10 = scmp.lt.u32.totalorder %s16519_s29, %s19847_s5 }
  0x2b   : > { %p16522_p8 = pnand %p17075_p7, %p16520_p6 }
  0x2d   : > { %p16523_p9 = pneg %p16522_p8 }
  0x2f   : > { %p16528_p11 = pnand %p16526_p10, %p16523_p9 }
  0x31   : > { %16531 = shalt.err (!%p16528_p11)
}
  0x32   : > { %s16532_s27 = scalar_lea.vmem %s309_s23, 16384  ;;  %p16540_p2 = scmp.lt.s32.totalorder %s309_s23, %s309_s23 }
  0x33   : > { %p16533_p12 = scmp.ne.s32.totalorder %s309_s23, %s16532_s27  ;;  %p16541_p4 = scmp.lt.s32.totalorder %s16532_s27, %s16532_s27 }
  0x35   : > { %p16535_p13 = pnand %p16533_p12, %p17075_p7  ;;  %p16542_p1 = por %p16541_p4, %p16540_p2 }
  0x37   : > { %p16536_p0 = pneg %p16535_p13 }
  0x39   : > { %p16543_p3 = pnand %p16542_p1, %p16536_p0 }
  0x3b   : > { %16546 = shalt.err (!%p16543_p3)
}
  0x3c   : > { %s19746_s9 = smov 256   ;;  %s19748_s16 = smov 16  }
  0x3d   : > { %15595 = dma.hbm_to_vmem [thread:$0]  (!%p17061_p5), %s19847_s5, 16384, %s309_s23, [#allocation12], %s19746_s9, %s19746_s9, %s19748_s16  }
  0x3e   : > { %s19849_s7 = sld [smem:[#allocation69_spill]] }
  0x44   : > { %s16547_s21 = scalar_lea.hbm %s19849_s7, 16384 }
  0x45   : > { %p16548_p1 = scmp.ne.s32.totalorder %s19849_s7, %s16547_s21  ;;  %p16554_p8 = scmp.lt.u32.totalorder %s16547_s21, %s19849_s7 }
  0x47   : > { %p16550_p3 = pnand %p16548_p1, %p17075_p7 }
  0x49   : > { %p16551_p6 = pneg %p16550_p3 }
  0x4b   : > { %p16556_p9 = pnand %p16554_p8, %p16551_p6 }
  0x4d   : > { %16559 = shalt.err (!%p16556_p9)
}
  0x4e   : > { %s16560_s23 = scalar_lea.vmem %s17065_s26, 16384  ;;  %p16568_p13 = scmp.lt.s32.totalorder %s17065_s26, %s17065_s26 }
  0x4f   : > { %p16561_p10 = scmp.ne.s32.totalorder %s17065_s26, %s16560_s23  ;;  %p16569_p0 = scmp.lt.s32.totalorder %s16560_s23, %s16560_s23 }
  0x51   : > { %p16563_p11 = pnand %p16561_p10, %p17075_p7  ;;  %p16570_p2 = por %p16569_p0, %p16568_p13 }
  0x53   : > { %p16564_p12 = pneg %p16563_p11 }
  0x55   : > { %p16571_p4 = pnand %p16570_p2, %p16564_p12 }
  0x57   : > { %16574 = shalt.err (!%p16571_p4)
}
  0x58   : > { %15601 = dma.hbm_to_vmem [thread:$0]  (!%p17061_p5), %s19849_s7, 16384, %s17065_s26, [#allocation15], %s19746_s9, %s19746_s9, %s19748_s16  }
  0x59   : > { %p19751_p1 = scmp.eq.s32.totalorder %s16923_s19, 0  ;;  %p87_p3 = scmp.ne.s32.totalorder %s16891_s11, %s16887_s10 }
  0x5a   : > { %p93_p6 = scmp.ne.s32.totalorder %s16887_s10, %s16883_s30  ;;  %p19750_p8 = scmp.lt.s32.totalorder %s16923_s19, 4 }
  0x5b   : > { %s19752_s21 = sand.u32 1, %s16923_s19   ;;  %p89_p9 = por %p87_p3, %p19751_p1 }
  0x5c   : > { %p19850_p10 = scmp.eq.s32.totalorder %s17048_s20, 0  ;;  %s19745_s28 = sand.u32 1, %s16891_s11  }
  0x5d   : > { %s17139_s29 = sshll.u32 %s19745_s28, 5  ;;  %s15302_s26 = sshll.u32 %s16919_s18, 9 }
  0x5e   : > { %p17132_p11 = por %p93_p6, %p19850_p10  ;;  %s19853_s1 = sld [smem:[#allocation65_spill]] }
  0x5f   : > { %s386_s30 = scalar_lea.vmem [#allocation5], %s17139_s29  ;;  %p17150_p12 = pnand %p19750_p8, %p89_p9 }
  0x60   : > { %s19851_s15 = scalar_select %p17132_p11, 1, 0 }
  0x61   : > { %s394_s0 = sshll.u32 %s386_s30, 4  ;;  %s17159_s25 = scalar_lea.hbm %s19730_s2, %s15302_s26  ;;  %s17154_s0 = int_to_ptr.vmem [resolvable:$true] %s394_s0 }
  0x62   : > { %19852 = sst [smem:[#allocation33_spill]] %s19851_s15  ;;  %s17163_s27 = scalar_lea.sflag [#allocation6], %s19752_s21 }
  0x63   : > { %s19854_s4 = scalar_select %p17150_p12, 1, 0 }
  0x64   : > { %s17145_s23 = scalar_lea.hbm %s19853_s1, %s15302_s26  ;;  %p17169_p0 = pneg %p17150_p12 }
  0x65   : > { %s16575_s16 = scalar_lea.hbm %s17145_s23, 512  ;;  %s16580_s9 = scalar_lea.hbm %s19853_s1, 1024 }
  0x66   : > { %p16576_p13 = scmp.ne.s32.totalorder %s17145_s23, %s16575_s16  ;;  %p16581_p3 = scmp.lt.u32.totalorder %s17145_s23, %s19853_s1 }
  0x67   : > { %s19855_s30 = scalar_select %p17169_p0, 1, 0 }
  0x68   : > { %p16578_p2 = pnand %p17169_p0, %p16576_p13  ;;  %p16582_p6 = scmp.lt.u32.totalorder %s16580_s9, %s16575_s16 }
  0x69   : > { %p16584_p10 = scmp.lt.u32.totalorder %s16575_s16, %s17145_s23 }
  0x6a   : > { %p16579_p4 = pneg %p16578_p2  ;;  %p16583_p9 = por %p16582_p6, %p16581_p3 }
  0x6c   : > { %p16585_p8 = por %p16584_p10, %p16583_p9 }
  0x6e   : > { %p16586_p1 = pnand %p16585_p8, %p16579_p4 }
  0x70   : > { %16589 = shalt.err (!%p16586_p1)
}
  0x71   : > { %s16590_s21 = scalar_lea.vmem %s17154_s0, 512  ;;  %s16929_s5 = smov [#allocation5]  }
  0x72   : > { %p16591_p13 = scmp.ne.s32.totalorder %s17154_s0, %s16590_s21  ;;  %s16595_s8 = sshll.u32 %s16929_s5, 4  ;;  %s16596_s8 = int_to_ptr.vmem [resolvable:$false] %s16595_s8 }
  0x73   : > { %s16597_s28 = scalar_lea.vmem %s16596_s8, 1024  ;;  %p16598_p5 = scmp.lt.s32.totalorder %s17154_s0, %s16596_s8 }
  0x74   : > { %p16593_p2 = pnand %p16591_p13, %p17169_p0  ;;  %p16599_p7 = scmp.lt.s32.totalorder %s16597_s28, %s16590_s21 }
  0x76   : > { %p16594_p11 = pneg %p16593_p2  ;;  %p16600_p3 = por %p16599_p7, %p16598_p5 }
  0x78   : > { %p16601_p6 = pnand %p16600_p3, %p16594_p11 }
  0x7a   : > { %16604 = shalt.err (!%p16601_p6)
}
  0x7b   : > { %15611 = dma.hbm_to_vmem [thread:$0]  (!%p17150_p12), %s17145_s23, 512, %s17154_s0, %s17163_s27  }
  0x7c   : > { %s14714_s16 = sadd.s32 4294967294, %s16923_s19   ;;  %s42_s21 = sadd.s32 1, %s16915_s17 }
  0x7d   : > { %p43_p5 = scmp.ge.s32.totalorder %s42_s21, 2  ;;  %s45_s9 = sadd.s32 1, %s16919_s18 }
  0x7e   : > { %s54_s26 = sadd.s32 1, %s16903_s14  ;;  %p61_p7 = scmp.ne.s32.totalorder %s16903_s14, %s16899_s13 }
  0x7f   : > { %s20050_s21 = smov (%p43_p5, %s42_s21), 0  ;;  %s20052_s9 = smov (!%p43_p5, %s45_s9), %s16919_s18 }
  0x80   : > { %19856 = sst [smem:[#allocation34_spill]] %s20050_s21  ;;  %s50_s5 = ssub.s32 %s16915_s17, %s20050_s21 }
  0x81   : > { %p19857_p1 = scmp.eq.s32.totalorder %s16923_s19, 0  ;;  %p47_p11 = scmp.ge.s32.totalorder %s20052_s9, 2 }
  0x82   : > { %p67_p4 = scmp.ne.s32.totalorder %s16899_s13, %s16895_s12  ;;  %p283_p9 = scmp.eq.s32.totalorder %s17048_s20, 3 }
  0x83   : > { %p17206_p8 = por %p19857_p1, %p61_p7  ;;  %p289_p10 = scmp.eq.s32.totalorder %s14714_s16, 3 }
  0x84   : > { %s20054_s9 = smov (%p47_p11, %s20052_s9), 0  ;;  %p19860_p13 = scmp.eq.s32.totalorder %s17048_s20, 0 }
  0x85   : > { %19859 = sst [smem:[#allocation35_spill]] %s20054_s9  ;;  %p17221_p3 = por %p283_p9, %p61_p7 }
  0x86   : > { %p17217_p2 = por %p19860_p13, %p67_p4  ;;  %s49_s28 = ssub.s32 %s16919_s18, %s20054_s9 }
  0x87   : > { %s19862_s8 = scalar_select %p17221_p3, 1, 0 }
  0x88   : > { %s19861_s0 = scalar_select %p17217_p2, 1, 0 }
  0x89   : > { %19863 = sst [smem:[#allocation36_spill]] %s19862_s8  ;;  %p17227_p6 = por %p289_p10, %p67_p4 }
  0x8a   : > { %s51_s7 = sor.u32 %s50_s5, %s49_s28  ;;  %p78_p5 = scmp.eq.s32.totalorder %s49_s28, 0 }
  0x8b   : > { %s19864_s1 = scalar_select %p17227_p6, 1, 0 }
  0x8c   : > { %p52_p1 = scmp.eq.s32.totalorder %s51_s7, 0  ;;  %s17232_s16 = sand.u32 1, %s16903_s14  }
  0x8d   : > { %19865 = sst [smem:[#allocation37_spill]] %s19864_s1  ;;  %s19866_s21 = sadd.s32 1, %s16891_s11 }
  0x8e   : > { %s17237_s12 = scalar_select %p78_p5, %s16891_s11, %s19866_s21  }
  0x8f   : > { %s17240_s15 = scalar_select %p52_p1, %s16903_s14, %s54_s26  }
  0x90   : > { %19867 = sst [smem:[#allocation38_spill]] %s17237_s12  ;;  %p19869_p7 = scmp.lt.s32.totalorder %s16923_s19, 4 }
  0x91   : > { %19868 = sst [smem:[#allocation39_spill]] %s17240_s15  ;;  %s14731_s1 = sshll.u32 %s17232_s16, 3 }
  0x92   : > { %p17246_p11 = pnand %p19869_p7, %p17206_p8  ;;  %s14732_s5 = sshll.u32 %s16919_s18, 1 }
  0x93   : > { %s429_s28 = sadd.s32 %s16915_s17, %s14732_s5  ;;  %s424_s7 = scalar_lea.vmem [#allocation8], %s14731_s1 }
  0x94   : > { %s19870_s9 = scalar_select %p17246_p11, 1, 0 }
  0x95   : > { %s433_s8 = sshll.u32 %s424_s7, 4  ;;  %s14733_s10 = sshll.u32 %s429_s28, 7  ;;  %s17253_s8 = int_to_ptr.vmem [resolvable:$true] %s433_s8 }
  0x96   : > { %s19871_s3 = sld [smem:[#allocation66_spill]]  ;;  %s19872_s23 = sand.u32 1, %s16923_s19  }
  0x97   : > { %s17262_s15 = scalar_lea.sflag [#allocation9], %s19872_s23  ;;  %p19774_p4 = pneg %p17246_p11 }
  0x9c   : > { %s17258_s26 = scalar_lea.hbm %s19871_s3, %s14733_s10  ;;  %s16610_s10 = scalar_lea.hbm %s19871_s3, 512 }
  0x9d   : > { %s16605_s14 = scalar_lea.hbm %s17258_s26, 128  ;;  %p16611_p13 = scmp.lt.u32.totalorder %s17258_s26, %s19871_s3 }
  0x9e   : > { %p16606_p8 = scmp.ne.s32.totalorder %s17258_s26, %s16605_s14  ;;  %p16612_p5 = scmp.lt.u32.totalorder %s16610_s10, %s16605_s14 }
  0x9f   : > { %p16614_p7 = scmp.lt.u32.totalorder %s16605_s14, %s17258_s26 }
  0xa0   : > { %p16608_p9 = pnand %p19774_p4, %p16606_p8  ;;  %p16613_p1 = por %p16612_p5, %p16611_p13 }
  0xa2   : > { %p16609_p10 = pneg %p16608_p9  ;;  %p16615_p6 = por %p16614_p7, %p16613_p1 }
  0xa4   : > { %p16616_p3 = pnand %p16615_p6, %p16609_p10 }
  0xa6   : > { %16619 = shalt.err (!%p16616_p3)
}
  0xa7   : > { %s16620_s7 = scalar_lea.vmem %s17253_s8, 128  ;;  %s16930_s21 = smov [#allocation8]  }
  0xa8   : > { %p16621_p8 = scmp.ne.s32.totalorder %s17253_s8, %s16620_s7  ;;  %s16625_s23 = sshll.u32 %s16930_s21, 4  ;;  %s16626_s23 = int_to_ptr.vmem [resolvable:$false] %s16625_s23 }
  0xa9   : > { %s16627_s1 = scalar_lea.vmem %s16626_s23, 256  ;;  %p16628_p12 = scmp.lt.s32.totalorder %s17253_s8, %s16626_s23 }
  0xaa   : > { %p16623_p9 = pnand %p16621_p8, %p19774_p4  ;;  %p16629_p13 = scmp.lt.s32.totalorder %s16627_s1, %s16620_s7 }
  0xac   : > { %p16624_p2 = pneg %p16623_p9  ;;  %p16630_p5 = por %p16629_p13, %p16628_p12 }
  0xae   : > { %p16631_p1 = pnand %p16630_p5, %p16624_p2 }
  0xb0   : > { %16634 = shalt.err (!%p16631_p1)
}
  0xb1   : > { %15617 = dma.hbm_to_vmem [thread:$0]  (!%p17246_p11), %s17258_s26, 128, %s17253_s8, %s17262_s15  }
  0xb2   : > { %s16931_s14 = smov [#allocation13]   ;;  %s16932_s10 = smov [#allocation16]  }
  0xb3   : > { %s321_s5 = sshll.u32 %s16931_s14, 4  ;;  %s347_s12 = sshll.u32 %s16932_s10, 4  ;;  %s322_s5 = int_to_ptr.vmem [resolvable:$true] %s321_s5  ;;  %s348_s12 = int_to_ptr.vmem [resolvable:$true] %s347_s12 }
  0xb4   : > { %s16635_s23 = scalar_lea.hbm %s19734_s6, 16384  ;;  %p19873_p2 = scmp.ne.s32.totalorder %s19848_s22, 0 }
  0xb5   : > { %p16636_p12 = scmp.ne.s32.totalorder %s19734_s6, %s16635_s23  ;;  %p16642_p10 = scmp.lt.u32.totalorder %s16635_s23, %s19734_s6 }
  0xb7   : > { %p16638_p3 = pnand %p16636_p12, %p19873_p2 }
  0xb9   : > { %p16639_p6 = pneg %p16638_p3 }
  0xbb   : > { %p16644_p7 = pnand %p16642_p10, %p16639_p6 }
  0xbd   : > { %16647 = shalt.err (!%p16644_p7)
}
  0xbe   : > { %s16648_s8 = scalar_lea.vmem %s322_s5, 16384  ;;  %p16656_p5 = scmp.lt.s32.totalorder %s322_s5, %s322_s5 }
  0xbf   : > { %p16649_p8 = scmp.ne.s32.totalorder %s322_s5, %s16648_s8  ;;  %p16657_p1 = scmp.lt.s32.totalorder %s16648_s8, %s16648_s8 }
  0xc1   : > { %p16651_p9 = pnand %p16649_p8, %p19873_p2  ;;  %p16658_p4 = por %p16657_p1, %p16656_p5 }
  0xc3   : > { %p16652_p13 = pneg %p16651_p9 }
  0xc5   : > { %p16659_p0 = pnand %p16658_p4, %p16652_p13 }
  0xc7   : > { %16662 = shalt.err (!%p16659_p0)
}
  0xc8   : > { %p19874_p12 = scmp.ne.s32.totalorder %s19846_s24, 0  ;;  %s19875_s26 = smov 16  }
  0xc9   : > { %s19876_s14 = smov 256   ;;  %s19877_s21 = sld [smem:[#allocation70_spill]] }
  0xca   : > { %15598 = dma.hbm_to_vmem [thread:$0]  (!%p19874_p12), %s19734_s6, 16384, %s322_s5, [#allocation12], %s19876_s14, %s19876_s14, %s19875_s26  }
  0xcf   : > { %s16663_s23 = scalar_lea.hbm %s19877_s21, 16384 }
  0xd0   : > { %p16664_p4 = scmp.ne.s32.totalorder %s19877_s21, %s16663_s23  ;;  %p16670_p6 = scmp.lt.u32.totalorder %s16663_s23, %s19877_s21 }
  0xd2   : > { %p16666_p0 = pnand %p16664_p4, %p19873_p2 }
  0xd4   : > { %p16667_p3 = pneg %p16666_p0 }
  0xd6   : > { %p16672_p10 = pnand %p16670_p6, %p16667_p3 }
  0xd8   : > { %16675 = shalt.err (!%p16672_p10)
}
  0xd9   : > { %s16676_s3 = scalar_lea.vmem %s348_s12, 16384  ;;  %p16684_p13 = scmp.lt.s32.totalorder %s348_s12, %s348_s12 }
  0xda   : > { %p16677_p7 = scmp.ne.s32.totalorder %s348_s12, %s16676_s3  ;;  %p16685_p5 = scmp.lt.s32.totalorder %s16676_s3, %s16676_s3 }
  0xdc   : > { %p16679_p8 = pnand %p16677_p7, %p19873_p2  ;;  %p16686_p1 = por %p16685_p5, %p16684_p13 }
  0xde   : > { %p16680_p9 = pneg %p16679_p8 }
  0xe0   : > { %p16687_p11 = pnand %p16686_p1, %p16680_p9 }
  0xe2   : > { %16690 = shalt.err (!%p16687_p11)
}
  0xe3   : > { %15604 = dma.hbm_to_vmem [thread:$0]  (!%p19874_p12), %s19877_s21, 16384, %s348_s12, [#allocation15], %s19876_s14, %s19876_s14, %s19875_s26  }
  0xe4   : > { %s14721_s22 = sshll.u32 %s17232_s16, 5  ;;  %s14722_s19 = sshll.u32 %s16915_s17, 2 }
  0xe5   : > { %s14723_s10 = sshll.u32 %s16919_s18, 3  ;;  %s365_s23 = scalar_lea.vmem [#allocation2], %s14721_s22 }
  0xe6   : > { %s371_s28 = sadd.s32 %s14723_s10, %s14722_s19  ;;  %s375_s7 = sshll.u32 %s365_s23, 4  ;;  %s17335_s7 = int_to_ptr.vmem [resolvable:$true] %s375_s7 }
  0xe7   : > { %s14724_s24 = sshll.u32 %s371_s28, 7  ;;  %s19878_s3 = sld [smem:[#allocation64_spill]] }
  0xe8   : > { %s405_s5 = scalar_lea.vmem [#allocation7], %s17139_s29  ;;  %s362_s26 = scalar_lea.sflag [#allocation3], %s17232_s16 }
  0xe9   : > { %s17343_s12 = sshll.u32 %s405_s5, 4  ;;  %p19879_p2 = scmp.ne.s32.totalorder %s19870_s9, 0  ;;  %s414_s12 = int_to_ptr.vmem [resolvable:$true] %s17343_s12 }
  0xeb   : > { %p19880_p12 = pneg %p19879_p2 }
  0xed   : > { %s17340_s20 = scalar_lea.hbm %s19878_s3, %s14724_s24  ;;  %s16696_s10 = scalar_lea.hbm %s19878_s3, 2048 }
  0xee   : > { %s16691_s14 = scalar_lea.hbm %s17340_s20, 512  ;;  %p16697_p3 = scmp.lt.u32.totalorder %s17340_s20, %s19878_s3 }
  0xef   : > { %p16692_p11 = scmp.ne.s32.totalorder %s17340_s20, %s16691_s14  ;;  %p16698_p6 = scmp.lt.u32.totalorder %s16696_s10, %s16691_s14 }
  0xf0   : > { %p16700_p7 = scmp.lt.u32.totalorder %s16691_s14, %s17340_s20 }
  0xf1   : > { %p16694_p4 = pnand %p16692_p11, %p19880_p12  ;;  %p16699_p10 = por %p16698_p6, %p16697_p3 }
  0xf3   : > { %p16695_p0 = pneg %p16694_p4  ;;  %p16701_p8 = por %p16700_p7, %p16699_p10 }
  0xf5   : > { %p16702_p9 = pnand %p16701_p8, %p16695_p0 }
  0xf7   : > { %16705 = shalt.err (!%p16702_p9)
}
  0xf8   : > { %s16706_s29 = scalar_lea.vmem %s17335_s7, 512  ;;  %p19881_p5 = pmov %p19880_p12 }
  0xf9   : > { %p16707_p13 = scmp.ne.s32.totalorder %s17335_s7, %s16706_s29  ;;  %s16933_s16 = smov [#allocation2]  }
  0xfa   : > { %s16711_s24 = sshll.u32 %s16933_s16, 4  ;;  %s16712_s24 = int_to_ptr.vmem [resolvable:$false] %s16711_s24 }
  0xfb   : > { %p16709_p1 = pnand %p16707_p13, %p19881_p5  ;;  %s16713_s1 = scalar_lea.vmem %s16712_s24, 1024 }
  0xfc   : > { %p16714_p12 = scmp.lt.s32.totalorder %s17335_s7, %s16712_s24  ;;  %p16715_p4 = scmp.lt.s32.totalorder %s16713_s1, %s16706_s29 }
  0xfd   : > { %p16710_p11 = pneg %p16709_p1 }
  0xfe   : > { %p16716_p3 = por %p16715_p4, %p16714_p12 }
 0x100   : > { %p16717_p6 = pnand %p16716_p3, %p16710_p11 }
 0x102   : > { %16720 = shalt.err (!%p16717_p6)
}
 0x103   : > { %15608 = dma.hbm_to_vmem [thread:$0]  (!%p19879_p2), %s17340_s20, 512, %s17335_s7, %s362_s26  }
 0x104   : > { %s16721_s8 = scalar_lea.hbm %s17159_s25, 512  ;;  %p19882_p10 = scmp.ne.s32.totalorder %s19855_s30, 0 }
 0x105   : > { %p16722_p0 = scmp.ne.s32.totalorder %s17159_s25, %s16721_s8  ;;  %s16726_s22 = scalar_lea.hbm %s19730_s2, 1024 }
 0x106   : > { %p16727_p9 = scmp.lt.u32.totalorder %s17159_s25, %s19730_s2  ;;  %p16728_p13 = scmp.lt.u32.totalorder %s16726_s22, %s16721_s8 }
 0x107   : > { %p16724_p7 = pnand %p16722_p0, %p19882_p10  ;;  %p16730_p1 = scmp.lt.u32.totalorder %s16721_s8, %s17159_s25 }
 0x108   : > { %p16729_p5 = por %p16728_p13, %p16727_p9 }
 0x109   : > { %p16725_p8 = pneg %p16724_p7 }
 0x10a   : > { %p16731_p11 = por %p16730_p1, %p16729_p5 }
 0x10c   : > { %p16732_p12 = pnand %p16731_p11, %p16725_p8 }
 0x10e   : > { %16735 = shalt.err (!%p16732_p12)
}
 0x10f   : > { %s16736_s7 = scalar_lea.vmem %s414_s12, 512  ;;  %s16934_s20 = smov [#allocation7]  }
 0x110   : > { %p16737_p2 = scmp.ne.s32.totalorder %s414_s12, %s16736_s7  ;;  %s16741_s26 = sshll.u32 %s16934_s20, 4  ;;  %s16742_s26 = int_to_ptr.vmem [resolvable:$false] %s16741_s26 }
 0x111   : > { %s16743_s10 = scalar_lea.vmem %s16742_s26, 1024  ;;  %p16744_p6 = scmp.lt.s32.totalorder %s414_s12, %s16742_s26 }
 0x112   : > { %p16739_p4 = pnand %p16737_p2, %p19882_p10  ;;  %p16745_p0 = scmp.lt.s32.totalorder %s16743_s10, %s16736_s7 }
 0x114   : > { %p16740_p3 = pneg %p16739_p4  ;;  %p16746_p7 = por %p16745_p0, %p16744_p6 }
 0x116   : > { %p16747_p9 = pnand %p16746_p7, %p16740_p3 }
 0x118   : > { %16750 = shalt.err (!%p16747_p9)
}
 0x119   : > { %p19883_p13 = scmp.ne.s32.totalorder %s19854_s4, 0  ;;  %s14734_s28 = sshll.u32 %s16919_s18, 4 }
 0x11a   : > { %s19884_s23 = sand.u32 1, %s16891_s11   ;;  %s19885_s8 = sld [smem:[#allocation67_spill]] }
 0x11b   : > { %15614 = dma.hbm_to_vmem [thread:$0]  (!%p19883_p13), %s17159_s25, 512, %s414_s12, %s17163_s27  }
 0x11c   : > { %s443_s29 = scalar_lea.vmem [#allocation10], %s19884_s23 }
 0x11d   : > { %s450_s16 = sshll.u32 %s443_s29, 4  ;;  %s451_s16 = int_to_ptr.vmem [resolvable:$true] %s450_s16 }
 0x120   : > { %s448_s5 = scalar_lea.hbm %s19885_s8, %s14734_s28  ;;  %s16756_s19 = scalar_lea.hbm %s19885_s8, 32 }
 0x121   : > { %s16751_s14 = scalar_lea.hbm %s448_s5, 16  ;;  %p16757_p11 = scmp.lt.u32.totalorder %s448_s5, %s19885_s8 }
 0x122   : > { %p16752_p8 = scmp.ne.s32.totalorder %s448_s5, %s16751_s14  ;;  %p16758_p12 = scmp.lt.u32.totalorder %s16756_s19, %s16751_s14 }
 0x123   : > { %p16760_p4 = scmp.lt.u32.totalorder %s16751_s14, %s448_s5 }
 0x124   : > { %p16754_p5 = pnand %p16752_p8, %p19882_p10  ;;  %p16759_p2 = por %p16758_p12, %p16757_p11 }
 0x126   : > { %p16755_p1 = pneg %p16754_p5  ;;  %p16761_p3 = por %p16760_p4, %p16759_p2 }
 0x128   : > { %p16762_p6 = pnand %p16761_p3, %p16755_p1 }
 0x12a   : > { %16765 = shalt.err (!%p16762_p6)
}
 0x12b   : > { %s16766_s27 = scalar_lea.vmem %s451_s16, 16  ;;  %s16935_s12 = smov [#allocation10]  }
 0x12c   : > { %p16767_p0 = scmp.ne.s32.totalorder %s451_s16, %s16766_s27  ;;  %s16771_s20 = sshll.u32 %s16935_s12, 4  ;;  %s16772_s20 = int_to_ptr.vmem [resolvable:$false] %s16771_s20 }
 0x12d   : > { %s16773_s26 = scalar_lea.vmem %s16772_s20, 32  ;;  %p16774_p8 = scmp.lt.s32.totalorder %s451_s16, %s16772_s20 }
 0x12e   : > { %p16769_p7 = pnand %p16767_p0, %p19882_p10  ;;  %p16775_p5 = scmp.lt.s32.totalorder %s16773_s26, %s16766_s27 }
 0x130   : > { %p16770_p9 = pneg %p16769_p7  ;;  %p16776_p13 = por %p16775_p5, %p16774_p8 }
 0x132   : > { %p16777_p11 = pnand %p16776_p13, %p16770_p9 }
 0x134   : > { %16780 = shalt.err (!%p16777_p11)
}
 0x135   : > { %p19886_p12 = scmp.ne.s32.totalorder %s19854_s4, 0  ;;  %s19887_s10 = sld [smem:[#allocation32_spill]] }
 0x137   : > { %15620 = dma.hbm_to_vmem [thread:$0]  (!%p19886_p12), %s448_s5, 16, %s451_s16, %s17262_s15  }
 0x13b   : > { %p19888_p1 = scmp.ne.s32.totalorder %s19887_s10, 0 }
 0x13d   : > { %459 = sbr.rel (%p19888_p1) target bundleno = 2802 (0xaf2), region = 56 }
 0x144   : > { %s17410_s30 = sand.u32 1, %s16899_s13   ;;  %p19889_p10 = scmp.ne.s32.totalorder %s19861_s0, 0 }
 0x145   : > { %s14736_s28 = sshll.u32 %s17410_s30, 5  ;;  %s462_s23 = scalar_lea.sflag [#allocation3], %s17410_s30 }
 0x146   : > { %s17416_s29 = scalar_lea.vmem [#allocation2], %s14736_s28 }
 0x147   : > { %16854 = dma.done.wait (%p19889_p10), %s462_s23, 512  }
 0x148   : > { %16856 = vsyncadd (%p19889_p10), %s462_s23, 4294966784  ;;  %s19890_s15 = sld [smem:[#allocation31_spill]]  ;;  %s19891_s4 = sld [smem:[#allocation25_spill]] }
 0x149   : > { %s19892_s16 = sld [smem:[#allocation33_spill]] }
 0x14e   : > { %s470_s24 = sand.u32 1, %s19890_s15   ;;  %s472_s1 = sand.u32 1, %s19891_s4  }
 0x14f   : > { %s14737_s5 = sshll.u32 %s472_s1, 5  ;;  %s471_s14 = scalar_lea.sflag [#allocation6], %s470_s24 }
 0x150   : > { %s17424_s22 = scalar_lea.vmem [#allocation5], %s14737_s5  ;;  %p19893_p13 = scmp.ne.s32.totalorder %s19892_s16, 0 }
 0x152   : > { %16858 = dma.done.wait (%p19893_p13), %s471_s14, 1024  }
 0x153   : > { %16860 = vsyncadd (%p19893_p13), %s471_s14, 4294966272  ;;  %s14739_s9 = sshll.u32 %s17410_s30, 3  ;;  %s17431_s19 = scalar_lea.vmem [#allocation7], %s14737_s5 }
 0x154   : > { %s489_s7 = scalar_lea.sflag [#allocation9], %s470_s24  ;;  %s17433_s25 = scalar_lea.vmem [#allocation8], %s14739_s9 }
 0x155   : > { %16862 = dma.done.wait (%p19889_p10), %s489_s7, 128  }
 0x156   : > { %16864 = vsyncadd (%p19889_p10), %s489_s7, 4294967168  ;;  %s17439_s27 = scalar_lea.vmem [#allocation10], %s472_s1 }
 0x157   : > { %16866 = dma.done.wait (%p19893_p13), %s489_s7, 16  }
 0x158   : > { %16868 = vsyncadd (%p19893_p13), %s489_s7, 4294967280  ;;  %p19894_p2 = scmp.eq.s32.totalorder %s19890_s15, 0 }
 0x15a   : > { %16870 = dma.done.wait (%p19894_p2), [#allocation12], 32768   ;;  %p19895_p4 = pmov %p19894_p2 }
 0x15b   : > { %p19896_p3 = pmov %p19894_p2 }
 0x15c   : > { %16872 = vsyncadd (%p19895_p4), [#allocation12], 4294934528 }
 0x15d   : > { %16874 = dma.done.wait (%p19896_p3), [#allocation15], 32768   ;;  %p19897_p6 = pmov %p19894_p2 }
 0x15e   : > { %v15735_v0 = vld [vmem:[#allocation11 + $0x4] ss:$16 sps:$4 sm:$0xff]   ;;  %v15737_v1 = vld [vmem:[#allocation11 + $0xc] ss:$16 sps:$4 sm:$0xff]   ;;  %v15739_v2 = vld [vmem:[#allocation11] ss:$16 sps:$4 sm:$0xff]  }
 0x15f   : > { %16876 = vsyncadd (%p19897_p6), [#allocation15], 4294934528  ;;  %1357 = vmatprep.subr.bf16.mxu0 %v15735_v0  ;;  %v15740_v3 = vld [vmem:[#allocation11 + $0x8] ss:$16 sps:$4 sm:$0xff]   ;;  %1439 = vmatprep.subr.bf16.mxu1 %v15737_v1  ;;  %v15741_v4 = vld [vmem:[#allocation11 + $0x24] ss:$16 sps:$4 sm:$0xff]  }
 0x160   : > { %1358 = vmatpush1.bf16.msra.mxu0 %v15739_v2  ;;  %1440 = vmatpush1.bf16.msra.mxu1 %v15740_v3  ;;  %v15743_v5 = vld [vmem:[#allocation11 + $0x2c] ss:$16 sps:$4 sm:$0xff]   ;;  %v15745_v6 = vld [vmem:[#allocation11 + $0x20] ss:$16 sps:$4 sm:$0xff]   ;;  %v15746_v7 = vld [vmem:[#allocation11 + $0x28] ss:$16 sps:$4 sm:$0xff]  }
 0x161   : > { %1359 = vmatprep.subr.bf16.mxu0 %v15741_v4  ;;  %1441 = vmatprep.subr.bf16.mxu1 %v15743_v5  ;;  %v15747_v8 = vld [vmem:[#allocation11 + $0x44] ss:$16 sps:$4 sm:$0xff]   ;;  %v15749_v9 = vld [vmem:[#allocation11 + $0x4c] ss:$16 sps:$4 sm:$0xff]   ;;  %v15751_v10 = vld [vmem:[#allocation11 + $0x40] ss:$16 sps:$4 sm:$0xff]  }
 0x162   : > { %v15752_v11 = vld [vmem:[#allocation11 + $0x48] ss:$16 sps:$4 sm:$0xff]   ;;  %v15753_v12 = vld [vmem:[#allocation11 + $0x64] ss:$16 sps:$4 sm:$0xff]   ;;  %v15755_v13 = vld [vmem:[#allocation11 + $0x6c] ss:$16 sps:$4 sm:$0xff]  }
 0x163   : > { %v15757_v14 = vld [vmem:[#allocation11 + $0x60] ss:$16 sps:$4 sm:$0xff]   ;;  %v15758_v15 = vld [vmem:[#allocation11 + $0x68] ss:$16 sps:$4 sm:$0xff]   ;;  %v15759_v16 = vld [vmem:[#allocation11 + $0x84] ss:$16 sps:$4 sm:$0xff]  }
 0x164   : > { %1360 = vmatpush1.bf16.msra.mxu0 %v15745_v6  ;;  %1442 = vmatpush1.bf16.msra.mxu1 %v15746_v7  ;;  %v15761_v17 = vld [vmem:[#allocation11 + $0x8c] ss:$16 sps:$4 sm:$0xff]   ;;  %v15763_v18 = vld [vmem:[#allocation11 + $0x80] ss:$16 sps:$4 sm:$0xff]   ;;  %v15764_v19 = vld [vmem:[#allocation11 + $0x88] ss:$16 sps:$4 sm:$0xff]  }
 0x165   : > { %1361 = vmatprep.subr.bf16.mxu0 %v15747_v8  ;;  %1443 = vmatprep.subr.bf16.mxu1 %v15749_v9  ;;  %v15765_v20 = vld [vmem:[#allocation11 + $0xa4] ss:$16 sps:$4 sm:$0xff]   ;;  %v15767_v21 = vld [vmem:[#allocation11 + $0xac] ss:$16 sps:$4 sm:$0xff]   ;;  %v15769_v22 = vld [vmem:[#allocation11 + $0xa0] ss:$16 sps:$4 sm:$0xff]  }
 0x166   : > { %v15770_v23 = vld [vmem:[#allocation11 + $0xa8] ss:$16 sps:$4 sm:$0xff]   ;;  %v15771_v24 = vld [vmem:[#allocation11 + $0xc4] ss:$16 sps:$4 sm:$0xff]   ;;  %v15773_v25 = vld [vmem:[#allocation11 + $0xcc] ss:$16 sps:$4 sm:$0xff]  }
 0x167   : > { %v15775_v26 = vld [vmem:[#allocation11 + $0xc0] ss:$16 sps:$4 sm:$0xff]   ;;  %v15776_v27 = vld [vmem:[#allocation11 + $0xc8] ss:$16 sps:$4 sm:$0xff]   ;;  %v15777_v28 = vld [vmem:[#allocation11 + $0xe4] ss:$16 sps:$4 sm:$0xff]  }
 0x168   : > { %1362 = vmatpush1.bf16.msra.mxu0 %v15751_v10  ;;  %1444 = vmatpush1.bf16.msra.mxu1 %v15752_v11  ;;  %v15779_v29 = vld [vmem:[#allocation11 + $0xec] ss:$16 sps:$4 sm:$0xff]   ;;  %v15781_v30 = vld [vmem:[#allocation11 + $0xe0] ss:$16 sps:$4 sm:$0xff]   ;;  %v15782_v31 = vld [vmem:[#allocation11 + $0xe8] ss:$16 sps:$4 sm:$0xff]  }
 0x169   : > { %1363 = vmatprep.subr.bf16.mxu0 %v15753_v12  ;;  %1445 = vmatprep.subr.bf16.mxu1 %v15755_v13  ;;  %v15783_v32 = vld [vmem:[#allocation11 + $0x104] ss:$16 sps:$4 sm:$0xff]   ;;  %v15785_v33 = vld [vmem:[#allocation11 + $0x10c] ss:$16 sps:$4 sm:$0xff]   ;;  %v15787_v34 = vld [vmem:[#allocation11 + $0x100] ss:$16 sps:$4 sm:$0xff]  }
 0x16a   : > { %v15788_v35 = vld [vmem:[#allocation11 + $0x108] ss:$16 sps:$4 sm:$0xff]   ;;  %v15789_v36 = vld [vmem:[#allocation11 + $0x124] ss:$16 sps:$4 sm:$0xff]   ;;  %v15791_v37 = vld [vmem:[#allocation11 + $0x12c] ss:$16 sps:$4 sm:$0xff]  }
 0x16b   : > { %v15793_v38 = vld [vmem:[#allocation11 + $0x120] ss:$16 sps:$4 sm:$0xff]   ;;  %v15794_v39 = vld [vmem:[#allocation11 + $0x128] ss:$16 sps:$4 sm:$0xff]   ;;  %v15795_v40 = vld [vmem:[#allocation11 + $0x144] ss:$16 sps:$4 sm:$0xff]  }
 0x16c   : > { %1364 = vmatpush1.bf16.msra.mxu0 %v15757_v14  ;;  %1446 = vmatpush1.bf16.msra.mxu1 %v15758_v15  ;;  %v15797_v41 = vld [vmem:[#allocation11 + $0x14c] ss:$16 sps:$4 sm:$0xff]   ;;  %v15799_v42 = vld [vmem:[#allocation11 + $0x140] ss:$16 sps:$4 sm:$0xff]   ;;  %v15800_v43 = vld [vmem:[#allocation11 + $0x148] ss:$16 sps:$4 sm:$0xff]  }
 0x16d   : > { %1365 = vmatprep.subr.bf16.mxu0 %v15759_v16  ;;  %1447 = vmatprep.subr.bf16.mxu1 %v15761_v17  ;;  %v15801_v44 = vld [vmem:[#allocation11 + $0x164] ss:$16 sps:$4 sm:$0xff]   ;;  %v15803_v45 = vld [vmem:[#allocation11 + $0x16c] ss:$16 sps:$4 sm:$0xff]   ;;  %v15805_v47 = vld [vmem:[#allocation11 + $0x160] ss:$16 sps:$4 sm:$0xff]  }
 0x16e   : > { %v572_v46 = vld [vmem:[%s17416_s29 + $0x8] sm:$0xff]  ;;  %v15811_v52 = vld [vmem:[#allocation11 + $0x180] ss:$16 sps:$4 sm:$0xff]   ;;  %vm16940_vm0 = vmmov 0   ;;  %vm8305_vm1 = vcmask 64512   ;;  %s20025_s0 = sld [smem:[#allocation28_spill]] }
 0x16f   : > { %v586_v48 = vpack.c.bf16 %v572_v46, %v572_v46  ;;  %v15806_v49 = vld [vmem:[#allocation11 + $0x168] ss:$16 sps:$4 sm:$0xff]   ;;  %v15807_v50 = vld [vmem:[#allocation11 + $0x184] ss:$16 sps:$4 sm:$0xff]   ;;  %v15809_v51 = vld [vmem:[#allocation11 + $0x18c] ss:$16 sps:$4 sm:$0xff]  }
 0x170   : > { %1366 = vmatpush1.bf16.msra.mxu0 %v15763_v18  ;;  %1448 = vmatpush1.bf16.msra.mxu1 %v15764_v19  ;;  %v15812_v53 = vld [vmem:[#allocation11 + $0x188] ss:$16 sps:$4 sm:$0xff]   ;;  %v15813_v54 = vld [vmem:[#allocation11 + $0x1a4] ss:$16 sps:$4 sm:$0xff]   ;;  %v15815_v55 = vld [vmem:[#allocation11 + $0x1ac] ss:$16 sps:$4 sm:$0xff]  }
 0x171   : > { %1367 = vmatprep.subr.bf16.mxu0 %v15765_v20  ;;  %1449 = vmatprep.subr.bf16.mxu1 %v15767_v21  ;;  %v15817_v56 = vld [vmem:[#allocation11 + $0x1a0] ss:$16 sps:$4 sm:$0xff]   ;;  %v15818_v57 = vld [vmem:[#allocation11 + $0x1a8] ss:$16 sps:$4 sm:$0xff]   ;;  %v15819_v58 = vld [vmem:[#allocation11 + $0x1c4] ss:$16 sps:$4 sm:$0xff]  }
 0x172   : > { %1389 = vmatprep.mubr.bf16.mxu0 %v586_v48  ;;  %1471 = vmatprep.mubr.bf16.mxu1 %v586_v48  ;;  %v15821_v59 = vld [vmem:[#allocation11 + $0x1cc] ss:$16 sps:$4 sm:$0xff]   ;;  %v15823_v60 = vld [vmem:[#allocation11 + $0x1c0] ss:$16 sps:$4 sm:$0xff]   ;;  %v15824_v61 = vld [vmem:[#allocation11 + $0x1c8] ss:$16 sps:$4 sm:$0xff]  }
 0x173   : > { %v15825_v62 = vld [vmem:[#allocation11 + $0x1e4] ss:$16 sps:$4 sm:$0xff]   ;;  %v15827_v63 = vld [vmem:[#allocation11 + $0x1ec] ss:$16 sps:$4 sm:$0xff]   ;;  %v15829_v0 = vld [vmem:[#allocation11 + $0x1e0] ss:$16 sps:$4 sm:$0xff]  }
 0x174   : > { %1368 = vmatpush1.bf16.msra.mxu0 %v15769_v22  ;;  %1450 = vmatpush1.bf16.msra.mxu1 %v15770_v23  ;;  %v15830_v1 = vld [vmem:[#allocation11 + $0x1e8] ss:$16 sps:$4 sm:$0xff]   ;;  %v571_v2 = vld [vmem:[%s17416_s29] sm:$0xff]  ;;  %s20026_s12 = sld [smem:[#allocation29_spill]]  ;;  %s15297_s20 = sshll.u32 %s20025_s0, 2 }
 0x175   : > { %1369 = vmatprep.subr.bf16.mxu0 %v15771_v24  ;;  %1451 = vmatprep.subr.bf16.mxu1 %v15773_v25  ;;  %v15833_v3 = vld [vmem:[#allocation11 + $0x204] ss:$16 sps:$4 sm:$0xff]   ;;  %v15836_v4 = vld [vmem:[#allocation11 + $0x20c] ss:$16 sps:$4 sm:$0xff]   ;;  %v585_v5 = vpack.c.bf16 %v571_v2, %v571_v2  ;;  %v15831_v6 = vld [vmem:[#allocation11 + $0x200] ss:$16 sps:$4 sm:$0xff]  }
 0x176   : > { %v15834_v7 = vld [vmem:[#allocation11 + $0x208] ss:$16 sps:$4 sm:$0xff]   ;;  %v15839_v8 = vld [vmem:[#allocation11 + $0x224] ss:$16 sps:$4 sm:$0xff]   ;;  %v15842_v9 = vld [vmem:[#allocation11 + $0x22c] ss:$16 sps:$4 sm:$0xff]  }
 0x177   : > { %v15837_v10 = vld [vmem:[#allocation11 + $0x220] ss:$16 sps:$4 sm:$0xff]   ;;  %v15840_v11 = vld [vmem:[#allocation11 + $0x228] ss:$16 sps:$4 sm:$0xff]   ;;  %v15845_v12 = vld [vmem:[#allocation11 + $0x244] ss:$16 sps:$4 sm:$0xff]  }
 0x178   : > { %1370 = vmatpush1.bf16.msra.mxu0 %v15775_v26  ;;  %1452 = vmatpush1.bf16.msra.mxu1 %v15776_v27  ;;  %v15848_v13 = vld [vmem:[#allocation11 + $0x24c] ss:$16 sps:$4 sm:$0xff]   ;;  %v15843_v14 = vld [vmem:[#allocation11 + $0x240] ss:$16 sps:$4 sm:$0xff]   ;;  %v15846_v15 = vld [vmem:[#allocation11 + $0x248] ss:$16 sps:$4 sm:$0xff]  }
 0x179   : > { %1371 = vmatprep.subr.bf16.mxu0 %v15777_v28  ;;  %1453 = vmatprep.subr.bf16.mxu1 %v15779_v29  ;;  %v15851_v16 = vld [vmem:[#allocation11 + $0x264] ss:$16 sps:$4 sm:$0xff]   ;;  %v15854_v17 = vld [vmem:[#allocation11 + $0x26c] ss:$16 sps:$4 sm:$0xff]   ;;  %v15849_v18 = vld [vmem:[#allocation11 + $0x260] ss:$16 sps:$4 sm:$0xff]  }
 0x17a   : > { %v15852_v19 = vld [vmem:[#allocation11 + $0x268] ss:$16 sps:$4 sm:$0xff]   ;;  %v15857_v20 = vld [vmem:[#allocation11 + $0x284] ss:$16 sps:$4 sm:$0xff]   ;;  %v15860_v21 = vld [vmem:[#allocation11 + $0x28c] ss:$16 sps:$4 sm:$0xff]  }
 0x17b   : > { %v15855_v22 = vld [vmem:[#allocation11 + $0x280] ss:$16 sps:$4 sm:$0xff]   ;;  %v15858_v23 = vld [vmem:[#allocation11 + $0x288] ss:$16 sps:$4 sm:$0xff]   ;;  %v15863_v24 = vld [vmem:[#allocation11 + $0x2a4] ss:$16 sps:$4 sm:$0xff]  }
 0x17c   : > { %1372 = vmatpush1.bf16.msra.mxu0 %v15781_v30  ;;  %1454 = vmatpush1.bf16.msra.mxu1 %v15782_v31  ;;  %v15866_v25 = vld [vmem:[#allocation11 + $0x2ac] ss:$16 sps:$4 sm:$0xff]   ;;  %v15861_v26 = vld [vmem:[#allocation11 + $0x2a0] ss:$16 sps:$4 sm:$0xff]   ;;  %v15864_v27 = vld [vmem:[#allocation11 + $0x2a8] ss:$16 sps:$4 sm:$0xff]  }
 0x17d   : > { %1373 = vmatprep.subr.bf16.mxu0 %v15783_v32  ;;  %1455 = vmatprep.subr.bf16.mxu1 %v15785_v33  ;;  %v15869_v28 = vld [vmem:[#allocation11 + $0x2c4] ss:$16 sps:$4 sm:$0xff]   ;;  %v15872_v29 = vld [vmem:[#allocation11 + $0x2cc] ss:$16 sps:$4 sm:$0xff]   ;;  %v15867_v31 = vld [vmem:[#allocation11 + $0x2c0] ss:$16 sps:$4 sm:$0xff]  }
 0x17e   : > { %v574_v30 = vld [vmem:[%s17416_s29 + $0x18] sm:$0xff]  ;;  %v15891_v48 = vld [vmem:[#allocation11 + $0x340] ss:$16 sps:$4 sm:$0xff]   ;;  %s15298_s26 = sshll.u32 %s20026_s12, 3  ;;  %s20028_s4 = sld [smem:[#allocation36_spill]] }
 0x17f   : > { %v15870_v32 = vld [vmem:[#allocation11 + $0x2c8] ss:$16 sps:$4 sm:$0xff]   ;;  %v588_v33 = vpack.c.bf16 %v574_v30, %v574_v30  ;;  %v15893_v46 = vld [vmem:[#allocation11 + $0x344] ss:$16 sps:$4 sm:$0xff]   ;;  %s14499_s10 = sadd.s32 %s15298_s26, %s15297_s20  ;;  %s14487_s5 = scalar_lea.sflag [#allocation4], %s17410_s30 }
 0x180   : > { %1374 = vmatpush1.bf16.msra.mxu0 %v15787_v34  ;;  %1456 = vmatpush1.bf16.msra.mxu1 %v15788_v35  ;;  %v15875_v34 = vld [vmem:[#allocation11 + $0x2e4] ss:$16 sps:$4 sm:$0xff]   ;;  %v15878_v35 = vld [vmem:[#allocation11 + $0x2ec] ss:$16 sps:$4 sm:$0xff]   ;;  %s15299_s23 = sshll.u32 %s14499_s10, 7 }
 0x181   : > { %1375 = vmatprep.subr.bf16.mxu0 %v15789_v36  ;;  %1457 = vmatprep.subr.bf16.mxu1 %v15791_v37  ;;  %v15873_v36 = vld [vmem:[#allocation11 + $0x2e0] ss:$16 sps:$4 sm:$0xff]   ;;  %v15876_v37 = vld [vmem:[#allocation11 + $0x2e8] ss:$16 sps:$4 sm:$0xff]   ;;  %v15923_v2 = vld [vmem:[#allocation11 + $0x3e4] ss:$16 sps:$4 sm:$0xff]  }
 0x182   : > { %v15959_v30 = vld [vmem:[#allocation13 + $0xa4] ss:$16 sps:$4 sm:$0xff]  }
 0x184   : > { %1376 = vmatpush1.bf16.msra.mxu0 %v15793_v38  ;;  %1458 = vmatpush1.bf16.msra.mxu1 %v15794_v39  ;;  %v15881_v38 = vld [vmem:[#allocation11 + $0x304] ss:$16 sps:$4 sm:$0xff]   ;;  %v15884_v39 = vld [vmem:[#allocation11 + $0x30c] ss:$16 sps:$4 sm:$0xff]   ;;  %p20030_p7 = scmp.ne.s32.totalorder %s20028_s4, 0 }
 0x185   : > { %1377 = vmatprep.subr.bf16.mxu0 %v15795_v40  ;;  %1459 = vmatprep.subr.bf16.mxu1 %v15797_v41  ;;  %v15879_v40 = vld [vmem:[#allocation11 + $0x300] ss:$16 sps:$4 sm:$0xff]   ;;  %v15882_v41 = vld [vmem:[#allocation11 + $0x308] ss:$16 sps:$4 sm:$0xff]  }
 0x188   : > { %1378 = vmatpush1.bf16.msra.mxu0 %v15799_v42  ;;  %1460 = vmatpush1.bf16.msra.mxu1 %v15800_v43  ;;  %v15887_v42 = vld [vmem:[#allocation11 + $0x324] ss:$16 sps:$4 sm:$0xff]   ;;  %v15890_v43 = vld [vmem:[#allocation11 + $0x32c] ss:$16 sps:$4 sm:$0xff]  }
 0x189   : > { %1379 = vmatprep.subr.bf16.mxu0 %v15801_v44  ;;  %1461 = vmatprep.subr.bf16.mxu1 %v15803_v45  ;;  %v15885_v44 = vld [vmem:[#allocation11 + $0x320] ss:$16 sps:$4 sm:$0xff]   ;;  %v15888_v45 = vld [vmem:[#allocation11 + $0x328] ss:$16 sps:$4 sm:$0xff]  }
 0x18c   : > { %1380 = vmatpush1.bf16.msra.mxu0 %v15805_v47  ;;  %1462 = vmatpush1.bf16.msra.mxu1 %v15806_v49  ;;  %v15896_v47 = vld [vmem:[#allocation11 + $0x34c] ss:$16 sps:$4 sm:$0xff]   ;;  %v15894_v49 = vld [vmem:[#allocation11 + $0x348] ss:$16 sps:$4 sm:$0xff]  }
 0x18d   : > { %1381 = vmatprep.subr.bf16.mxu0 %v15807_v50  ;;  %1463 = vmatprep.subr.bf16.mxu1 %v15809_v51  ;;  %v15899_v50 = vld [vmem:[#allocation11 + $0x364] ss:$16 sps:$4 sm:$0xff]   ;;  %v15902_v51 = vld [vmem:[#allocation11 + $0x36c] ss:$16 sps:$4 sm:$0xff]  }
 0x190   : > { %1382 = vmatpush1.bf16.msra.mxu0 %v15811_v52  ;;  %1464 = vmatpush1.bf16.msra.mxu1 %v15812_v53  ;;  %v15897_v52 = vld [vmem:[#allocation11 + $0x360] ss:$16 sps:$4 sm:$0xff]   ;;  %v15900_v53 = vld [vmem:[#allocation11 + $0x368] ss:$16 sps:$4 sm:$0xff]  }
 0x191   : > { %1383 = vmatprep.subr.bf16.mxu0 %v15813_v54  ;;  %1465 = vmatprep.subr.bf16.mxu1 %v15815_v55  ;;  %v15905_v54 = vld [vmem:[#allocation11 + $0x384] ss:$16 sps:$4 sm:$0xff]   ;;  %v15908_v55 = vld [vmem:[#allocation11 + $0x38c] ss:$16 sps:$4 sm:$0xff]  }
 0x194   : > { %1384 = vmatpush1.bf16.msra.mxu0 %v15817_v56  ;;  %1466 = vmatpush1.bf16.msra.mxu1 %v15818_v57  ;;  %v15903_v56 = vld [vmem:[#allocation11 + $0x380] ss:$16 sps:$4 sm:$0xff]   ;;  %v15906_v57 = vld [vmem:[#allocation11 + $0x388] ss:$16 sps:$4 sm:$0xff]  }
 0x195   : > { %1385 = vmatprep.subr.bf16.mxu0 %v15819_v58  ;;  %1467 = vmatprep.subr.bf16.mxu1 %v15821_v59  ;;  %v15911_v58 = vld [vmem:[#allocation11 + $0x3a4] ss:$16 sps:$4 sm:$0xff]   ;;  %v15914_v59 = vld [vmem:[#allocation11 + $0x3ac] ss:$16 sps:$4 sm:$0xff]  }
 0x198   : > { %1386 = vmatpush1.bf16.msra.mxu0 %v15823_v60  ;;  %1468 = vmatpush1.bf16.msra.mxu1 %v15824_v61  ;;  %v15909_v60 = vld [vmem:[#allocation11 + $0x3a0] ss:$16 sps:$4 sm:$0xff]   ;;  %v15912_v61 = vld [vmem:[#allocation11 + $0x3a8] ss:$16 sps:$4 sm:$0xff]  }
 0x199   : > { %1387 = vmatprep.subr.bf16.mxu0 %v15825_v62  ;;  %1469 = vmatprep.subr.bf16.mxu1 %v15827_v63  ;;  %v15917_v62 = vld [vmem:[#allocation11 + $0x3c4] ss:$16 sps:$4 sm:$0xff]   ;;  %v15920_v63 = vld [vmem:[#allocation11 + $0x3cc] ss:$16 sps:$4 sm:$0xff]  }
 0x19c   : > { %1388 = vmatpush1.bf16.msra.mxu0 %v15829_v0  ;;  %1470 = vmatpush1.bf16.msra.mxu1 %v15830_v1  ;;  %v15915_v0 = vld [vmem:[#allocation11 + $0x3c0] ss:$16 sps:$4 sm:$0xff]   ;;  %v15918_v1 = vld [vmem:[#allocation11 + $0x3c8] ss:$16 sps:$4 sm:$0xff]  }
 0x19d   : > { %1398 = vmatprep.subr.bf16.mxu0 %v15833_v3  ;;  %1480 = vmatprep.subr.bf16.mxu1 %v15836_v4  ;;  %v15926_v3 = vld [vmem:[#allocation11 + $0x3ec] ss:$16 sps:$4 sm:$0xff]   ;;  %v15921_v4 = vld [vmem:[#allocation11 + $0x3e0] ss:$16 sps:$4 sm:$0xff]  }
 0x19f   : > { %1390 = vmatmul.mubr.bf16.vlgmr.msra.gmra.mrb[0].mxu0 %v585_v5  ;;  %1472 = vmatmul.mubr.bf16.vlgmr.msra.gmra.mrb[0].mxu1 %v585_v5  ;;  %v15924_v5 = vld [vmem:[#allocation11 + $0x3e8] ss:$16 sps:$4 sm:$0xff]  }
 0x1a0   : > { %1399 = vmatpush1.bf16.msra.mxu0 %v15831_v6  ;;  %1481 = vmatpush1.bf16.msra.mxu1 %v15834_v7  ;;  %v573_v6 = vld [vmem:[%s17416_s29 + $0x10] sm:$0xff]  ;;  %s569_s29 = scalar_lea.vmem [#allocation17], %s14736_s28  ;;  %s20029_s28 = sld [smem:[#allocation71_spill]] }
 0x1a1   : > { %1400 = vmatprep.subr.bf16.mxu0 %v15839_v8  ;;  %1482 = vmatprep.subr.bf16.mxu1 %v15842_v9  ;;  %v15929_v7 = vld [vmem:[#allocation13 + $0x4] ss:$16 sps:$4 sm:$0xff]   ;;  %v15932_v8 = vld [vmem:[#allocation13 + $0xc] ss:$16 sps:$4 sm:$0xff]   ;;  %v587_v9 = vpack.c.bf16 %v573_v6, %v573_v6  ;;  %s14503_s15 = sshll.u32 %s569_s29, 4  ;;  %s19667_s15 = int_to_ptr.vmem [resolvable:$true] %s14503_s15 }
 0x1a2   : > { %1430 = vmatprep.mubr.bf16.mxu0 %v588_v33  ;;  %1512 = vmatprep.mubr.bf16.mxu1 %v588_v33  ;;  %v15960_v33 = vld [vmem:[#allocation13 + $0xa8] ss:$16 sps:$4 sm:$0xff]   ;;  %v16019_v6 = vld [vmem:[#allocation13 + $0x1e4] ss:$16 sps:$4 sm:$0xff]   ;;  %s16781_s14 = scalar_lea.vmem %s19667_s15, 512 }
 0x1a3   : > { %p16782_p0 = scmp.ne.s32.totalorder %s19667_s15, %s16781_s14 }
 0x1a4   : > { %1401 = vmatpush1.bf16.msra.mxu0 %v15837_v10  ;;  %1483 = vmatpush1.bf16.msra.mxu1 %v15840_v11  ;;  %v15927_v10 = vld [vmem:[#allocation13] ss:$16 sps:$4 sm:$0xff]   ;;  %v15930_v11 = vld [vmem:[#allocation13 + $0x8] ss:$16 sps:$4 sm:$0xff]  }
 0x1a5   : > { %1402 = vmatprep.subr.bf16.mxu0 %v15845_v12  ;;  %1484 = vmatprep.subr.bf16.mxu1 %v15848_v13  ;;  %v15935_v12 = vld [vmem:[#allocation13 + $0x24] ss:$16 sps:$4 sm:$0xff]   ;;  %v15938_v13 = vld [vmem:[#allocation13 + $0x2c] ss:$16 sps:$4 sm:$0xff]   ;;  %p16783_p9 = pnand %p16782_p0, %p20030_p7 }
 0x1a6   : > { %s19665_s1 = scalar_lea.hbm %s20029_s28, %s15299_s23 }
 0x1a7   : > { %p16784_p8 = pneg %p16783_p9 }
 0x1a8   : > { %1403 = vmatpush1.bf16.msra.mxu0 %v15843_v14  ;;  %1485 = vmatpush1.bf16.msra.mxu1 %v15846_v15  ;;  %v576_v14 = vld [vmem:[%s17424_s22 + $0x8] sm:$0xff] }
 0x1a9   : > { %1404 = vmatprep.subr.bf16.mxu0 %v15851_v16  ;;  %1486 = vmatprep.subr.bf16.mxu1 %v15854_v17  ;;  %v1522_v15 = vpack.c.bf16 %v576_v14, %v576_v14  ;;  %v15933_v16 = vld [vmem:[#allocation13 + $0x20] ss:$16 sps:$4 sm:$0xff]   ;;  %v15936_v17 = vld [vmem:[#allocation13 + $0x28] ss:$16 sps:$4 sm:$0xff]  }
 0x1aa   : > { %v16023_v14 = vld [vmem:[#allocation13 + $0x200] ss:$16 sps:$4 sm:$0xff]  }
 0x1ac   : > { %1405 = vmatpush1.bf16.msra.mxu0 %v15849_v18  ;;  %1487 = vmatpush1.bf16.msra.mxu1 %v15852_v19  ;;  %v15941_v18 = vld [vmem:[#allocation13 + $0x44] ss:$16 sps:$4 sm:$0xff]   ;;  %v15944_v19 = vld [vmem:[#allocation13 + $0x4c] ss:$16 sps:$4 sm:$0xff]  }
 0x1ad   : > { %1406 = vmatprep.subr.bf16.mxu0 %v15857_v20  ;;  %1488 = vmatprep.subr.bf16.mxu1 %v15860_v21  ;;  %v15939_v20 = vld [vmem:[#allocation13 + $0x40] ss:$16 sps:$4 sm:$0xff]   ;;  %v15942_v21 = vld [vmem:[#allocation13 + $0x48] ss:$16 sps:$4 sm:$0xff]  }
 0x1b0   : > { %1407 = vmatpush1.bf16.msra.mxu0 %v15855_v22  ;;  %1489 = vmatpush1.bf16.msra.mxu1 %v15858_v23  ;;  %v15947_v22 = vld [vmem:[#allocation13 + $0x64] ss:$16 sps:$4 sm:$0xff]   ;;  %v15950_v23 = vld [vmem:[#allocation13 + $0x6c] ss:$16 sps:$4 sm:$0xff]  }
 0x1b1   : > { %1408 = vmatprep.subr.bf16.mxu0 %v15863_v24  ;;  %1490 = vmatprep.subr.bf16.mxu1 %v15866_v25  ;;  %v15945_v24 = vld [vmem:[#allocation13 + $0x60] ss:$16 sps:$4 sm:$0xff]   ;;  %v15948_v25 = vld [vmem:[#allocation13 + $0x68] ss:$16 sps:$4 sm:$0xff]  }
 0x1b4   : > { %1409 = vmatpush1.bf16.msra.mxu0 %v15861_v26  ;;  %1491 = vmatpush1.bf16.msra.mxu1 %v15864_v27  ;;  %v15953_v26 = vld [vmem:[#allocation13 + $0x84] ss:$16 sps:$4 sm:$0xff]   ;;  %v15956_v27 = vld [vmem:[#allocation13 + $0x8c] ss:$16 sps:$4 sm:$0xff]  }
 0x1b5   : > { %1410 = vmatprep.subr.bf16.mxu0 %v15869_v28  ;;  %1492 = vmatprep.subr.bf16.mxu1 %v15872_v29  ;;  %v15951_v28 = vld [vmem:[#allocation13 + $0x80] ss:$16 sps:$4 sm:$0xff]   ;;  %v15954_v29 = vld [vmem:[#allocation13 + $0x88] ss:$16 sps:$4 sm:$0xff]  }
 0x1b8   : > { %1411 = vmatpush1.bf16.msra.mxu0 %v15867_v31  ;;  %1493 = vmatpush1.bf16.msra.mxu1 %v15870_v32  ;;  %v15962_v31 = vld [vmem:[#allocation13 + $0xac] ss:$16 sps:$4 sm:$0xff]   ;;  %v15957_v32 = vld [vmem:[#allocation13 + $0xa0] ss:$16 sps:$4 sm:$0xff]  }
 0x1b9   : > { %1412 = vmatprep.subr.bf16.mxu0 %v15875_v34  ;;  %1494 = vmatprep.subr.bf16.mxu1 %v15878_v35  ;;  %v15965_v34 = vld [vmem:[#allocation13 + $0xc4] ss:$16 sps:$4 sm:$0xff]   ;;  %v15968_v35 = vld [vmem:[#allocation13 + $0xcc] ss:$16 sps:$4 sm:$0xff]  }
 0x1bc   : > { %1413 = vmatpush1.bf16.msra.mxu0 %v15873_v36  ;;  %1495 = vmatpush1.bf16.msra.mxu1 %v15876_v37  ;;  %v15963_v36 = vld [vmem:[#allocation13 + $0xc0] ss:$16 sps:$4 sm:$0xff]   ;;  %v15966_v37 = vld [vmem:[#allocation13 + $0xc8] ss:$16 sps:$4 sm:$0xff]  }
 0x1bd   : > { %1414 = vmatprep.subr.bf16.mxu0 %v15881_v38  ;;  %1496 = vmatprep.subr.bf16.mxu1 %v15884_v39  ;;  %v15971_v38 = vld [vmem:[#allocation13 + $0xe4] ss:$16 sps:$4 sm:$0xff]   ;;  %v15974_v39 = vld [vmem:[#allocation13 + $0xec] ss:$16 sps:$4 sm:$0xff]  }
 0x1c0   : > { %1415 = vmatpush1.bf16.msra.mxu0 %v15879_v40  ;;  %1497 = vmatpush1.bf16.msra.mxu1 %v15882_v41  ;;  %v15969_v40 = vld [vmem:[#allocation13 + $0xe0] ss:$16 sps:$4 sm:$0xff]   ;;  %v15972_v41 = vld [vmem:[#allocation13 + $0xe8] ss:$16 sps:$4 sm:$0xff]  }
 0x1c1   : > { %1416 = vmatprep.subr.bf16.mxu0 %v15887_v42  ;;  %1498 = vmatprep.subr.bf16.mxu1 %v15890_v43  ;;  %v15977_v42 = vld [vmem:[#allocation13 + $0x104] ss:$16 sps:$4 sm:$0xff]   ;;  %v15980_v43 = vld [vmem:[#allocation13 + $0x10c] ss:$16 sps:$4 sm:$0xff]  }
 0x1c4   : > { %1417 = vmatpush1.bf16.msra.mxu0 %v15885_v44  ;;  %1499 = vmatpush1.bf16.msra.mxu1 %v15888_v45  ;;  %v15975_v44 = vld [vmem:[#allocation13 + $0x100] ss:$16 sps:$4 sm:$0xff]   ;;  %v15978_v45 = vld [vmem:[#allocation13 + $0x108] ss:$16 sps:$4 sm:$0xff]  }
 0x1c5   : > { %1418 = vmatprep.subr.bf16.mxu0 %v15893_v46  ;;  %1500 = vmatprep.subr.bf16.mxu1 %v15896_v47  ;;  %v15983_v46 = vld [vmem:[#allocation13 + $0x124] ss:$16 sps:$4 sm:$0xff]   ;;  %v15986_v47 = vld [vmem:[#allocation13 + $0x12c] ss:$16 sps:$4 sm:$0xff]  }
 0x1c8   : > { %1419 = vmatpush1.bf16.msra.mxu0 %v15891_v48  ;;  %1501 = vmatpush1.bf16.msra.mxu1 %v15894_v49  ;;  %v15981_v48 = vld [vmem:[#allocation13 + $0x120] ss:$16 sps:$4 sm:$0xff]   ;;  %v15984_v49 = vld [vmem:[#allocation13 + $0x128] ss:$16 sps:$4 sm:$0xff]  }
 0x1c9   : > { %1420 = vmatprep.subr.bf16.mxu0 %v15899_v50  ;;  %1502 = vmatprep.subr.bf16.mxu1 %v15902_v51  ;;  %v15989_v50 = vld [vmem:[#allocation13 + $0x144] ss:$16 sps:$4 sm:$0xff]   ;;  %v15992_v51 = vld [vmem:[#allocation13 + $0x14c] ss:$16 sps:$4 sm:$0xff]  }
 0x1cc   : > { %1421 = vmatpush1.bf16.msra.mxu0 %v15897_v52  ;;  %1503 = vmatpush1.bf16.msra.mxu1 %v15900_v53  ;;  %v15987_v52 = vld [vmem:[#allocation13 + $0x140] ss:$16 sps:$4 sm:$0xff]   ;;  %v15990_v53 = vld [vmem:[#allocation13 + $0x148] ss:$16 sps:$4 sm:$0xff]  }
 0x1cd   : > { %1422 = vmatprep.subr.bf16.mxu0 %v15905_v54  ;;  %1504 = vmatprep.subr.bf16.mxu1 %v15908_v55  ;;  %v15995_v54 = vld [vmem:[#allocation13 + $0x164] ss:$16 sps:$4 sm:$0xff]   ;;  %v15998_v55 = vld [vmem:[#allocation13 + $0x16c] ss:$16 sps:$4 sm:$0xff]  }
 0x1d0   : > { %1423 = vmatpush1.bf16.msra.mxu0 %v15903_v56  ;;  %1505 = vmatpush1.bf16.msra.mxu1 %v15906_v57  ;;  %v15993_v56 = vld [vmem:[#allocation13 + $0x160] ss:$16 sps:$4 sm:$0xff]   ;;  %v15996_v57 = vld [vmem:[#allocation13 + $0x168] ss:$16 sps:$4 sm:$0xff]  }
 0x1d1   : > { %1424 = vmatprep.subr.bf16.mxu0 %v15911_v58  ;;  %1506 = vmatprep.subr.bf16.mxu1 %v15914_v59  ;;  %v16001_v58 = vld [vmem:[#allocation13 + $0x184] ss:$16 sps:$4 sm:$0xff]   ;;  %v16004_v59 = vld [vmem:[#allocation13 + $0x18c] ss:$16 sps:$4 sm:$0xff]  }
 0x1d4   : > { %1425 = vmatpush1.bf16.msra.mxu0 %v15909_v60  ;;  %1507 = vmatpush1.bf16.msra.mxu1 %v15912_v61  ;;  %v15999_v60 = vld [vmem:[#allocation13 + $0x180] ss:$16 sps:$4 sm:$0xff]   ;;  %v16002_v61 = vld [vmem:[#allocation13 + $0x188] ss:$16 sps:$4 sm:$0xff]  }
 0x1d5   : > { %1426 = vmatprep.subr.bf16.mxu0 %v15917_v62  ;;  %1508 = vmatprep.subr.bf16.mxu1 %v15920_v63  ;;  %v16007_v62 = vld [vmem:[#allocation13 + $0x1a4] ss:$16 sps:$4 sm:$0xff]   ;;  %v16010_v63 = vld [vmem:[#allocation13 + $0x1ac] ss:$16 sps:$4 sm:$0xff]  }
 0x1d8   : > { %1427 = vmatpush1.bf16.msra.mxu0 %v15915_v0  ;;  %1509 = vmatpush1.bf16.msra.mxu1 %v15918_v1  ;;  %v16005_v0 = vld [vmem:[#allocation13 + $0x1a0] ss:$16 sps:$4 sm:$0xff]   ;;  %v16008_v1 = vld [vmem:[#allocation13 + $0x1a8] ss:$16 sps:$4 sm:$0xff]  }
 0x1d9   : > { %1428 = vmatprep.subr.bf16.mxu0 %v15923_v2  ;;  %1510 = vmatprep.subr.bf16.mxu1 %v15926_v3  ;;  %v16013_v2 = vld [vmem:[#allocation13 + $0x1c4] ss:$16 sps:$4 sm:$0xff]   ;;  %v16016_v3 = vld [vmem:[#allocation13 + $0x1cc] ss:$16 sps:$4 sm:$0xff]  }
 0x1dc   : > { %1429 = vmatpush1.bf16.msra.mxu0 %v15921_v4  ;;  %1511 = vmatpush1.bf16.msra.mxu1 %v15924_v5  ;;  %v16011_v4 = vld [vmem:[#allocation13 + $0x1c0] ss:$16 sps:$4 sm:$0xff]   ;;  %v16014_v5 = vld [vmem:[#allocation13 + $0x1c8] ss:$16 sps:$4 sm:$0xff]  }
 0x1dd   : > { %2293 = vmatprep.subr.bf16.mxu0 %v15929_v7  ;;  %2375 = vmatprep.subr.bf16.mxu1 %v15932_v8  ;;  %v16022_v7 = vld [vmem:[#allocation13 + $0x1ec] ss:$16 sps:$4 sm:$0xff]   ;;  %v16017_v8 = vld [vmem:[#allocation13 + $0x1e0] ss:$16 sps:$4 sm:$0xff]  }
 0x1df   : > { %1431 = vmatmul.mubr.bf16.vlgmr.msra.gmra.mrb[0].mxu0 %v587_v9  ;;  %1513 = vmatmul.mubr.bf16.vlgmr.msra.gmra.mrb[0].mxu1 %v587_v9  ;;  %v16020_v9 = vld [vmem:[#allocation13 + $0x1e8] ss:$16 sps:$4 sm:$0xff]  }
 0x1e0   : > { %2294 = vmatpush1.bf16.msra.mxu0 %v15927_v10  ;;  %2376 = vmatpush1.bf16.msra.mxu1 %v15930_v11  ;;  %v575_v10 = vld [vmem:[%s17424_s22] sm:$0xff] }
 0x1e1   : > { %2295 = vmatprep.subr.bf16.mxu0 %v15935_v12  ;;  %2377 = vmatprep.subr.bf16.mxu1 %v15938_v13  ;;  %v16025_v11 = vld [vmem:[#allocation13 + $0x204] ss:$16 sps:$4 sm:$0xff]   ;;  %v16028_v12 = vld [vmem:[#allocation13 + $0x20c] ss:$16 sps:$4 sm:$0xff]  }
 0x1e2   : > { %2325 = vmatprep.mubr.bf16.mxu0 %v1522_v15  ;;  %2407 = vmatprep.mubr.bf16.mxu1 %v1522_v15  ;;  %v578_v13 = vld [vmem:[%s17424_s22 + $0x18] sm:$0xff] }
 0x1e3   : > { %v16026_v15 = vld [vmem:[#allocation13 + $0x208] ss:$16 sps:$4 sm:$0xff]  }
 0x1e4   : > { %2296 = vmatpush1.bf16.msra.mxu0 %v15933_v16  ;;  %2378 = vmatpush1.bf16.msra.mxu1 %v15936_v17  ;;  %v1521_v16 = vpack.c.bf16 %v575_v10, %v575_v10  ;;  %v16031_v17 = vld [vmem:[#allocation13 + $0x224] ss:$16 sps:$4 sm:$0xff]   ;;  %v16107_v10 = vld [vmem:[#allocation13 + $0x3c0] ss:$16 sps:$4 sm:$0xff]  }
 0x1e5   : > { %2297 = vmatprep.subr.bf16.mxu0 %v15941_v18  ;;  %2379 = vmatprep.subr.bf16.mxu1 %v15944_v19  ;;  %v16034_v18 = vld [vmem:[#allocation13 + $0x22c] ss:$16 sps:$4 sm:$0xff]   ;;  %v16029_v19 = vld [vmem:[#allocation13 + $0x220] ss:$16 sps:$4 sm:$0xff]  }
 0x1e8   : > { %2298 = vmatpush1.bf16.msra.mxu0 %v15939_v20  ;;  %2380 = vmatpush1.bf16.msra.mxu1 %v15942_v21  ;;  %v16032_v20 = vld [vmem:[#allocation13 + $0x228] ss:$16 sps:$4 sm:$0xff]   ;;  %v1524_v21 = vpack.c.bf16 %v578_v13, %v578_v13  ;;  %v16118_v13 = vld [vmem:[#allocation13 + $0x3ec] ss:$16 sps:$4 sm:$0xff]  }
 0x1e9   : > { %2299 = vmatprep.subr.bf16.mxu0 %v15947_v22  ;;  %2381 = vmatprep.subr.bf16.mxu1 %v15950_v23  ;;  %v16037_v22 = vld [vmem:[#allocation13 + $0x244] ss:$16 sps:$4 sm:$0xff]   ;;  %v16040_v23 = vld [vmem:[#allocation13 + $0x24c] ss:$16 sps:$4 sm:$0xff]  }
 0x1ec   : > { %2300 = vmatpush1.bf16.msra.mxu0 %v15945_v24  ;;  %2382 = vmatpush1.bf16.msra.mxu1 %v15948_v25  ;;  %v16035_v24 = vld [vmem:[#allocation13 + $0x240] ss:$16 sps:$4 sm:$0xff]   ;;  %v16038_v25 = vld [vmem:[#allocation13 + $0x248] ss:$16 sps:$4 sm:$0xff]  }
 0x1ed   : > { %2301 = vmatprep.subr.bf16.mxu0 %v15953_v26  ;;  %2383 = vmatprep.subr.bf16.mxu1 %v15956_v27  ;;  %v16043_v26 = vld [vmem:[#allocation13 + $0x264] ss:$16 sps:$4 sm:$0xff]   ;;  %v16046_v27 = vld [vmem:[#allocation13 + $0x26c] ss:$16 sps:$4 sm:$0xff]  }
 0x1f0   : > { %2302 = vmatpush1.bf16.msra.mxu0 %v15951_v28  ;;  %2384 = vmatpush1.bf16.msra.mxu1 %v15954_v29  ;;  %v16041_v28 = vld [vmem:[#allocation13 + $0x260] ss:$16 sps:$4 sm:$0xff]   ;;  %v16044_v29 = vld [vmem:[#allocation13 + $0x268] ss:$16 sps:$4 sm:$0xff]  }
 0x1f1   : > { %2303 = vmatprep.subr.bf16.mxu0 %v15959_v30  ;;  %2385 = vmatprep.subr.bf16.mxu1 %v15962_v31  ;;  %v16049_v30 = vld [vmem:[#allocation13 + $0x284] ss:$16 sps:$4 sm:$0xff]   ;;  %v16052_v31 = vld [vmem:[#allocation13 + $0x28c] ss:$16 sps:$4 sm:$0xff]  }
 0x1f4   : > { %2304 = vmatpush1.bf16.msra.mxu0 %v15957_v32  ;;  %2386 = vmatpush1.bf16.msra.mxu1 %v15960_v33  ;;  %v16047_v32 = vld [vmem:[#allocation13 + $0x280] ss:$16 sps:$4 sm:$0xff]   ;;  %v16050_v33 = vld [vmem:[#allocation13 + $0x288] ss:$16 sps:$4 sm:$0xff]  }
 0x1f5   : > { %2305 = vmatprep.subr.bf16.mxu0 %v15965_v34  ;;  %2387 = vmatprep.subr.bf16.mxu1 %v15968_v35  ;;  %v16055_v34 = vld [vmem:[#allocation13 + $0x2a4] ss:$16 sps:$4 sm:$0xff]   ;;  %v16058_v35 = vld [vmem:[#allocation13 + $0x2ac] ss:$16 sps:$4 sm:$0xff]  }
 0x1f8   : > { %2306 = vmatpush1.bf16.msra.mxu0 %v15963_v36  ;;  %2388 = vmatpush1.bf16.msra.mxu1 %v15966_v37  ;;  %v16053_v36 = vld [vmem:[#allocation13 + $0x2a0] ss:$16 sps:$4 sm:$0xff]   ;;  %v16056_v37 = vld [vmem:[#allocation13 + $0x2a8] ss:$16 sps:$4 sm:$0xff]  }
 0x1f9   : > { %2307 = vmatprep.subr.bf16.mxu0 %v15971_v38  ;;  %2389 = vmatprep.subr.bf16.mxu1 %v15974_v39  ;;  %v16061_v38 = vld [vmem:[#allocation13 + $0x2c4] ss:$16 sps:$4 sm:$0xff]   ;;  %v16064_v39 = vld [vmem:[#allocation13 + $0x2cc] ss:$16 sps:$4 sm:$0xff]  }
 0x1fc   : > { %2308 = vmatpush1.bf16.msra.mxu0 %v15969_v40  ;;  %2390 = vmatpush1.bf16.msra.mxu1 %v15972_v41  ;;  %v16059_v40 = vld [vmem:[#allocation13 + $0x2c0] ss:$16 sps:$4 sm:$0xff]   ;;  %v16062_v41 = vld [vmem:[#allocation13 + $0x2c8] ss:$16 sps:$4 sm:$0xff]  }
 0x1fd   : > { %2309 = vmatprep.subr.bf16.mxu0 %v15977_v42  ;;  %2391 = vmatprep.subr.bf16.mxu1 %v15980_v43  ;;  %v16067_v42 = vld [vmem:[#allocation13 + $0x2e4] ss:$16 sps:$4 sm:$0xff]   ;;  %v16070_v43 = vld [vmem:[#allocation13 + $0x2ec] ss:$16 sps:$4 sm:$0xff]  }
 0x200   : > { %2310 = vmatpush1.bf16.msra.mxu0 %v15975_v44  ;;  %2392 = vmatpush1.bf16.msra.mxu1 %v15978_v45  ;;  %v16065_v44 = vld [vmem:[#allocation13 + $0x2e0] ss:$16 sps:$4 sm:$0xff]   ;;  %v16068_v45 = vld [vmem:[#allocation13 + $0x2e8] ss:$16 sps:$4 sm:$0xff]  }
 0x201   : > { %2311 = vmatprep.subr.bf16.mxu0 %v15983_v46  ;;  %2393 = vmatprep.subr.bf16.mxu1 %v15986_v47  ;;  %v16073_v46 = vld [vmem:[#allocation13 + $0x304] ss:$16 sps:$4 sm:$0xff]   ;;  %v16076_v47 = vld [vmem:[#allocation13 + $0x30c] ss:$16 sps:$4 sm:$0xff]  }
 0x204   : > { %2312 = vmatpush1.bf16.msra.mxu0 %v15981_v48  ;;  %2394 = vmatpush1.bf16.msra.mxu1 %v15984_v49  ;;  %v16071_v48 = vld [vmem:[#allocation13 + $0x300] ss:$16 sps:$4 sm:$0xff]   ;;  %v16074_v49 = vld [vmem:[#allocation13 + $0x308] ss:$16 sps:$4 sm:$0xff]  }
 0x205   : > { %2313 = vmatprep.subr.bf16.mxu0 %v15989_v50  ;;  %2395 = vmatprep.subr.bf16.mxu1 %v15992_v51  ;;  %v16079_v50 = vld [vmem:[#allocation13 + $0x324] ss:$16 sps:$4 sm:$0xff]   ;;  %v16082_v51 = vld [vmem:[#allocation13 + $0x32c] ss:$16 sps:$4 sm:$0xff]  }
 0x208   : > { %2314 = vmatpush1.bf16.msra.mxu0 %v15987_v52  ;;  %2396 = vmatpush1.bf16.msra.mxu1 %v15990_v53  ;;  %v16077_v52 = vld [vmem:[#allocation13 + $0x320] ss:$16 sps:$4 sm:$0xff]   ;;  %v16080_v53 = vld [vmem:[#allocation13 + $0x328] ss:$16 sps:$4 sm:$0xff]  }
 0x209   : > { %2315 = vmatprep.subr.bf16.mxu0 %v15995_v54  ;;  %2397 = vmatprep.subr.bf16.mxu1 %v15998_v55  ;;  %v16085_v54 = vld [vmem:[#allocation13 + $0x344] ss:$16 sps:$4 sm:$0xff]   ;;  %v16088_v55 = vld [vmem:[#allocation13 + $0x34c] ss:$16 sps:$4 sm:$0xff]  }
 0x20c   : > { %2316 = vmatpush1.bf16.msra.mxu0 %v15993_v56  ;;  %2398 = vmatpush1.bf16.msra.mxu1 %v15996_v57  ;;  %v16083_v56 = vld [vmem:[#allocation13 + $0x340] ss:$16 sps:$4 sm:$0xff]   ;;  %v16086_v57 = vld [vmem:[#allocation13 + $0x348] ss:$16 sps:$4 sm:$0xff]  }
 0x20d   : > { %2317 = vmatprep.subr.bf16.mxu0 %v16001_v58  ;;  %2399 = vmatprep.subr.bf16.mxu1 %v16004_v59  ;;  %v583_v58 = vld [vmem:[%s17433_s25] sm:$0xff] }
 0x20e   : > { %v16091_v59 = vld [vmem:[#allocation13 + $0x364] ss:$16 sps:$4 sm:$0xff]  }
 0x210   : > { %2318 = vmatpush1.bf16.msra.mxu0 %v15999_v60  ;;  %2400 = vmatpush1.bf16.msra.mxu1 %v16002_v61  ;;  %v16094_v60 = vld [vmem:[#allocation13 + $0x36c] ss:$16 sps:$4 sm:$0xff]   ;;  %v19783_v61 = vmov 0  }
 0x211   : > { %2319 = vmatprep.subr.bf16.mxu0 %v16007_v62  ;;  %2401 = vmatprep.subr.bf16.mxu1 %v16010_v63  ;;  %v16089_v62 = vld [vmem:[#allocation13 + $0x360] ss:$16 sps:$4 sm:$0xff]   ;;  %v16092_v63 = vld [vmem:[#allocation13 + $0x368] ss:$16 sps:$4 sm:$0xff]  }
 0x212   : > { %15734 = vset.pattern.permute.xlu0 %v19783_v61 }
 0x213   : > { %3395 = vperm.xlu0 %15734, %v583_v58  }
 0x214   : > { %2320 = vmatpush1.bf16.msra.mxu0 %v16005_v0  ;;  %2402 = vmatpush1.bf16.msra.mxu1 %v16008_v1  ;;  %v16097_v0 = vld [vmem:[#allocation13 + $0x384] ss:$16 sps:$4 sm:$0xff]   ;;  %v16100_v1 = vld [vmem:[#allocation13 + $0x38c] ss:$16 sps:$4 sm:$0xff]  }
 0x215   : > { %2321 = vmatprep.subr.bf16.mxu0 %v16013_v2  ;;  %2403 = vmatprep.subr.bf16.mxu1 %v16016_v3  ;;  %v16095_v2 = vld [vmem:[#allocation13 + $0x380] ss:$16 sps:$4 sm:$0xff]   ;;  %v16098_v3 = vld [vmem:[#allocation13 + $0x388] ss:$16 sps:$4 sm:$0xff]  }
 0x218   : > { %2322 = vmatpush1.bf16.msra.mxu0 %v16011_v4  ;;  %2404 = vmatpush1.bf16.msra.mxu1 %v16014_v5  ;;  %v16103_v4 = vld [vmem:[#allocation13 + $0x3a4] ss:$16 sps:$4 sm:$0xff]   ;;  %v16106_v5 = vld [vmem:[#allocation13 + $0x3ac] ss:$16 sps:$4 sm:$0xff]  }
 0x219   : > { %2323 = vmatprep.subr.bf16.mxu0 %v16019_v6  ;;  %2405 = vmatprep.subr.bf16.mxu1 %v16022_v7  ;;  %v16101_v6 = vld [vmem:[#allocation13 + $0x3a0] ss:$16 sps:$4 sm:$0xff]   ;;  %v16104_v7 = vld [vmem:[#allocation13 + $0x3a8] ss:$16 sps:$4 sm:$0xff]  }
 0x21c   : > { %2324 = vmatpush1.bf16.msra.mxu0 %v16017_v8  ;;  %2406 = vmatpush1.bf16.msra.mxu1 %v16020_v9  ;;  %v16109_v8 = vld [vmem:[#allocation13 + $0x3c4] ss:$16 sps:$4 sm:$0xff]   ;;  %v16112_v9 = vld [vmem:[#allocation13 + $0x3cc] ss:$16 sps:$4 sm:$0xff]  }
 0x21d   : > { %2334 = vmatprep.subr.bf16.mxu0 %v16025_v11  ;;  %2416 = vmatprep.subr.bf16.mxu1 %v16028_v12  ;;  %v16110_v11 = vld [vmem:[#allocation13 + $0x3c8] ss:$16 sps:$4 sm:$0xff]   ;;  %v16115_v12 = vld [vmem:[#allocation13 + $0x3e4] ss:$16 sps:$4 sm:$0xff]  }
 0x21f   : > { %2326 = vmatmul.mubr.bf16.vlgmr.msra.gmra.mrb[4].mxu0 %v1521_v16  ;;  %2408 = vmatmul.mubr.bf16.vlgmr.msra.gmra.mrb[4].mxu1 %v1521_v16  ;;  %v577_v16 = vld [vmem:[%s17424_s22 + $0x10] sm:$0xff]  ;;  %s16941_s22 = smov [#allocation17]  }
 0x220   : > { %2335 = vmatpush1.bf16.msra.mxu0 %v16023_v14  ;;  %2417 = vmatpush1.bf16.msra.mxu1 %v16026_v15  ;;  %v16113_v14 = vld [vmem:[#allocation13 + $0x3e0] ss:$16 sps:$4 sm:$0xff]   ;;  %v16116_v15 = vld [vmem:[#allocation13 + $0x3e8] ss:$16 sps:$4 sm:$0xff]   ;;  %s16785_s9 = sshll.u32 %s16941_s22, 4  ;;  %s16786_s9 = int_to_ptr.vmem [resolvable:$false] %s16785_s9 }
 0x221   : > { %2336 = vmatprep.subr.bf16.mxu0 %v16031_v17  ;;  %2418 = vmatprep.subr.bf16.mxu1 %v16034_v18  ;;  %v1523_v17 = vpack.c.bf16 %v577_v16, %v577_v16  ;;  %v16937_v18 = vmov 1983009808   ;;  %p16788_p5 = scmp.lt.s32.totalorder %s19667_s15, %s16786_s9 }
 0x222   : > { %2366 = vmatprep.mubr.bf16.mxu0 %v1524_v21  ;;  %2448 = vmatprep.mubr.bf16.mxu1 %v1524_v21 }
 0x224   : > { %2337 = vmatpush1.bf16.msra.mxu0 %v16029_v19  ;;  %2419 = vmatpush1.bf16.msra.mxu1 %v16032_v20  ;;  %v3414_v19 = vunpack.c.l.s4 %v16937_v18  ;;  %v3416_v20 = vlaneseq }
 0x225   : > { %2338 = vmatprep.subr.bf16.mxu0 %v16037_v22  ;;  %2420 = vmatprep.subr.bf16.mxu1 %v16040_v23  ;;  %v16938_v23 = vmov 1934713408  }
 0x226   : > { %v3415_v21 = vunpack.c.0.s8 %v3414_v19  ;;  %v3417_v22 = vshrl.u32 %v3416_v20, 7  ;;  %v16119_v20 = vld [vmem:[#allocation14] ss:$16 sps:$4 sm:$0xff]  }
 0x228   : > { %2339 = vmatpush1.bf16.msra.mxu0 %v16035_v24  ;;  %2421 = vmatpush1.bf16.msra.mxu1 %v16038_v25  ;;  %v3446_v24 = vunpack.c.l.s4 %v16938_v23  ;;  %v16124_v23 = vld [vmem:[#allocation14 + $0xc] ss:$16 sps:$4 sm:$0xff]  }
 0x229   : > { %2340 = vmatprep.subr.bf16.mxu0 %v16043_v26  ;;  %2422 = vmatprep.subr.bf16.mxu1 %v16046_v27 }
 0x22c   : > { %2341 = vmatpush1.bf16.msra.mxu0 %v16041_v28  ;;  %2423 = vmatpush1.bf16.msra.mxu1 %v16044_v29  ;;  %v17463_v29 = vsub.s32 %v3415_v21, %v3417_v22  ;;  %v16121_v21 = vld [vmem:[#allocation14 + $0x4] ss:$16 sps:$4 sm:$0xff]  }
 0x22d   : > { %2342 = vmatprep.subr.bf16.mxu0 %v16049_v30  ;;  %2424 = vmatprep.subr.bf16.mxu1 %v16052_v31 }
 0x230   : > { %2343 = vmatpush1.bf16.msra.mxu0 %v16047_v32  ;;  %2425 = vmatpush1.bf16.msra.mxu1 %v16050_v33 }
 0x231   : > { %2344 = vmatprep.subr.bf16.mxu0 %v16055_v34  ;;  %2426 = vmatprep.subr.bf16.mxu1 %v16058_v35  ;;  %v3447_v34 = vunpack.c.0.s8 %v3446_v24  ;;  %v16127_v24 = vld [vmem:[#allocation14 + $0x24] ss:$16 sps:$4 sm:$0xff]  }
 0x234   : > { %2345 = vmatpush1.bf16.msra.mxu0 %v16053_v36  ;;  %2427 = vmatpush1.bf16.msra.mxu1 %v16056_v37 }
 0x235   : > { %2346 = vmatprep.subr.bf16.mxu0 %v16061_v38  ;;  %2428 = vmatprep.subr.bf16.mxu1 %v16064_v39 }
 0x238   : > { %2347 = vmatpush1.bf16.msra.mxu0 %v16059_v40  ;;  %2429 = vmatpush1.bf16.msra.mxu1 %v16062_v41 }
 0x239   : > { %2348 = vmatprep.subr.bf16.mxu0 %v16067_v42  ;;  %2430 = vmatprep.subr.bf16.mxu1 %v16070_v43 }
 0x23c   : > { %2349 = vmatpush1.bf16.msra.mxu0 %v16065_v44  ;;  %2431 = vmatpush1.bf16.msra.mxu1 %v16068_v45 }
 0x23d   : > { %2350 = vmatprep.subr.bf16.mxu0 %v16073_v46  ;;  %2432 = vmatprep.subr.bf16.mxu1 %v16076_v47  ;;  %v17469_v47 = vsub.s32 %v3447_v34, %v3417_v22  ;;  %v16122_v22 = vld [vmem:[#allocation14 + $0x8] ss:$16 sps:$4 sm:$0xff]   ;;  %v16139_v34 = vld [vmem:[#allocation14 + $0x64] ss:$16 sps:$4 sm:$0xff]  }
 0x240   : > { %2351 = vmatpush1.bf16.msra.mxu0 %v16071_v48  ;;  %2433 = vmatpush1.bf16.msra.mxu1 %v16074_v49 }
 0x241   : > { %2352 = vmatprep.subr.bf16.mxu0 %v16079_v50  ;;  %2434 = vmatprep.subr.bf16.mxu1 %v16082_v51 }
 0x244   : > { %2353 = vmatpush1.bf16.msra.mxu0 %v16077_v52  ;;  %2435 = vmatpush1.bf16.msra.mxu1 %v16080_v53 }
 0x245   : > { %2354 = vmatprep.subr.bf16.mxu0 %v16085_v54  ;;  %2436 = vmatprep.subr.bf16.mxu1 %v16088_v55 }
 0x248   : > { %2355 = vmatpush1.bf16.msra.mxu0 %v16083_v56  ;;  %2437 = vmatpush1.bf16.msra.mxu1 %v16086_v57  ;;  %v19781_v56 = vmov 0.0  }
 0x249   : > { %2356 = vmatprep.subr.bf16.mxu0 %v16091_v59  ;;  %2438 = vmatprep.subr.bf16.mxu1 %v16094_v60 }
 0x24c   : > { %2357 = vmatpush1.bf16.msra.mxu0 %v16089_v62  ;;  %2439 = vmatpush1.bf16.msra.mxu1 %v16092_v63 }
 0x24d   : > { %2358 = vmatprep.subr.bf16.mxu0 %v16097_v0  ;;  %2440 = vmatprep.subr.bf16.mxu1 %v16100_v1 }
 0x250   : > { %2359 = vmatpush1.bf16.msra.mxu0 %v16095_v2  ;;  %2441 = vmatpush1.bf16.msra.mxu1 %v16098_v3 }
 0x251   : > { %2360 = vmatprep.subr.bf16.mxu0 %v16103_v4  ;;  %2442 = vmatprep.subr.bf16.mxu1 %v16106_v5 }
 0x254   : > { %2361 = vmatpush1.bf16.msra.mxu0 %v16101_v6  ;;  %2443 = vmatpush1.bf16.msra.mxu1 %v16104_v7 }
 0x255   : > { %2362 = vmatprep.subr.bf16.mxu0 %v16109_v8  ;;  %2444 = vmatprep.subr.bf16.mxu1 %v16112_v9 }
 0x258   : > { %2363 = vmatpush1.bf16.msra.mxu0 %v16107_v10  ;;  %2445 = vmatpush1.bf16.msra.mxu1 %v16110_v11 }
 0x259   : > { %2364 = vmatprep.subr.bf16.mxu0 %v16115_v12  ;;  %2446 = vmatprep.subr.bf16.mxu1 %v16118_v13 }
 0x25c   : > { %2365 = vmatpush1.bf16.msra.mxu0 %v16113_v14  ;;  %2447 = vmatpush1.bf16.msra.mxu1 %v16116_v15 }
 0x25d   : > { %3229 = vmatprep.subr.bf16.mxu0 %v16121_v21  ;;  %3311 = vmatprep.subr.bf16.mxu1 %v16124_v23  ;;  %v16202_v21 = vld [vmem:[#allocation14 + $0x1ac] ss:$16 sps:$4 sm:$0xff]   ;;  %v16200_v23 = vld [vmem:[#allocation14 + $0x1a8] ss:$16 sps:$4 sm:$0xff]  }
 0x25f   : > { %2367 = vmatmul.mubr.bf16.vlgmr.msra.gmra.mrb[4].mxu0 %v1523_v17  ;;  %2449 = vmatmul.mubr.bf16.vlgmr.msra.gmra.mrb[4].mxu1 %v1523_v17 }
 0x260   : > { %3230 = vmatpush1.bf16.msra.mxu0 %v16119_v20  ;;  %3312 = vmatpush1.bf16.msra.mxu1 %v16122_v22  ;;  %v16199_v20 = vld [vmem:[#allocation14 + $0x1a4] ss:$16 sps:$4 sm:$0xff]   ;;  %v16197_v22 = vld [vmem:[#allocation14 + $0x1a0] ss:$16 sps:$4 sm:$0xff]  }
 0x261   : > { %3231 = vmatprep.subr.bf16.mxu0 %v16127_v24  ;;  %v16203_v24 = vld [vmem:[#allocation14 + $0x1c0] ss:$16 sps:$4 sm:$0xff]  }
 0x2b2   : > { %v1432_v25 = vpop.f32.mrb[0].mxu0  ;;  %v1514_v26 = vpop.f32.mrb[0].mxu1 }
 0x2b3   : > { %v3407_v27 = vmul.f32 0.088388346, %v1432_v25  ;;  %v3409_v28 = vmul.f32 0.088388346, %v1514_v26  ;;  %v1434_v30 = vpop.f32.mrb[1].mxu0  ;;  %v1516_v31 = vpop.f32.mrb[1].mxu1 }
 0x2b4   : > { %v3408_v32 = vmul.f32 0.088388346, %v1434_v30  ;;  %v3410_v33 = vmul.f32 0.088388346, %v1516_v31  ;;  %v1436_v35 = vpop.f32.mrb[2].mxu0  ;;  %v1518_v36 = vpop.f32.mrb[2].mxu1 }
 0x2b5   : > { %v3411_v37 = vcombine.low %v3407_v27, %v3409_v28  ;;  %v3412_v38 = vcombine.high %v3407_v27, %v3409_v28  ;;  %v1437_v39 = vpop.f32.mrb[3].mxu0  ;;  %v1519_v40 = vpop.f32.mrb[3].mxu1  ;;  %v16130_v25 = vld [vmem:[#allocation14 + $0x2c] ss:$16 sps:$4 sm:$0xff]   ;;  %v16125_v26 = vld [vmem:[#allocation14 + $0x20] ss:$16 sps:$4 sm:$0xff]  }
 0x2b6   : > { %v3427_v41 = vcombine.low %v3408_v32, %v3410_v33  ;;  %v3428_v42 = vcombine.high %v3408_v32, %v3410_v33  ;;  %v16128_v27 = vld [vmem:[#allocation14 + $0x28] ss:$16 sps:$4 sm:$0xff]   ;;  %v16133_v28 = vld [vmem:[#allocation14 + $0x44] ss:$16 sps:$4 sm:$0xff]   ;;  %3313 = vmatprep.subr.bf16.mxu1 %v16130_v25  ;;  %v16136_v30 = vld [vmem:[#allocation14 + $0x4c] ss:$16 sps:$4 sm:$0xff]   ;;  %3232 = vmatpush1.bf16.msra.mxu0 %v16125_v26 }
 0x2b7   : > { %v3419_v43 = vrot.slane %v3411_v37, %v17463_v29  ;;  %v3426_v44 = vrot.slane %v3412_v38, %v17463_v29  ;;  %v16131_v31 = vld [vmem:[#allocation14 + $0x40] ss:$16 sps:$4 sm:$0xff]   ;;  %3314 = vmatpush1.bf16.msra.mxu1 %v16128_v27  ;;  %3233 = vmatprep.subr.bf16.mxu0 %v16133_v28  ;;  %v16134_v32 = vld [vmem:[#allocation14 + $0x48] ss:$16 sps:$4 sm:$0xff]   ;;  %v16142_v36 = vld [vmem:[#allocation14 + $0x6c] ss:$16 sps:$4 sm:$0xff]  }
 0x2b8   : > { %v3435_v45 = vrot.slane %v3427_v41, %v17463_v29  ;;  %v3442_v46 = vrot.slane %v3428_v42, %v17463_v29  ;;  %3315 = vmatprep.subr.bf16.mxu1 %v16136_v30  ;;  %v16137_v33 = vld [vmem:[#allocation14 + $0x60] ss:$16 sps:$4 sm:$0xff]   ;;  %v16140_v35 = vld [vmem:[#allocation14 + $0x68] ss:$16 sps:$4 sm:$0xff]   ;;  %v16145_v37 = vld [vmem:[#allocation14 + $0x84] ss:$16 sps:$4 sm:$0xff]  }
 0x2b9   : > { %v16148_v38 = vld [vmem:[#allocation14 + $0x8c] ss:$16 sps:$4 sm:$0xff]   ;;  %v16143_v39 = vld [vmem:[#allocation14 + $0x80] ss:$16 sps:$4 sm:$0xff]   ;;  %v16146_v40 = vld [vmem:[#allocation14 + $0x88] ss:$16 sps:$4 sm:$0xff]  }
 0x2ba   : > { %v3443_v48 = vcombine.low %v3419_v43, %v3435_v45  ;;  %v3444_v49 = vcombine.high %v3419_v43, %v3435_v45  ;;  %v3459_v50 = vcombine.low %v3426_v44, %v3442_v46  ;;  %v3460_v51 = vcombine.high %v3426_v44, %v3442_v46  ;;  %3234 = vmatpush1.bf16.msra.mxu0 %v16131_v31  ;;  %v16151_v41 = vld [vmem:[#allocation14 + $0xa4] ss:$16 sps:$4 sm:$0xff]   ;;  %v16154_v42 = vld [vmem:[#allocation14 + $0xac] ss:$16 sps:$4 sm:$0xff]   ;;  %v16149_v43 = vld [vmem:[#allocation14 + $0xa0] ss:$16 sps:$4 sm:$0xff]  }
 0x2bb   : > { %3316 = vmatpush1.bf16.msra.mxu1 %v16134_v32  ;;  %3235 = vmatprep.subr.bf16.mxu0 %v16139_v34  ;;  %v16152_v44 = vld [vmem:[#allocation14 + $0xa8] ss:$16 sps:$4 sm:$0xff]   ;;  %v16157_v45 = vld [vmem:[#allocation14 + $0xc4] ss:$16 sps:$4 sm:$0xff]   ;;  %v16160_v46 = vld [vmem:[#allocation14 + $0xcc] ss:$16 sps:$4 sm:$0xff]  }
 0x2bc   : > { %v3451_v52 = vrot.slane %v3443_v48, %v17469_v47  ;;  %v3458_v53 = vrot.slane %v3444_v49, %v17469_v47  ;;  %v3467_v54 = vrot.slane %v3459_v50, %v17469_v47  ;;  %v3474_v55 = vrot.slane %v3460_v51, %v17469_v47  ;;  %3317 = vmatprep.subr.bf16.mxu1 %v16142_v36  ;;  %v16155_v48 = vld [vmem:[#allocation14 + $0xc0] ss:$16 sps:$4 sm:$0xff]   ;;  %v16158_v49 = vld [vmem:[#allocation14 + $0xc8] ss:$16 sps:$4 sm:$0xff]   ;;  %v16163_v50 = vld [vmem:[#allocation14 + $0xe4] ss:$16 sps:$4 sm:$0xff]  }
 0x2bd   : > { %v16166_v51 = vld [vmem:[#allocation14 + $0xec] ss:$16 sps:$4 sm:$0xff]   ;;  %v16205_v25 = vld [vmem:[#allocation14 + $0x1c4] ss:$16 sps:$4 sm:$0xff]   ;;  %v16206_v26 = vld [vmem:[#allocation14 + $0x1c8] ss:$16 sps:$4 sm:$0xff]  }
 0x2be   : > { %v3475_v57 = vcombine.high %v3451_v52, %v19781_v56  ;;  %v3476_v58 = vcombine.high %v3458_v53, %v19781_v56  ;;  %v3477_v59 = vcombine.high %v3467_v54, %v19781_v56  ;;  %v3478_v60 = vcombine.high %v3474_v55, %v19781_v56  ;;  %3236 = vmatpush1.bf16.msra.mxu0 %v16137_v33  ;;  %v16208_v27 = vld [vmem:[#allocation14 + $0x1cc] ss:$16 sps:$4 sm:$0xff]   ;;  %v16209_v28 = vld [vmem:[#allocation14 + $0x1e0] ss:$16 sps:$4 sm:$0xff]   ;;  %v16211_v30 = vld [vmem:[#allocation14 + $0x1e4] ss:$16 sps:$4 sm:$0xff]  }
 0x2bf   : > { %v15130_v62 = vpack.c.bf16 %v3467_v54, %v3451_v52  ;;  %v15131_v63 = vpack.c.bf16 %v3474_v55, %v3458_v53  ;;  %3318 = vmatpush1.bf16.msra.mxu1 %v16140_v35  ;;  %3237 = vmatprep.subr.bf16.mxu0 %v16145_v37  ;;  %v16161_v52 = vld [vmem:[#allocation14 + $0xe0] ss:$16 sps:$4 sm:$0xff]   ;;  %v16164_v53 = vld [vmem:[#allocation14 + $0xe8] ss:$16 sps:$4 sm:$0xff]   ;;  %v16169_v54 = vld [vmem:[#allocation14 + $0x104] ss:$16 sps:$4 sm:$0xff]  }
 0x2c0   : > { %v15132_v0 = vpack.c.bf16 %v3477_v59, %v3475_v57  ;;  %v15133_v1 = vpack.c.bf16 %v3478_v60, %v3476_v58  ;;  %3319 = vmatprep.subr.bf16.mxu1 %v16148_v38  ;;  %v16172_v55 = vld [vmem:[#allocation14 + $0x10c] ss:$16 sps:$4 sm:$0xff]   ;;  %v16167_v57 = vld [vmem:[#allocation14 + $0x100] ss:$16 sps:$4 sm:$0xff]   ;;  %v16170_v58 = vld [vmem:[#allocation14 + $0x108] ss:$16 sps:$4 sm:$0xff]  }
 0x2c1   : > { %v3638_v2 = vrot.slane %v15130_v62, %v17463_v29  ;;  %v3646_v3 = vrot.slane %v15131_v63, %v17463_v29  ;;  %v16175_v59 = vld [vmem:[#allocation14 + $0x124] ss:$16 sps:$4 sm:$0xff]   ;;  %v16178_v60 = vld [vmem:[#allocation14 + $0x12c] ss:$16 sps:$4 sm:$0xff]   ;;  %v16173_v62 = vld [vmem:[#allocation14 + $0x120] ss:$16 sps:$4 sm:$0xff]  }
 0x2c2   : > { %v3663_v4 = vrot.slane %v15132_v0, %v17463_v29  ;;  %v3671_v5 = vrot.slane %v15133_v1, %v17463_v29  ;;  %3238 = vmatpush1.bf16.msra.mxu0 %v16143_v39  ;;  %v16176_v63 = vld [vmem:[#allocation14 + $0x128] ss:$16 sps:$4 sm:$0xff]   ;;  %v16179_v0 = vld [vmem:[#allocation14 + $0x140] ss:$16 sps:$4 sm:$0xff]   ;;  %v16181_v1 = vld [vmem:[#allocation14 + $0x144] ss:$16 sps:$4 sm:$0xff]  }
 0x2c3   : > { %v3647_v6 = vcombine.low %v3638_v2, %v3646_v3  ;;  %3320 = vmatpush1.bf16.msra.mxu1 %v16146_v40  ;;  %3239 = vmatprep.subr.bf16.mxu0 %v16151_v41  ;;  %v16182_v2 = vld [vmem:[#allocation14 + $0x148] ss:$16 sps:$4 sm:$0xff]   ;;  %v16184_v3 = vld [vmem:[#allocation14 + $0x14c] ss:$16 sps:$4 sm:$0xff]   ;;  %v16215_v35 = vld [vmem:[#allocation14 + $0x200] ss:$16 sps:$4 sm:$0xff]  }
 0x2c4   : > { %v3672_v7 = vcombine.low %v3663_v4, %v3671_v5  ;;  %3321 = vmatprep.subr.bf16.mxu1 %v16154_v42  ;;  %v16187_v4 = vld [vmem:[#allocation14 + $0x164] ss:$16 sps:$4 sm:$0xff]   ;;  %v16190_v5 = vld [vmem:[#allocation14 + $0x16c] ss:$16 sps:$4 sm:$0xff]   ;;  %v16212_v31 = vld [vmem:[#allocation14 + $0x1e8] ss:$16 sps:$4 sm:$0xff]  }
 0x2c5   : > { %v17484_v8 = vrot.slane %v3647_v6, %v17469_v47  ;;  %v16185_v6 = vld [vmem:[#allocation14 + $0x160] ss:$16 sps:$4 sm:$0xff]   ;;  %v16214_v32 = vld [vmem:[#allocation14 + $0x1ec] ss:$16 sps:$4 sm:$0xff]   ;;  %v16217_v36 = vld [vmem:[#allocation14 + $0x204] ss:$16 sps:$4 sm:$0xff]  }
 0x2c6   : > { %v17487_v9 = vrot.slane %v3672_v7, %v17469_v47  ;;  %3240 = vmatpush1.bf16.msra.mxu0 %v16149_v43  ;;  %v16188_v7 = vld [vmem:[#allocation14 + $0x168] ss:$16 sps:$4 sm:$0xff]   ;;  %v16220_v38 = vld [vmem:[#allocation14 + $0x20c] ss:$16 sps:$4 sm:$0xff]   ;;  %v16221_v41 = vld [vmem:[#allocation14 + $0x220] ss:$16 sps:$4 sm:$0xff]  }
 0x2c7   : > { %19898 = vst [vmem:[#allocation40_spill] sm:$0xff] %v17484_v8  ;;  %v17491_v10 = vcombine.high %v17484_v8, %v19783_v61  ;;  %v3685_v12 = vshrl.u32 %v17484_v8, 16  ;;  %3322 = vmatpush1.bf16.msra.mxu1 %v16152_v44  ;;  %3241 = vmatprep.subr.bf16.mxu0 %v16157_v45  ;;  %v580_v33 = vld [vmem:[%s17431_s19 + $0x8] sm:$0xff]  ;;  %v579_v39 = vld [vmem:[%s17431_s19] sm:$0xff] }
 0x2c8   : > { %19899 = vst [vmem:[#allocation41_spill] sm:$0xff] %v17487_v9  ;;  %v3686_v13 = vshrl.u32 %v17487_v9, 16  ;;  %v17499_v14 = vcombine.high %v17487_v9, %v19783_v61  ;;  %3323 = vmatprep.subr.bf16.mxu1 %v16160_v46  ;;  %v2458_v34 = vpack.c.bf16 %v580_v33, %v580_v33  ;;  %v16218_v37 = vld [vmem:[#allocation14 + $0x208] ss:$16 sps:$4 sm:$0xff]   ;;  %v2457_v40 = vpack.c.bf16 %v579_v39, %v579_v39  ;;  %v16223_v42 = vld [vmem:[#allocation14 + $0x224] ss:$16 sps:$4 sm:$0xff]  }
 0x2c9   : > { %19900 = vst [vmem:[#allocation42_spill] sm:$0xff] %v17491_v10  ;;  %v3693_v17 = vshrl.u32 %v17491_v10, 16  ;;  %v16224_v45 = vld [vmem:[#allocation14 + $0x228] ss:$16 sps:$4 sm:$0xff]   ;;  %v16226_v46 = vld [vmem:[#allocation14 + $0x22c] ss:$16 sps:$4 sm:$0xff]  }
 0x2ca   : > { %19901 = vst [vmem:[#allocation43_spill] sm:$0xff] %v17499_v14  ;;  %v17501_v15 = vpack.i.b16 %v3686_v13, %v3685_v12  ;;  %v3694_v18 = vshrl.u32 %v17499_v14, 16  ;;  %3242 = vmatpush1.bf16.msra.mxu0 %v16155_v48  ;;  %v16193_v12 = vld [vmem:[#allocation14 + $0x184] ss:$16 sps:$4 sm:$0xff]   ;;  %v16196_v13 = vld [vmem:[#allocation14 + $0x18c] ss:$16 sps:$4 sm:$0xff]   ;;  %3261 = vmatprep.mubr.bf16.mxu0 %v2458_v34 }
 0x2cb   : > { %3324 = vmatpush1.bf16.msra.mxu1 %v16158_v49  ;;  %3243 = vmatprep.subr.bf16.mxu0 %v16163_v50  ;;  %v16253_v33 = vld [vmem:[#allocation14 + $0x2c4] ss:$16 sps:$4 sm:$0xff]   ;;  %v16257_v39 = vld [vmem:[#allocation14 + $0x2e0] ss:$16 sps:$4 sm:$0xff]  }
 0x2cc   : > { %19902 = vst [vmem:[#allocation44_spill] sm:$0xff] %v17501_v15  ;;  %v17507_v19 = vpack.i.b16 %v3694_v18, %v3693_v17  ;;  %3325 = vmatprep.subr.bf16.mxu1 %v16166_v51  ;;  %v16191_v17 = vld [vmem:[#allocation14 + $0x180] ss:$16 sps:$4 sm:$0xff]   ;;  %v16194_v18 = vld [vmem:[#allocation14 + $0x188] ss:$16 sps:$4 sm:$0xff]   ;;  %3343 = vmatprep.mubr.bf16.mxu1 %v2458_v34 }
 0x2cd   : > { %v16256_v34 = vld [vmem:[#allocation14 + $0x2cc] ss:$16 sps:$4 sm:$0xff]  }
 0x2ce   : > { %19903 = vst [vmem:[#allocation45_spill] sm:$0xff] %v17507_v19  ;;  %3244 = vmatpush1.bf16.msra.mxu0 %v16161_v52 }
 0x2cf   : > { %3326 = vmatpush1.bf16.msra.mxu1 %v16164_v53  ;;  %3245 = vmatprep.subr.bf16.mxu0 %v16169_v54 }
 0x2d0   : > { %3327 = vmatprep.subr.bf16.mxu1 %v16172_v55 }
 0x2d2   : > { %3246 = vmatpush1.bf16.msra.mxu0 %v16167_v57 }
 0x2d3   : > { %3328 = vmatpush1.bf16.msra.mxu1 %v16170_v58  ;;  %3247 = vmatprep.subr.bf16.mxu0 %v16175_v59 }
 0x2d4   : > { %3329 = vmatprep.subr.bf16.mxu1 %v16178_v60 }
 0x2d6   : > { %3248 = vmatpush1.bf16.msra.mxu0 %v16173_v62  ;;  %v16229_v62 = vld [vmem:[#allocation14 + $0x244] ss:$16 sps:$4 sm:$0xff]  }
 0x2d7   : > { %3330 = vmatpush1.bf16.msra.mxu1 %v16176_v63  ;;  %3249 = vmatprep.subr.bf16.mxu0 %v16181_v1  ;;  %v16227_v1 = vld [vmem:[#allocation14 + $0x240] ss:$16 sps:$4 sm:$0xff]  }
 0x2d8   : > { %3331 = vmatprep.subr.bf16.mxu1 %v16184_v3  ;;  %v16230_v3 = vld [vmem:[#allocation14 + $0x248] ss:$16 sps:$4 sm:$0xff]  }
 0x2da   : > { %3250 = vmatpush1.bf16.msra.mxu0 %v16179_v0 }
 0x2db   : > { %3332 = vmatpush1.bf16.msra.mxu1 %v16182_v2  ;;  %3251 = vmatprep.subr.bf16.mxu0 %v16187_v4  ;;  %v16232_v2 = vld [vmem:[#allocation14 + $0x24c] ss:$16 sps:$4 sm:$0xff]  }
 0x2dc   : > { %3333 = vmatprep.subr.bf16.mxu1 %v16190_v5 }
 0x2de   : > { %3252 = vmatpush1.bf16.msra.mxu0 %v16185_v6 }
 0x2df   : > { %3334 = vmatpush1.bf16.msra.mxu1 %v16188_v7  ;;  %3253 = vmatprep.subr.bf16.mxu0 %v16193_v12  ;;  %v16235_v12 = vld [vmem:[#allocation14 + $0x264] ss:$16 sps:$4 sm:$0xff]  }
 0x2e0   : > { %3335 = vmatprep.subr.bf16.mxu1 %v16196_v13 }
 0x2e2   : > { %3254 = vmatpush1.bf16.msra.mxu0 %v16191_v17 }
 0x2e3   : > { %3336 = vmatpush1.bf16.msra.mxu1 %v16194_v18  ;;  %3255 = vmatprep.subr.bf16.mxu0 %v16199_v20  ;;  %v16238_v18 = vld [vmem:[#allocation14 + $0x26c] ss:$16 sps:$4 sm:$0xff]   ;;  %v16233_v20 = vld [vmem:[#allocation14 + $0x260] ss:$16 sps:$4 sm:$0xff]  }
 0x2e4   : > { %3337 = vmatprep.subr.bf16.mxu1 %v16202_v21  ;;  %v16236_v21 = vld [vmem:[#allocation14 + $0x268] ss:$16 sps:$4 sm:$0xff]  }
 0x2e6   : > { %3256 = vmatpush1.bf16.msra.mxu0 %v16197_v22 }
 0x2e7   : > { %3338 = vmatpush1.bf16.msra.mxu1 %v16200_v23  ;;  %3257 = vmatprep.subr.bf16.mxu0 %v16205_v25  ;;  %v16244_v25 = vld [vmem:[#allocation14 + $0x28c] ss:$16 sps:$4 sm:$0xff]  }
 0x2e8   : > { %3339 = vmatprep.subr.bf16.mxu1 %v16208_v27  ;;  %v16242_v27 = vld [vmem:[#allocation14 + $0x288] ss:$16 sps:$4 sm:$0xff]  }
 0x2ea   : > { %3258 = vmatpush1.bf16.msra.mxu0 %v16203_v24  ;;  %v16241_v24 = vld [vmem:[#allocation14 + $0x284] ss:$16 sps:$4 sm:$0xff]  }
 0x2eb   : > { %3340 = vmatpush1.bf16.msra.mxu1 %v16206_v26  ;;  %3259 = vmatprep.subr.bf16.mxu0 %v16211_v30  ;;  %v16239_v26 = vld [vmem:[#allocation14 + $0x280] ss:$16 sps:$4 sm:$0xff]   ;;  %v16250_v30 = vld [vmem:[#allocation14 + $0x2ac] ss:$16 sps:$4 sm:$0xff]  }
 0x2ec   : > { %3341 = vmatprep.subr.bf16.mxu1 %v16214_v32  ;;  %v16248_v32 = vld [vmem:[#allocation14 + $0x2a8] ss:$16 sps:$4 sm:$0xff]  }
 0x2ee   : > { %3260 = vmatpush1.bf16.msra.mxu0 %v16209_v28  ;;  %v16247_v28 = vld [vmem:[#allocation14 + $0x2a4] ss:$16 sps:$4 sm:$0xff]  }
 0x2ef   : > { %3342 = vmatpush1.bf16.msra.mxu1 %v16212_v31  ;;  %3270 = vmatprep.subr.bf16.mxu0 %v16217_v36  ;;  %v16245_v31 = vld [vmem:[#allocation14 + $0x2a0] ss:$16 sps:$4 sm:$0xff]   ;;  %v16254_v36 = vld [vmem:[#allocation14 + $0x2c8] ss:$16 sps:$4 sm:$0xff]  }
 0x2f0   : > { %3352 = vmatprep.subr.bf16.mxu1 %v16220_v38  ;;  %v16262_v38 = vld [vmem:[#allocation14 + $0x2ec] ss:$16 sps:$4 sm:$0xff]  }
 0x2f1   : > { %3262 = vmatmul.mubr.bf16.vlgmr.msra.gmra.mrb[8].mxu0 %v2457_v40 }
 0x2f2   : > { %3344 = vmatmul.mubr.bf16.vlgmr.msra.gmra.mrb[8].mxu1 %v2457_v40  ;;  %3271 = vmatpush1.bf16.msra.mxu0 %v16215_v35  ;;  %v16251_v35 = vld [vmem:[#allocation14 + $0x2c0] ss:$16 sps:$4 sm:$0xff]   ;;  %v16260_v40 = vld [vmem:[#allocation14 + $0x2e8] ss:$16 sps:$4 sm:$0xff]  }
 0x2f3   : > { %3353 = vmatpush1.bf16.msra.mxu1 %v16218_v37  ;;  %3272 = vmatprep.subr.bf16.mxu0 %v16223_v42  ;;  %v16259_v37 = vld [vmem:[#allocation14 + $0x2e4] ss:$16 sps:$4 sm:$0xff]   ;;  %v16268_v42 = vld [vmem:[#allocation14 + $0x30c] ss:$16 sps:$4 sm:$0xff]  }
 0x2f4   : > { %3354 = vmatprep.subr.bf16.mxu1 %v16226_v46  ;;  %v16274_v46 = vld [vmem:[#allocation14 + $0x32c] ss:$16 sps:$4 sm:$0xff]  }
 0x2f6   : > { %3273 = vmatpush1.bf16.msra.mxu0 %v16221_v41  ;;  %v16265_v41 = vld [vmem:[#allocation14 + $0x304] ss:$16 sps:$4 sm:$0xff]  }
 0x2f7   : > { %3355 = vmatpush1.bf16.msra.mxu1 %v16224_v45  ;;  %3274 = vmatprep.subr.bf16.mxu0 %v16229_v62  ;;  %v16271_v45 = vld [vmem:[#allocation14 + $0x324] ss:$16 sps:$4 sm:$0xff]   ;;  %v16286_v62 = vld [vmem:[#allocation14 + $0x36c] ss:$16 sps:$4 sm:$0xff]  }
 0x2f8   : > { %3356 = vmatprep.subr.bf16.mxu1 %v16232_v2  ;;  %v16289_v2 = vld [vmem:[#allocation14 + $0x384] ss:$16 sps:$4 sm:$0xff]  }
 0x2fa   : > { %3275 = vmatpush1.bf16.msra.mxu0 %v16227_v1  ;;  %v16284_v1 = vld [vmem:[#allocation14 + $0x368] ss:$16 sps:$4 sm:$0xff]  }
 0x2fb   : > { %3357 = vmatpush1.bf16.msra.mxu1 %v16230_v3  ;;  %3276 = vmatprep.subr.bf16.mxu0 %v16235_v12  ;;  %v16292_v3 = vld [vmem:[#allocation14 + $0x38c] ss:$16 sps:$4 sm:$0xff]  }
 0x2fc   : > { %3358 = vmatprep.subr.bf16.mxu1 %v16238_v18  ;;  %v16298_v12 = vld [vmem:[#allocation14 + $0x3ac] ss:$16 sps:$4 sm:$0xff]   ;;  %v16296_v18 = vld [vmem:[#allocation14 + $0x3a8] ss:$16 sps:$4 sm:$0xff]  }
 0x2fe   : > { %3277 = vmatpush1.bf16.msra.mxu0 %v16233_v20  ;;  %v16301_v20 = vld [vmem:[#allocation14 + $0x3c4] ss:$16 sps:$4 sm:$0xff]  }
 0x2ff   : > { %3359 = vmatpush1.bf16.msra.mxu1 %v16236_v21  ;;  %3278 = vmatprep.subr.bf16.mxu0 %v16241_v24  ;;  %v16304_v21 = vld [vmem:[#allocation14 + $0x3cc] ss:$16 sps:$4 sm:$0xff]   ;;  %v16307_v24 = vld [vmem:[#allocation14 + $0x3e4] ss:$16 sps:$4 sm:$0xff]  }
 0x300   : > { %3360 = vmatprep.subr.bf16.mxu1 %v16244_v25  ;;  %v16310_v25 = vld [vmem:[#allocation14 + $0x3ec] ss:$16 sps:$4 sm:$0xff]  }
 0x302   : > { %3279 = vmatpush1.bf16.msra.mxu0 %v16239_v26  ;;  %v582_v26 = vld [vmem:[%s17431_s19 + $0x18] sm:$0xff] }
 0x303   : > { %3361 = vmatpush1.bf16.msra.mxu1 %v16242_v27  ;;  %3280 = vmatprep.subr.bf16.mxu0 %v16247_v28  ;;  %v16305_v27 = vld [vmem:[#allocation14 + $0x3e0] ss:$16 sps:$4 sm:$0xff]   ;;  %v16308_v28 = vld [vmem:[#allocation14 + $0x3e8] ss:$16 sps:$4 sm:$0xff]  }
 0x304   : > { %3362 = vmatprep.subr.bf16.mxu1 %v16250_v30  ;;  %v2460_v30 = vpack.c.bf16 %v582_v26, %v582_v26 }
 0x306   : > { %3281 = vmatpush1.bf16.msra.mxu0 %v16245_v31  ;;  %v581_v31 = vld [vmem:[%s17431_s19 + $0x10] sm:$0xff]  ;;  %3302 = vmatprep.mubr.bf16.mxu0 %v2460_v30  ;;  %s16787_s19 = scalar_lea.vmem %s16786_s9, 1024 }
 0x307   : > { %3363 = vmatpush1.bf16.msra.mxu1 %v16248_v32  ;;  %3282 = vmatprep.subr.bf16.mxu0 %v16253_v33  ;;  %v2459_v32 = vpack.c.bf16 %v581_v31, %v581_v31  ;;  %p16789_p11 = scmp.lt.s32.totalorder %s16787_s19, %s16781_s14 }
 0x308   : > { %3364 = vmatprep.subr.bf16.mxu1 %v16256_v34  ;;  %3384 = vmatprep.mubr.bf16.mxu1 %v2460_v30 }
 0x309   : > { %p16790_p12 = por %p16789_p11, %p16788_p5 }
 0x30a   : > { %3283 = vmatpush1.bf16.msra.mxu0 %v16251_v35 }
 0x30b   : > { %3365 = vmatpush1.bf16.msra.mxu1 %v16254_v36  ;;  %3284 = vmatprep.subr.bf16.mxu0 %v16259_v37  ;;  %p16791_p1 = pnand %p16790_p12, %p16784_p8 }
 0x30c   : > { %3366 = vmatprep.subr.bf16.mxu1 %v16262_v38 }
 0x30e   : > { %3285 = vmatpush1.bf16.msra.mxu0 %v16257_v39 }
 0x30f   : > { %3367 = vmatpush1.bf16.msra.mxu1 %v16260_v40  ;;  %3286 = vmatprep.subr.bf16.mxu0 %v16265_v41  ;;  %v17551_v41 = vpop.permute.xlu0 %3395 }
 0x310   : > { %3368 = vmatprep.subr.bf16.mxu1 %v16268_v42  ;;  %19904 = vst [vmem:[#allocation46_spill] sm:$0xff] %v17551_v41 }
 0x332   : > { %v2368_v43 = vpop.f32.mrb[4].mxu0  ;;  %v2450_v44 = vpop.f32.mrb[4].mxu1 }
 0x333   : > { %v3479_v48 = vcombine.low %v2368_v43, %v2450_v44  ;;  %v3480_v49 = vcombine.high %v2368_v43, %v2450_v44  ;;  %v2370_v50 = vpop.f32.mrb[5].mxu0  ;;  %v2452_v51 = vpop.f32.mrb[5].mxu1  ;;  %v16263_v43 = vld [vmem:[#allocation14 + $0x300] ss:$16 sps:$4 sm:$0xff]   ;;  %v16266_v44 = vld [vmem:[#allocation14 + $0x308] ss:$16 sps:$4 sm:$0xff]  }
 0x334   : > { %v3495_v52 = vcombine.low %v2370_v50, %v2452_v51  ;;  %v3496_v53 = vcombine.high %v2370_v50, %v2452_v51  ;;  %v2372_v54 = vpop.f32.mrb[6].mxu0  ;;  %v2454_v55 = vpop.f32.mrb[6].mxu1  ;;  %3287 = vmatpush1.bf16.msra.mxu0 %v16263_v43  ;;  %3369 = vmatpush1.bf16.msra.mxu1 %v16266_v44 }
 0x335   : > { %v3487_v57 = vrot.slane %v3479_v48, %v17463_v29  ;;  %v17513_v58 = vrot.slane %v3480_v49, %v17463_v29  ;;  %v2373_v59 = vpop.f32.mrb[7].mxu0  ;;  %v2455_v60 = vpop.f32.mrb[7].mxu1  ;;  %v16269_v48 = vld [vmem:[#allocation14 + $0x320] ss:$16 sps:$4 sm:$0xff]   ;;  %v16272_v49 = vld [vmem:[#allocation14 + $0x328] ss:$16 sps:$4 sm:$0xff]   ;;  %3288 = vmatprep.subr.bf16.mxu0 %v16271_v45  ;;  %3370 = vmatprep.subr.bf16.mxu1 %v16274_v46 }
 0x336   : > { %v3503_v63 = vrot.slane %v3495_v52, %v17463_v29  ;;  %v17517_v0 = vrot.slane %v3496_v53, %v17463_v29  ;;  %v16277_v52 = vld [vmem:[#allocation14 + $0x344] ss:$16 sps:$4 sm:$0xff]   ;;  %v16280_v53 = vld [vmem:[#allocation14 + $0x34c] ss:$16 sps:$4 sm:$0xff]   ;;  %v16275_v54 = vld [vmem:[#allocation14 + $0x340] ss:$16 sps:$4 sm:$0xff]  }
 0x337   : > { %v16278_v55 = vld [vmem:[#allocation14 + $0x348] ss:$16 sps:$4 sm:$0xff]   ;;  %v16283_v60 = vld [vmem:[#allocation14 + $0x364] ss:$16 sps:$4 sm:$0xff]  }
 0x338   : > { %v3511_v4 = vcombine.low %v3487_v57, %v3503_v63  ;;  %v3527_v5 = vcombine.low %v17513_v58, %v17517_v0  ;;  %v3528_v6 = vcombine.high %v17513_v58, %v17517_v0  ;;  %v3512_v7 = vcombine.high %v3487_v57, %v3503_v63  ;;  %3289 = vmatpush1.bf16.msra.mxu0 %v16269_v48  ;;  %v16281_v63 = vld [vmem:[#allocation14 + $0x360] ss:$16 sps:$4 sm:$0xff]  }
 0x339   : > { %3371 = vmatpush1.bf16.msra.mxu1 %v16272_v49  ;;  %3290 = vmatprep.subr.bf16.mxu0 %v16277_v52 }
 0x33a   : > { %v3526_v13 = vrot.slane %v3512_v7, %v17469_v47  ;;  %v17525_v17 = vrot.slane %v3511_v4, %v17469_v47  ;;  %v17534_v51 = vrot.slane %v3527_v5, %v17469_v47  ;;  %3372 = vmatprep.subr.bf16.mxu1 %v16280_v53  ;;  %v16287_v4 = vld [vmem:[#allocation14 + $0x380] ss:$16 sps:$4 sm:$0xff]   ;;  %v16290_v5 = vld [vmem:[#allocation14 + $0x388] ss:$16 sps:$4 sm:$0xff]   ;;  %v16295_v7 = vld [vmem:[#allocation14 + $0x3a4] ss:$16 sps:$4 sm:$0xff]   ;;  %v3542_v34 = vrot.slane %v3528_v6, %v17469_v47 }
 0x33c   : > { %v3625_v22 = vpack.c.bf16 %v3526_v13, %v3526_v13  ;;  %v3623_v23 = vpack.c.bf16 %v17525_v17, %v17525_v17  ;;  %v3544_v50 = vcombine.high %v3526_v13, %v19781_v56  ;;  %v3627_v59 = vpack.c.bf16 %v17534_v51, %v17534_v51  ;;  %3291 = vmatpush1.bf16.msra.mxu0 %v16275_v54  ;;  %v16293_v13 = vld [vmem:[#allocation14 + $0x3a0] ss:$16 sps:$4 sm:$0xff]  }
 0x33d   : > { %3373 = vmatpush1.bf16.msra.mxu1 %v16278_v55  ;;  %3292 = vmatprep.subr.bf16.mxu0 %v16283_v60  ;;  %v3545_v33 = vcombine.high %v17534_v51, %v19781_v56  ;;  %v3629_v36 = vpack.c.bf16 %v3542_v34, %v3542_v34  ;;  %v3546_v37 = vcombine.high %v3542_v34, %v19781_v56 }
 0x33e   : > { %3729 = vxpose.xlu1.c.b16.start.end [1/1] (short) %v3625_v22, 128  ;;  %3697 = vxpose.xlu0.c.b16.start.end [1/1] (short) %v3623_v23, 128  ;;  %v3626_v57 = vpack.c.bf16 %v3544_v50, %v3544_v50  ;;  %v16299_v22 = vld [vmem:[#allocation14 + $0x3c0] ss:$16 sps:$4 sm:$0xff]   ;;  %v16302_v23 = vld [vmem:[#allocation14 + $0x3c8] ss:$16 sps:$4 sm:$0xff]   ;;  %v3543_v38 = vcombine.high %v17525_v17, %v19781_v56 }
 0x33f   : > { %3374 = vmatprep.subr.bf16.mxu1 %v16286_v62  ;;  %v3628_v35 = vpack.c.bf16 %v3545_v33, %v3545_v33  ;;  %v3630_v39 = vpack.c.bf16 %v3546_v37, %v3546_v37 }
 0x340   : > { %3293 = vmatpush1.bf16.msra.mxu0 %v16281_v63  ;;  %v3624_v40 = vpack.c.bf16 %v3543_v38, %v3543_v38 }
 0x341   : > { %3375 = vmatpush1.bf16.msra.mxu1 %v16284_v1  ;;  %3294 = vmatprep.subr.bf16.mxu0 %v16289_v2 }
 0x342   : > { %3376 = vmatprep.subr.bf16.mxu1 %v16292_v3 }
 0x344   : > { %3295 = vmatpush1.bf16.msra.mxu0 %v16287_v4 }
 0x345   : > { %3377 = vmatpush1.bf16.msra.mxu1 %v16290_v5  ;;  %3296 = vmatprep.subr.bf16.mxu0 %v16295_v7 }
 0x346   : > { %3378 = vmatprep.subr.bf16.mxu1 %v16298_v12 }
 0x348   : > { %3297 = vmatpush1.bf16.msra.mxu0 %v16293_v13 }
 0x349   : > { %3379 = vmatpush1.bf16.msra.mxu1 %v16296_v18  ;;  %3298 = vmatprep.subr.bf16.mxu0 %v16301_v20 }
 0x34a   : > { %3380 = vmatprep.subr.bf16.mxu1 %v16304_v21 }
 0x34c   : > { %3299 = vmatpush1.bf16.msra.mxu0 %v16299_v22 }
 0x34d   : > { %3381 = vmatpush1.bf16.msra.mxu1 %v16302_v23  ;;  %3300 = vmatprep.subr.bf16.mxu0 %v16307_v24 }
 0x34e   : > { %3382 = vmatprep.subr.bf16.mxu1 %v16310_v25 }
 0x350   : > { %3301 = vmatpush1.bf16.msra.mxu0 %v16305_v27 }
 0x351   : > { %3383 = vmatpush1.bf16.msra.mxu1 %v16308_v28  ;;  %15376 = vmatprep.subr.bf16.mxu0 %v19781_v56 }
 0x352   : > { %15396 = vmatprep.subr.bf16.mxu1 %v19781_v56 }
 0x353   : > { %3303 = vmatmul.mubr.bf16.vlgmr.msra.gmra.mrb[8].mxu0 %v2459_v32 }
 0x354   : > { %3385 = vmatmul.mubr.bf16.vlgmr.msra.gmra.mrb[8].mxu1 %v2459_v32 }
 0x35b   : > { %3745 = vxpose.xlu1.c.b16.start.end [1/1] (short) %v3626_v57, 128  ;;  %3761 = vxpose.xlu0.c.b16.start.end [1/1] (short) %v3627_v59, 128 }
 0x378   : > { %3777 = vxpose.xlu1.c.b16.start.end [1/1] (short) %v3628_v35, 128  ;;  %3793 = vxpose.xlu0.c.b16.start.end [1/1] (short) %v3629_v36, 128 }
 0x395   : > { %3809 = vxpose.xlu1.c.b16.start.end [1/1] (short) %v3630_v39, 128  ;;  %3713 = vxpose.xlu0.c.b16.start.end [1/1] (short) %v3624_v40, 128 }
 0x3a4   : > { %v17553_v42 = vpop.trf.xlu1  ;;  %v17555_v58 = vpop.trf.xlu0 }
 0x3a5   : > { %v3829_v14 = vshrl.u32 %v17555_v58, 16 }
 0x3a8   : > { %v17557_v0 = vpop.trf.xlu1  ;;  %v17559_v6 = vpop.trf.xlu0 }
 0x3ac   : > { %v17561_v43 = vpop.trf.xlu1  ;;  %v17563_v44 = vpop.trf.xlu0 }
 0x3b0   : > { %v17565_v45 = vpop.trf.xlu1  ;;  %v17567_v17 = vpop.trf.xlu0 }
 0x3b4   : > { %v17569_v46 = vpop.trf.xlu1  ;;  %v17571_v48 = vpop.trf.xlu0 }
 0x3b8   : > { %v17573_v49 = vpop.trf.xlu1  ;;  %v17575_v50 = vpop.trf.xlu0 }
 0x3bc   : > { %v17577_v51 = vpop.trf.xlu1  ;;  %v17579_v52 = vpop.trf.xlu0 }
 0x3c0   : > { %v17581_v53 = vpop.trf.xlu1  ;;  %v17583_v54 = vpop.trf.xlu0 }
 0x3c1   : > { %19905 = vst [vmem:[#allocation47_spill] sm:$0xff] %v17581_v53  ;;  %19906 = vst [vmem:[#allocation48_spill] sm:$0xff] %v17583_v54 }
 0x3c4   : > { %v3753_v55 = vpop.trf.xlu1  ;;  %v3769_v57 = vpop.trf.xlu0 }
 0x3c5   : > { %v3835_v40 = vpack.i.b16 %v3753_v55, %v17553_v42  ;;  %v3845_v9 = vshrl.u32 %v3769_v57, 16 }
 0x3c8   : > { %v17585_v59 = vpop.trf.xlu1  ;;  %v17587_v60 = vpop.trf.xlu0 }
 0x3cc   : > { %v17589_v62 = vpop.trf.xlu1  ;;  %v17591_v63 = vpop.trf.xlu0 }
 0x3d0   : > { %v17593_v1 = vpop.trf.xlu1  ;;  %v17595_v2 = vpop.trf.xlu0 }
 0x3d4   : > { %v17597_v3 = vpop.trf.xlu1  ;;  %v17599_v4 = vpop.trf.xlu0 }
 0x3d8   : > { %v17601_v5 = vpop.trf.xlu1  ;;  %v17603_v7 = vpop.trf.xlu0 }
 0x3dc   : > { %v17605_v12 = vpop.trf.xlu1  ;;  %v17607_v13 = vpop.trf.xlu0 }
 0x3dd   : > { %19907 = vst [vmem:[#allocation49_spill] sm:$0xff] %v17605_v12  ;;  %19908 = vst [vmem:[#allocation50_spill] sm:$0xff] %v17607_v13 }
 0x3e0   : > { %v17609_v18 = vpop.trf.xlu1  ;;  %v17611_v20 = vpop.trf.xlu0 }
 0x3e1   : > { %19909 = vst [vmem:[#allocation51_spill] sm:$0xff] %v17609_v18  ;;  %19910 = vst [vmem:[#allocation52_spill] sm:$0xff] %v17611_v20 }
 0x3e4   : > { %v3785_v21 = vpop.trf.xlu1  ;;  %v3801_v22 = vpop.trf.xlu0 }
 0x3e5   : > { %v3843_v56 = vpack.i.b16 %v3785_v21, %v3769_v57  ;;  %v3846_v15 = vshrl.u32 %v3785_v21, 16  ;;  %v3853_v53 = vshrl.u32 %v3801_v22, 16 }
 0x3e7   : > { %v3847_v54 = vpack.i.b16 %v3846_v15, %v3845_v9 }
 0x3e8   : > { %v17613_v23 = vpop.trf.xlu1  ;;  %v17615_v24 = vpop.trf.xlu0 }
 0x3ec   : > { %v17617_v25 = vpop.trf.xlu1  ;;  %v17619_v26 = vpop.trf.xlu0 }
 0x3f0   : > { %v17621_v27 = vpop.trf.xlu1  ;;  %v17623_v28 = vpop.trf.xlu0 }
 0x3f4   : > { %v17625_v30 = vpop.trf.xlu1  ;;  %v17627_v31 = vpop.trf.xlu0 }
 0x3f8   : > { %v17629_v32 = vpop.trf.xlu1  ;;  %v17631_v33 = vpop.trf.xlu0 }
 0x3fc   : > { %v17633_v34 = vpop.trf.xlu1  ;;  %v17635_v35 = vpop.trf.xlu0 }
 0x3fd   : > { %19911 = vst [vmem:[#allocation53_spill] sm:$0xff] %v17633_v34  ;;  %19912 = vst [vmem:[#allocation54_spill] sm:$0xff] %v17635_v35 }
 0x400   : > { %v17637_v36 = vpop.trf.xlu1  ;;  %v17639_v37 = vpop.trf.xlu0 }
 0x401   : > { %19913 = vst [vmem:[#allocation55_spill] sm:$0xff] %v17637_v36  ;;  %19914 = vst [vmem:[#allocation56_spill] sm:$0xff] %v17639_v37  ;;  %v3838_v37 = vshrl.u32 %v3753_v55, 16 }
 0x404   : > { %v3817_v38 = vpop.trf.xlu1  ;;  %v3721_v39 = vpop.trf.xlu0 }
 0x405   : > { %v3851_v16 = vpack.i.b16 %v3817_v38, %v3801_v22  ;;  %v3827_v11 = vpack.i.b16 %v3721_v39, %v17555_v58  ;;  %v3830_v41 = vshrl.u32 %v3721_v39, 16  ;;  %v3854_v36 = vshrl.u32 %v3817_v38, 16 }
 0x406   : > { %v3837_v39 = vshrl.u32 %v17553_v42, 16 }
 0x407   : > { %v4097_v61 = vcombine.low %v3835_v40, %v3851_v16  ;;  %v4081_v19 = vcombine.low %v3827_v11, %v3843_v56  ;;  %v3831_v20 = vpack.i.b16 %v3830_v41, %v3829_v14  ;;  %v4098_v34 = vcombine.high %v3835_v40, %v3851_v16 }
 0x408   : > { %v4082_v13 = vcombine.high %v3827_v11, %v3843_v56  ;;  %v3855_v35 = vpack.i.b16 %v3854_v36, %v3853_v53  ;;  %v3839_v58 = vpack.i.b16 %v3838_v37, %v3837_v39  ;;  %v3818_v37 = vpop.trf.xlu1  ;;  %v3722_v38 = vpop.trf.xlu0 }
 0x409   : > { %v4105_v10 = vrot.slane %v4097_v61, %v17463_v29  ;;  %v4089_v8 = vrot.slane %v4081_v19, %v17463_v29  ;;  %v4149_v61 = vcombine.low %v3831_v20, %v3847_v54  ;;  %v4112_v21 = vrot.slane %v4098_v34, %v17463_v29 }
 0x40a   : > { %v4096_v19 = vrot.slane %v4082_v13, %v17463_v29  ;;  %v4165_v41 = vcombine.low %v3839_v58, %v3855_v35  ;;  %v4150_v13 = vcombine.high %v3831_v20, %v3847_v54  ;;  %v3859_v54 = vpack.i.b16 %v3722_v38, %v17559_v6 }
 0x40b   : > { %v4113_v18 = vcombine.low %v4089_v8, %v4105_v10  ;;  %v4157_v14 = vrot.slane %v4149_v61, %v17463_v29  ;;  %v4114_v55 = vcombine.high %v4089_v8, %v4105_v10  ;;  %v3883_v61 = vpack.i.b16 %v3818_v37, %v17615_v24 }
 0x40c   : > { %v4173_v9 = vrot.slane %v4165_v41, %v17463_v29  ;;  %v4129_v11 = vcombine.low %v4096_v19, %v4112_v21  ;;  %v4130_v8 = vcombine.high %v4096_v19, %v4112_v21  ;;  %v4164_v10 = vrot.slane %v4150_v13, %v17463_v29 }
 0x40d   : > { %v4121_v12 = vrot.slane %v4113_v18, %v17469_v47  ;;  %v4128_v56 = vrot.slane %v4114_v55, %v17469_v47  ;;  %v4166_v18 = vcombine.high %v3839_v58, %v3855_v35  ;;  %v19915_v20 = vmov 0  }
 0x40e   : > { %v4181_v15 = vcombine.low %v4157_v14, %v4173_v9  ;;  %v4182_v42 = vcombine.high %v4157_v14, %v4173_v9  ;;  %v4137_v53 = vrot.slane %v4129_v11, %v17469_v47  ;;  %v4144_v36 = vrot.slane %v4130_v8, %v17469_v47 }
 0x40f   : > { %5169 = vxpose.xlu0.c.b16.start.end [1/1] (short) (narrow) %v4121_v12, 16  ;;  %v4180_v22 = vrot.slane %v4166_v18, %v17463_v29  ;;  %v4145_v35 = vcombine.high %v4121_v12, %v19915_v20  ;;  %v3867_v58 = vpack.i.b16 %v17585_v59, %v17557_v0  ;;  %v3875_v21 = vpack.i.b16 %v17613_v23, %v17587_v60 }
 0x410   : > { %v4189_v16 = vrot.slane %v4181_v15, %v17469_v47  ;;  %v4196_v57 = vrot.slane %v4182_v42, %v17469_v47  ;;  %v3886_v19 = vshrl.u32 %v3818_v37, 16  ;;  %v3862_v14 = vshrl.u32 %v3722_v38, 16 }
 0x411   : > { %v4197_v34 = vcombine.low %v4164_v10, %v4180_v22  ;;  %v4198_v39 = vcombine.high %v4164_v10, %v4180_v22  ;;  %v3861_v55 = vshrl.u32 %v17559_v6, 16  ;;  %v3870_v9 = vshrl.u32 %v17585_v59, 16 }
 0x412   : > { %5185 = vxpose.xlu1.c.b16.start.end [1/1] (short) (narrow) %v4189_v16, 16  ;;  %v3878_v11 = vshrl.u32 %v17613_v23, 16  ;;  %v3885_v15 = vshrl.u32 %v17615_v24, 16  ;;  %v4233_v12 = vcombine.low %v3867_v58, %v3883_v61  ;;  %v4217_v42 = vcombine.low %v3859_v54, %v3875_v21 }
 0x413   : > { %5233 = vxpose.xlu0.c.b16.start.end [1/1] (short) (narrow) %v4128_v56, 16  ;;  %v4205_v40 = vrot.slane %v4197_v34, %v17469_v47  ;;  %v4212_v41 = vrot.slane %v4198_v39, %v17469_v47  ;;  %v4146_v13 = vcombine.high %v4128_v56, %v19915_v20  ;;  %v3869_v18 = vshrl.u32 %v17557_v0, 16 }
 0x414   : > { %v3877_v8 = vshrl.u32 %v17587_v60, 16  ;;  %v3887_v10 = vpack.i.b16 %v3886_v19, %v3885_v15  ;;  %v3863_v22 = vpack.i.b16 %v3862_v14, %v3861_v55  ;;  %v4213_v34 = vcombine.high %v4189_v16, %v19915_v20 }
 0x415   : > { %v3871_v6 = vpack.i.b16 %v3870_v9, %v3869_v18  ;;  %v4241_v23 = vrot.slane %v4233_v12, %v17463_v29  ;;  %v4225_v24 = vrot.slane %v4217_v42, %v17463_v29  ;;  %v4147_v37 = vcombine.high %v4137_v53, %v19915_v20 }
 0x416   : > { %5249 = vxpose.xlu1.c.b16.start.end [1/1] (short) (narrow) %v4196_v57, 16  ;;  %v3879_v59 = vpack.i.b16 %v3878_v11, %v3877_v8  ;;  %v4214_v56 = vcombine.high %v4196_v57, %v19915_v20  ;;  %v4234_v60 = vcombine.high %v3867_v58, %v3883_v61  ;;  %v4218_v39 = vcombine.high %v3859_v54, %v3875_v21 }
 0x417   : > { %5297 = vxpose.xlu0.c.b16.start.end [1/1] (short) (narrow) %v4137_v53, 16  ;;  %v4301_v38 = vcombine.low %v3871_v6, %v3887_v10  ;;  %v4148_v16 = vcombine.high %v4144_v36, %v19915_v20  ;;  %v4215_v19 = vcombine.high %v4205_v40, %v19915_v20  ;;  %v4250_v61 = vcombine.high %v4225_v24, %v4241_v23 }
 0x418   : > { %v4285_v0 = vcombine.low %v3863_v22, %v3879_v59  ;;  %v4248_v53 = vrot.slane %v4234_v60, %v17463_v29  ;;  %v4232_v57 = vrot.slane %v4218_v39, %v17463_v29  ;;  %v4216_v54 = vcombine.high %v4212_v41, %v19915_v20 }
 0x419   : > { %v4309_v55 = vrot.slane %v4301_v38, %v17463_v29  ;;  %v4286_v58 = vcombine.high %v3863_v22, %v3879_v59  ;;  %v4302_v21 = vcombine.high %v3871_v6, %v3887_v10  ;;  %v3723_v6 = vpop.trf.xlu0  ;;  %v3899_v60 = vpack.i.b16 %v17589_v62, %v17561_v43 }
 0x41a   : > { %5313 = vxpose.xlu1.c.b16.start.end [1/1] (short) (narrow) %v4205_v40, 16  ;;  %v4293_v14 = vrot.slane %v4285_v0, %v17463_v29  ;;  %v4264_v40 = vrot.slane %v4250_v61, %v17469_v47  ;;  %v4265_v11 = vcombine.low %v4232_v57, %v4248_v53  ;;  %v3894_v38 = vshrl.u32 %v3723_v6, 16 }
 0x41b   : > { %5361 = vxpose.xlu0.c.b16.start.end [1/1] (short) (narrow) %v4144_v36, 16  ;;  %v4300_v42 = vrot.slane %v4286_v58, %v17463_v29  ;;  %v3907_v39 = vpack.i.b16 %v17617_v25, %v17591_v63  ;;  %v3901_v61 = vshrl.u32 %v17561_v43, 16 }
 0x41c   : > { %v4317_v36 = vcombine.low %v4293_v14, %v4309_v55  ;;  %v4318_v12 = vcombine.high %v4293_v14, %v4309_v55  ;;  %v4273_v18 = vrot.slane %v4265_v11, %v17469_v47  ;;  %v3910_v14 = vshrl.u32 %v17617_v25, 16 }
 0x41d   : > { %v3917_v55 = vshrl.u32 %v17619_v26, 16 }
 0x41e   : > { %5377 = vxpose.xlu1.c.b16.start.end [1/1] (short) (narrow) %v4212_v41, 16  ;;  %v4325_v15 = vrot.slane %v4317_v36, %v17469_v47  ;;  %v4266_v41 = vcombine.high %v4232_v57, %v4248_v53  ;;  %v4332_v8 = vrot.slane %v4318_v12, %v17469_v47  ;;  %v4283_v12 = vcombine.high %v4273_v18, %v19915_v20 }
 0x41f   : > { %5201 = vxpose.xlu0.c.b16.start.end [1/1] (short) (narrow) %v4145_v35, 16  ;;  %v4249_v35 = vcombine.low %v4225_v24, %v4241_v23 }
 0x420   : > { %v4280_v22 = vrot.slane %v4266_v41, %v17469_v47 }
 0x421   : > { %v4257_v9 = vrot.slane %v4249_v35, %v17469_v47  ;;  %v3893_v35 = vshrl.u32 %v17563_v44, 16 }
 0x422   : > { %5217 = vxpose.xlu1.c.b16.start.end [1/1] (short) (narrow) %v4213_v34, 16  ;;  %v3819_v34 = vpop.trf.xlu1 }
 0x423   : > { %5265 = vxpose.xlu0.c.b16.start.end [1/1] (short) (narrow) %v4146_v13, 16  ;;  %v4316_v13 = vrot.slane %v4302_v21, %v17463_v29  ;;  %v17697_v24 = vpack.i.b16 %v3819_v34, %v17619_v26  ;;  %v3918_v0 = vshrl.u32 %v3819_v34, 16  ;;  %v3895_v58 = vpack.i.b16 %v3894_v38, %v3893_v35 }
 0x425   : > { %v4333_v10 = vcombine.low %v4300_v42, %v4316_v13  ;;  %v4334_v23 = vcombine.high %v4300_v42, %v4316_v13  ;;  %v4369_v53 = vcombine.low %v3899_v60, %v17697_v24  ;;  %v3919_v36 = vpack.i.b16 %v3918_v0, %v3917_v55 }
 0x426   : > { %5281 = vxpose.xlu1.c.b16.start.end [1/1] (short) (narrow) %v4214_v56, 16  ;;  %v4281_v56 = vcombine.high %v4257_v9, %v19915_v20  ;;  %v4370_v0 = vcombine.high %v3899_v60, %v17697_v24 }
 0x427   : > { %5329 = vxpose.xlu0.c.b16.start.end [1/1] (short) (narrow) %v4147_v37, 16  ;;  %v4341_v59 = vrot.slane %v4333_v10, %v17469_v47  ;;  %v17700_v37 = vpack.i.b16 %v3723_v6, %v17563_v44  ;;  %v4349_v44 = vcombine.high %v4325_v15, %v19915_v20  ;;  %v3386_v21 = vpop.f32.mrb[8].mxu1  ;;  %v4377_v26 = vrot.slane %v4369_v53, %v17463_v29 }
 0x428   : > { %v3388_v42 = vpop.f32.mrb[9].mxu1  ;;  %v4350_v10 = vcombine.high %v4332_v8, %v19915_v20 }
 0x429   : > { %v4353_v57 = vcombine.low %v17700_v37, %v3907_v39  ;;  %v3390_v41 = vpop.f32.mrb[10].mxu1  ;;  %v4354_v38 = vcombine.high %v17700_v37, %v3907_v39 }
 0x42a   : > { %5345 = vxpose.xlu1.c.b16.start.end [1/1] (short) (narrow) %v4215_v19, 16  ;;  %v3902_v19 = vshrl.u32 %v17589_v62, 16  ;;  %v3724_v41 = vpop.trf.xlu0 }
 0x42b   : > { %5393 = vxpose.xlu0.c.b16.start.end [1/1] (short) (narrow) %v4148_v16, 16  ;;  %v4348_v16 = vrot.slane %v4334_v23, %v17469_v47  ;;  %v4361_v11 = vrot.slane %v4353_v57, %v17463_v29 }
 0x42c   : > { %v3903_v62 = vpack.i.b16 %v3902_v19, %v3901_v61 }
 0x42e   : > { %5409 = vxpose.xlu1.c.b16.start.end [1/1] (short) (narrow) %v4216_v54, 16  ;;  %v3909_v54 = vshrl.u32 %v17591_v63, 16  ;;  %v4437_v13 = vcombine.low %v3903_v62, %v3919_v36 }
 0x42f   : > { %5425 = vxpose.xlu0.c.b16.start.end [1/1] (short) (narrow) %v4257_v9, 16  ;;  %v4282_v9 = vcombine.high %v4264_v40, %v19915_v20 }
 0x430   : > { %v3911_v25 = vpack.i.b16 %v3910_v14, %v3909_v54  ;;  %v4385_v14 = vcombine.low %v4361_v11, %v4377_v26  ;;  %v4445_v37 = vrot.slane %v4437_v13, %v17463_v29  ;;  %v4384_v54 = vrot.slane %v4370_v0, %v17463_v29 }
 0x432   : > { %5441 = vxpose.xlu1.c.b16.start.end [1/1] (short) (narrow) %v4325_v15, 16  ;;  %v4421_v43 = vcombine.low %v3895_v58, %v3911_v25 }
 0x433   : > { %5489 = vxpose.xlu0.c.b16.start.end [1/1] (short) (narrow) %v4264_v40, 16  ;;  %v3304_v40 = vpop.f32.mrb[8].mxu0 }
 0x434   : > { %v3306_v63 = vpop.f32.mrb[9].mxu0  ;;  %v3547_v15 = vcombine.low %v3304_v40, %v3386_v21  ;;  %v3548_v34 = vcombine.high %v3304_v40, %v3386_v21  ;;  %v4429_v57 = vrot.slane %v4421_v43, %v17463_v29  ;;  %v4386_v21 = vcombine.high %v4361_v11, %v4377_v26  ;;  %v3820_v11 = vpop.trf.xlu1 }
 0x435   : > { %v3563_v6 = vcombine.low %v3306_v63, %v3388_v42  ;;  %v3308_v23 = vpop.f32.mrb[10].mxu0  ;;  %v3564_v35 = vcombine.high %v3306_v63, %v3388_v42  ;;  %v4422_v40 = vcombine.high %v3895_v58, %v3911_v25  ;;  %v4352_v42 = vcombine.high %v4348_v16, %v19915_v20  ;;  %v17758_v25 = vpop.trf.xlu0 }
 0x436   : > { %5505 = vxpose.xlu1.c.b16.start.end [1/1] (short) (narrow) %v4332_v8, 16  ;;  %v3309_v19 = vpop.f32.mrb[11].mxu0  ;;  %v17726_v55 = vrot.slane %v3547_v15, %v17463_v29  ;;  %v17729_v8 = vrot.slane %v3548_v34, %v17463_v29  ;;  %v4453_v43 = vcombine.low %v4429_v57, %v4445_v37  ;;  %v4400_v13 = vrot.slane %v4386_v21, %v17469_v47 }
 0x437   : > { %5553 = vxpose.xlu0.c.b16.start.end [1/1] (short) (narrow) %v4273_v18, 16  ;;  %v4284_v18 = vcombine.high %v4280_v22, %v19915_v20  ;;  %v17732_v53 = vrot.slane %v3563_v6, %v17463_v29  ;;  %v17736_v24 = vrot.slane %v3564_v35, %v17463_v29  ;;  %v4454_v15 = vcombine.high %v4429_v57, %v4445_v37 }
 0x438   : > { %v4436_v34 = vrot.slane %v4422_v40, %v17463_v29  ;;  %v3947_v0 = vpack.i.b16 %v3820_v11, %v17623_v28  ;;  %v3931_v35 = vpack.i.b16 %v17593_v1, %v17565_v45  ;;  %v3939_v19 = vpack.i.b16 %v17621_v27, %v17595_v2 }
 0x439   : > { %v3579_v60 = vcombine.low %v17726_v55, %v17732_v53  ;;  %v3580_v39 = vcombine.high %v17726_v55, %v17732_v53  ;;  %v3926_v57 = vshrl.u32 %v3724_v41, 16  ;;  %v3942_v21 = vshrl.u32 %v17621_v27, 16 }
 0x43a   : > { %5569 = vxpose.xlu1.c.b16.start.end [1/1] (short) (narrow) %v4341_v59, 16 }
 0x43b   : > { %5617 = vxpose.xlu0.c.b16.start.end [1/1] (short) (narrow) %v4280_v22, 16  ;;  %v4351_v22 = vcombine.high %v4341_v59, %v19915_v20  ;;  %v4393_v59 = vrot.slane %v4385_v14, %v17469_v47  ;;  %v3950_v14 = vshrl.u32 %v3820_v11, 16 }
 0x43e   : > { %5633 = vxpose.xlu1.c.b16.start.end [1/1] (short) (narrow) %v4348_v16, 16  ;;  %v4468_v16 = vrot.slane %v4454_v15, %v17469_v47 }
 0x43f   : > { %5457 = vxpose.xlu0.c.b16.start.end [1/1] (short) (narrow) %v4281_v56, 16  ;;  %v3391_v56 = vpop.f32.mrb[11].mxu1 }
 0x442   : > { %5473 = vxpose.xlu1.c.b16.start.end [1/1] (short) (narrow) %v4349_v44, 16  ;;  %v4368_v44 = vrot.slane %v4354_v38, %v17463_v29  ;;  %v3923_v38 = vpack.i.b16 %v3724_v41, %v17567_v17  ;;  %v3941_v41 = vshrl.u32 %v17595_v2, 16  ;;  %v4486_v2 = vcombine.high %v4468_v16, %v19915_v20 }
 0x443   : > { %5521 = vxpose.xlu0.c.b16.start.end [1/1] (short) (narrow) %v4282_v9, 16  ;;  %v3595_v9 = vcombine.low %v17729_v8, %v17736_v24 }
 0x444   : > { %v4401_v63 = vcombine.low %v4368_v44, %v4384_v54  ;;  %v4402_v58 = vcombine.high %v4368_v44, %v4384_v54  ;;  %v3925_v54 = vshrl.u32 %v17567_v17, 16  ;;  %v3934_v44 = vshrl.u32 %v17593_v1, 16 }
 0x445   : > { %v4489_v40 = vcombine.low %v3923_v38, %v3939_v19  ;;  %v3943_v27 = vpack.i.b16 %v3942_v21, %v3941_v41 }
 0x446   : > { %5537 = vxpose.xlu1.c.b16.start.end [1/1] (short) (narrow) %v4350_v10, 16  ;;  %v4461_v10 = vrot.slane %v4453_v43, %v17469_v47  ;;  %v4416_v26 = vrot.slane %v4402_v58, %v17469_v47  ;;  %v4418_v43 = vcombine.high %v4400_v13, %v19915_v20 }
 0x447   : > { %5585 = vxpose.xlu0.c.b16.start.end [1/1] (short) (narrow) %v4283_v12, 16  ;;  %v4438_v12 = vcombine.high %v3903_v62, %v3919_v36  ;;  %v4409_v36 = vrot.slane %v4401_v63, %v17469_v47  ;;  %v3933_v63 = vshrl.u32 %v17565_v45, 16 }
 0x448   : > { %v4485_v17 = vcombine.high %v4461_v10, %v19915_v20 }
 0x449   : > { %v4452_v6 = vrot.slane %v4438_v12, %v17463_v29  ;;  %v4505_v12 = vcombine.low %v3931_v35, %v3947_v0  ;;  %v3935_v1 = vpack.i.b16 %v3934_v44, %v3933_v63 }
 0x44a   : > { %5601 = vxpose.xlu1.c.b16.start.end [1/1] (short) (narrow) %v4351_v22, 16  ;;  %v17769_v22 = vpop.trf.xlu0 }
 0x44b   : > { %5649 = vxpose.xlu0.c.b16.start.end [1/1] (short) (narrow) %v4284_v18, 16  ;;  %v4469_v62 = vcombine.low %v4436_v34, %v4452_v6  ;;  %v4470_v56 = vcombine.high %v4436_v34, %v4452_v6  ;;  %v4417_v18 = vcombine.high %v4393_v59, %v19915_v20  ;;  %v3927_v34 = vpack.i.b16 %v3926_v57, %v3925_v54 }
 0x44c   : > { %v4497_v6 = vrot.slane %v4489_v40, %v17463_v29 }
 0x44d   : > { %v4477_v23 = vrot.slane %v4469_v62, %v17469_v47  ;;  %v4484_v37 = vrot.slane %v4470_v56, %v17469_v47  ;;  %v4557_v45 = vcombine.low %v3927_v34, %v3943_v27  ;;  %v4490_v56 = vcombine.high %v3923_v38, %v3939_v19 }
 0x44e   : > { %5665 = vxpose.xlu1.c.b16.start.end [1/1] (short) (narrow) %v4352_v42, 16  ;;  %v17776_v42 = vpop.trf.xlu1  ;;  %v17784_v58 = vpop.trf.xlu0 }
 0x44f   : > { %5681 = vxpose.xlu0.c.b16.start.end [1/1] (short) (narrow) %v4393_v59, 16  ;;  %v3949_v59 = vshrl.u32 %v17623_v28, 16  ;;  %v4513_v28 = vrot.slane %v4505_v12, %v17463_v29  ;;  %v4487_v54 = vcombine.high %v4477_v23, %v19915_v20  ;;  %v4488_v19 = vcombine.high %v4484_v37, %v19915_v20 }
 0x451   : > { %v3951_v15 = vpack.i.b16 %v3950_v14, %v3949_v59  ;;  %v4521_v14 = vcombine.low %v4497_v6, %v4513_v28 }
 0x452   : > { %5697 = vxpose.xlu1.c.b16.start.end [1/1] (short) (narrow) %v4461_v10, 16  ;;  %v17787_v11 = vpop.trf.xlu1  ;;  %v4506_v10 = vcombine.high %v3931_v35, %v3947_v0  ;;  %v17791_v57 = vpop.trf.xlu0  ;;  %v4558_v35 = vcombine.high %v3927_v34, %v3943_v27 }
 0x453   : > { %5745 = vxpose.xlu0.c.b16.start.end [1/1] (short) (narrow) %v4400_v13, 16  ;;  %v4419_v13 = vcombine.high %v4409_v36, %v19915_v20  ;;  %v4573_v62 = vcombine.low %v3935_v1, %v3951_v15  ;;  %v4529_v0 = vrot.slane %v4521_v14, %v17469_v47  ;;  %v4574_v38 = vcombine.high %v3935_v1, %v3951_v15 }
 0x454   : > { %v4520_v21 = vrot.slane %v4506_v10, %v17463_v29 }
 0x455   : > { %v4581_v44 = vrot.slane %v4573_v62, %v17463_v29  ;;  %v4588_v15 = vrot.slane %v4574_v38, %v17463_v29  ;;  %v3957_v38 = vshrl.u32 %v17571_v48, 16 }
 0x456   : > { %5761 = vxpose.xlu1.c.b16.start.end [1/1] (short) (narrow) %v4468_v16, 16  ;;  %v4504_v16 = vrot.slane %v4490_v56, %v17463_v29  ;;  %v17798_v59 = vpop.trf.xlu1  ;;  %v3979_v56 = vpack.i.b16 %v17776_v42, %v17627_v31 }
 0x457   : > { %5809 = vxpose.xlu0.c.b16.start.end [1/1] (short) (narrow) %v4409_v36, 16  ;;  %v4565_v36 = vrot.slane %v4557_v45, %v17463_v29 }
 0x458   : > { %v4538_v1 = vcombine.high %v4504_v16, %v4520_v21 }
 0x45a   : > { %5825 = vxpose.xlu1.c.b16.start.end [1/1] (short) (narrow) %v4477_v23, 16  ;;  %v4589_v23 = vcombine.low %v4565_v36, %v4581_v44  ;;  %v17805_v63 = vpop.trf.xlu1  ;;  %v4552_v62 = vrot.slane %v4538_v1, %v17469_v47 }
 0x45b   : > { %5873 = vxpose.xlu0.c.b16.start.end [1/1] (short) (narrow) %v4416_v26, 16 }
 0x45c   : > { %v4597_v41 = vrot.slane %v4589_v23, %v17469_v47 }
 0x45e   : > { %5889 = vxpose.xlu1.c.b16.start.end [1/1] (short) (narrow) %v4484_v37, 16 }
 0x45f   : > { %5713 = vxpose.xlu0.c.b16.start.end [1/1] (short) (narrow) %v4417_v18, 16  ;;  %v4420_v18 = vcombine.high %v4416_v26, %v19915_v20  ;;  %v4522_v26 = vcombine.high %v4497_v6, %v4513_v28  ;;  %v4572_v28 = vrot.slane %v4558_v35, %v17463_v29  ;;  %v3966_v35 = vshrl.u32 %v17597_v3, 16 }
 0x461   : > { %v4536_v40 = vrot.slane %v4522_v26, %v17469_v47 }
 0x462   : > { %5729 = vxpose.xlu1.c.b16.start.end [1/1] (short) (narrow) %v4485_v17, 16  ;;  %v4590_v17 = vcombine.high %v4565_v36, %v4581_v44  ;;  %v3963_v36 = vpack.i.b16 %v17597_v3, %v17569_v46  ;;  %v3971_v44 = vpack.i.b16 %v17625_v30, %v17599_v4  ;;  %v4621_v3 = vcombine.high %v4597_v41, %v19915_v20 }
 0x463   : > { %5777 = vxpose.xlu0.c.b16.start.end [1/1] (short) (narrow) %v4418_v43, 16  ;;  %v4537_v43 = vcombine.low %v4504_v16, %v4520_v21  ;;  %v3982_v21 = vshrl.u32 %v17776_v42, 16  ;;  %v3958_v16 = vshrl.u32 %v17758_v25, 16  ;;  %v4554_v42 = vcombine.high %v4536_v40, %v19915_v20 }
 0x464   : > { %v4604_v27 = vrot.slane %v4590_v17, %v17469_v47  ;;  %v4641_v23 = vcombine.low %v3963_v36, %v3979_v56 }
 0x465   : > { %v4545_v37 = vrot.slane %v4537_v43, %v17469_v47  ;;  %v3959_v1 = vpack.i.b16 %v3958_v16, %v3957_v38  ;;  %v4642_v16 = vcombine.high %v3963_v36, %v3979_v56 }
 0x466   : > { %5793 = vxpose.xlu1.c.b16.start.end [1/1] (short) (narrow) %v4486_v2, 16  ;;  %v4606_v2 = vcombine.high %v4572_v28, %v4588_v15 }
 0x467   : > { %5841 = vxpose.xlu0.c.b16.start.end [1/1] (short) (narrow) %v4419_v13, 16  ;;  %v4605_v13 = vcombine.low %v4572_v28, %v4588_v15  ;;  %v3973_v28 = vshrl.u32 %v17599_v4, 16 }
 0x468   : > { %v4620_v26 = vrot.slane %v4606_v2, %v17469_v47 }
 0x469   : > { %v4613_v45 = vrot.slane %v4605_v13, %v17469_v47  ;;  %v4649_v13 = vrot.slane %v4641_v23, %v17463_v29 }
 0x46a   : > { %5857 = vxpose.xlu1.c.b16.start.end [1/1] (short) (narrow) %v4487_v54, 16  ;;  %v4553_v54 = vcombine.high %v4529_v0, %v19915_v20 }
 0x46b   : > { %5905 = vxpose.xlu0.c.b16.start.end [1/1] (short) (narrow) %v4420_v18, 16  ;;  %v3955_v18 = vpack.i.b16 %v17758_v25, %v17571_v48  ;;  %v3965_v25 = vshrl.u32 %v17569_v46, 16  ;;  %v4623_v23 = vcombine.high %v4613_v45, %v19915_v20 }
 0x46d   : > { %v4625_v43 = vcombine.low %v3955_v18, %v3971_v44 }
 0x46e   : > { %5921 = vxpose.xlu1.c.b16.start.end [1/1] (short) (narrow) %v4488_v19, 16  ;;  %v3974_v19 = vshrl.u32 %v17625_v30, 16  ;;  %v3967_v30 = vpack.i.b16 %v3966_v35, %v3965_v25  ;;  %v4556_v35 = vcombine.high %v4552_v62, %v19915_v20  ;;  %v4656_v25 = vrot.slane %v4642_v16, %v17463_v29 }
 0x46f   : > { %5937 = vxpose.xlu0.c.b16.start.end [1/1] (short) (narrow) %v4529_v0, 16  ;;  %v3981_v0 = vshrl.u32 %v17627_v31, 16  ;;  %v4633_v2 = vrot.slane %v4625_v43, %v17463_v29 }
 0x470   : > { %v3975_v31 = vpack.i.b16 %v3974_v19, %v3973_v28 }
 0x471   : > { %v3983_v15 = vpack.i.b16 %v3982_v21, %v3981_v0  ;;  %v4622_v21 = vcombine.high %v4604_v27, %v19915_v20  ;;  %v4657_v19 = vcombine.low %v4633_v2, %v4649_v13 }
 0x472   : > { %5953 = vxpose.xlu1.c.b16.start.end [1/1] (short) (narrow) %v4597_v41, 16  ;;  %v4693_v61 = vcombine.low %v3959_v1, %v3975_v31  ;;  %v4626_v41 = vcombine.high %v3955_v18, %v3971_v44  ;;  %v4694_v44 = vcombine.high %v3959_v1, %v3975_v31 }
 0x473   : > { %6001 = vxpose.xlu0.c.b16.start.end [1/1] (short) (narrow) %v4536_v40, 16  ;;  %v4555_v40 = vcombine.high %v4545_v37, %v19915_v20  ;;  %v4709_v46 = vcombine.low %v3967_v30, %v3983_v15  ;;  %v17859_v18 = vrot.slane %v4657_v19, %v17469_v47 }
 0x475   : > { %v17802_v12 = vpop.trf.xlu0  ;;  %v4717_v43 = vrot.slane %v4709_v46, %v17463_v29 }
 0x476   : > { %6017 = vxpose.xlu1.c.b16.start.end [1/1] (short) (narrow) %v4604_v27, 16  ;;  %v4640_v27 = vrot.slane %v4626_v41, %v17463_v29 }
 0x477   : > { %6065 = vxpose.xlu0.c.b16.start.end [1/1] (short) (narrow) %v4545_v37, 16  ;;  %v4701_v37 = vrot.slane %v4693_v61, %v17463_v29  ;;  %v4624_v61 = vcombine.high %v4620_v26, %v19915_v20 }
 0x478   : > { %v17814_v6 = vpop.trf.xlu1  ;;  %v4674_v19 = vcombine.high %v4640_v27, %v4656_v25 }
 0x479   : > { %v17811_v34 = vpop.trf.xlu0 }
 0x47a   : > { %6081 = vxpose.xlu1.c.b16.start.end [1/1] (short) (narrow) %v4613_v45, 16  ;;  %v7217_v36 = vcombine.low %v17802_v12, %v17811_v34  ;;  %v4710_v45 = vcombine.high %v3967_v30, %v3983_v15  ;;  %v4726_v30 = vcombine.high %v4701_v37, %v4717_v43 }
 0x47b   : > { %6129 = vxpose.xlu0.c.b16.start.end [1/1] (short) (narrow) %v4552_v62, 16  ;;  %v4658_v62 = vcombine.high %v4633_v2, %v4649_v13  ;;  %v4673_v2 = vcombine.low %v4640_v27, %v4656_v25 }
 0x47c   : > { %v17824_v14 = vpop.trf.xlu1  ;;  %v7224_v12 = vrot.slane %v7217_v36, %v17463_v29 }
 0x47d   : > { %v17818_v10 = vpop.trf.xlu0  ;;  %v17869_v13 = vrot.slane %v4658_v62, %v17469_v47  ;;  %v7267_v31 = vcombine.low %v17814_v6, %v17824_v14  ;;  %v17892_v14 = vrot.slane %v4726_v30, %v17469_v47  ;;  %v4689_v30 = vcombine.high %v17859_v18, %v19915_v20 }
 0x47e   : > { %6145 = vxpose.xlu1.c.b16.start.end [1/1] (short) (narrow) %v4620_v26, 16 }
 0x47f   : > { %5969 = vxpose.xlu0.c.b16.start.end [1/1] (short) (narrow) %v4553_v54, 16 }
 0x480   : > { %v17843_v48 = vpop.trf.xlu1 }
 0x481   : > { %v17838_v17 = vpop.trf.xlu0 }
 0x482   : > { %5985 = vxpose.xlu1.c.b16.start.end [1/1] (short) (narrow) %v4621_v3, 16  ;;  %v4725_v3 = vcombine.low %v4701_v37, %v4717_v43 }
 0x483   : > { %6033 = vxpose.xlu0.c.b16.start.end [1/1] (short) (narrow) %v4554_v42, 16 }
 0x484   : > { %v17849_v4 = vpop.trf.xlu1  ;;  %v17873_v26 = vrot.slane %v4725_v3, %v17469_v47 }
 0x485   : > { %v5209_v54 = vpop.trf.xlu0 }
 0x486   : > { %6049 = vxpose.xlu1.c.b16.start.end [1/1] (short) (narrow) %v4622_v21, 16 }
 0x487   : > { %6097 = vxpose.xlu0.c.b16.start.end [1/1] (short) (narrow) %v4555_v40, 16 }
 0x488   : > { %v5225_v0 = vpop.trf.xlu1 }
 0x489   : > { %v5273_v38 = vpop.trf.xlu0 }
 0x48a   : > { %v7225_v42 = vcombine.low %v5209_v54, %v5273_v38  ;;  %6113 = vxpose.xlu1.c.b16.start.end [1/1] (short) (narrow) %v4623_v23, 16  ;;  %v7233_v54 = vcombine.low %v17818_v10, %v17838_v17  ;;  %v4708_v10 = vrot.slane %v4694_v44, %v17463_v29  ;;  %v4724_v17 = vrot.slane %v4710_v45, %v17463_v29 }
 0x48b   : > { %6161 = vxpose.xlu0.c.b16.start.end [1/1] (short) (narrow) %v4556_v35, 16  ;;  %v17886_v35 = vrot.slane %v4673_v2, %v17469_v47 }
 0x48c   : > { %v5289_v28 = vpop.trf.xlu1  ;;  %v7232_v40 = vrot.slane %v7225_v42, %v17463_v29  ;;  %v7240_v21 = vrot.slane %v7233_v54, %v17463_v29  ;;  %v4741_v43 = vcombine.low %v4708_v10, %v4724_v17  ;;  %v7274_v42 = vrot.slane %v7267_v31, %v17463_v29 }
 0x48d   : > { %v5337_v56 = vpop.trf.xlu0  ;;  %v7275_v34 = vcombine.low %v5225_v0, %v5289_v28  ;;  %v7283_v0 = vcombine.low %v17843_v48, %v17849_v4  ;;  %v17902_v4 = vrot.slane %v4674_v19, %v17469_v47  ;;  %v4742_v3 = vcombine.high %v4708_v10, %v4724_v17 }
 0x48e   : > { %6177 = vxpose.xlu1.c.b16.start.end [1/1] (short) (narrow) %v4624_v61, 16  ;;  %v7249_v16 = vcombine.low %v7224_v12, %v7232_v40  ;;  %v17911_v61 = vrot.slane %v4741_v43, %v17469_v47  ;;  %v3997_v54 = vshrl.u32 %v17573_v49, 16  ;;  %v3989_v40 = vshrl.u32 %v17575_v50, 16 }
 0x48f   : > { %6193 = vxpose.xlu0.c.b16.start.end [1/1] (short) (narrow) %v17859_v18, 16  ;;  %v7282_v23 = vrot.slane %v7275_v34, %v17463_v29  ;;  %v7290_v27 = vrot.slane %v7283_v0, %v17463_v29  ;;  %v17922_v12 = vpack.i.b16 %v17601_v5, %v17573_v49  ;;  %v4014_v34 = vshrl.u32 %v17787_v11, 16 }
 0x490   : > { %v5353_v1 = vpop.trf.xlu1  ;;  %v3990_v10 = vshrl.u32 %v17769_v22, 16  ;;  %v4006_v18 = vshrl.u32 %v17629_v32, 16 }
 0x491   : > { %v5401_v46 = vpop.trf.xlu0  ;;  %v7299_v36 = vcombine.low %v7274_v42, %v7282_v23 }
 0x492   : > { %v7241_v15 = vcombine.low %v5337_v56, %v5401_v46  ;;  %6209 = vxpose.xlu1.c.b16.start.end [1/1] (short) (narrow) %v17873_v26, 16  ;;  %v7256_v56 = vrot.slane %v7249_v16, %v17469_v47  ;;  %v17918_v46 = vpack.i.b16 %v17787_v11, %v17631_v33  ;;  %v3998_v11 = vshrl.u32 %v17601_v5, 16 }
 0x493   : > { %6257 = vxpose.xlu0.c.b16.start.end [1/1] (short) (narrow) %v17869_v13, 16  ;;  %v7306_v17 = vrot.slane %v7299_v36, %v17469_v47  ;;  %v4005_v5 = vshrl.u32 %v17603_v7, 16  ;;  %v17957_v43 = vpack.i.b16 %v3990_v10, %v3989_v40 }
 0x494   : > { %v7248_v41 = vrot.slane %v7241_v15, %v17463_v29  ;;  %v5417_v6 = vpop.trf.xlu1  ;;  %v17927_v15 = vpack.i.b16 %v17769_v22, %v17575_v50  ;;  %v4003_v50 = vpack.i.b16 %v17629_v32, %v17603_v7  ;;  %v4777_v22 = vcombine.low %v17922_v12, %v17918_v46 }
 0x495   : > { %v17883_v38 = vpop.trf.xlu0  ;;  %v7291_v25 = vcombine.low %v5353_v1, %v5417_v6  ;;  %v4690_v6 = vcombine.high %v17869_v13, %v19915_v20  ;;  %v4757_v7 = vcombine.high %v17873_v26, %v19915_v20  ;;  %v4007_v13 = vpack.i.b16 %v4006_v18, %v4005_v5 }
 0x496   : > { %v7257_v37 = vcombine.low %v7240_v21, %v7248_v41  ;;  %6273 = vxpose.xlu1.c.b16.start.end [1/1] (short) (narrow) %v17892_v14, 16  ;;  %v4013_v21 = vshrl.u32 %v17631_v33, 16  ;;  %v4756_v41 = vrot.slane %v4742_v3, %v17469_v47  ;;  %v4785_v3 = vrot.slane %v4777_v22, %v17463_v29 }
 0x497   : > { %6321 = vxpose.xlu0.c.b16.start.end [1/1] (short) (narrow) %v17886_v35, 16  ;;  %v7298_v45 = vrot.slane %v7291_v25, %v17463_v29  ;;  %v4691_v26 = vcombine.high %v17886_v35, %v19915_v20  ;;  %v4778_v35 = vcombine.high %v17922_v12, %v17918_v46  ;;  %v4692_v18 = vcombine.high %v17902_v4, %v19915_v20 }
 0x498   : > { %v7264_v62 = vrot.slane %v7257_v37, %v17469_v47  ;;  %v17908_v28 = vpop.trf.xlu1  ;;  %v17950_v23 = vpack.i.b16 %v4014_v34, %v4013_v21  ;;  %v4761_v37 = vcombine.low %v17927_v15, %v4003_v50  ;;  %v4759_v5 = vcombine.high %v17911_v61, %v19915_v20 }
 0x499   : > { %v17899_v48 = vpop.trf.xlu0  ;;  %v7307_v2 = vcombine.low %v7290_v27, %v7298_v45  ;;  %v3999_v45 = vpack.i.b16 %v3998_v11, %v3997_v54  ;;  %v4829_v54 = vcombine.low %v17957_v43, %v4007_v13  ;;  %v4762_v11 = vcombine.high %v17927_v15, %v4003_v50 }
 0x49a   : > { %v17906_v44 = vcombine.high %v7256_v56, %v7264_v62  ;;  %6337 = vxpose.xlu1.c.b16.start.end [1/1] (short) (narrow) %v17911_v61, 16  ;;  %v7265_v31 = vcombine.low %v7256_v56, %v7264_v62  ;;  %v4792_v46 = vrot.slane %v4778_v35, %v17463_v29 }
 0x49b   : > { %6385 = vxpose.xlu0.c.b16.start.end [1/1] (short) (narrow) %v17902_v4, 16  ;;  %v7314_v49 = vrot.slane %v7307_v2, %v17469_v47  ;;  %v4769_v2 = vrot.slane %v4761_v37, %v17463_v29  ;;  %v4776_v12 = vrot.slane %v4762_v11, %v17463_v29  ;;  %v4846_v61 = vcombine.high %v3999_v45, %v17950_v23 }
 0x49c   : > { %v17941_v16 = vpop.trf.xlu1  ;;  %v8021_v42 = vshrl.u32 %v7265_v31, 16  ;;  %v8029_v27 = vshrl.u32 %v17906_v44, 16 }
 0x49d   : > { %v17930_v1 = vpop.trf.xlu0  ;;  %v7315_v19 = vcombine.low %v7306_v17, %v7314_v49  ;;  %v17947_v0 = vcombine.high %v7306_v17, %v7314_v49  ;;  %v4845_v17 = vcombine.low %v3999_v45, %v17950_v23  ;;  %v4793_v22 = vcombine.low %v4769_v2, %v4785_v3 }
 0x49e   : > { %6401 = vxpose.xlu1.c.b16.start.end [1/1] (short) (narrow) %v4756_v41, 16  ;;  %v4794_v4 = vcombine.high %v4769_v2, %v4785_v3  ;;  %v4810_v11 = vcombine.high %v4776_v12, %v4792_v46 }
 0x49f   : > { %6225 = vxpose.xlu0.c.b16.start.end [1/1] (short) (narrow) %v4689_v30, 16  ;;  %v8019_v32 = vpack.i.b16 %v7315_v19, %v7265_v31  ;;  %v8022_v56 = vshrl.u32 %v7315_v19, 16  ;;  %v8027_v25 = vpack.i.b16 %v17947_v0, %v17906_v44  ;;  %v8030_v36 = vshrl.u32 %v17947_v0, 16 }
 0x4a0   : > { %v17959_v62 = vpop.trf.xlu1  ;;  %v19916_v30 = vmov 0.0   ;;  %v4758_v31 = vcombine.high %v17892_v14, %v19915_v20  ;;  %v4837_v14 = vrot.slane %v4829_v54, %v17463_v29  ;;  %v4853_v37 = vrot.slane %v4845_v17, %v17463_v29 }
 0x4a1   : > { %v17953_v33 = vpop.trf.xlu0  ;;  %15377 = vmatpush3.bf16.msra.mxu0 %v8019_v32  ;;  %v8023_v40 = vpack.i.b16 %v8022_v56, %v8021_v42  ;;  %v17972_v10 = vpack.i.b16 %v8030_v36, %v8029_v27  ;;  %v17993_v50 = vrot.slane %v4793_v22, %v17469_v47  ;;  %v7317_v32 = vcombine.low %v17883_v38, %v17899_v48 }
 0x4a2   : > { %6241 = vxpose.xlu1.c.b16.start.end [1/1] (short) (narrow) %v4757_v7, 16  ;;  %15378 = vmatprep.subr.bf16.mxu0 %v19916_v30  ;;  %v4830_v42 = vcombine.high %v17957_v43, %v4007_v13  ;;  %v4760_v7 = vcombine.high %v4756_v41, %v19915_v20  ;;  %v4861_v27 = vcombine.low %v4837_v14, %v4853_v37 }
 0x4a3   : > { %6289 = vxpose.xlu0.c.b16.start.end [1/1] (short) (narrow) %v4690_v6, 16  ;;  %15397 = vmatpush3.bf16.msra.mxu1 %v8023_v40  ;;  %v7333_v36 = vcombine.low %v17930_v1, %v17953_v33  ;;  %v18005_v2 = vrot.slane %v4794_v4, %v17469_v47  ;;  %v4809_v38 = vcombine.low %v4776_v12, %v4792_v46 }
 0x4a4   : > { %v17976_v49 = vpop.trf.xlu1  ;;  %15398 = vmatprep.subr.bf16.mxu1 %v19916_v30  ;;  %v7324_v48 = vrot.slane %v7317_v32, %v17463_v29  ;;  %v18009_v41 = vrot.slane %v4861_v27, %v17469_v47  ;;  %v4862_v13 = vcombine.high %v4837_v14, %v4853_v37  ;;  %v4844_v1 = vrot.slane %v4830_v42, %v17463_v29  ;;  %v19917_v27 = vld [vmem:[#allocation54_spill] sm:$0xff] }
 0x4a5   : > { %v5465_v34 = vpop.trf.xlu0  ;;  %v4860_v33 = vrot.slane %v4846_v61, %v17463_v29  ;;  %v18022_v35 = vrot.slane %v4809_v38, %v17469_v47  ;;  %15392 = vmatprep.mubr.msk.bf16.mxu0 %vm16940_vm0, %v19916_v30  ;;  %15412 = vmatprep.mubr.msk.bf16.mxu1 %vm16940_vm0, %v19916_v30 }
 0x4a6   : > { %6305 = vxpose.xlu1.c.b16.start.end [1/1] (short) (narrow) %v4758_v31, 16 }
 0x4a7   : > { %6353 = vxpose.xlu0.c.b16.start.end [1/1] (short) (narrow) %v4691_v26, 16  ;;  %v7340_v26 = vrot.slane %v7333_v36, %v17463_v29  ;;  %v4878_v42 = vcombine.high %v4844_v1, %v4860_v33  ;;  %v18054_v36 = vpack.i.b16 %v17798_v59, %v19917_v27 }
 0x4a8   : > { %v5481_v19 = vpop.trf.xlu1 }
 0x4a9   : > { %v5529_v21 = vpop.trf.xlu0 }
 0x4aa   : > { %v7325_v6 = vcombine.low %v5465_v34, %v5529_v21  ;;  %6369 = vxpose.xlu1.c.b16.start.end [1/1] (short) (narrow) %v4759_v5, 16  ;;  %v7367_v34 = vcombine.low %v17908_v28, %v17941_v16  ;;  %v7383_v21 = vcombine.low %v17959_v62, %v17976_v49  ;;  %v18028_v16 = vrot.slane %v4862_v13, %v17469_v47 }
 0x4ab   : > { %6417 = vxpose.xlu0.c.b16.start.end [1/1] (short) (narrow) %v4692_v18, 16  ;;  %v18038_v49 = vrot.slane %v4810_v11, %v17469_v47  ;;  %v4022_v13 = vshrl.u32 %v17784_v58, 16  ;;  %v4892_v11 = vrot.slane %v4878_v42, %v17469_v47  ;;  %v4893_v42 = vcombine.high %v18009_v41, %v19915_v20 }
 0x4ac   : > { %v5545_v56 = vpop.trf.xlu1  ;;  %v7332_v40 = vrot.slane %v7325_v6, %v17463_v29  ;;  %v7374_v5 = vrot.slane %v7367_v34, %v17463_v29  ;;  %v7390_v46 = vrot.slane %v7383_v21, %v17463_v29  ;;  %v19919_v34 = vld [vmem:[#allocation50_spill] sm:$0xff] }
 0x4ad   : > { %v5593_v15 = vpop.trf.xlu0  ;;  %v7375_v23 = vcombine.low %v5481_v19, %v5545_v56  ;;  %v4877_v19 = vcombine.low %v4844_v1, %v4860_v33  ;;  %v4029_v56 = vshrl.u32 %v17577_v51, 16 }
 0x4ae   : > { %6433 = vxpose.xlu1.c.b16.start.end [1/1] (short) (narrow) %v4760_v7, 16  ;;  %v7349_v17 = vcombine.low %v7324_v48, %v7332_v40  ;;  %v4021_v7 = vshrl.u32 %v17579_v52, 16  ;;  %v4046_v48 = vshrl.u32 %v17798_v59, 16 }
 0x4af   : > { %6449 = vxpose.xlu0.c.b16.start.end [1/1] (short) (narrow) %v17993_v50, 16  ;;  %v7382_v18 = vrot.slane %v7375_v23, %v17463_v29  ;;  %v18047_v61 = vrot.slane %v4877_v19, %v17469_v47  ;;  %v18063_v23 = vpack.i.b16 %v17784_v58, %v17579_v52 }
 0x4b0   : > { %v5609_v45 = vpop.trf.xlu1  ;;  %v7356_v14 = vrot.slane %v7349_v17, %v17469_v47  ;;  %v4045_v17 = vshrl.u32 %v19917_v27, 16 }
 0x4b1   : > { %v5657_v3 = vpop.trf.xlu0  ;;  %v7399_v12 = vcombine.low %v7374_v5, %v7382_v18 }
 0x4b2   : > { %v7341_v43 = vcombine.low %v5593_v15, %v5657_v3  ;;  %6465 = vxpose.xlu1.c.b16.start.end [1/1] (short) (narrow) %v18009_v41, 16  ;;  %v19918_v3 = vld [vmem:[#allocation49_spill] sm:$0xff]  ;;  %v4827_v41 = vcombine.high %v18022_v35, %v19915_v20 }
 0x4b3   : > { %6513 = vxpose.xlu0.c.b16.start.end [1/1] (short) (narrow) %v18005_v2, 16  ;;  %v18058_v38 = vpack.i.b16 %v19918_v3, %v17577_v51  ;;  %v7406_v1 = vrot.slane %v7399_v12, %v17469_v47  ;;  %v4030_v59 = vshrl.u32 %v19918_v3, 16 }
 0x4b4   : > { %v7348_v54 = vrot.slane %v7341_v43, %v17463_v29  ;;  %v5673_v28 = vpop.trf.xlu1 }
 0x4b5   : > { %v18019_v31 = vpop.trf.xlu0  ;;  %v7391_v6 = vcombine.low %v5609_v45, %v5673_v28  ;;  %v4825_v45 = vcombine.high %v17993_v50, %v19915_v20  ;;  %v4913_v58 = vcombine.low %v18058_v38, %v18054_v36  ;;  %v18086_v28 = vpack.i.b16 %v4046_v48, %v4045_v17 }
 0x4b6   : > { %v7357_v22 = vcombine.low %v7340_v26, %v7348_v54  ;;  %6529 = vxpose.xlu1.c.b16.start.end [1/1] (short) (narrow) %v18028_v16, 16  ;;  %v19920_v26 = vld [vmem:[#allocation53_spill] sm:$0xff]  ;;  %v4031_v48 = vpack.i.b16 %v4030_v59, %v4029_v56 }
 0x4b7   : > { %6577 = vxpose.xlu0.c.b16.start.end [1/1] (short) (narrow) %v18022_v35, 16  ;;  %v7398_v4 = vrot.slane %v7391_v6, %v17463_v29  ;;  %v4035_v52 = vpack.i.b16 %v19920_v26, %v19919_v34  ;;  %v4038_v50 = vshrl.u32 %v19920_v26, 16  ;;  %v4914_v35 = vcombine.high %v18058_v38, %v18054_v36 }
 0x4b8   : > { %v7364_v37 = vrot.slane %v7357_v22, %v17469_v47  ;;  %v18044_v32 = vpop.trf.xlu1  ;;  %v4037_v22 = vshrl.u32 %v19919_v34, 16  ;;  %v4894_v34 = vcombine.high %v18028_v16, %v19915_v20 }
 0x4b9   : > { %v18035_v62 = vpop.trf.xlu0  ;;  %v7407_v40 = vcombine.low %v7390_v46, %v7398_v4  ;;  %v4897_v19 = vcombine.low %v18063_v23, %v4035_v52  ;;  %v4898_v26 = vcombine.high %v18063_v23, %v4035_v52  ;;  %v4928_v36 = vrot.slane %v4914_v35, %v17463_v29 }
 0x4ba   : > { %v18041_v15 = vcombine.high %v7356_v14, %v7364_v37  ;;  %6593 = vxpose.xlu1.c.b16.start.end [1/1] (short) (narrow) %v18047_v61, 16  ;;  %v7365_v33 = vcombine.low %v7356_v14, %v7364_v37  ;;  %v4826_v14 = vcombine.high %v18005_v2, %v19915_v20  ;;  %v18093_v37 = vpack.i.b16 %v4022_v13, %v4021_v7 }
 0x4bb   : > { %6641 = vxpose.xlu0.c.b16.start.end [1/1] (short) (narrow) %v18038_v49, 16  ;;  %v7414_v51 = vrot.slane %v7407_v40, %v17469_v47  ;;  %v4039_v2 = vpack.i.b16 %v4038_v50, %v4037_v22  ;;  %v4921_v7 = vrot.slane %v4913_v58, %v17463_v29  ;;  %v4905_v13 = vrot.slane %v4897_v19, %v17463_v29 }
 0x4bc   : > { %v18077_v54 = vpop.trf.xlu1  ;;  %v8037_v46 = vshrl.u32 %v7365_v33, 16  ;;  %v8045_v40 = vshrl.u32 %v18041_v15, 16  ;;  %v4828_v50 = vcombine.high %v18038_v49, %v19915_v20  ;;  %v4895_v22 = vcombine.high %v18047_v61, %v19915_v20 }
 0x4bd   : > { %v18066_v43 = vpop.trf.xlu0  ;;  %v7415_v21 = vcombine.low %v7406_v1, %v7414_v51  ;;  %v18083_v18 = vcombine.high %v7406_v1, %v7414_v51  ;;  %v4981_v51 = vcombine.low %v4031_v48, %v18086_v28  ;;  %v4965_v56 = vcombine.low %v18093_v37, %v4039_v2 }
 0x4be   : > { %6657 = vxpose.xlu1.c.b16.start.end [1/1] (short) (narrow) %v4892_v11, 16  ;;  %v4929_v58 = vcombine.low %v4905_v13, %v4921_v7  ;;  %v4912_v38 = vrot.slane %v4898_v26, %v17463_v29  ;;  %v4930_v49 = vcombine.high %v4905_v13, %v4921_v7  ;;  %v4982_v61 = vcombine.high %v4031_v48, %v18086_v28 }
 0x4bf   : > { %6481 = vxpose.xlu0.c.b16.start.end [1/1] (short) (narrow) %v4825_v45, 16  ;;  %v8035_v6 = vpack.i.b16 %v7415_v21, %v7365_v33  ;;  %v8038_v12 = vshrl.u32 %v7415_v21, 16  ;;  %v8043_v27 = vpack.i.b16 %v18083_v18, %v18041_v15  ;;  %v8046_v3 = vshrl.u32 %v18083_v18, 16 }
 0x4c0   : > { %v18095_v4 = vpop.trf.xlu1  ;;  %v4973_v16 = vrot.slane %v4965_v56, %v17463_v29  ;;  %v4989_v19 = vrot.slane %v4981_v51, %v17463_v29  ;;  %v18129_v52 = vrot.slane %v4929_v58, %v17469_v47  ;;  %v18141_v13 = vrot.slane %v4930_v49, %v17469_v47 }
 0x4c1   : > { %v18089_v5 = vpop.trf.xlu0  ;;  %15379 = vmatpush3.bf16.msra.mxu0 %v8035_v6  ;;  %v8039_v45 = vpack.i.b16 %v8038_v12, %v8037_v46  ;;  %v18108_v33 = vpack.i.b16 %v8046_v3, %v8045_v40  ;;  %v7417_v6 = vcombine.low %v18019_v31, %v18035_v62  ;;  %v4966_v46 = vcombine.high %v18093_v37, %v4039_v2 }
 0x4c2   : > { %6497 = vxpose.xlu1.c.b16.start.end [1/1] (short) (narrow) %v4893_v42, 16  ;;  %15380 = vmatprep.subr.bf16.mxu0 %v19916_v30  ;;  %v4896_v42 = vcombine.high %v4892_v11, %v19915_v20  ;;  %v4997_v40 = vcombine.low %v4973_v16, %v4989_v19  ;;  %v7433_v3 = vcombine.low %v18066_v43, %v18089_v5 }
 0x4c3   : > { %6545 = vxpose.xlu0.c.b16.start.end [1/1] (short) (narrow) %v4826_v14, 16  ;;  %15399 = vmatpush3.bf16.msra.mxu1 %v8039_v45  ;;  %v4945_v31 = vcombine.low %v4912_v38, %v4928_v36  ;;  %v7424_v62 = vrot.slane %v7417_v6, %v17463_v29  ;;  %v4998_v2 = vcombine.high %v4973_v16, %v4989_v19 }
 0x4c4   : > { %v18112_v59 = vpop.trf.xlu1  ;;  %15400 = vmatprep.subr.bf16.mxu1 %v19916_v30  ;;  %v18145_v11 = vrot.slane %v4997_v40, %v17469_v47  ;;  %v4980_v43 = vrot.slane %v4966_v46, %v17463_v29  ;;  %v4996_v5 = vrot.slane %v4982_v61, %v17463_v29  ;;  %v4946_v26 = vcombine.high %v4912_v38, %v4928_v36  ;;  %v19922_v40 = vld [vmem:[#allocation48_spill] sm:$0xff] }
 0x4c5   : > { %v5721_v1 = vpop.trf.xlu0  ;;  %v18158_v35 = vrot.slane %v4945_v31, %v17469_v47 }
 0x4c6   : > { %6561 = vxpose.xlu1.c.b16.start.end [1/1] (short) (narrow) %v4894_v34, 16  ;;  %v5014_v46 = vcombine.high %v4980_v43, %v4996_v5 }
 0x4c7   : > { %6609 = vxpose.xlu0.c.b16.start.end [1/1] (short) (narrow) %v4827_v41, 16  ;;  %v7440_v41 = vrot.slane %v7433_v3, %v17463_v29  ;;  %v4053_v3 = vshrl.u32 %v19922_v40, 16 }
 0x4c8   : > { %v5737_v21 = vpop.trf.xlu1 }
 0x4c9   : > { %v5785_v17 = vpop.trf.xlu0 }
 0x4ca   : > { %v7425_v14 = vcombine.low %v5721_v1, %v5785_v17  ;;  %6625 = vxpose.xlu1.c.b16.start.end [1/1] (short) (narrow) %v4895_v22, 16  ;;  %v7467_v1 = vcombine.low %v18044_v32, %v18077_v54  ;;  %v7483_v17 = vcombine.low %v18095_v4, %v18112_v59  ;;  %v18164_v54 = vrot.slane %v4998_v2, %v17469_v47 }
 0x4cb   : > { %6673 = vxpose.xlu0.c.b16.start.end [1/1] (short) (narrow) %v4828_v50, 16  ;;  %v18174_v59 = vrot.slane %v4946_v26, %v17469_v47  ;;  %v19926_v26 = vld [vmem:[#allocation55_spill] sm:$0xff] }
 0x4cc   : > { %v5801_v12 = vpop.trf.xlu1  ;;  %v7432_v45 = vrot.slane %v7425_v14, %v17463_v29  ;;  %v7474_v22 = vrot.slane %v7467_v1, %v17463_v29  ;;  %v7490_v36 = vrot.slane %v7483_v17, %v17463_v29 }
 0x4cd   : > { %v5849_v23 = vpop.trf.xlu0  ;;  %v7475_v28 = vcombine.low %v5737_v21, %v5801_v12  ;;  %v5013_v21 = vcombine.low %v4980_v43, %v4996_v5  ;;  %v19921_v12 = vld [vmem:[#allocation47_spill] sm:$0xff]  ;;  %v4961_v43 = vcombine.high %v18129_v52, %v19915_v20  ;;  %v4054_v5 = vshrl.u32 %v17791_v57, 16 }
 0x4ce   : > { %6689 = vxpose.xlu1.c.b16.start.end [1/1] (short) (narrow) %v4896_v42, 16  ;;  %v7449_v51 = vcombine.low %v7424_v62, %v7432_v45  ;;  %v4061_v42 = vshrl.u32 %v19921_v12, 16  ;;  %v19923_v45 = vld [vmem:[#allocation56_spill] sm:$0xff]  ;;  %v19924_v62 = vld [vmem:[#allocation51_spill] sm:$0xff] }
 0x4cf   : > { %6705 = vxpose.xlu0.c.b16.start.end [1/1] (short) (narrow) %v18129_v52, 16  ;;  %v7482_v50 = vrot.slane %v7475_v28, %v17463_v29  ;;  %v18183_v61 = vrot.slane %v5013_v21, %v17469_v47  ;;  %v18194_v28 = vpack.i.b16 %v19924_v62, %v19921_v12  ;;  %v4070_v52 = vshrl.u32 %v19926_v26, 16 }
 0x4d0   : > { %v5865_v48 = vpop.trf.xlu1  ;;  %v7456_v16 = vrot.slane %v7449_v51, %v17469_v47 }
 0x4d1   : > { %v5913_v7 = vpop.trf.xlu0  ;;  %v7499_v38 = vcombine.low %v7474_v22, %v7482_v50  ;;  %v4077_v50 = vshrl.u32 %v19923_v45, 16 }
 0x4d2   : > { %v7441_v37 = vcombine.low %v5849_v23, %v5913_v7  ;;  %6721 = vxpose.xlu1.c.b16.start.end [1/1] (short) (narrow) %v18145_v11, 16  ;;  %v18190_v7 = vpack.i.b16 %v17805_v63, %v19923_v45 }
 0x4d3   : > { %6769 = vxpose.xlu0.c.b16.start.end [1/1] (short) (narrow) %v18141_v13, 16  ;;  %v7506_v1 = vrot.slane %v7499_v38, %v17469_v47  ;;  %v4962_v38 = vcombine.high %v18141_v13, %v19915_v20 }
 0x4d4   : > { %v7448_v56 = vrot.slane %v7441_v37, %v17463_v29  ;;  %v5929_v32 = vpop.trf.xlu1  ;;  %v4078_v37 = vshrl.u32 %v17805_v63, 16  ;;  %v4062_v63 = vshrl.u32 %v19924_v62, 16 }
 0x4d5   : > { %v18155_v34 = vpop.trf.xlu0  ;;  %v7491_v14 = vcombine.low %v5865_v48, %v5929_v32  ;;  %v18199_v48 = vpack.i.b16 %v17791_v57, %v19922_v40  ;;  %v5028_v32 = vrot.slane %v5014_v46, %v17469_v47  ;;  %v5049_v57 = vcombine.low %v18194_v28, %v18190_v7 }
 0x4d6   : > { %v7457_v58 = vcombine.low %v7440_v41, %v7448_v56  ;;  %6785 = vxpose.xlu1.c.b16.start.end [1/1] (short) (narrow) %v18164_v54, 16  ;;  %v19925_v56 = vld [vmem:[#allocation52_spill] sm:$0xff] }
 0x4d7   : > { %6833 = vxpose.xlu0.c.b16.start.end [1/1] (short) (narrow) %v18158_v35, 16  ;;  %v7498_v49 = vrot.slane %v7491_v14, %v17463_v29  ;;  %v4067_v17 = vpack.i.b16 %v19926_v26, %v19925_v56 }
 0x4d8   : > { %v7464_v19 = vrot.slane %v7457_v58, %v17469_v47  ;;  %v18180_v6 = vpop.trf.xlu1 }
 0x4d9   : > { %v18171_v4 = vpop.trf.xlu0  ;;  %v7507_v31 = vcombine.low %v7490_v36, %v7498_v49  ;;  %v5033_v14 = vcombine.low %v18199_v48, %v4067_v17  ;;  %v18229_v49 = vpack.i.b16 %v4054_v5, %v4053_v3  ;;  %v5057_v3 = vrot.slane %v5049_v57, %v17463_v29 }
 0x4da   : > { %v18177_v23 = vcombine.high %v7456_v16, %v7464_v19  ;;  %6849 = vxpose.xlu1.c.b16.start.end [1/1] (short) (narrow) %v18183_v61, 16  ;;  %v7465_v41 = vcombine.low %v7456_v16, %v7464_v19  ;;  %v4069_v16 = vshrl.u32 %v19925_v56, 16  ;;  %v18222_v19 = vpack.i.b16 %v4078_v37, %v4077_v50 }
 0x4db   : > { %6897 = vxpose.xlu0.c.b16.start.end [1/1] (short) (narrow) %v18174_v59, 16  ;;  %v7514_v51 = vrot.slane %v7507_v31, %v17469_v47  ;;  %v5029_v31 = vcombine.high %v18145_v11, %v19915_v20  ;;  %v4963_v11 = vcombine.high %v18158_v35, %v19915_v20  ;;  %v5030_v50 = vcombine.high %v18164_v54, %v19915_v20 }
 0x4dc   : > { %v18213_v58 = vpop.trf.xlu1  ;;  %v8053_v12 = vshrl.u32 %v7465_v41, 16  ;;  %v8061_v37 = vshrl.u32 %v18177_v23, 16  ;;  %v4071_v13 = vpack.i.b16 %v4070_v52, %v4069_v16  ;;  %v5050_v35 = vcombine.high %v18194_v28, %v18190_v7 }
 0x4dd   : > { %v18202_v2 = vpop.trf.xlu0  ;;  %v7515_v21 = vcombine.low %v7506_v1, %v7514_v51  ;;  %v18219_v22 = vcombine.high %v7506_v1, %v7514_v51  ;;  %v4063_v1 = vpack.i.b16 %v4062_v63, %v4061_v42  ;;  %v5034_v52 = vcombine.high %v18199_v48, %v4067_v17 }
 0x4de   : > { %6913 = vxpose.xlu1.c.b16.start.end [1/1] (short) (narrow) %v5028_v32, 16  ;;  %v5101_v42 = vcombine.low %v18229_v49, %v4071_v13  ;;  %v5064_v7 = vrot.slane %v5050_v35, %v17463_v29 }
 0x4df   : > { %6737 = vxpose.xlu0.c.b16.start.end [1/1] (short) (narrow) %v4961_v43, 16  ;;  %v8051_v46 = vpack.i.b16 %v7515_v21, %v7465_v41  ;;  %v8054_v40 = vshrl.u32 %v7515_v21, 16  ;;  %v8059_v62 = vpack.i.b16 %v18219_v22, %v18177_v23  ;;  %v8062_v43 = vshrl.u32 %v18219_v22, 16 }
 0x4e0   : > { %v18231_v45 = vpop.trf.xlu1  ;;  %v5041_v41 = vrot.slane %v5033_v14, %v17463_v29  ;;  %v5117_v26 = vcombine.low %v4063_v1, %v18222_v19  ;;  %v4964_v21 = vcombine.high %v18174_v59, %v19915_v20  ;;  %v5109_v54 = vrot.slane %v5101_v42, %v17463_v29 }
 0x4e1   : > { %v18225_v36 = vpop.trf.xlu0  ;;  %15381 = vmatpush3.bf16.msra.mxu0 %v8051_v46  ;;  %v8055_v5 = vpack.i.b16 %v8054_v40, %v8053_v12  ;;  %v18244_v56 = vpack.i.b16 %v8062_v43, %v8061_v37  ;;  %v5048_v28 = vrot.slane %v5034_v52, %v17463_v29  ;;  %v7517_v40 = vcombine.low %v18155_v34, %v18171_v4 }
 0x4e2   : > { %6753 = vxpose.xlu1.c.b16.start.end [1/1] (short) (narrow) %v5029_v31, 16  ;;  %15382 = vmatprep.subr.bf16.mxu0 %v19916_v30  ;;  %v5065_v16 = vcombine.low %v5041_v41, %v5057_v3  ;;  %v5125_v46 = vrot.slane %v5117_v26, %v17463_v29  ;;  %v5066_v59 = vcombine.high %v5041_v41, %v5057_v3 }
 0x4e3   : > { %6801 = vxpose.xlu0.c.b16.start.end [1/1] (short) (narrow) %v4962_v38, 16  ;;  %15401 = vmatpush3.bf16.msra.mxu1 %v8055_v5  ;;  %v5031_v38 = vcombine.high %v18183_v61, %v19915_v20  ;;  %v5118_v61 = vcombine.high %v4063_v1, %v18222_v19  ;;  %v5102_v31 = vcombine.high %v18229_v49, %v4071_v13 }
 0x4e4   : > { %v18248_v63 = vpop.trf.xlu1  ;;  %15402 = vmatprep.subr.bf16.mxu1 %v19916_v30  ;;  %v5073_v17 = vrot.slane %v5065_v16, %v17469_v47  ;;  %v5032_v43 = vcombine.high %v5028_v32, %v19915_v20  ;;  %v5133_v5 = vcombine.low %v5109_v54, %v5125_v46  ;;  %v5080_v3 = vrot.slane %v5066_v59, %v17469_v47 }
 0x4e5   : > { %v5977_v51 = vpop.trf.xlu0  ;;  %v5081_v41 = vcombine.low %v5048_v28, %v5064_v7  ;;  %v7524_v34 = vrot.slane %v7517_v40, %v17463_v29  ;;  %v5134_v32 = vcombine.high %v5109_v54, %v5125_v46  ;;  %v5116_v13 = vrot.slane %v5102_v31, %v17463_v29 }
 0x4e6   : > { %6817 = vxpose.xlu1.c.b16.start.end [1/1] (short) (narrow) %v5030_v50, 16  ;;  %v5141_v1 = vrot.slane %v5133_v5, %v17469_v47  ;;  %v7583_v16 = vcombine.low %v18231_v45, %v18248_v63 }
 0x4e7   : > { %6865 = vxpose.xlu0.c.b16.start.end [1/1] (short) (narrow) %v4963_v11, 16 }
 0x4e8   : > { %v5993_v14 = vpop.trf.xlu1  ;;  %v7590_v63 = vrot.slane %v7583_v16, %v17463_v29 }
 0x4e9   : > { %v6041_v57 = vpop.trf.xlu0 }
 0x4ea   : > { %v7525_v12 = vcombine.low %v5977_v51, %v6041_v57  ;;  %6881 = vxpose.xlu1.c.b16.start.end [1/1] (short) (narrow) %v5031_v38, 16  ;;  %v7533_v51 = vcombine.low %v18202_v2, %v18225_v36  ;;  %v5132_v2 = vrot.slane %v5118_v61, %v17463_v29  ;;  %v7567_v36 = vcombine.low %v18180_v6, %v18213_v58 }
 0x4eb   : > { %6929 = vxpose.xlu0.c.b16.start.end [1/1] (short) (narrow) %v4964_v21, 16  ;;  %v5089_v57 = vrot.slane %v5081_v41, %v17469_v47  ;;  %v5082_v21 = vcombine.high %v5048_v28, %v5064_v7  ;;  %v5148_v6 = vrot.slane %v5134_v32, %v17469_v47 }
 0x4ec   : > { %v6057_v37 = vpop.trf.xlu1  ;;  %v7532_v11 = vrot.slane %v7525_v12, %v17463_v29  ;;  %v7540_v42 = vrot.slane %v7533_v51, %v17463_v29  ;;  %v5149_v58 = vcombine.low %v5116_v13, %v5132_v2  ;;  %v7574_v46 = vrot.slane %v7567_v36, %v17463_v29 }
 0x4ed   : > { %v6105_v48 = vpop.trf.xlu0  ;;  %v7575_v4 = vcombine.low %v5993_v14, %v6057_v37  ;;  %v5096_v45 = vrot.slane %v5082_v21, %v17469_v47 }
 0x4ee   : > { %6945 = vxpose.xlu1.c.b16.start.end [1/1] (short) (narrow) %v5032_v43, 16  ;;  %v7549_v50 = vcombine.low %v7524_v34, %v7532_v11  ;;  %v5157_v37 = vrot.slane %v5149_v58, %v17469_v47  ;;  %v5150_v43 = vcombine.high %v5116_v13, %v5132_v2  ;;  %v5097_v11 = vcombine.high %v5073_v17, %v19915_v20 }
 0x4ef   : > { %6961 = vxpose.xlu0.c.b16.start.end [1/1] (short) (narrow) %v5073_v17, 16  ;;  %v7582_v14 = vrot.slane %v7575_v4, %v17463_v29  ;;  %v5098_v2 = vcombine.high %v5080_v3, %v19915_v20  ;;  %v5099_v58 = vcombine.high %v5089_v57, %v19915_v20 }
 0x4f0   : > { %v6121_v49 = vpop.trf.xlu1  ;;  %v7556_v12 = vrot.slane %v7549_v50, %v17469_v47 }
 0x4f1   : > { %v6169_v26 = vpop.trf.xlu0  ;;  %v7599_v28 = vcombine.low %v7574_v46, %v7582_v14 }
 0x4f2   : > { %v7541_v19 = vcombine.low %v6105_v48, %v6169_v26  ;;  %6977 = vxpose.xlu1.c.b16.start.end [1/1] (short) (narrow) %v5141_v1, 16 }
 0x4f3   : > { %7025 = vxpose.xlu0.c.b16.start.end [1/1] (short) (narrow) %v5080_v3, 16  ;;  %v7606_v26 = vrot.slane %v7599_v28, %v17469_v47  ;;  %v3587_v3 = vrot.slane %v3579_v60, %v17469_v47 }
 0x4f4   : > { %v7548_v35 = vrot.slane %v7541_v19, %v17463_v29  ;;  %v6185_v54 = vpop.trf.xlu1  ;;  %v5164_v19 = vrot.slane %v5150_v43, %v17469_v47 }
 0x4f5   : > { %v18282_v52 = vpop.trf.xlu0  ;;  %v7591_v59 = vcombine.low %v6121_v49, %v6185_v54 }
 0x4f6   : > { %v7557_v38 = vcombine.low %v7540_v42, %v7548_v35  ;;  %7041 = vxpose.xlu1.c.b16.start.end [1/1] (short) (narrow) %v5148_v6, 16  ;;  %v5165_v35 = vcombine.high %v5141_v1, %v19915_v20 }
 0x4f7   : > { %7089 = vxpose.xlu0.c.b16.start.end [1/1] (short) (narrow) %v5089_v57, 16  ;;  %v7598_v61 = vrot.slane %v7591_v59, %v17463_v29  ;;  %v5100_v57 = vcombine.high %v5096_v45, %v19915_v20 }
 0x4f8   : > { %v7564_v48 = vrot.slane %v7557_v38, %v17469_v47  ;;  %v18299_v31 = vpop.trf.xlu1 }
 0x4f9   : > { %v18292_v7 = vpop.trf.xlu0  ;;  %v7607_v5 = vcombine.low %v7590_v63, %v7598_v61  ;;  %v5167_v63 = vcombine.high %v5157_v37, %v19915_v20 }
 0x4fa   : > { %v18296_v40 = vcombine.high %v7556_v12, %v7564_v48  ;;  %7105 = vxpose.xlu1.c.b16.start.end [1/1] (short) (narrow) %v5157_v37, 16  ;;  %v7565_v41 = vcombine.low %v7556_v12, %v7564_v48  ;;  %v5166_v12 = vcombine.high %v5148_v6, %v19915_v20  ;;  %v3611_v48 = vcombine.high %v3587_v3, %v19916_v30 }
 0x4fb   : > { %7153 = vxpose.xlu0.c.b16.start.end [1/1] (short) (narrow) %v5096_v45, 16  ;;  %v7614_v34 = vrot.slane %v7607_v5, %v17469_v47  ;;  %v7617_v43 = vcombine.low %v18282_v52, %v18292_v7 }
 0x4fc   : > { %v18307_v4 = vpop.trf.xlu1  ;;  %v8069_v42 = vshrl.u32 %v7565_v41, 16  ;;  %v8077_v16 = vshrl.u32 %v18296_v40, 16  ;;  %v8359_v61 = vpack.c.bf16 %v3611_v48, %v3611_v48 }
 0x4fd   : > { %v18302_v51 = vpop.trf.xlu0  ;;  %v7615_v49 = vcombine.low %v7606_v26, %v7614_v34  ;;  %v18310_v32 = vcombine.high %v7606_v26, %v7614_v34  ;;  %v7624_v37 = vrot.slane %v7617_v43, %v17463_v29 }
 0x4fe   : > { %7169 = vxpose.xlu1.c.b16.start.end [1/1] (short) (narrow) %v5164_v19, 16 }
 0x4ff   : > { %6993 = vxpose.xlu0.c.b16.start.end [1/1] (short) (narrow) %v5097_v11, 16  ;;  %v8067_v36 = vpack.i.b16 %v7615_v49, %v7565_v41  ;;  %v8070_v17 = vshrl.u32 %v7615_v49, 16  ;;  %v8075_v21 = vpack.i.b16 %v18310_v32, %v18296_v40  ;;  %v8078_v14 = vshrl.u32 %v18310_v32, 16 }
 0x500   : > { %v6345_v50 = vpop.trf.xlu1  ;;  %v5168_v11 = vcombine.high %v5164_v19, %v19915_v20 }
 0x501   : > { %v6393_v13 = vpop.trf.xlu0  ;;  %15383 = vmatpush3.bf16.msra.mxu0 %v8067_v36  ;;  %v8071_v38 = vpack.i.b16 %v8070_v17, %v8069_v42  ;;  %v18324_v1 = vpack.i.b16 %v8078_v14, %v8077_v16  ;;  %v8358_v36 = vpack.c.bf16 %v3587_v3, %v3587_v3  ;;  %v7667_v42 = vcombine.low %v18299_v31, %v18307_v4 }
 0x502   : > { %7009 = vxpose.xlu1.c.b16.start.end [1/1] (short) (narrow) %v5165_v35, 16  ;;  %15384 = vmatprep.subr.bf16.mxu0 %v19916_v30  ;;  %v7633_v26 = vcombine.low %v18302_v51, %v6393_v13 }
 0x503   : > { %7057 = vxpose.xlu0.c.b16.start.end [1/1] (short) (narrow) %v5098_v2, 16  ;;  %15403 = vmatpush3.bf16.msra.mxu1 %v8071_v38  ;;  %v7674_v14 = vrot.slane %v7667_v42, %v17463_v29 }
 0x504   : > { %v6409_v46 = vpop.trf.xlu1  ;;  %15404 = vmatprep.subr.bf16.mxu1 %v19916_v30  ;;  %v7640_v52 = vrot.slane %v7633_v26, %v17463_v29 }
 0x505   : > { %v6233_v54 = vpop.trf.xlu0  ;;  %v7683_v13 = vcombine.low %v6345_v50, %v6409_v46 }
 0x506   : > { %7073 = vxpose.xlu1.c.b16.start.end [1/1] (short) (narrow) %v5166_v12, 16 }
 0x507   : > { %7121 = vxpose.xlu0.c.b16.start.end [1/1] (short) (narrow) %v5099_v58, 16  ;;  %v7690_v4 = vrot.slane %v7683_v13, %v17463_v29 }
 0x508   : > { %v6249_v59 = vpop.trf.xlu1 }
 0x509   : > { %v6297_v60 = vpop.trf.xlu0 }
 0x50a   : > { %v7625_v6 = vcombine.low %v6233_v54, %v6297_v60  ;;  %7137 = vxpose.xlu1.c.b16.start.end [1/1] (short) (narrow) %v5167_v63, 16 }
 0x50b   : > { %7185 = vxpose.xlu0.c.b16.start.end [1/1] (short) (narrow) %v5100_v57, 16 }
 0x50c   : > { %v6313_v5 = vpop.trf.xlu1  ;;  %v7632_v45 = vrot.slane %v7625_v6, %v17463_v29 }
 0x50d   : > { %v6361_v28 = vpop.trf.xlu0  ;;  %v7675_v34 = vcombine.low %v6249_v59, %v6313_v5  ;;  %v3594_v5 = vrot.slane %v3580_v39, %v17469_v47 }
 0x50e   : > { %7201 = vxpose.xlu1.c.b16.start.end [1/1] (short) (narrow) %v5168_v11, 16  ;;  %v7649_v7 = vcombine.low %v7624_v37, %v7632_v45 }
 0x50f   : > { %8382 = vxpose.xlu0.c.b16.start.end [1/1] (short) %v8359_v61, 128  ;;  %v7682_v17 = vrot.slane %v7675_v34, %v17463_v29  ;;  %v3612_v55 = vcombine.high %v3594_v5, %v19916_v30 }
 0x510   : > { %v6377_v2 = vpop.trf.xlu1  ;;  %v7656_v38 = vrot.slane %v7649_v7, %v17469_v47 }
 0x511   : > { %v6425_v41 = vpop.trf.xlu0  ;;  %v7699_v58 = vcombine.low %v7674_v14, %v7682_v17 }
 0x512   : > { %v7641_v49 = vcombine.low %v6361_v28, %v6425_v41  ;;  %8366 = vxpose.xlu1.c.b16.start.end [1/1] (short) %v8358_v36, 128 }
 0x513   : > { %v7706_v48 = vrot.slane %v7699_v58, %v17469_v47 }
 0x514   : > { %v7648_v19 = vrot.slane %v7641_v49, %v17463_v29  ;;  %v6441_v16 = vpop.trf.xlu1 }
 0x515   : > { %v6457_v51 = vpop.trf.xlu0  ;;  %v7691_v54 = vcombine.low %v6377_v2, %v6441_v16 }
 0x516   : > { %v7657_v35 = vcombine.low %v7640_v52, %v7648_v19  ;;  %v8361_v52 = vpack.c.bf16 %v3612_v55, %v3612_v55 }
 0x517   : > { %v7698_v60 = vrot.slane %v7691_v54, %v17463_v29 }
 0x518   : > { %v7664_v3 = vrot.slane %v7657_v35, %v17469_v47  ;;  %v6473_v50 = vpop.trf.xlu1 }
 0x519   : > { %v6521_v31 = vpop.trf.xlu0  ;;  %v7707_v46 = vcombine.low %v7690_v4, %v7698_v60 }
 0x51a   : > { %v18350_v12 = vcombine.high %v7656_v38, %v7664_v3  ;;  %v7665_v59 = vcombine.low %v7656_v38, %v7664_v3  ;;  %v7717_v17 = vcombine.low %v6457_v51, %v6521_v31  ;;  %v8360_v38 = vpack.c.bf16 %v3594_v5, %v3594_v5 }
 0x51b   : > { %v7714_v63 = vrot.slane %v7707_v46, %v17469_v47 }
 0x51c   : > { %v6537_v6 = vpop.trf.xlu1  ;;  %v8085_v26 = vshrl.u32 %v7665_v59, 16  ;;  %v8093_v34 = vshrl.u32 %v18350_v12, 16  ;;  %v7724_v54 = vrot.slane %v7717_v17, %v17463_v29 }
 0x51d   : > { %v6585_v57 = vpop.trf.xlu0  ;;  %v7715_v28 = vcombine.low %v7706_v48, %v7714_v63  ;;  %v18355_v61 = vcombine.high %v7706_v48, %v7714_v63  ;;  %v7767_v46 = vcombine.low %v6473_v50, %v6537_v6 }
 0x51f   : > { %v8083_v11 = vpack.i.b16 %v7715_v28, %v7665_v59  ;;  %v8086_v45 = vshrl.u32 %v7715_v28, 16  ;;  %v8091_v37 = vpack.i.b16 %v18355_v61, %v18350_v12  ;;  %v8094_v49 = vshrl.u32 %v18355_v61, 16 }
 0x520   : > { %v6601_v41 = vpop.trf.xlu1  ;;  %v7774_v5 = vrot.slane %v7767_v46, %v17463_v29 }
 0x521   : > { %v6649_v43 = vpop.trf.xlu0  ;;  %15385 = vmatpush3.bf16.msra.mxu0 %v8083_v11  ;;  %v8087_v2 = vpack.i.b16 %v8086_v45, %v8085_v26  ;;  %v18366_v42 = vpack.i.b16 %v8094_v49, %v8093_v34 }
 0x522   : > { %15386 = vmatprep.subr.bf16.mxu0 %v19916_v30  ;;  %v7733_v16 = vcombine.low %v6585_v57, %v6649_v43 }
 0x523   : > { %15405 = vmatpush3.bf16.msra.mxu1 %v8087_v2 }
 0x524   : > { %v6665_v53 = vpop.trf.xlu1  ;;  %15406 = vmatprep.subr.bf16.mxu1 %v19916_v30  ;;  %v7740_v48 = vrot.slane %v7733_v16, %v17463_v29 }
 0x525   : > { %v6489_v36 = vpop.trf.xlu0  ;;  %v7783_v51 = vcombine.low %v6601_v41, %v6665_v53 }
 0x527   : > { %v7790_v50 = vrot.slane %v7783_v51, %v17463_v29 }
 0x528   : > { %v6505_v7 = vpop.trf.xlu1 }
 0x529   : > { %v6553_v39 = vpop.trf.xlu0 }
 0x52a   : > { %v7725_v19 = vcombine.low %v6489_v36, %v6553_v39 }
 0x52c   : > { %8414 = vxpose.xlu0.c.b16.start.end [1/1] (short) %v8361_v52, 128  ;;  %v6569_v35 = vpop.trf.xlu1  ;;  %v7732_v14 = vrot.slane %v7725_v19, %v17463_v29 }
 0x52d   : > { %v6617_v13 = vpop.trf.xlu0  ;;  %v7775_v4 = vcombine.low %v6505_v7, %v6569_v35  ;;  %v3603_v7 = vrot.slane %v3595_v9, %v17469_v47 }
 0x52e   : > { %v7749_v59 = vcombine.low %v7724_v54, %v7732_v14 }
 0x52f   : > { %8398 = vxpose.xlu1.c.b16.start.end [1/1] (short) %v8360_v38, 128  ;;  %v7782_v31 = vrot.slane %v7775_v4, %v17463_v29  ;;  %v3613_v54 = vcombine.high %v3603_v7, %v19916_v30 }
 0x530   : > { %v6633_v60 = vpop.trf.xlu1  ;;  %v7756_v11 = vrot.slane %v7749_v59, %v17469_v47 }
 0x531   : > { %v6681_v3 = vpop.trf.xlu0  ;;  %v7799_v6 = vcombine.low %v7774_v5, %v7782_v31 }
 0x532   : > { %v7741_v58 = vcombine.low %v6617_v13, %v6681_v3 }
 0x533   : > { %v7806_v53 = vrot.slane %v7799_v6, %v17469_v47 }
 0x534   : > { %v7748_v63 = vrot.slane %v7741_v58, %v17463_v29  ;;  %v6697_v43 = vpop.trf.xlu1 }
 0x535   : > { %v6713_v28 = vpop.trf.xlu0  ;;  %v7791_v45 = vcombine.low %v6633_v60, %v6697_v43 }
 0x536   : > { %v7757_v57 = vcombine.low %v7740_v48, %v7748_v63  ;;  %v8363_v63 = vpack.c.bf16 %v3613_v54, %v3613_v54 }
 0x537   : > { %v7798_v49 = vrot.slane %v7791_v45, %v17463_v29 }
 0x538   : > { %v7764_v26 = vrot.slane %v7757_v57, %v17469_v47  ;;  %v6729_v41 = vpop.trf.xlu1  ;;  %v8362_v57 = vpack.c.bf16 %v3603_v7, %v3603_v7 }
 0x539   : > { %v6777_v34 = vpop.trf.xlu0  ;;  %v7807_v36 = vcombine.low %v7790_v50, %v7798_v49 }
 0x53a   : > { %v18380_v2 = vcombine.high %v7756_v11, %v7764_v26  ;;  %v7765_v52 = vcombine.low %v7756_v11, %v7764_v26  ;;  %v7817_v50 = vcombine.low %v6713_v28, %v6777_v34 }
 0x53b   : > { %v7814_v39 = vrot.slane %v7807_v36, %v17469_v47 }
 0x53c   : > { %v6793_v19 = vpop.trf.xlu1  ;;  %v8101_v14 = vshrl.u32 %v7765_v52, 16  ;;  %v8109_v58 = vshrl.u32 %v18380_v2, 16  ;;  %v7824_v7 = vrot.slane %v7817_v50, %v17463_v29 }
 0x53d   : > { %v6841_v55 = vpop.trf.xlu0  ;;  %v7815_v13 = vcombine.low %v7806_v53, %v7814_v39  ;;  %v18388_v17 = vcombine.high %v7806_v53, %v7814_v39  ;;  %v7867_v53 = vcombine.low %v6729_v41, %v6793_v19 }
 0x53f   : > { %v8099_v16 = vpack.i.b16 %v7815_v13, %v7765_v52  ;;  %v8102_v38 = vshrl.u32 %v7815_v13, 16  ;;  %v8107_v4 = vpack.i.b16 %v18388_v17, %v18380_v2  ;;  %v8110_v60 = vshrl.u32 %v18388_v17, 16 }
 0x540   : > { %v6857_v3 = vpop.trf.xlu1  ;;  %v7874_v28 = vrot.slane %v7867_v53, %v17463_v29 }
 0x541   : > { %v6905_v35 = vpop.trf.xlu0  ;;  %15387 = vmatpush3.bf16.msra.mxu0 %v8099_v16  ;;  %v8103_v9 = vpack.i.b16 %v8102_v38, %v8101_v14  ;;  %v18396_v48 = vpack.i.b16 %v8110_v60, %v8109_v58 }
 0x542   : > { %15388 = vmatprep.subr.bf16.mxu0 %v19916_v30  ;;  %v7833_v11 = vcombine.low %v6841_v55, %v6905_v35 }
 0x543   : > { %15407 = vmatpush3.bf16.msra.mxu1 %v8103_v9 }
 0x544   : > { %v6921_v59 = vpop.trf.xlu1  ;;  %15408 = vmatprep.subr.bf16.mxu1 %v19916_v30  ;;  %v7840_v39 = vrot.slane %v7833_v11, %v17463_v29 }
 0x545   : > { %v6745_v46 = vpop.trf.xlu0  ;;  %v7883_v14 = vcombine.low %v6857_v3, %v6921_v59  ;;  %v19927_v3 = vcombine.high %v17729_v8, %v17736_v24 }
 0x547   : > { %v7890_v41 = vrot.slane %v7883_v14, %v17463_v29  ;;  %v3610_v59 = vrot.slane %v19927_v3, %v17469_v47 }
 0x548   : > { %v6761_v31 = vpop.trf.xlu1 }
 0x549   : > { %v6809_v51 = vpop.trf.xlu0  ;;  %8446 = vxpose.xlu0.c.b16.start.end [1/1] (short) %v8363_v63, 128  ;;  %v3614_v8 = vcombine.high %v3610_v59, %v19916_v30 }
 0x54a   : > { %v7825_v26 = vcombine.low %v6745_v46, %v6809_v51 }
 0x54b   : > { %v8365_v53 = vpack.c.bf16 %v3614_v8, %v3614_v8 }
 0x54c   : > { %v6825_v5 = vpop.trf.xlu1  ;;  %8430 = vxpose.xlu1.c.b16.start.end [1/1] (short) %v8362_v57, 128  ;;  %v7832_v52 = vrot.slane %v7825_v26, %v17463_v29 }
 0x54d   : > { %v6873_v43 = vpop.trf.xlu0  ;;  %v7875_v6 = vcombine.low %v6761_v31, %v6825_v5 }
 0x54e   : > { %v7849_v34 = vcombine.low %v7824_v7, %v7832_v52  ;;  %v8364_v7 = vpack.c.bf16 %v3610_v59, %v3610_v59 }
 0x54f   : > { %v7882_v38 = vrot.slane %v7875_v6, %v17463_v29 }
 0x550   : > { %v6889_v36 = vpop.trf.xlu1  ;;  %v18415_v63 = vrot.slane %v7849_v34, %v17469_v47 }
 0x551   : > { %v6937_v45 = vpop.trf.xlu0  ;;  %v7899_v19 = vcombine.low %v7874_v28, %v7882_v38 }
 0x552   : > { %v7841_v49 = vcombine.low %v6873_v43, %v6937_v45 }
 0x553   : > { %v18418_v57 = vrot.slane %v7899_v19, %v17469_v47 }
 0x554   : > { %v7848_v13 = vrot.slane %v7841_v49, %v17463_v29  ;;  %v6953_v35 = vpop.trf.xlu1 }
 0x555   : > { %v6969_v16 = vpop.trf.xlu0  ;;  %v7891_v54 = vcombine.low %v6889_v36, %v6953_v35 }
 0x556   : > { %v7857_v55 = vcombine.low %v7840_v39, %v7848_v13 }
 0x557   : > { %v7898_v9 = vrot.slane %v7891_v54, %v17463_v29 }
 0x558   : > { %v18407_v60 = vrot.slane %v7857_v55, %v17469_v47  ;;  %v6985_v46 = vpop.trf.xlu1 }
 0x559   : > { %v7033_v58 = vpop.trf.xlu0  ;;  %v7907_v51 = vcombine.low %v7890_v41, %v7898_v9 }
 0x55a   : > { %v7865_v5 = vcombine.low %v18415_v63, %v18407_v60  ;;  %v7917_v54 = vcombine.low %v6969_v16, %v7033_v58  ;;  %v7866_v23 = vcombine.high %v18415_v63, %v18407_v60  ;;  %v19939_v63 = vld [vmem:[#allocation43_spill] sm:$0xff] }
 0x55b   : > { %v18421_v43 = vrot.slane %v7907_v51, %v17469_v47 }
 0x55c   : > { %v7049_v11 = vpop.trf.xlu1  ;;  %v8117_v50 = vshrl.u32 %v7865_v5, 16  ;;  %v7924_v59 = vrot.slane %v7917_v54, %v17463_v29 }
 0x55d   : > { %v7097_v31 = vpop.trf.xlu0  ;;  %v7915_v26 = vcombine.low %v18418_v57, %v18421_v43  ;;  %v7967_v3 = vcombine.low %v6985_v46, %v7049_v11 }
 0x55f   : > { %v8115_v45 = vpack.i.b16 %v7915_v26, %v7865_v5  ;;  %v8118_v6 = vshrl.u32 %v7915_v26, 16  ;;  %v7974_v16 = vrot.slane %v7967_v3, %v17463_v29 }
 0x560   : > { %v7113_v49 = vpop.trf.xlu1 }
 0x561   : > { %v7161_v24 = vpop.trf.xlu0  ;;  %15389 = vmatpush3.bf16.msra.mxu0 %v8115_v45  ;;  %v8119_v36 = vpack.i.b16 %v8118_v6, %v8117_v50 }
 0x562   : > { %15390 = vmatprep.subr.bf16.mxu0 %v19916_v30  ;;  %v7933_v35 = vcombine.low %v7097_v31, %v7161_v24 }
 0x563   : > { %15409 = vmatpush3.bf16.msra.mxu1 %v8119_v36 }
 0x564   : > { %v7177_v52 = vpop.trf.xlu1  ;;  %15410 = vmatprep.subr.bf16.mxu1 %v19916_v30  ;;  %v7940_v51 = vrot.slane %v7933_v35, %v17463_v29 }
 0x565   : > { %v7001_v39 = vpop.trf.xlu0  ;;  %v7983_v45 = vcombine.low %v7113_v49, %v7177_v52 }
 0x566   : > { %8478 = vxpose.xlu0.c.b16.start.end [1/1] (short) %v8365_v53, 128 }
 0x567   : > { %v7990_v11 = vrot.slane %v7983_v45, %v17463_v29 }
 0x568   : > { %v7017_v14 = vpop.trf.xlu1 }
 0x569   : > { %v7065_v13 = vpop.trf.xlu0  ;;  %8462 = vxpose.xlu1.c.b16.start.end [1/1] (short) %v8364_v7, 128 }
 0x56a   : > { %v7925_v28 = vcombine.low %v7001_v39, %v7065_v13 }
 0x56c   : > { %v7081_v55 = vpop.trf.xlu1  ;;  %v7932_v5 = vrot.slane %v7925_v28, %v17463_v29 }
 0x56d   : > { %v7129_v38 = vpop.trf.xlu0  ;;  %v7975_v41 = vcombine.low %v7017_v14, %v7081_v55 }
 0x56e   : > { %v7949_v58 = vcombine.low %v7924_v59, %v7932_v5  ;;  %v19929_v5 = vld [vmem:[#allocation41_spill] sm:$0xff] }
 0x56f   : > { %v7982_v31 = vrot.slane %v7975_v41, %v17463_v29 }
 0x570   : > { %v7145_v9 = vpop.trf.xlu1  ;;  %v18448_v49 = vrot.slane %v7949_v58, %v17469_v47  ;;  %v19942_v58 = vld [vmem:[#allocation45_spill] sm:$0xff] }
 0x571   : > { %v7193_v34 = vpop.trf.xlu0  ;;  %v7999_v36 = vcombine.low %v7974_v16, %v7982_v31  ;;  %v19932_v31 = vld [vmem:[#allocation44_spill] sm:$0xff] }
 0x572   : > { %v7941_v19 = vcombine.low %v7129_v38, %v7193_v34 }
 0x573   : > { %v8006_v14 = vrot.slane %v7999_v36, %v17469_v47 }
 0x574   : > { %v7948_v26 = vrot.slane %v7941_v19, %v17463_v29  ;;  %v7209_v50 = vpop.trf.xlu1 }
 0x575   : > { %v18433_v8 = vpop.trf.xlu0  ;;  %v7991_v6 = vcombine.low %v7145_v9, %v7209_v50 }
 0x576   : > { %v7957_v24 = vcombine.low %v7940_v51, %v7948_v26  ;;  %v19930_v26 = vld [vmem:[#allocation40_spill] sm:$0xff] }
 0x577   : > { %v7998_v39 = vrot.slane %v7991_v6, %v17463_v29  ;;  %v19931_v59 = vpack.i.b16 %v19929_v5, %v19930_v26 }
 0x578   : > { %v18442_v53 = vrot.slane %v7957_v24, %v17469_v47  ;;  %v18445_v13 = vpop.trf.xlu1 }
 0x579   : > { %v18438_v46 = vpop.trf.xlu0  ;;  %v8007_v52 = vcombine.low %v7990_v11, %v7998_v39 }
 0x57a   : > { %v7965_v55 = vcombine.low %v18448_v49, %v18442_v53 }
 0x57b   : > { %v8014_v38 = vrot.slane %v8007_v52, %v17469_v47 }
 0x57c   : > { %v18456_v35 = vpop.trf.xlu1  ;;  %v8133_v41 = vshrl.u32 %v7965_v55, 16 }
 0x57d   : > { %v18450_v7 = vpop.trf.xlu0  ;;  %v8015_v28 = vcombine.low %v8006_v14, %v8014_v38 }
 0x57f   : > { %v8131_v54 = vpack.i.b16 %v8015_v28, %v7965_v55  ;;  %v8134_v19 = vshrl.u32 %v8015_v28, 16 }
 0x580   : > { %v18460_v9 = vpop.trf.xlu1 }
 0x581   : > { %v18458_v34 = vpop.trf.xlu0  ;;  %15391 = vmatpush3.bf16.msra.mxu0 %v8131_v54  ;;  %v8135_v3 = vpack.i.b16 %v8134_v19, %v8133_v41 }
 0x582   : > { %15416 = vmatprep.subr.bf16.mxu0 %v19916_v30 }
 0x583   : > { %15411 = vmatpush3.bf16.msra.mxu1 %v8135_v3 }
 0x584   : > { %15393 = vmatmul.mubr.bf16.vlgmr.msra.gmra.mrb[12].mxu0 %v19931_v59  ;;  %v18468_v45 = vpop.trf.xlu1  ;;  %15436 = vmatprep.subr.bf16.mxu1 %v19916_v30 }
 0x585   : > { %v18463_v51 = vpop.trf.xlu0  ;;  %15417 = vmatpush3.bf16.msra.mxu0 %v8027_v25  ;;  %15432 = vmatprep.mubr.msk.bf16.mxu0 %vm16940_vm0, %v19916_v30 }
 0x586   : > { %19928 = vst [vmem:[#allocation54_spill] sm:$0xff] %v18463_v51  ;;  %15413 = vmatmul.mubr.bf16.vlgmr.msra.gmra.mrb[12].mxu1 %v19932_v31  ;;  %15418 = vmatprep.subr.bf16.mxu0 %v19916_v30 }
 0x587   : > { %15437 = vmatpush3.bf16.msra.mxu1 %v17972_v10  ;;  %15452 = vmatprep.mubr.msk.bf16.mxu1 %vm16940_vm0, %v19916_v30 }
 0x588   : > { %v18483_v50 = vpop.trf.xlu1  ;;  %15438 = vmatprep.subr.bf16.mxu1 %v19916_v30 }
 0x589   : > { %v18478_v24 = vpop.trf.xlu0  ;;  %19934 = vst [vmem:[#allocation50_spill] sm:$0xff] %v18483_v50  ;;  %15419 = vmatpush3.bf16.msra.mxu0 %v8043_v27  ;;  %v7916_v27 = vcombine.high %v18418_v57, %v18421_v43  ;;  %v19940_v57 = vld [vmem:[#allocation42_spill] sm:$0xff] }
 0x58a   : > { %19933 = vst [vmem:[#allocation49_spill] sm:$0xff] %v18478_v24  ;;  %15420 = vmatprep.subr.bf16.mxu0 %v19916_v30  ;;  %v19941_v43 = vpack.i.b16 %v19939_v63, %v19940_v57 }
 0x58b   : > { %15439 = vmatpush3.bf16.msra.mxu1 %v18108_v33  ;;  %v8123_v32 = vpack.i.b16 %v7916_v27, %v7866_v23 }
 0x58c   : > { %v18493_v0 = vpop.trf.xlu1  ;;  %15440 = vmatprep.subr.bf16.mxu1 %v19916_v30 }
 0x58d   : > { %v18490_v44 = vpop.trf.xlu0  ;;  %19936 = vst [vmem:[#allocation47_spill] sm:$0xff] %v18493_v0  ;;  %15421 = vmatpush3.bf16.msra.mxu0 %v8059_v62  ;;  %v8126_v62 = vshrl.u32 %v7916_v27, 16 }
 0x58e   : > { %19935 = vst [vmem:[#allocation53_spill] sm:$0xff] %v18490_v44  ;;  %15422 = vmatprep.subr.bf16.mxu0 %v19916_v30 }
 0x58f   : > { %15441 = vmatpush3.bf16.msra.mxu1 %v18244_v56  ;;  %v8016_v56 = vcombine.high %v8006_v14, %v8014_v38 }
 0x590   : > { %v18503_v10 = vpop.trf.xlu1  ;;  %15442 = vmatprep.subr.bf16.mxu1 %v19916_v30 }
 0x591   : > { %v18500_v25 = vpop.trf.xlu0  ;;  %19937 = vst [vmem:[#allocation48_spill] sm:$0xff] %v18503_v10  ;;  %15423 = vmatpush3.bf16.msra.mxu0 %v8075_v21  ;;  %v8125_v21 = vshrl.u32 %v7866_v23, 16 }
 0x592   : > { %15424 = vmatprep.subr.bf16.mxu0 %v19916_v30 }
 0x593   : > { %15443 = vmatpush3.bf16.msra.mxu1 %v18324_v1  ;;  %v7966_v1 = vcombine.high %v18448_v49, %v18442_v53  ;;  %v8127_v61 = vpack.i.b16 %v8126_v62, %v8125_v21  ;;  %v18596_v62 = vpack.i.b16 %v18490_v44, %v18503_v10  ;;  %v8499_v21 = vshrl.u32 %v18433_v8, 16 }
 0x594   : > { %v18513_v18 = vpop.trf.xlu1  ;;  %15444 = vmatprep.subr.bf16.mxu1 %v19916_v30 }
 0x595   : > { %v18510_v15 = vpop.trf.xlu0  ;;  %15425 = vmatpush3.bf16.msra.mxu0 %v8091_v37  ;;  %v8142_v37 = vshrl.u32 %v8016_v56, 16  ;;  %v8139_v2 = vpack.i.b16 %v8016_v56, %v7966_v1  ;;  %v8141_v17 = vshrl.u32 %v7966_v1, 16  ;;  %v18612_v44 = vpack.i.b16 %v18500_v25, %v18513_v18 }
 0x596   : > { %15426 = vmatprep.subr.bf16.mxu0 %v19916_v30  ;;  %v8507_v24 = vshrl.u32 %v18510_v15, 16 }
 0x597   : > { %15445 = vmatpush3.bf16.msra.mxu1 %v18366_v42 }
 0x598   : > { %v18527_v22 = vpop.trf.xlu1  ;;  %15446 = vmatprep.subr.bf16.mxu1 %v19916_v30 }
 0x599   : > { %v18522_v33 = vpop.trf.xlu0  ;;  %15427 = vmatpush3.bf16.msra.mxu0 %v8107_v4 }
 0x59a   : > { %15428 = vmatprep.subr.bf16.mxu0 %v19916_v30 }
 0x59b   : > { %15447 = vmatpush3.bf16.msra.mxu1 %v18396_v48  ;;  %v8143_v48 = vpack.i.b16 %v8142_v37, %v8141_v17  ;;  %v8722_v17 = vshrl.u32 %v18513_v18, 16 }
 0x59c   : > { %v18539_v12 = vpop.trf.xlu1  ;;  %15448 = vmatprep.subr.bf16.mxu1 %v19916_v30 }
 0x59d   : > { %v18534_v40 = vpop.trf.xlu0  ;;  %15429 = vmatpush3.bf16.msra.mxu0 %v8123_v32 }
 0x59e   : > { %15430 = vmatprep.subr.bf16.mxu0 %v19916_v30 }
 0x59f   : > { %15449 = vmatpush3.bf16.msra.mxu1 %v8127_v61 }
 0x5a0   : > { %v18545_v4 = vpop.trf.xlu1  ;;  %15450 = vmatprep.subr.bf16.mxu1 %v19916_v30 }
 0x5a1   : > { %v18543_v42 = vpop.trf.xlu0  ;;  %15431 = vmatpush3.bf16.msra.mxu0 %v8139_v2  ;;  %v8498_v2 = vshrl.u32 %v18445_v13, 16 }
 0x5a3   : > { %15451 = vmatpush3.bf16.msra.mxu1 %v8143_v48  ;;  %v8723_v48 = vshrl.u32 %v18500_v25, 16  ;;  %v8504_v25 = vpack.i.b16 %v18510_v15, %v18527_v22 }
 0x5a4   : > { %15433 = vmatmul.mubr.bf16.vlgmr.msra.gmra.mrb[16].mxu0 %v19941_v43  ;;  %v18553_v16 = vpop.trf.xlu1 }
 0x5a5   : > { %v18548_v60 = vpop.trf.xlu0 }
 0x5a6   : > { %19938 = vst [vmem:[#allocation56_spill] sm:$0xff] %v18548_v60  ;;  %15453 = vmatmul.mubr.bf16.vlgmr.msra.gmra.mrb[16].mxu1 %v19942_v58  ;;  %v8496_v58 = vpack.i.b16 %v18433_v8, %v18445_v13 }
 0x5a8   : > { %v18558_v11 = vpop.trf.xlu1 }
 0x5a9   : > { %v18556_v6 = vpop.trf.xlu0  ;;  %19944 = vst [vmem:[#allocation52_spill] sm:$0xff] %v18558_v11 }
 0x5aa   : > { %19943 = vst [vmem:[#allocation51_spill] sm:$0xff] %v18556_v6 }
 0x5ac   : > { %v18562_v30 = vpop.trf.xlu1 }
 0x5ad   : > { %v18560_v36 = vpop.trf.xlu0  ;;  %19946 = vst [vmem:[#allocation41_spill] sm:$0xff] %v18562_v30 }
 0x5ae   : > { %19945 = vst [vmem:[#allocation55_spill] sm:$0xff] %v18560_v36 }
 0x5b0   : > { %v18566_v39 = vpop.trf.xlu1 }
 0x5b1   : > { %v18564_v53 = vpop.trf.xlu0  ;;  %19947 = vst [vmem:[#allocation40_spill] sm:$0xff] %v18566_v39 }
 0x5b4   : > { %v18568_v52 = vpop.trf.xlu1 }
 0x5b5   : > { %v8454_v49 = vpop.trf.xlu0 }
 0x5b6   : > { %v8515_v61 = vshrl.u32 %v8454_v49, 16 }
 0x5b8   : > { %v8438_v38 = vpop.trf.xlu1 }
 0x5b9   : > { %v18570_v14 = vpop.trf.xlu0  ;;  %v8514_v1 = vshrl.u32 %v8438_v38, 16  ;;  %v8512_v43 = vpack.i.b16 %v8454_v49, %v8438_v38  ;;  %v18620_v49 = vpack.i.b16 %v8723_v48, %v8722_v17 }
 0x5bb   : > { %v8516_v0 = vpack.i.b16 %v8515_v61, %v8514_v1  ;;  %v8750_v18 = vcombine.low %v8496_v58, %v8512_v43  ;;  %v8751_v30 = vcombine.high %v8496_v58, %v8512_v43 }
 0x5bc   : > { %v18574_v28 = vpop.trf.xlu1 }
 0x5bd   : > { %v18572_v55 = vpop.trf.xlu0  ;;  %v8758_v48 = vrot.slane %v8750_v18, %v17463_v29 }
 0x5c0   : > { %v18578_v41 = vpop.trf.xlu1 }
 0x5c1   : > { %v18576_v54 = vpop.trf.xlu0 }
 0x5c4   : > { %v18582_v3 = vpop.trf.xlu1 }
 0x5c5   : > { %v18580_v19 = vpop.trf.xlu0 }
 0x5c6   : > { %19948 = vst [vmem:[#allocation44_spill] sm:$0xff] %v18580_v19  ;;  %v8531_v19 = vshrl.u32 %v18438_v46, 16 }
 0x5c8   : > { %v18586_v26 = vpop.trf.xlu1 }
 0x5c9   : > { %v18584_v5 = vpop.trf.xlu0  ;;  %19950 = vst [vmem:[#allocation42_spill] sm:$0xff] %v18586_v26 }
 0x5ca   : > { %19949 = vst [vmem:[#allocation43_spill] sm:$0xff] %v18584_v5 }
 0x5cc   : > { %v18590_v31 = vpop.trf.xlu1 }
 0x5cd   : > { %v18588_v59 = vpop.trf.xlu0  ;;  %19952 = vst [vmem:[#allocation57_spill] sm:$0xff] %v18590_v31  ;;  %v8500_v31 = vpack.i.b16 %v8499_v21, %v8498_v2 }
 0x5ce   : > { %19951 = vst [vmem:[#allocation45_spill] sm:$0xff] %v18588_v59 }
 0x5cf   : > { %v8818_v61 = vcombine.low %v8500_v31, %v8516_v0  ;;  %v8819_v18 = vcombine.high %v8500_v31, %v8516_v0 }
 0x5d0   : > { %v18592_v23 = vpop.trf.xlu1 }
 0x5d1   : > { %v8461_v27 = vpop.trf.xlu0  ;;  %19953 = vst [vmem:[#allocation58_spill] sm:$0xff] %v18592_v23  ;;  %v18600_v56 = vpack.i.b16 %v18588_v59, %v18592_v23  ;;  %v8506_v23 = vshrl.u32 %v18527_v22, 16  ;;  %v8833_v0 = vrot.slane %v8819_v18, %v17463_v29  ;;  %v8546_v18 = vshrl.u32 %v18574_v28, 16 }
 0x5d2   : > { %v8739_v57 = vshrl.u32 %v8461_v27, 16 }
 0x5d3   : > { %v8508_v21 = vpack.i.b16 %v8507_v24, %v8506_v23 }
 0x5d4   : > { %v8445_v63 = vpop.trf.xlu1 }
 0x5d5   : > { %v8486_v32 = vpop.trf.xlu0  ;;  %v8738_v10 = vshrl.u32 %v8445_v63, 16  ;;  %v18614_v59 = vpack.i.b16 %v8461_v27, %v8445_v63 }
 0x5d6   : > { %v8523_v5 = vshrl.u32 %v8486_v32, 16 }
 0x5d7   : > { %v18622_v38 = vpack.i.b16 %v8739_v57, %v8738_v10 }
 0x5d8   : > { %v8470_v13 = vpop.trf.xlu1 }
 0x5d9   : > { %v18616_v37 = vpop.trf.xlu0  ;;  %v8522_v27 = vshrl.u32 %v8470_v13, 16  ;;  %v8520_v63 = vpack.i.b16 %v8486_v32, %v8470_v13  ;;  %v8826_v32 = vrot.slane %v8818_v61, %v17463_v29 }
 0x5db   : > { %v8524_v2 = vpack.i.b16 %v8523_v5, %v8522_v27  ;;  %v8766_v10 = vcombine.low %v8504_v25, %v8520_v63  ;;  %v8767_v15 = vcombine.high %v8504_v25, %v8520_v63 }
 0x5dc   : > { %v18632_v17 = vpop.trf.xlu1 }
 0x5dd   : > { %v18630_v1 = vpop.trf.xlu0  ;;  %v8774_v57 = vrot.slane %v8766_v10, %v17463_v29  ;;  %v8834_v8 = vcombine.low %v8508_v21, %v8524_v2  ;;  %v8835_v24 = vcombine.high %v8508_v21, %v8524_v2  ;;  %v8781_v10 = vrot.slane %v8767_v15, %v17463_v29 }
 0x5df   : > { %v8842_v13 = vrot.slane %v8834_v8, %v17463_v29  ;;  %v8782_v6 = vcombine.low %v8758_v48, %v8774_v57  ;;  %v8783_v51 = vcombine.high %v8758_v48, %v8774_v57  ;;  %v8765_v8 = vrot.slane %v8751_v30, %v17463_v29 }
 0x5e0   : > { %v18640_v23 = vpop.trf.xlu1  ;;  %v8849_v43 = vrot.slane %v8835_v24, %v17463_v29 }
 0x5e1   : > { %v18636_v22 = vpop.trf.xlu0  ;;  %v8790_v5 = vrot.slane %v8782_v6, %v17469_v47  ;;  %v8850_v27 = vcombine.low %v8826_v32, %v8842_v13  ;;  %v8797_v6 = vrot.slane %v8783_v51, %v17469_v47  ;;  %v8851_v31 = vcombine.high %v8826_v32, %v8842_v13 }
 0x5e2   : > { %v8798_v63 = vcombine.low %v8765_v8, %v8781_v10  ;;  %v8866_v30 = vcombine.low %v8833_v0, %v8849_v43  ;;  %v8799_v57 = vcombine.high %v8765_v8, %v8781_v10  ;;  %v8554_v51 = vshrl.u32 %v18632_v17, 16 }
 0x5e3   : > { %9838 = vxpose.xlu1.c.b16.start.end [1/1] (short) (narrow) %v8790_v5, 16  ;;  %v18647_v25 = vrot.slane %v8850_v27, %v17469_v47  ;;  %v8865_v2 = vrot.slane %v8851_v31, %v17469_v47  ;;  %v8555_v32 = vshrl.u32 %v18616_v37, 16  ;;  %v8867_v27 = vcombine.high %v8833_v0, %v8849_v43 }
 0x5e4   : > { %v18651_v58 = vpop.trf.xlu1  ;;  %v8806_v48 = vrot.slane %v8798_v63, %v17469_v47  ;;  %v8874_v24 = vrot.slane %v8866_v30, %v17469_v47  ;;  %v8547_v31 = vshrl.u32 %v18570_v14, 16  ;;  %v8538_v63 = vshrl.u32 %v18539_v12, 16 }
 0x5e5   : > { %v18644_v50 = vpop.trf.xlu0  ;;  %9854 = vxpose.xlu0.c.b16.start.end [1/1] (short) (narrow) %v18647_v25, 16  ;;  %v8813_v10 = vrot.slane %v8799_v57, %v17469_v47  ;;  %v8530_v8 = vshrl.u32 %v18456_v35, 16  ;;  %v8556_v26 = vpack.i.b16 %v8555_v32, %v8554_v51  ;;  %v8881_v43 = vrot.slane %v8867_v27, %v17469_v47 }
 0x5e6   : > { %19954 = vst [vmem:[#allocation59_spill] sm:$0xff] %v18644_v50  ;;  %v18681_v0 = vpack.i.b16 %v18560_v36, %v18566_v39  ;;  %v8548_v30 = vpack.i.b16 %v8547_v31, %v8546_v18  ;;  %v8814_v50 = vcombine.high %v8790_v5, %v19915_v20  ;;  %v8730_v32 = vshrl.u32 %v18568_v52, 16 }
 0x5e7   : > { %9902 = vxpose.xlu1.c.b16.start.end [1/1] (short) (narrow) %v8797_v6, 16  ;;  %v8532_v51 = vpack.i.b16 %v8531_v19, %v8530_v8  ;;  %v8883_v39 = vcombine.high %v8865_v2, %v19915_v20  ;;  %v8552_v19 = vpack.i.b16 %v18616_v37, %v18632_v17  ;;  %v8815_v27 = vcombine.high %v8797_v6, %v19915_v20 }
 0x5e8   : > { %v18658_v61 = vpop.trf.xlu1  ;;  %v8528_v17 = vpack.i.b16 %v18438_v46, %v18456_v35  ;;  %v8817_v46 = vcombine.high %v8813_v10, %v19915_v20 }
 0x5e9   : > { %v18656_v21 = vpop.trf.xlu0  ;;  %19956 = vst [vmem:[#allocation61_spill] sm:$0xff] %v18658_v61  ;;  %9918 = vxpose.xlu0.c.b16.start.end [1/1] (short) (narrow) %v8865_v2, 16  ;;  %v8731_v61 = vshrl.u32 %v18564_v53, 16  ;;  %v8544_v2 = vpack.i.b16 %v18570_v14, %v18574_v28 }
 0x5ea   : > { %19955 = vst [vmem:[#allocation60_spill] sm:$0xff] %v18656_v21  ;;  %v8539_v21 = vshrl.u32 %v18522_v33, 16 }
 0x5eb   : > { %9966 = vxpose.xlu1.c.b16.start.end [1/1] (short) (narrow) %v8806_v48, 16  ;;  %v8886_v14 = vcombine.low %v8528_v17, %v8544_v2 }
 0x5ec   : > { %v18666_v13 = vpop.trf.xlu1  ;;  %v8540_v11 = vpack.i.b16 %v8539_v21, %v8538_v63  ;;  %v18695_v21 = vpack.i.b16 %v18564_v53, %v18568_v52  ;;  %v8954_v63 = vcombine.low %v8532_v51, %v8548_v30 }
 0x5ed   : > { %v18662_v15 = vpop.trf.xlu0  ;;  %19958 = vst [vmem:[#allocation63_spill] sm:$0xff] %v18666_v13  ;;  %9982 = vxpose.xlu0.c.b16.start.end [1/1] (short) (narrow) %v8874_v24, 16  ;;  %v8894_v35 = vrot.slane %v8886_v14, %v17463_v29  ;;  %v8579_v14 = vshrl.u32 %v18572_v55, 16 }
 0x5ee   : > { %19957 = vst [vmem:[#allocation62_spill] sm:$0xff] %v18662_v15  ;;  %v8970_v36 = vcombine.low %v8540_v11, %v8556_v26  ;;  %v8971_v28 = vcombine.high %v8540_v11, %v8556_v26 }
 0x5ef   : > { %10030 = vxpose.xlu1.c.b16.start.end [1/1] (short) (narrow) %v8813_v10, 16 }
 0x5f0   : > { %v18676_v13 = vpop.trf.xlu1  ;;  %v8978_v53 = vrot.slane %v8970_v36, %v17463_v29  ;;  %v8816_v36 = vcombine.high %v8806_v48, %v19915_v20 }
 0x5f1   : > { %v18685_v60 = vpack.i.b16 %v18662_v15, %v18676_v13  ;;  %v8493_v57 = vpop.trf.xlu0  ;;  %10046 = vxpose.xlu0.c.b16.start.end [1/1] (short) (narrow) %v8881_v43, 16  ;;  %v18704_v15 = vpack.i.b16 %v8731_v61, %v8730_v32  ;;  %v8885_v61 = vcombine.high %v8881_v43, %v19915_v20  ;;  %v8955_v32 = vcombine.high %v8532_v51, %v8548_v30 }
 0x5f2   : > { %v8747_v31 = vshrl.u32 %v8493_v57, 16  ;;  %v8882_v43 = vcombine.high %v18647_v25, %v19915_v20  ;;  %v8887_v51 = vcombine.high %v8528_v17, %v8544_v2  ;;  %v8586_v17 = vshrl.u32 %v18640_v23, 16 }
 0x5f3   : > { %9870 = vxpose.xlu1.c.b16.start.end [1/1] (short) (narrow) %v8814_v50, 16  ;;  %v8536_v50 = vpack.i.b16 %v18522_v33, %v18539_v12  ;;  %v8962_v33 = vrot.slane %v8954_v63, %v17463_v29  ;;  %v8969_v11 = vrot.slane %v8955_v32, %v17463_v29 }
 0x5f4   : > { %v8477_v18 = vpop.trf.xlu1 }
 0x5f5   : > { %v8746_v5 = vshrl.u32 %v8477_v18, 16  ;;  %v18699_v8 = vpack.i.b16 %v8493_v57, %v8477_v18  ;;  %9950 = vxpose.xlu0.c.b16.start.end [1/1] (short) (narrow) %v8883_v39, 16  ;;  %v8884_v39 = vcombine.high %v8874_v24, %v19915_v20  ;;  %v8902_v12 = vcombine.low %v8536_v50, %v8552_v19 }
 0x5f6   : > { %v8986_v57 = vcombine.low %v8962_v33, %v8978_v53  ;;  %v8987_v48 = vcombine.high %v8962_v33, %v8978_v53  ;;  %v8903_v26 = vcombine.high %v8536_v50, %v8552_v19  ;;  %v8901_v53 = vrot.slane %v8887_v51, %v17463_v29 }
 0x5f7   : > { %v18709_v52 = vpack.i.b16 %v8747_v31, %v8746_v5  ;;  %v9719_v37 = vcombine.high %v18695_v21, %v18699_v8  ;;  %9934 = vxpose.xlu1.c.b16.start.end [1/1] (short) (narrow) %v8815_v27, 16  ;;  %v8910_v24 = vrot.slane %v8902_v12, %v17463_v29  ;;  %v8985_v27 = vrot.slane %v8971_v28, %v17463_v29 }
 0x5f8   : > { %v8994_v18 = vrot.slane %v8986_v57, %v17469_v47  ;;  %v9001_v10 = vrot.slane %v8987_v48, %v17469_v47  ;;  %v8917_v63 = vrot.slane %v8903_v26, %v17463_v29  ;;  %v8587_v33 = vshrl.u32 %v18630_v1, 16 }
 0x5f9   : > { %v9787_v6 = vcombine.high %v18704_v15, %v18709_v52  ;;  %10014 = vxpose.xlu0.c.b16.start.end [1/1] (short) (narrow) %v8884_v39, 16  ;;  %v8918_v30 = vcombine.low %v8894_v35, %v8910_v24  ;;  %v9002_v31 = vcombine.low %v8969_v11, %v8985_v27  ;;  %v8919_v39 = vcombine.high %v8894_v35, %v8910_v24 }
 0x5fa   : > { %v9003_v50 = vcombine.high %v8969_v11, %v8985_v27  ;;  %v8934_v2 = vcombine.low %v8901_v53, %v8917_v63  ;;  %v8570_v28 = vshrl.u32 %v18545_v4, 16  ;;  %v8935_v32 = vcombine.high %v8901_v53, %v8917_v63 }
 0x5fb   : > { %9998 = vxpose.xlu1.c.b16.start.end [1/1] (short) (narrow) %v8816_v36, 16  ;;  %v8926_v5 = vrot.slane %v8918_v30, %v17469_v47  ;;  %v9010_v19 = vrot.slane %v9002_v31, %v17469_v47  ;;  %v8933_v25 = vrot.slane %v8919_v39, %v17469_v47  ;;  %v8578_v36 = vshrl.u32 %v18578_v41, 16 }
 0x5fc   : > { %v9017_v12 = vrot.slane %v9003_v50, %v17469_v47  ;;  %v8942_v57 = vrot.slane %v8934_v2, %v17469_v47  ;;  %v8562_v24 = vshrl.u32 %v18460_v9, 16  ;;  %v8588_v35 = vpack.i.b16 %v8587_v33, %v8586_v17 }
 0x5fd   : > { %10078 = vxpose.xlu0.c.b16.start.end [1/1] (short) (narrow) %v8885_v61, 16  ;;  %v8571_v61 = vshrl.u32 %v18534_v40, 16  ;;  %v9018_v27 = vcombine.high %v8994_v18, %v19915_v20  ;;  %v8580_v48 = vpack.i.b16 %v8579_v14, %v8578_v36  ;;  %v8949_v26 = vrot.slane %v8935_v32, %v17469_v47 }
 0x5fe   : > { %v9019_v51 = vcombine.high %v9001_v10, %v19915_v20  ;;  %v18750_v31 = vpack.i.b16 %v18572_v55, %v18578_v41  ;;  %v19959_v39 = vcombine.high %v18681_v0, %v18685_v60  ;;  %v8584_v53 = vpack.i.b16 %v18630_v1, %v18640_v23 }
 0x5ff   : > { %10062 = vxpose.xlu1.c.b16.start.end [1/1] (short) (narrow) %v8817_v46, 16  ;;  %v8563_v46 = vshrl.u32 %v18450_v7, 16  ;;  %v8572_v11 = vpack.i.b16 %v8571_v61, %v8570_v28  ;;  %v9718_v50 = vcombine.low %v18695_v21, %v18699_v8  ;;  %v8950_v55 = vcombine.high %v8926_v5, %v19915_v20 }
 0x600   : > { %v8560_v41 = vpack.i.b16 %v18450_v7, %v18460_v9  ;;  %v19960_v2 = vcombine.high %v18596_v62, %v18600_v56  ;;  %v9702_v1 = vcombine.low %v18612_v44, %v18614_v59  ;;  %v8568_v23 = vpack.i.b16 %v18534_v40, %v18545_v4 }
 0x601   : > { %10110 = vxpose.xlu0.c.b16.start.end [1/1] (short) (narrow) %v8994_v18, 16  ;;  %v9106_v30 = vcombine.low %v8572_v11, %v8588_v35  ;;  %v18756_v18 = vrot.slane %v19959_v39, %v17463_v29  ;;  %v9770_v33 = vcombine.low %v18620_v49, %v18622_v38  ;;  %v9020_v7 = vcombine.high %v9010_v19, %v19915_v20 }
 0x602   : > { %v18771_v17 = vrot.slane %v19960_v2, %v17463_v29  ;;  %v9022_v9 = vcombine.low %v8560_v41, %v18750_v31  ;;  %v9038_v28 = vcombine.low %v8568_v23, %v8584_v53  ;;  %v18786_v61 = vrot.slane %v9718_v50, %v17463_v29 }
 0x603   : > { %9886 = vxpose.xlu1.c.b16.start.end [1/1] (short) (narrow) %v8882_v43, 16  ;;  %v8564_v43 = vpack.i.b16 %v8563_v46, %v8562_v24  ;;  %v8951_v4 = vcombine.high %v8933_v25, %v19915_v20  ;;  %v18793_v32 = vrot.slane %v9702_v1, %v17463_v29  ;;  %v18805_v24 = vrot.slane %v9787_v6, %v17463_v29 }
 0x604   : > { %v19961_v8 = vcombine.high %v18612_v44, %v18614_v59  ;;  %v9046_v6 = vrot.slane %v9038_v28, %v17463_v29  ;;  %v9030_v44 = vrot.slane %v9022_v9, %v17463_v29  ;;  %v9039_v50 = vcombine.high %v8568_v23, %v8584_v53 }
 0x605   : > { %10174 = vxpose.xlu0.c.b16.start.end [1/1] (short) (narrow) %v9001_v10, 16  ;;  %v9090_v63 = vcombine.low %v8564_v43, %v8580_v48  ;;  %v9786_v10 = vcombine.low %v18704_v15, %v18709_v52  ;;  %v9091_v21 = vcombine.high %v8564_v43, %v8580_v48  ;;  %v19962_v15 = vcombine.high %v18620_v49, %v18622_v38  ;;  %v19977_v43 = vld [vmem:[#allocation43_spill] sm:$0xff] }
 0x606   : > { %v9023_v2 = vcombine.high %v8560_v41, %v18750_v31  ;;  %v9055_v9 = vcombine.high %v9030_v44, %v9046_v6  ;;  %v8618_v41 = vshrl.u32 %v18651_v58, 16  ;;  %v8619_v28 = vshrl.u32 %v18636_v22, 16 }
 0x607   : > { %10094 = vxpose.xlu1.c.b16.start.end [1/1] (short) (narrow) %v8926_v5, 16  ;;  %v9114_v5 = vrot.slane %v9106_v30, %v17463_v29  ;;  %v9098_v36 = vrot.slane %v9090_v63, %v17463_v29  ;;  %v18789_v40 = vrot.slane %v9786_v10, %v17463_v29  ;;  %v9021_v30 = vcombine.high %v9017_v12, %v19915_v20 }
 0x608   : > { %v18823_v52 = vrot.slane %v19962_v15, %v17463_v29  ;;  %v9105_v39 = vrot.slane %v9091_v21, %v17463_v29  ;;  %v8953_v10 = vcombine.high %v8949_v26, %v19915_v20  ;;  %v8611_v21 = vshrl.u32 %v18576_v54, 16 }
 0x609   : > { %10238 = vxpose.xlu0.c.b16.start.end [1/1] (short) (narrow) %v9010_v19, 16  ;;  %v18799_v19 = vrot.slane %v9719_v37, %v17463_v29  ;;  %v18817_v37 = vrot.slane %v19961_v8, %v17463_v29  ;;  %v8675_v49 = vshrl.u32 %v19977_v43, 16 }
 0x60b   : > { %10158 = vxpose.xlu1.c.b16.start.end [1/1] (short) (narrow) %v8933_v25, 16  ;;  %v18810_v25 = vrot.slane %v9770_v33, %v17463_v29 }
 0x60d   : > { %10302 = vxpose.xlu0.c.b16.start.end [1/1] (short) (narrow) %v9017_v12, 16 }
 0x60f   : > { %10222 = vxpose.xlu1.c.b16.start.end [1/1] (short) (narrow) %v8942_v57, 16 }
 0x611   : > { %10142 = vxpose.xlu0.c.b16.start.end [1/1] (short) (narrow) %v9018_v27, 16  ;;  %v9107_v27 = vcombine.high %v8572_v11, %v8588_v35  ;;  %v8952_v35 = vcombine.high %v8942_v57, %v19915_v20  ;;  %v9123_v57 = vcombine.high %v9098_v36, %v9114_v5 }
 0x613   : > { %10286 = vxpose.xlu1.c.b16.start.end [1/1] (short) (narrow) %v8949_v26, 16  ;;  %v9121_v38 = vrot.slane %v9107_v27, %v17463_v29  ;;  %v9137_v1 = vrot.slane %v9123_v57, %v17469_v47  ;;  %v9069_v26 = vrot.slane %v9055_v9, %v17469_v47  ;;  %v8602_v27 = vshrl.u32 %v18553_v16, 16 }
 0x615   : > { %10206 = vxpose.xlu0.c.b16.start.end [1/1] (short) (narrow) %v9019_v51, 16  ;;  %v9122_v51 = vcombine.low %v9098_v36, %v9114_v5  ;;  %v9138_v33 = vcombine.low %v9105_v39, %v9121_v38  ;;  %v9053_v5 = vrot.slane %v9039_v50, %v17463_v29  ;;  %v9037_v36 = vrot.slane %v9023_v2, %v17463_v29 }
 0x616   : > { %v9139_v23 = vcombine.high %v9105_v39, %v9121_v38  ;;  %v9155_v2 = vcombine.high %v9137_v1, %v19915_v20 }
 0x617   : > { %10126 = vxpose.xlu1.c.b16.start.end [1/1] (short) (narrow) %v8950_v55, 16  ;;  %v9130_v11 = vrot.slane %v9122_v51, %v17469_v47  ;;  %v9054_v55 = vcombine.low %v9030_v44, %v9046_v6  ;;  %v9146_v53 = vrot.slane %v9138_v33, %v17469_v47  ;;  %v9070_v31 = vcombine.low %v9037_v36, %v9053_v5 }
 0x618   : > { %v8610_v51 = vshrl.u32 %v18582_v3, 16  ;;  %v9071_v15 = vcombine.high %v9037_v36, %v9053_v5  ;;  %v8594_v6 = vshrl.u32 %v18468_v45, 16  ;;  %v8620_v44 = vpack.i.b16 %v8619_v28, %v8618_v41 }
 0x619   : > { %10270 = vxpose.xlu0.c.b16.start.end [1/1] (short) (narrow) %v9020_v7, 16  ;;  %v9062_v7 = vrot.slane %v9054_v55, %v17469_v47  ;;  %v9078_v8 = vrot.slane %v9070_v31, %v17469_v47  ;;  %v9154_v38 = vcombine.high %v9130_v11, %v19915_v20  ;;  %v8616_v5 = vpack.i.b16 %v18636_v22, %v18651_v58 }
 0x61a   : > { %v8612_v39 = vpack.i.b16 %v8611_v21, %v8610_v51  ;;  %v9085_v50 = vrot.slane %v9071_v15, %v17469_v47  ;;  %v8608_v36 = vpack.i.b16 %v18576_v54, %v18582_v3  ;;  %v9156_v31 = vcombine.high %v9146_v53, %v19915_v20 }
 0x61b   : > { %10190 = vxpose.xlu1.c.b16.start.end [1/1] (short) (narrow) %v8951_v4, 16  ;;  %v9153_v4 = vrot.slane %v9139_v23, %v17469_v47  ;;  %v9086_v9 = vcombine.high %v9062_v7, %v19915_v20  ;;  %v9087_v58 = vcombine.high %v9069_v26, %v19915_v20 }
 0x61d   : > { %10334 = vxpose.xlu0.c.b16.start.end [1/1] (short) (narrow) %v9021_v30, 16  ;;  %v8603_v30 = vshrl.u32 %v18543_v42, 16 }
 0x61f   : > { %10254 = vxpose.xlu1.c.b16.start.end [1/1] (short) (narrow) %v8952_v35, 16  ;;  %v8595_v35 = vshrl.u32 %v18458_v34, 16  ;;  %v8604_v57 = vpack.i.b16 %v8603_v30, %v8602_v27 }
 0x621   : > { %10366 = vxpose.xlu0.c.b16.start.end [1/1] (short) (narrow) %v9130_v11, 16  ;;  %v9242_v55 = vcombine.low %v8604_v57, %v8620_v44  ;;  %v8600_v11 = vpack.i.b16 %v18543_v42, %v18553_v16  ;;  %v9243_v28 = vcombine.high %v8604_v57, %v8620_v44  ;;  %v9157_v42 = vcombine.high %v9153_v4, %v19915_v20 }
 0x623   : > { %10318 = vxpose.xlu1.c.b16.start.end [1/1] (short) (narrow) %v8953_v10, 16  ;;  %v8596_v10 = vpack.i.b16 %v8595_v35, %v8594_v6  ;;  %v9250_v23 = vrot.slane %v9242_v55, %v17463_v29  ;;  %v9174_v22 = vcombine.low %v8600_v11, %v8616_v5  ;;  %v9175_v51 = vcombine.high %v8600_v11, %v8616_v5  ;;  %v19963_v5 = vld [vmem:[#allocation61_spill] sm:$0xff]  ;;  %v19964_v11 = vld [vmem:[#allocation59_spill] sm:$0xff] }
 0x625   : > { %10430 = vxpose.xlu0.c.b16.start.end [1/1] (short) (narrow) %v9137_v1, 16  ;;  %v9226_v33 = vcombine.low %v8596_v10, %v8612_v39  ;;  %v8592_v1 = vpack.i.b16 %v18458_v34, %v18468_v45  ;;  %v9227_v54 = vcombine.high %v8596_v10, %v8612_v39  ;;  %v9182_v3 = vrot.slane %v9174_v22, %v17463_v29 }
 0x626   : > { %v9257_v45 = vrot.slane %v9243_v28, %v17463_v29  ;;  %v9189_v35 = vrot.slane %v9175_v51, %v17463_v29 }
 0x627   : > { %10350 = vxpose.xlu1.c.b16.start.end [1/1] (short) (narrow) %v9062_v7, 16  ;;  %v9234_v41 = vrot.slane %v9226_v33, %v17463_v29  ;;  %v9158_v7 = vcombine.low %v8592_v1, %v8608_v36  ;;  %v9241_v30 = vrot.slane %v9227_v54, %v17463_v29  ;;  %v9159_v15 = vcombine.high %v8592_v1, %v8608_v36 }
 0x628   : > { %v8651_v36 = vshrl.u32 %v19964_v11, 16 }
 0x629   : > { %10494 = vxpose.xlu0.c.b16.start.end [1/1] (short) (narrow) %v9146_v53, 16  ;;  %v9258_v16 = vcombine.low %v9234_v41, %v9250_v23  ;;  %v9088_v53 = vcombine.high %v9078_v8, %v19915_v20  ;;  %v9166_v34 = vrot.slane %v9158_v7, %v17463_v29  ;;  %v9173_v57 = vrot.slane %v9159_v15, %v17463_v29  ;;  %v19967_v7 = vld [vmem:[#allocation42_spill] sm:$0xff] }
 0x62a   : > { %v9275_v10 = vcombine.high %v9241_v30, %v9257_v45  ;;  %v8642_v28 = vshrl.u32 %v19967_v7, 16 }
 0x62b   : > { %10414 = vxpose.xlu1.c.b16.start.end [1/1] (short) (narrow) %v9069_v26, 16  ;;  %v9266_v27 = vrot.slane %v9258_v16, %v17469_v47  ;;  %v9259_v26 = vcombine.high %v9234_v41, %v9250_v23  ;;  %v9190_v21 = vcombine.low %v9166_v34, %v9182_v3  ;;  %v19966_v41 = vld [vmem:[#allocation56_spill] sm:$0xff] }
 0x62c   : > { %v9289_v23 = vrot.slane %v9275_v10, %v17469_v47  ;;  %v8635_v22 = vshrl.u32 %v19966_v41, 16 }
 0x62d   : > { %10558 = vxpose.xlu0.c.b16.start.end [1/1] (short) (narrow) %v9153_v4, 16  ;;  %v9089_v4 = vcombine.high %v9085_v50, %v19915_v20  ;;  %v9273_v6 = vrot.slane %v9259_v26, %v17469_v47  ;;  %v9198_v44 = vrot.slane %v9190_v21, %v17469_v47  ;;  %v9290_v51 = vcombine.high %v9266_v27, %v19915_v20 }
 0x62f   : > { %10478 = vxpose.xlu1.c.b16.start.end [1/1] (short) (narrow) %v9078_v8, 16  ;;  %v9274_v8 = vcombine.low %v9241_v30, %v9257_v45  ;;  %v19970_v45 = vld [vmem:[#allocation54_spill] sm:$0xff] }
 0x630   : > { %v8627_v26 = vshrl.u32 %v19970_v45, 16 }
 0x631   : > { %10398 = vxpose.xlu0.c.b16.start.end [1/1] (short) (narrow) %v9154_v38, 16  ;;  %v9191_v38 = vcombine.high %v9166_v34, %v9182_v3  ;;  %v9282_v39 = vrot.slane %v9274_v8, %v17469_v47  ;;  %v9207_v3 = vcombine.high %v9173_v57, %v9189_v35 }
 0x633   : > { %10542 = vxpose.xlu1.c.b16.start.end [1/1] (short) (narrow) %v9085_v50, 16  ;;  %v9205_v50 = vrot.slane %v9191_v38, %v17469_v47  ;;  %v9221_v38 = vrot.slane %v9207_v3, %v17469_v47 }
 0x635   : > { %10462 = vxpose.xlu0.c.b16.start.end [1/1] (short) (narrow) %v9155_v2, 16  ;;  %v9206_v2 = vcombine.low %v9173_v57, %v9189_v35  ;;  %v9291_v35 = vcombine.high %v9273_v6, %v19915_v20 }
 0x637   : > { %10382 = vxpose.xlu1.c.b16.start.end [1/1] (short) (narrow) %v9086_v9, 16  ;;  %v8650_v9 = vshrl.u32 %v19963_v5, 16  ;;  %v9214_v54 = vrot.slane %v9206_v2, %v17469_v47 }
 0x639   : > { %10526 = vxpose.xlu0.c.b16.start.end [1/1] (short) (narrow) %v9156_v31, 16  ;;  %v19965_v31 = vld [vmem:[#allocation52_spill] sm:$0xff]  ;;  %v8652_v30 = vpack.i.b16 %v8651_v36, %v8650_v9  ;;  %v9222_v36 = vcombine.high %v9198_v44, %v19915_v20 }
 0x63a   : > { %v8634_v1 = vshrl.u32 %v19965_v31, 16 }
 0x63b   : > { %10446 = vxpose.xlu1.c.b16.start.end [1/1] (short) (narrow) %v9087_v58, 16 }
 0x63c   : > { %v8636_v15 = vpack.i.b16 %v8635_v22, %v8634_v1 }
 0x63d   : > { %10590 = vxpose.xlu0.c.b16.start.end [1/1] (short) (narrow) %v9157_v42, 16  ;;  %v19968_v42 = vld [vmem:[#allocation44_spill] sm:$0xff] }
 0x63e   : > { %v8643_v16 = vshrl.u32 %v19968_v42, 16  ;;  %v9378_v2 = vcombine.low %v8636_v15, %v8652_v30  ;;  %v8640_v22 = vpack.i.b16 %v19968_v42, %v19967_v7 }
 0x63f   : > { %10510 = vxpose.xlu1.c.b16.start.end [1/1] (short) (narrow) %v9088_v53, 16  ;;  %v19969_v53 = vld [vmem:[#allocation50_spill] sm:$0xff] }
 0x640   : > { %v8626_v34 = vshrl.u32 %v19969_v53, 16  ;;  %v8644_v8 = vpack.i.b16 %v8643_v16, %v8642_v28  ;;  %v9386_v16 = vrot.slane %v9378_v2, %v17463_v29 }
 0x641   : > { %10622 = vxpose.xlu0.c.b16.start.end [1/1] (short) (narrow) %v9266_v27, 16  ;;  %v18918_v27 = vpack.i.b16 %v19964_v11, %v19963_v5  ;;  %v9292_v5 = vcombine.high %v9282_v39, %v19915_v20 }
 0x642   : > { %v8628_v10 = vpack.i.b16 %v8627_v26, %v8626_v34 }
 0x643   : > { %10574 = vxpose.xlu1.c.b16.start.end [1/1] (short) (narrow) %v9089_v4, 16 }
 0x644   : > { %v9362_v9 = vcombine.low %v8628_v10, %v8644_v8 }
 0x645   : > { %10686 = vxpose.xlu0.c.b16.start.end [1/1] (short) (narrow) %v9273_v6, 16  ;;  %v8632_v6 = vpack.i.b16 %v19966_v41, %v19965_v31 }
 0x646   : > { %v9370_v7 = vrot.slane %v9362_v9, %v17463_v29  ;;  %v9363_v9 = vcombine.high %v8628_v10, %v8644_v8 }
 0x647   : > { %10606 = vxpose.xlu1.c.b16.start.end [1/1] (short) (narrow) %v9198_v44, 16  ;;  %v8624_v44 = vpack.i.b16 %v19970_v45, %v19969_v53  ;;  %v9310_v42 = vcombine.low %v8632_v6, %v18918_v27  ;;  %v9293_v53 = vcombine.high %v9289_v23, %v19915_v20 }
 0x648   : > { %v9394_v45 = vcombine.low %v9370_v7, %v9386_v16  ;;  %v9377_v10 = vrot.slane %v9363_v9, %v17463_v29 }
 0x649   : > { %v18890_v55 = vpop.trf.xlu1  ;;  %10750 = vxpose.xlu0.c.b16.start.end [1/1] (short) (narrow) %v9282_v39, 16  ;;  %v9294_v2 = vcombine.low %v8624_v44, %v8640_v22  ;;  %v9318_v63 = vrot.slane %v9310_v42, %v17463_v29  ;;  %v15129_v42 = vld [vmem:[%s17439_s27] ss:$0 sm:$0xff] }
 0x64b   : > { %v18893_v33 = vpop.trf.xlu0  ;;  %10670 = vxpose.xlu1.c.b16.start.end [1/1] (short) (narrow) %v9205_v50, 16 }
 0x64d   : > { %v18900_v58 = vpop.trf.xlu1  ;;  %10814 = vxpose.xlu0.c.b16.start.end [1/1] (short) (narrow) %v9289_v23, 16  ;;  %v9395_v23 = vcombine.high %v9370_v7, %v9386_v16 }
 0x64f   : > { %10734 = vxpose.xlu1.c.b16.start.end [1/1] (short) (narrow) %v9214_v54, 16  ;;  %v18908_v4 = vpop.trf.xlu0 }
 0x651   : > { %v18910_v21 = vpop.trf.xlu1  ;;  %10654 = vxpose.xlu0.c.b16.start.end [1/1] (short) (narrow) %v9290_v51, 16  ;;  %v9223_v51 = vcombine.high %v9205_v50, %v19915_v20  ;;  %v9302_v50 = vrot.slane %v9294_v2, %v17463_v29  ;;  %v9225_v2 = vcombine.high %v9221_v38, %v19915_v20 }
 0x653   : > { %10798 = vxpose.xlu1.c.b16.start.end [1/1] (short) (narrow) %v9221_v38, 16  ;;  %v18914_v57 = vpop.trf.xlu0 }
 0x655   : > { %10718 = vxpose.xlu0.c.b16.start.end [1/1] (short) (narrow) %v9291_v35, 16  ;;  %v18921_v1 = vpop.trf.xlu1  ;;  %v9379_v35 = vcombine.high %v8636_v15, %v8652_v30 }
 0x656   : > { %v11902_v16 = vcombine.low %v18910_v21, %v18921_v1 }
 0x657   : > { %v18925_v28 = vpop.f32.mrb[12].mxu0  ;;  %10638 = vxpose.xlu1.c.b16.start.end [1/1] (short) (narrow) %v9222_v36, 16  ;;  %v18931_v11 = vpop.trf.xlu0  ;;  %v9393_v30 = vrot.slane %v9379_v35, %v17463_v29  ;;  %v9326_v35 = vcombine.low %v9302_v50, %v9318_v63 }
 0x658   : > { %v15394_v3 = vpop.f32.mrb[13].mxu0 }
 0x659   : > { %v18935_v34 = vpop.f32.mrb[12].mxu1  ;;  %v8182_v26 = vpop.f32.mrb[14].mxu0  ;;  %10782 = vxpose.xlu0.c.b16.start.end [1/1] (short) (narrow) %v9292_v5, 16  ;;  %v9224_v5 = vcombine.high %v9214_v54, %v19915_v20  ;;  %v9311_v54 = vcombine.high %v8632_v6, %v18918_v27  ;;  %v11952_v27 = vcombine.low %v18914_v57, %v18931_v11  ;;  %v18973_v1 = vrot.slane %v9326_v35, %v17469_v47 }
 0x65a   : > { %v15395_v31 = vpop.f32.mrb[15].mxu0  ;;  %v15414_v41 = vpop.f32.mrb[13].mxu1  ;;  %v11909_v57 = vrot.slane %v11902_v16, %v17463_v29  ;;  %v11936_v11 = vcombine.low %v18893_v33, %v18908_v4  ;;  %v19972_v4 = vld [vmem:[#allocation63_spill] sm:$0xff] }
 0x65b   : > { %v8222_v39 = vpop.f32.mrb[14].mxu1  ;;  %v9878_v36 = vpop.trf.xlu1  ;;  %10702 = vxpose.xlu1.c.b16.start.end [1/1] (short) (narrow) %v9223_v51, 16  ;;  %v18948_v31 = vrot.slane %v9394_v45, %v17469_v47  ;;  %v11886_v41 = vcombine.low %v18890_v55, %v18900_v58  ;;  %v18960_v55 = vrot.slane %v9395_v23, %v17469_v47  ;;  %v9325_v21 = vrot.slane %v9311_v54, %v17463_v29 }
 0x65c   : > { %v15415_v3 = vpop.f32.mrb[15].mxu1  ;;  %v18941_v26 = vpop.trf.xlu0  ;;  %v9295_v39 = vcombine.high %v8624_v44, %v8640_v22  ;;  %v19971_v44 = vld [vmem:[#allocation46_spill] sm:$0xff]  ;;  %v9327_v45 = vcombine.high %v9302_v50, %v9318_v63  ;;  %v11943_v35 = vrot.slane %v11936_v11, %v17463_v29 }
 0x65d   : > { %10846 = vxpose.xlu0.c.b16.start.end [1/1] (short) (narrow) %v9293_v53, 16  ;;  %v9410_v3 = vcombine.low %v9377_v10, %v9393_v30  ;;  %v11893_v58 = vrot.slane %v11886_v41, %v17463_v29  ;;  %v18967_v38 = vmul.f32 %v15129_v42, %v19971_v44  ;;  %v11959_v41 = vrot.slane %v11952_v27, %v17463_v29 }
 0x65e   : > { %v9309_v53 = vrot.slane %v9295_v39, %v17463_v29  ;;  %v18989_v50 = vrot.slane %v9327_v45, %v17469_v47  ;;  %v19973_v39 = vld [vmem:[#allocation60_spill] sm:$0xff]  ;;  %v19975_v45 = vld [vmem:[#allocation51_spill] sm:$0xff]  ;;  %v9426_v48 = vcombine.high %v18948_v31, %v19915_v20 }
 0x65f   : > { %v9942_v15 = vpop.trf.xlu1  ;;  %10766 = vxpose.xlu1.c.b16.start.end [1/1] (short) (narrow) %v9224_v5, 16  ;;  %v18976_v9 = vrot.slane %v9410_v3, %v17469_v47  ;;  %v9411_v5 = vcombine.high %v9377_v10, %v9393_v30  ;;  %v3405_v63 = vsub.f32 1.0, %v18967_v38  ;;  %v8682_v10 = vshrl.u32 %v19972_v4, 16 }
 0x660   : > { %v11894_v51 = vcombine.low %v9878_v36, %v9942_v15  ;;  %v10022_v8 = vpop.trf.xlu0  ;;  %v9342_v30 = vcombine.low %v9309_v53, %v9325_v21  ;;  %v8683_v54 = vshrl.u32 %v19973_v39, 16 }
 0x661   : > { %10878 = vxpose.xlu0.c.b16.start.end [1/1] (short) (narrow) %v18948_v31, 16 }
 0x662   : > { %v11901_v22 = vrot.slane %v11894_v51, %v17463_v29  ;;  %v19009_v11 = vrot.slane %v9342_v30, %v17469_v47  ;;  %v19015_v59 = vpack.i.b16 %v8683_v54, %v8682_v10 }
 0x663   : > { %v10006_v7 = vpop.trf.xlu1  ;;  %10830 = vxpose.xlu1.c.b16.start.end [1/1] (short) (narrow) %v9225_v2, 16  ;;  %v18995_v2 = vrot.slane %v9411_v5, %v17469_v47 }
 0x664   : > { %v10086_v6 = vpop.trf.xlu0  ;;  %v11918_v23 = vcombine.low %v11893_v58, %v11901_v22 }
 0x665   : > { %v11960_v36 = vcombine.low %v10022_v8, %v10086_v6  ;;  %10942 = vxpose.xlu0.c.b16.start.end [1/1] (short) (narrow) %v18960_v55, 16  ;;  %v19974_v6 = vld [vmem:[#allocation41_spill] sm:$0xff] }
 0x666   : > { %v11925_v16 = vrot.slane %v11918_v23, %v17469_v47  ;;  %v9343_v23 = vcombine.high %v9309_v53, %v9325_v21 }
 0x667   : > { %v10070_v15 = vpop.trf.xlu1  ;;  %10862 = vxpose.xlu1.c.b16.start.end [1/1] (short) (narrow) %v18973_v1, 16  ;;  %v11967_v8 = vrot.slane %v11960_v36, %v17463_v29  ;;  %v8666_v36 = vshrl.u32 %v19974_v6, 16 }
 0x668   : > { %v11910_v51 = vcombine.low %v10006_v7, %v10070_v15  ;;  %v18984_v42 = vpop.trf.xlu0  ;;  %v8667_v15 = vshrl.u32 %v19975_v45, 16  ;;  %v19032_v10 = vrot.slane %v9343_v23, %v17469_v47  ;;  %v19058_v23 = vpack.i.b16 %v19973_v39, %v19972_v4 }
 0x669   : > { %11006 = vxpose.xlu0.c.b16.start.end [1/1] (short) (narrow) %v18976_v9, 16  ;;  %v11976_v22 = vcombine.low %v11959_v41, %v11967_v8  ;;  %v19978_v41 = vld [vmem:[#allocation47_spill] sm:$0xff] }
 0x66a   : > { %v11917_v33 = vrot.slane %v11910_v51, %v17463_v29  ;;  %v19976_v51 = vld [vmem:[#allocation57_spill] sm:$0xff]  ;;  %v8658_v8 = vshrl.u32 %v19978_v41, 16  ;;  %v19027_v46 = vpack.i.b16 %v8667_v15, %v8666_v36 }
 0x66b   : > { %v9894_v3 = vpop.trf.xlu1  ;;  %10926 = vxpose.xlu1.c.b16.start.end [1/1] (short) (narrow) %v18989_v50, 16  ;;  %v8674_v5 = vshrl.u32 %v19976_v51, 16  ;;  %v11983_v53 = vrot.slane %v11976_v22, %v17469_v47  ;;  %v19039_v22 = vmul.f32 -883.8835, %v3405_v63 }
 0x66c   : > { %v11926_v7 = vcombine.low %v11909_v57, %v11917_v33  ;;  %v11944_v58 = vcombine.low %v9894_v3, %v18941_v26  ;;  %v19001_v27 = vpop.trf.xlu0  ;;  %v19979_v33 = vld [vmem:[#allocation49_spill] sm:$0xff] }
 0x66d   : > { %11070 = vxpose.xlu0.c.b16.start.end [1/1] (short) (narrow) %v18995_v2, 16  ;;  %v8659_v3 = vshrl.u32 %v19979_v33, 16  ;;  %v19029_v14 = vpack.i.b16 %v8675_v49, %v8674_v5  ;;  %v9427_v49 = vcombine.high %v18960_v55, %v19915_v20  ;;  %v19052_v5 = vpack.i.b16 %v19975_v45, %v19974_v6 }
 0x66e   : > { %v11933_v57 = vrot.slane %v11926_v7, %v17469_v47  ;;  %v11951_v26 = vrot.slane %v11944_v58, %v17463_v29  ;;  %v9358_v55 = vcombine.high %v18973_v1, %v19915_v20  ;;  %v19067_v6 = vpack.i.b16 %v19977_v43, %v19976_v51 }
 0x66f   : > { %v19019_v12 = vpop.trf.xlu1  ;;  %10990 = vxpose.xlu1.c.b16.start.end [1/1] (short) (narrow) %v19009_v11, 16  ;;  %v19035_v54 = vpack.i.b16 %v8659_v3, %v8658_v8 }
 0x670   : > { %v11968_v30 = vcombine.low %v11943_v35, %v11951_v26  ;;  %v11934_v21 = vcombine.low %v11925_v16, %v11933_v57  ;;  %v19023_v7 = vpop.trf.xlu0  ;;  %v19025_v58 = vcombine.high %v11925_v16, %v11933_v57  ;;  %v9514_v35 = vcombine.low %v19027_v46, %v19015_v59 }
 0x671   : > { %10910 = vxpose.xlu0.c.b16.start.end [1/1] (short) (narrow) %v9426_v48, 16  ;;  %v9498_v63 = vcombine.low %v19035_v54, %v19029_v14 }
 0x672   : > { %v11975_v31 = vrot.slane %v11968_v30, %v17469_v47  ;;  %v12689_v16 = vshrl.u32 %v11934_v21, 16  ;;  %v12695_v57 = vshrl.u32 %v19025_v58, 16  ;;  %v9522_v45 = vrot.slane %v9514_v35, %v17463_v29 }
 0x673   : > { %v19041_v26 = vpop.trf.xlu1  ;;  %11054 = vxpose.xlu1.c.b16.start.end [1/1] (short) (narrow) %v19032_v10, 16  ;;  %v8656_v35 = vpack.i.b16 %v19979_v33, %v19978_v41 }
 0x674   : > { %v11984_v48 = vcombine.low %v11975_v31, %v11983_v53  ;;  %v19046_v36 = vpop.trf.xlu0  ;;  %v19048_v15 = vcombine.high %v11975_v31, %v11983_v53  ;;  %v9428_v31 = vcombine.high %v18976_v9, %v19915_v20 }
 0x675   : > { %10974 = vxpose.xlu0.c.b16.start.end [1/1] (short) (narrow) %v9427_v49, 16  ;;  %v9506_v49 = vrot.slane %v9498_v63, %v17463_v29  ;;  %v9430_v63 = vcombine.low %v8656_v35, %v19067_v6 }
 0x676   : > { %v12688_v8 = vpack.i.b16 %v11984_v48, %v11934_v21  ;;  %v12690_v3 = vshrl.u32 %v11984_v48, 16  ;;  %v12696_v39 = vshrl.u32 %v19048_v15, 16 }
 0x677   : > { %v8259_v53 = vpop.f32.mrb[16].mxu0  ;;  %v19070_v4 = vpop.trf.xlu1  ;;  %10894 = vxpose.xlu1.c.b16.start.end [1/1] (short) (narrow) %v9358_v55, 16  ;;  %v9446_v55 = vcombine.low %v19052_v5, %v19058_v23 }
 0x678   : > { %v19074_v1 = vadd.f32 %v8259_v53, %v19039_v22  ;;  %v15434_v21 = vpop.f32.mrb[17].mxu0  ;;  %15458 = vmatprep.mubr.msk.bf16.mxu0 %vm8305_vm1, %v12688_v8  ;;  %v12691_v43 = vpack.i.b16 %v12690_v3, %v12689_v16  ;;  %v10150_v51 = vpop.trf.xlu0  ;;  %v19082_v44 = vpack.i.b16 %v12696_v39, %v12695_v57  ;;  %v9359_v16 = vcombine.high %v18989_v50, %v19915_v20 }
 0x679   : > { %v8299_v48 = vpop.f32.mrb[16].mxu1  ;;  %v8262_v30 = vpop.f32.mrb[18].mxu0  ;;  %11038 = vxpose.xlu0.c.b16.start.end [1/1] (short) (narrow) %v9428_v31, 16  ;;  %v9515_v57 = vcombine.high %v19027_v46, %v19015_v59  ;;  %v9530_v39 = vcombine.low %v9506_v49, %v9522_v45  ;;  %v12036_v50 = vcombine.low %v18984_v42, %v19001_v27  ;;  %v9360_v46 = vcombine.high %v19009_v11, %v19915_v20 }
 0x67a   : > { %v19087_v53 = vadd.f32 %v8299_v48, %v19039_v22  ;;  %v15435_v9 = vpop.f32.mrb[19].mxu0  ;;  %v15454_v8 = vpop.f32.mrb[17].mxu1  ;;  %15476 = vmatprep.mubr.msk.bf16.mxu1 %vm8305_vm1, %v12691_v43  ;;  %v9429_v30 = vcombine.high %v18995_v2, %v19915_v20  ;;  %v9499_v43 = vcombine.high %v19035_v54, %v19029_v14  ;;  %v9454_v48 = vrot.slane %v9446_v55, %v17463_v29 }
 0x67b   : > { %v8302_v41 = vpop.f32.mrb[18].mxu1  ;;  %v19092_v33 = vpop.trf.xlu1  ;;  %10958 = vxpose.xlu1.c.b16.start.end [1/1] (short) (narrow) %v9359_v16, 16  ;;  %v9438_v9 = vrot.slane %v9430_v63, %v17463_v29  ;;  %v19108_v2 = vrot.slane %v9515_v57, %v17463_v29  ;;  %v9538_v8 = vrot.slane %v9530_v39, %v17469_v47  ;;  %v9531_v42 = vcombine.high %v9506_v49, %v9522_v45 }
 0x67c   : > { %v15455_v3 = vpop.f32.mrb[19].mxu1  ;;  %v10214_v21 = vpop.trf.xlu0  ;;  %v12052_v14 = vcombine.low %v19023_v7, %v19046_v36  ;;  %v19116_v11 = vrot.slane %v9499_v43, %v17463_v29  ;;  %v9447_v55 = vcombine.high %v19052_v5, %v19058_v23  ;;  %v9361_v16 = vcombine.high %v19032_v10, %v19915_v20 }
 0x67d   : > { %v12044_v31 = vcombine.low %v10150_v51, %v10214_v21  ;;  %11102 = vxpose.xlu0.c.b16.start.end [1/1] (short) (narrow) %v9429_v30, 16  ;;  %v12043_v51 = vrot.slane %v12036_v50, %v17463_v29  ;;  %v9462_v41 = vcombine.low %v9438_v9, %v9454_v48  ;;  %v9431_v45 = vcombine.high %v8656_v35, %v19067_v6 }
 0x67e   : > { %v9545_v63 = vrot.slane %v9531_v42, %v17469_v47  ;;  %v9546_v7 = vcombine.low %v19116_v11, %v19108_v2  ;;  %v11986_v36 = vcombine.low %v19019_v12, %v19041_v26  ;;  %v12059_v5 = vrot.slane %v12052_v14, %v17463_v29 }
 0x67f   : > { %v10134_v59 = vpop.trf.xlu1  ;;  %11022 = vxpose.xlu1.c.b16.start.end [1/1] (short) (narrow) %v9360_v46, 16  ;;  %v12051_v54 = vrot.slane %v12044_v31, %v17463_v29  ;;  %v19130_v10 = vrot.slane %v9447_v55, %v17463_v29  ;;  %v9470_v6 = vrot.slane %v9462_v41, %v17469_v47  ;;  %v9463_v35 = vcombine.high %v9438_v9, %v9454_v48 }
 0x680   : > { %v10278_v27 = vpop.trf.xlu0  ;;  %v19134_v39 = vrot.slane %v9431_v45, %v17463_v29  ;;  %v9554_v12 = vrot.slane %v9546_v7, %v17469_v47  ;;  %v11993_v26 = vrot.slane %v11986_v36, %v17463_v29  ;;  %v12002_v31 = vcombine.low %v19070_v4, %v19092_v33 }
 0x681   : > { %11134 = vxpose.xlu0.c.b16.start.end [1/1] (short) (narrow) %v9538_v8, 16  ;;  %v12068_v23 = vcombine.low %v12043_v51, %v12051_v54  ;;  %v9477_v9 = vrot.slane %v9463_v35, %v17469_v47  ;;  %v9562_v4 = vcombine.high %v9538_v8, %v19915_v20  ;;  %v9563_v7 = vcombine.high %v9545_v63, %v19915_v20 }
 0x682   : > { %v9478_v42 = vcombine.low %v19134_v39, %v19130_v10  ;;  %v12009_v33 = vrot.slane %v12002_v31, %v17463_v29  ;;  %v9547_v35 = vcombine.high %v19116_v11, %v19108_v2  ;;  %v19990_v31 = vld [vmem:[#allocation53_spill] sm:$0xff] }
 0x683   : > { %v10198_v49 = vpop.trf.xlu1  ;;  %11086 = vxpose.xlu1.c.b16.start.end [1/1] (short) (narrow) %v9361_v16, 16 }
 0x684   : > { %v11994_v57 = vcombine.low %v10134_v59, %v10198_v49  ;;  %v10342_v3 = vpop.trf.xlu0  ;;  %v19143_v59 = vrot.slane %v12068_v23, %v17469_v47  ;;  %v9486_v41 = vrot.slane %v9478_v42, %v17469_v47 }
 0x685   : > { %v12060_v30 = vcombine.low %v10278_v27, %v10342_v3  ;;  %11198 = vxpose.xlu0.c.b16.start.end [1/1] (short) (narrow) %v9545_v63, 16  ;;  %v9494_v3 = vcombine.high %v9470_v6, %v19915_v20 }
 0x686   : > { %v12001_v43 = vrot.slane %v11994_v57, %v17463_v29  ;;  %v9496_v42 = vcombine.high %v9486_v41, %v19915_v20 }
 0x687   : > { %v10262_v21 = vpop.trf.xlu1  ;;  %v12067_v50 = vrot.slane %v12060_v30, %v17463_v29  ;;  %11118 = vxpose.xlu1.c.b16.start.end [1/1] (short) (narrow) %v9470_v6, 16  ;;  %v9564_v30 = vcombine.high %v9554_v12, %v19915_v20  ;;  %v9495_v6 = vcombine.high %v9477_v9, %v19915_v20 }
 0x688   : > { %v10374_v46 = vpop.trf.xlu0  ;;  %v12018_v14 = vcombine.low %v11993_v26, %v12001_v43 }
 0x689   : > { %v12076_v48 = vcombine.low %v12059_v5, %v12067_v50  ;;  %11262 = vxpose.xlu0.c.b16.start.end [1/1] (short) (narrow) %v9554_v12, 16  ;;  %v9561_v12 = vrot.slane %v9547_v35, %v17469_v47 }
 0x68a   : > { %v19161_v8 = vrot.slane %v12018_v14, %v17469_v47 }
 0x68b   : > { %v10326_v27 = vpop.trf.xlu1  ;;  %v19149_v51 = vrot.slane %v12076_v48, %v17469_v47  ;;  %11182 = vxpose.xlu1.c.b16.start.end [1/1] (short) (narrow) %v9477_v9, 16  ;;  %v9582_v48 = vcombine.low %v18681_v0, %v18685_v60  ;;  %v9479_v9 = vcombine.high %v19134_v39, %v19130_v10 }
 0x68c   : > { %v12010_v54 = vcombine.low %v10262_v21, %v10326_v27  ;;  %v10438_v55 = vpop.trf.xlu0 }
 0x68d   : > { %v19155_v16 = vcombine.high %v19143_v59, %v19149_v51  ;;  %11166 = vxpose.xlu0.c.b16.start.end [1/1] (short) (narrow) %v9562_v4, 16  ;;  %v9566_v4 = vcombine.low %v18596_v62, %v18600_v56  ;;  %v9493_v60 = vrot.slane %v9479_v9, %v17469_v47 }
 0x68e   : > { %v12017_v45 = vrot.slane %v12010_v54, %v17463_v29  ;;  %v12136_v54 = vcombine.low %v10374_v46, %v10438_v55 }
 0x68f   : > { %v10358_v49 = vpop.trf.xlu1  ;;  %11246 = vxpose.xlu1.c.b16.start.end [1/1] (short) (narrow) %v9486_v41, 16  ;;  %v12708_v21 = vshrl.u32 %v19155_v16, 16  ;;  %v19195_v41 = vrot.slane %v9566_v4, %v17463_v29  ;;  %v9497_v46 = vcombine.high %v9493_v60, %v19915_v20 }
 0x690   : > { %v12026_v36 = vcombine.low %v12009_v33, %v12017_v45  ;;  %v10502_v57 = vpop.trf.xlu0  ;;  %v9565_v33 = vcombine.high %v9561_v12, %v19915_v20  ;;  %v12143_v62 = vrot.slane %v12136_v54, %v17463_v29 }
 0x691   : > { %11230 = vxpose.xlu0.c.b16.start.end [1/1] (short) (narrow) %v9563_v7, 16  ;;  %v19191_v7 = vrot.slane %v9582_v48, %v17463_v29 }
 0x692   : > { %v19165_v5 = vrot.slane %v12026_v36, %v17469_v47 }
 0x693   : > { %v10422_v23 = vpop.trf.xlu1  ;;  %11150 = vxpose.xlu1.c.b16.start.end [1/1] (short) (narrow) %v9494_v3, 16  ;;  %v9598_v55 = vcombine.low %v19195_v41, %v19191_v7 }
 0x694   : > { %v19172_v63 = vcombine.high %v19161_v8, %v19165_v5  ;;  %v10566_v50 = vpop.trf.xlu0  ;;  %v12086_v3 = vcombine.low %v10358_v49, %v10422_v23 }
 0x695   : > { %11294 = vxpose.xlu0.c.b16.start.end [1/1] (short) (narrow) %v9564_v30, 16  ;;  %v12152_v56 = vcombine.low %v10502_v57, %v10566_v50  ;;  %v19208_v57 = vrot.slane %v9598_v55, %v17469_v47 }
 0x696   : > { %v12707_v26 = vshrl.u32 %v19172_v63, 16  ;;  %v12093_v49 = vrot.slane %v12086_v3, %v17463_v29 }
 0x697   : > { %v10486_v43 = vpop.trf.xlu1  ;;  %11214 = vxpose.xlu1.c.b16.start.end [1/1] (short) (narrow) %v9495_v6, 16 }
 0x698   : > { %v19180_v2 = vpack.i.b16 %v12708_v21, %v12707_v26  ;;  %v10406_v11 = vpop.trf.xlu0  ;;  %v12159_v21 = vrot.slane %v12152_v56, %v17463_v29  ;;  %v19226_v56 = vadd.f32 %v18925_v28, %v19039_v22 }
 0x699   : > { %11326 = vxpose.xlu0.c.b16.start.end [1/1] (short) (narrow) %v9561_v12, 16  ;;  %v19205_v12 = vadd.f32 %v18935_v34, %v19039_v22 }
 0x69a   : > { %19980 = vst [vmem:[#allocation61_spill] sm:$0xff] %v19180_v2 }
 0x69b   : > { %v10550_v27 = vpop.trf.xlu1  ;;  %11278 = vxpose.xlu1.c.b16.start.end [1/1] (short) (narrow) %v9496_v42, 16  ;;  %v8309_v34 = vsel %vm8305_vm1, %v19205_v12, -inf }
 0x69c   : > { %v10470_v14 = vpop.trf.xlu0  ;;  %v12102_v23 = vcombine.low %v10486_v43, %v10550_v27 }
 0x69d   : > { %v12144_v45 = vcombine.low %v10406_v11, %v10470_v14  ;;  %11358 = vxpose.xlu0.c.b16.start.end [1/1] (short) (narrow) %v9565_v33, 16 }
 0x69e   : > { %v12109_v54 = vrot.slane %v12102_v23, %v17463_v29 }
 0x69f   : > { %v10390_v0 = vpop.trf.xlu1  ;;  %11310 = vxpose.xlu1.c.b16.start.end [1/1] (short) (narrow) %v9493_v60, 16  ;;  %v12151_v39 = vrot.slane %v12144_v45, %v17463_v29 }
 0x6a0   : > { %v10534_v10 = vpop.trf.xlu0 }
 0x6a1   : > { %v12168_v6 = vcombine.low %v12143_v62, %v12151_v39 }
 0x6a3   : > { %v10454_v36 = vpop.trf.xlu1  ;;  %11342 = vxpose.xlu1.c.b16.start.end [1/1] (short) (narrow) %v9497_v46, 16  ;;  %v12175_v9 = vrot.slane %v12168_v6, %v17469_v47 }
 0x6a4   : > { %v12094_v30 = vcombine.low %v10390_v0, %v10454_v36  ;;  %v10598_v35 = vpop.trf.xlu0 }
 0x6a5   : > { %v12160_v26 = vcombine.low %v10534_v10, %v10598_v35 }
 0x6a6   : > { %v12101_v48 = vrot.slane %v12094_v30, %v17463_v29  ;;  %v8306_v30 = vsel %vm8305_vm1, %v19226_v56, -inf }
 0x6a7   : > { %v10518_v50 = vpop.trf.xlu1  ;;  %v12167_v11 = vrot.slane %v12160_v26, %v17463_v29  ;;  %11374 = vxpose.xlu1.c.b16.start.end [1/1] (short) (narrow) %v19208_v57, 16 }
 0x6a8   : > { %v10630_v42 = vpop.trf.xlu0  ;;  %v12118_v45 = vcombine.low %v12093_v49, %v12101_v48 }
 0x6a9   : > { %v12176_v4 = vcombine.low %v12159_v21, %v12167_v11 }
 0x6aa   : > { %8310 = vmax.xlane.f32.xlu0 %v8309_v34  ;;  %v12125_v46 = vrot.slane %v12118_v45, %v17469_v47 }
 0x6ab   : > { %v10582_v33 = vpop.trf.xlu1  ;;  %v12183_v14 = vrot.slane %v12176_v4, %v17469_v47 }
 0x6ac   : > { %v12110_v60 = vcombine.low %v10518_v50, %v10582_v33  ;;  %v10694_v0 = vpop.trf.xlu0 }
 0x6ad   : > { %v19219_v10 = vcombine.low %v12175_v9, %v12183_v14  ;;  %v19221_v43 = vcombine.high %v12175_v9, %v12183_v14  ;;  %v12236_v27 = vcombine.low %v10630_v42, %v10694_v0 }
 0x6ae   : > { %v12117_v62 = vrot.slane %v12110_v60, %v17463_v29 }
 0x6af   : > { %19981 = vst [vmem:[#allocation59_spill] sm:$0xff] %v19221_v43  ;;  %v10614_v39 = vpop.trf.xlu1  ;;  %v12714_v28 = vshrl.u32 %v19219_v10, 16  ;;  %v12720_v11 = vshrl.u32 %v19221_v43, 16  ;;  %v12243_v60 = vrot.slane %v12236_v27, %v17463_v29 }
 0x6b0   : > { %v12126_v55 = vcombine.low %v12109_v54, %v12117_v62  ;;  %v10758_v36 = vpop.trf.xlu0 }
 0x6b2   : > { %v12133_v3 = vrot.slane %v12126_v55, %v17469_v47 }
 0x6b3   : > { %v10678_v35 = vpop.trf.xlu1 }
 0x6b4   : > { %v19232_v21 = vcombine.low %v12125_v46, %v12133_v3  ;;  %v19234_v6 = vcombine.high %v12125_v46, %v12133_v3  ;;  %v12186_v26 = vcombine.low %v10614_v39, %v10678_v35  ;;  %v10822_v50 = vpop.trf.xlu0  ;;  %8307 = vmax.xlane.f32.xlu1 %v8306_v30  ;;  %v19984_v3 = vld [vmem:[#allocation62_spill] sm:$0xff]  ;;  %v19985_v35 = vld [vmem:[#allocation40_spill] sm:$0xff] }
 0x6b5   : > { %v12252_v22 = vcombine.low %v10758_v36, %v10822_v50  ;;  %v8714_v36 = vshrl.u32 %v18676_v13, 16  ;;  %v8715_v30 = vshrl.u32 %v19984_v3, 16  ;;  %v8698_v50 = vshrl.u32 %v19985_v35, 16 }
 0x6b6   : > { %19982 = vst [vmem:[#allocation52_spill] sm:$0xff] %v19234_v6  ;;  %v12713_v49 = vshrl.u32 %v19232_v21, 16  ;;  %v12719_v9 = vshrl.u32 %v19234_v6, 16  ;;  %v12193_v27 = vrot.slane %v12186_v26, %v17463_v29  ;;  %v8691_v3 = vshrl.u32 %v19990_v31, 16 }
 0x6b7   : > { %v10742_v42 = vpop.trf.xlu1  ;;  %v8716_v23 = vpack.i.b16 %v8715_v30, %v8714_v36 }
 0x6b8   : > { %v10662_v4 = vpop.trf.xlu0  ;;  %v19244_v34 = vpack.i.b16 %v12714_v28, %v12713_v49  ;;  %v19246_v33 = vpack.i.b16 %v12720_v11, %v12719_v9  ;;  %v19986_v28 = vld [vmem:[#allocation55_spill] sm:$0xff]  ;;  %v19987_v9 = vld [vmem:[#allocation58_spill] sm:$0xff] }
 0x6b9   : > { %v8699_v11 = vshrl.u32 %v19986_v28, 16 }
 0x6ba   : > { %19983 = vst [vmem:[#allocation56_spill] sm:$0xff] %v19246_v33 }
 0x6bb   : > { %v10806_v14 = vpop.trf.xlu1 }
 0x6bc   : > { %v12202_v54 = vcombine.low %v10742_v42, %v10806_v14  ;;  %v10726_v45 = vpop.trf.xlu0  ;;  %v8706_v42 = vshrl.u32 %v19987_v9, 16  ;;  %v19988_v14 = vld [vmem:[#allocation45_spill] sm:$0xff]  ;;  %v8700_v9 = vpack.i.b16 %v8699_v11, %v8698_v50 }
 0x6bd   : > { %v12244_v0 = vcombine.low %v10662_v4, %v10726_v45  ;;  %v8707_v48 = vshrl.u32 %v19988_v14, 16 }
 0x6be   : > { %v12209_v31 = vrot.slane %v12202_v54, %v17463_v29 }
 0x6bf   : > { %v10646_v62 = vpop.trf.xlu1  ;;  %v12251_v39 = vrot.slane %v12244_v0, %v17463_v29  ;;  %v12259_v0 = vrot.slane %v12252_v22, %v17463_v29  ;;  %v8708_v2 = vpack.i.b16 %v8707_v48, %v8706_v42  ;;  %v9650_v22 = vcombine.low %v8700_v9, %v8716_v23 }
 0x6c0   : > { %v10790_v46 = vpop.trf.xlu0 }
 0x6c1   : > { %v12268_v55 = vcombine.low %v12243_v60, %v12251_v39  ;;  %v19989_v39 = vld [vmem:[#allocation48_spill] sm:$0xff]  ;;  %v9658_v50 = vrot.slane %v9650_v22, %v17463_v29 }
 0x6c2   : > { %v8690_v13 = vshrl.u32 %v19989_v39, 16 }
 0x6c3   : > { %v10710_v49 = vpop.trf.xlu1  ;;  %v12275_v26 = vrot.slane %v12268_v55, %v17469_v47 }
 0x6c4   : > { %v12194_v4 = vcombine.low %v10646_v62, %v10710_v49  ;;  %v10854_v45 = vpop.trf.xlu0  ;;  %v8692_v49 = vpack.i.b16 %v8691_v3, %v8690_v13 }
 0x6c5   : > { %v12260_v60 = vcombine.low %v10790_v46, %v10854_v45 }
 0x6c6   : > { %v12201_v35 = vrot.slane %v12194_v4, %v17463_v29  ;;  %v9634_v39 = vcombine.low %v8692_v49, %v8708_v2 }
 0x6c7   : > { %v10774_v28 = vpop.trf.xlu1  ;;  %v12267_v33 = vrot.slane %v12260_v60, %v17463_v29 }
 0x6c8   : > { %v12218_v14 = vcombine.low %v12193_v27, %v12201_v35  ;;  %v10886_v6 = vpop.trf.xlu0  ;;  %v9642_v11 = vrot.slane %v9634_v39, %v17463_v29 }
 0x6c9   : > { %v12276_v62 = vcombine.low %v12259_v0, %v12267_v33 }
 0x6ca   : > { %v12225_v42 = vrot.slane %v12218_v14, %v17469_v47  ;;  %v9666_v13 = vcombine.low %v9642_v11, %v9658_v50 }
 0x6cb   : > { %v10838_v46 = vpop.trf.xlu1  ;;  %v12283_v45 = vrot.slane %v12276_v62, %v17469_v47 }
 0x6cc   : > { %v12210_v36 = vcombine.low %v10774_v28, %v10838_v46  ;;  %v10950_v30 = vpop.trf.xlu0 }
 0x6cd   : > { %v19265_v4 = vcombine.low %v12275_v26, %v12283_v45  ;;  %v19267_v60 = vcombine.high %v12275_v26, %v12283_v45  ;;  %v12336_v48 = vcombine.low %v10886_v6, %v10950_v30  ;;  %v9674_v45 = vrot.slane %v9666_v13, %v17469_v47 }
 0x6ce   : > { %v12217_v55 = vrot.slane %v12210_v36, %v17463_v29  ;;  %v9667_v13 = vcombine.high %v9642_v11, %v9658_v50 }
 0x6cf   : > { %19991 = vst [vmem:[#allocation42_spill] sm:$0xff] %v19267_v60  ;;  %v10870_v33 = vpop.trf.xlu1  ;;  %v12726_v62 = vshrl.u32 %v19265_v4, 16  ;;  %v12732_v46 = vshrl.u32 %v19267_v60, 16 }
 0x6d0   : > { %v12226_v27 = vcombine.low %v12209_v31, %v12217_v55  ;;  %v11014_v0 = vpop.trf.xlu0  ;;  %v12343_v31 = vrot.slane %v12336_v48, %v17463_v29  ;;  %v9681_v43 = vrot.slane %v9667_v13, %v17469_v47 }
 0x6d2   : > { %v12233_v54 = vrot.slane %v12226_v27, %v17469_v47  ;;  %v9651_v27 = vcombine.high %v8700_v9, %v8716_v23  ;;  %v9630_v9 = vcombine.high %v19208_v57, %v19915_v20  ;;  %v9699_v48 = vcombine.high %v9681_v43, %v19915_v20 }
 0x6d3   : > { %v10934_v3 = vpop.trf.xlu1 }
 0x6d4   : > { %v19274_v35 = vcombine.low %v12225_v42, %v12233_v54  ;;  %v19276_v28 = vcombine.high %v12225_v42, %v12233_v54  ;;  %v12286_v6 = vcombine.low %v10870_v33, %v10934_v3  ;;  %v11078_v26 = vpop.trf.xlu0  ;;  %v9635_v3 = vcombine.high %v8692_v49, %v8708_v2 }
 0x6d5   : > { %v12352_v22 = vcombine.low %v11014_v0, %v11078_v26  ;;  %v9698_v0 = vcombine.high %v9674_v45, %v19915_v20  ;;  %v9599_v2 = vcombine.high %v19195_v41, %v19191_v7 }
 0x6d6   : > { %19992 = vst [vmem:[#allocation44_spill] sm:$0xff] %v19276_v28  ;;  %v12725_v14 = vshrl.u32 %v19274_v35, 16  ;;  %v12731_v30 = vshrl.u32 %v19276_v28, 16  ;;  %v9665_v28 = vrot.slane %v9651_v27, %v17463_v29  ;;  %v9649_v23 = vrot.slane %v9635_v3, %v17463_v29 }
 0x6d7   : > { %v10998_v36 = vpop.trf.xlu1  ;;  %11390 = vxpose.xlu0.c.b16.start.end [1/1] (short) (narrow) %v9674_v45, 16  ;;  %v12359_v57 = vrot.slane %v12352_v22, %v17463_v29 }
 0x6d8   : > { %v10918_v55 = vpop.trf.xlu0  ;;  %v19287_v33 = vpack.i.b16 %v12726_v62, %v12725_v14  ;;  %v19289_v42 = vpack.i.b16 %v12732_v46, %v12731_v30  ;;  %v9682_v11 = vcombine.low %v9649_v23, %v9665_v28  ;;  %v9613_v14 = vrot.slane %v9599_v2, %v17469_v47 }
 0x6da   : > { %v9690_v7 = vrot.slane %v9682_v11, %v17469_v47 }
 0x6db   : > { %v11062_v54 = vpop.trf.xlu1  ;;  %11422 = vxpose.xlu0.c.b16.start.end [1/1] (short) (narrow) %v9698_v0, 16 }
 0x6dc   : > { %v12302_v26 = vcombine.low %v10998_v36, %v11062_v54  ;;  %v10982_v39 = vpop.trf.xlu0  ;;  %v9700_v22 = vcombine.high %v9690_v7, %v19915_v20  ;;  %v9683_v54 = vcombine.high %v9649_v23, %v9665_v28 }
 0x6dd   : > { %v12344_v60 = vcombine.low %v10918_v55, %v10982_v39  ;;  %v9631_v55 = vcombine.high %v9613_v14, %v19915_v20 }
 0x6de   : > { %v12309_v2 = vrot.slane %v12302_v26, %v17463_v29  ;;  %v9697_v28 = vrot.slane %v9683_v54, %v17469_v47 }
 0x6df   : > { %v10902_v62 = vpop.trf.xlu1  ;;  %v12351_v46 = vrot.slane %v12344_v60, %v17463_v29  ;;  %11454 = vxpose.xlu0.c.b16.start.end [1/1] (short) (narrow) %v9681_v43, 16  ;;  %v12293_v60 = vrot.slane %v12286_v6, %v17463_v29 }
 0x6e0   : > { %v11046_v49 = vpop.trf.xlu0 }
 0x6e1   : > { %v12368_v50 = vcombine.low %v12343_v31, %v12351_v46  ;;  %11406 = vxpose.xlu1.c.b16.start.end [1/1] (short) (narrow) %v9630_v9, 16  ;;  %v19993_v46 = vcombine.low %v18771_v17, %v18756_v18 }
 0x6e3   : > { %v10966_v45 = vpop.trf.xlu1  ;;  %11486 = vxpose.xlu0.c.b16.start.end [1/1] (short) (narrow) %v9699_v48, 16  ;;  %v12375_v6 = vrot.slane %v12368_v50, %v17469_v47  ;;  %v9622_v9 = vrot.slane %v19993_v46, %v17469_v47 }
 0x6e4   : > { %v12294_v39 = vcombine.low %v10902_v62, %v10966_v45  ;;  %v11110_v36 = vpop.trf.xlu0 }
 0x6e5   : > { %v12360_v30 = vcombine.low %v11046_v49, %v11110_v36  ;;  %11438 = vxpose.xlu1.c.b16.start.end [1/1] (short) (narrow) %v9613_v14, 16 }
 0x6e6   : > { %v12301_v41 = vrot.slane %v12294_v39, %v17463_v29 }
 0x6e7   : > { %v11030_v31 = vpop.trf.xlu1  ;;  %v12367_v43 = vrot.slane %v12360_v30, %v17463_v29  ;;  %11518 = vxpose.xlu0.c.b16.start.end [1/1] (short) (narrow) %v9690_v7, 16  ;;  %v9802_v30 = vcombine.low %v18810_v25, %v18789_v40 }
 0x6e8   : > { %v12318_v27 = vcombine.low %v12293_v60, %v12301_v41  ;;  %v11142_v0 = vpop.trf.xlu0  ;;  %v9632_v60 = vcombine.high %v9622_v9, %v19915_v20  ;;  %v19994_v41 = vcombine.high %v18771_v17, %v18756_v18 }
 0x6e9   : > { %v12376_v13 = vcombine.low %v12359_v57, %v12367_v43  ;;  %11470 = vxpose.xlu1.c.b16.start.end [1/1] (short) (narrow) %v9631_v55, 16  ;;  %v9701_v57 = vcombine.high %v9697_v28, %v19915_v20  ;;  %v19340_v54 = vrot.slane %v9802_v30, %v17469_v47 }
 0x6ea   : > { %v12325_v39 = vrot.slane %v12318_v27, %v17469_v47 }
 0x6eb   : > { %v11094_v3 = vpop.trf.xlu1  ;;  %v12383_v62 = vrot.slane %v12376_v13, %v17469_v47  ;;  %11550 = vxpose.xlu0.c.b16.start.end [1/1] (short) (narrow) %v9700_v22, 16 }
 0x6ec   : > { %v12310_v49 = vcombine.low %v11030_v31, %v11094_v3  ;;  %v11206_v48 = vpop.trf.xlu0  ;;  %v9629_v31 = vrot.slane %v19994_v41, %v17469_v47 }
 0x6ed   : > { %v19317_v11 = vcombine.low %v12375_v6, %v12383_v62  ;;  %v19319_v50 = vcombine.high %v12375_v6, %v12383_v62  ;;  %v12436_v45 = vcombine.low %v11142_v0, %v11206_v48  ;;  %11502 = vxpose.xlu1.c.b16.start.end [1/1] (short) (narrow) %v9622_v9, 16 }
 0x6ee   : > { %v12317_v23 = vrot.slane %v12310_v49, %v17463_v29  ;;  %v9633_v9 = vcombine.high %v9629_v31, %v19915_v20 }
 0x6ef   : > { %v11126_v14 = vpop.trf.xlu1  ;;  %11582 = vxpose.xlu0.c.b16.start.end [1/1] (short) (narrow) %v9697_v28, 16  ;;  %v12738_v13 = vshrl.u32 %v19317_v11, 16  ;;  %v12744_v22 = vshrl.u32 %v19319_v50, 16  ;;  %v12443_v28 = vrot.slane %v12436_v45, %v17463_v29 }
 0x6f0   : > { %v12326_v36 = vcombine.low %v12309_v2, %v12317_v23  ;;  %v11270_v26 = vpop.trf.xlu0  ;;  %v9734_v2 = vcombine.low %v18793_v32, %v18786_v61 }
 0x6f1   : > { %11534 = vxpose.xlu1.c.b16.start.end [1/1] (short) (narrow) %v9632_v60, 16 }
 0x6f2   : > { %v12333_v7 = vrot.slane %v12326_v36, %v17469_v47  ;;  %v9742_v36 = vrot.slane %v9734_v2, %v17469_v47 }
 0x6f3   : > { %v11190_v43 = vpop.trf.xlu1  ;;  %11614 = vxpose.xlu0.c.b16.start.end [1/1] (short) (narrow) %v9701_v57, 16 }
 0x6f4   : > { %v19333_v55 = vcombine.low %v12325_v39, %v12333_v7  ;;  %v19335_v27 = vcombine.high %v12325_v39, %v12333_v7  ;;  %v12386_v0 = vcombine.low %v11126_v14, %v11190_v43  ;;  %v11174_v6 = vpop.trf.xlu0  ;;  %v9766_v41 = vcombine.high %v9742_v36, %v19915_v20 }
 0x6f5   : > { %11566 = vxpose.xlu1.c.b16.start.end [1/1] (short) (narrow) %v9629_v31, 16 }
 0x6f6   : > { %v12737_v3 = vshrl.u32 %v19333_v55, 16  ;;  %v12743_v46 = vshrl.u32 %v19335_v27, 16  ;;  %v12393_v31 = vrot.slane %v12386_v0, %v17463_v29 }
 0x6f7   : > { %v11254_v62 = vpop.trf.xlu1  ;;  %11646 = vxpose.xlu0.c.b16.start.end [1/1] (short) (narrow) %v19340_v54, 16 }
 0x6f8   : > { %v11238_v49 = vpop.trf.xlu0  ;;  %v19352_v48 = vpack.i.b16 %v12738_v13, %v12737_v3  ;;  %v19355_v14 = vpack.i.b16 %v12744_v22, %v12743_v46 }
 0x6f9   : > { %v12444_v23 = vcombine.low %v11174_v6, %v11238_v49  ;;  %11598 = vxpose.xlu1.c.b16.start.end [1/1] (short) (narrow) %v9633_v9, 16 }
 0x6fa   : > { %19995 = vst [vmem:[#allocation50_spill] sm:$0xff] %v19355_v14 }
 0x6fb   : > { %v11158_v60 = vpop.trf.xlu1  ;;  %v12451_v39 = vrot.slane %v12444_v23, %v17463_v29 }
 0x6fc   : > { %v11302_v57 = vpop.trf.xlu0 }
 0x6fd   : > { %v12468_v30 = vcombine.low %v12443_v28, %v12451_v39  ;;  %11630 = vxpose.xlu1.c.b16.start.end [1/1] (short) (narrow) %v9742_v36, 16 }
 0x6ff   : > { %v11222_v7 = vpop.trf.xlu1  ;;  %v12475_v39 = vrot.slane %v12468_v30, %v17469_v47 }
 0x700   : > { %v12394_v43 = vcombine.low %v11158_v60, %v11222_v7  ;;  %v11334_v13 = vpop.trf.xlu0 }
 0x701   : > { %v12452_v45 = vcombine.low %v11270_v26, %v11334_v13  ;;  %11662 = vxpose.xlu1.c.b16.start.end [1/1] (short) (narrow) %v9766_v41, 16  ;;  %v8315_v13 = vsel %vm8305_vm1, %v19087_v53, -inf }
 0x702   : > { %v12401_v6 = vrot.slane %v12394_v43, %v17463_v29 }
 0x703   : > { %v11286_v22 = vpop.trf.xlu1  ;;  %v12459_v9 = vrot.slane %v12452_v45, %v17463_v29 }
 0x704   : > { %v12418_v3 = vcombine.low %v12393_v31, %v12401_v6  ;;  %v11366_v46 = vpop.trf.xlu0 }
 0x705   : > { %v12460_v2 = vcombine.low %v11302_v57, %v11366_v46  ;;  %v8312_v57 = vsel %vm8305_vm1, %v19074_v1, -inf }
 0x707   : > { %v11318_v49 = vpop.trf.xlu1  ;;  %v12467_v28 = vrot.slane %v12460_v2, %v17463_v29 }
 0x708   : > { %v12402_v23 = vcombine.low %v11254_v62, %v11318_v49  ;;  %v12425_v62 = vrot.slane %v12418_v3, %v17469_v47 }
 0x709   : > { %v12476_v36 = vcombine.low %v12459_v9, %v12467_v28 }
 0x70a   : > { %v12409_v26 = vrot.slane %v12402_v23, %v17463_v29 }
 0x70b   : > { %v11350_v0 = vpop.trf.xlu1  ;;  %v12483_v60 = vrot.slane %v12476_v36, %v17469_v47 }
 0x70c   : > { %v12410_v7 = vcombine.low %v11286_v22, %v11350_v0 }
 0x70d   : > { %v19367_v41 = vcombine.low %v12475_v39, %v12483_v60  ;;  %v19369_v31 = vcombine.high %v12475_v39, %v12483_v60 }
 0x70e   : > { %v12417_v43 = vrot.slane %v12410_v7, %v17463_v29  ;;  %8313 = vmax.xlane.f32.xlu1 %v8312_v57 }
 0x70f   : > { %19996 = vst [vmem:[#allocation54_spill] sm:$0xff] %v19369_v31  ;;  %v12750_v46 = vshrl.u32 %v19367_v41, 16  ;;  %v12756_v9 = vshrl.u32 %v19369_v31, 16 }
 0x710   : > { %v12426_v30 = vcombine.low %v12409_v26, %v12417_v43  ;;  %v11382_v26 = vpop.trf.xlu1 }
 0x712   : > { %v12433_v45 = vrot.slane %v12426_v30, %v17469_v47  ;;  %8316 = vmax.xlane.f32.xlu1 %v8315_v13 }
 0x714   : > { %v19378_v6 = vcombine.low %v12425_v62, %v12433_v45  ;;  %v19380_v22 = vcombine.high %v12425_v62, %v12433_v45 }
 0x716   : > { %19997 = vst [vmem:[#allocation63_spill] sm:$0xff] %v19380_v22  ;;  %v12749_v2 = vshrl.u32 %v19378_v6, 16  ;;  %v12755_v28 = vshrl.u32 %v19380_v22, 16 }
 0x718   : > { %v19390_v23 = vpack.i.b16 %v12750_v46, %v12749_v2  ;;  %v19392_v39 = vpack.i.b16 %v12756_v9, %v12755_v28 }
 0x71a   : > { %19998 = vst [vmem:[#allocation60_spill] sm:$0xff] %v19392_v39 }
 0x737   : > { %v8311_v36 = vpop.xlane.xlu0 %8310 }
 0x738   : > { %v8319_v0 = vsub.f32 %v19205_v12, %v8311_v36 }
 0x73a   : > { %v8324_v60 = vmul.f32 1.442695, %v8319_v0 }
 0x73c   : > { %16503 = vpow2.f32 %v8324_v60 }
 0x73d   : > { %v11398_v7 = vpop.trf.xlu0 }
 0x741   : > { %v8308_v57 = vpop.xlane.xlu1 %8307  ;;  %v11430_v43 = vpop.trf.xlu0 }
 0x742   : > { %v8318_v62 = vsub.f32 %v19226_v56, %v8308_v57 }
 0x744   : > { %v8322_v30 = vmul.f32 1.442695, %v8318_v62 }
 0x745   : > { %v11462_v13 = vpop.trf.xlu0 }
 0x746   : > { %v19396_v45 = vpop.eup %16503  ;;  %16505 = vpow2.f32 %v8322_v30  ;;  %v12536_v62 = vcombine.low %v11398_v7, %v11462_v13 }
 0x747   : > { %v11414_v46 = vpop.trf.xlu1  ;;  %v8333_v9 = vsel %vm8305_vm1, %v19396_v45, 0.0 }
 0x748   : > { %8334 = vadd.xlane.f32.xlu0 %v8333_v9 }
 0x749   : > { %v11494_v2 = vpop.trf.xlu0 }
 0x74a   : > { %v12544_v17 = vcombine.low %v11430_v43, %v11494_v2 }
 0x74b   : > { %v11446_v12 = vpop.trf.xlu1 }
 0x74c   : > { %v12486_v28 = vcombine.low %v11382_v26, %v11446_v12  ;;  %v12543_v26 = vrot.slane %v12536_v62, %v17463_v29  ;;  %v12551_v12 = vrot.slane %v12544_v17, %v17463_v29 }
 0x74d   : > { %v11526_v36 = vpop.trf.xlu0 }
 0x74e   : > { %v12493_v30 = vrot.slane %v12486_v28, %v17463_v29  ;;  %v12568_v31 = vcombine.low %v12543_v26, %v12551_v12 }
 0x74f   : > { %v11478_v0 = vpop.trf.xlu1 }
 0x750   : > { %v19400_v60 = vpop.eup %16505  ;;  %v12494_v49 = vcombine.low %v11414_v46, %v11478_v0 }
 0x751   : > { %v8330_v56 = vsel %vm8305_vm1, %v19400_v60, 0.0  ;;  %v11558_v57 = vpop.trf.xlu0 }
 0x752   : > { %v12501_v3 = vrot.slane %v12494_v49, %v17463_v29  ;;  %8331 = vadd.xlane.f32.xlu1 %v8330_v56  ;;  %v12575_v49 = vrot.slane %v12568_v31, %v17469_v47 }
 0x753   : > { %v11510_v9 = vpop.trf.xlu1 }
 0x754   : > { %v12518_v18 = vcombine.low %v12493_v30, %v12501_v3 }
 0x755   : > { %v11590_v39 = vpop.trf.xlu0 }
 0x756   : > { %v12552_v22 = vcombine.low %v11526_v36, %v11590_v39 }
 0x757   : > { %v11542_v46 = vpop.trf.xlu1 }
 0x758   : > { %v12559_v14 = vrot.slane %v12552_v22, %v17463_v29 }
 0x759   : > { %v11622_v0 = vpop.trf.xlu0 }
 0x75a   : > { %v12560_v7 = vcombine.low %v11558_v57, %v11622_v0  ;;  %v12525_v57 = vrot.slane %v12518_v18, %v17469_v47 }
 0x75b   : > { %v11574_v13 = vpop.trf.xlu1 }
 0x75c   : > { %v12502_v28 = vcombine.low %v11510_v9, %v11574_v13  ;;  %v12567_v43 = vrot.slane %v12560_v7, %v17463_v29 }
 0x75e   : > { %v12576_v2 = vcombine.low %v12559_v14, %v12567_v43  ;;  %v12509_v56 = vrot.slane %v12502_v28, %v17463_v29  ;;  %v9834_v43 = vcombine.high %v19340_v54, %v19915_v20  ;;  %v20001_v54 = vcombine.low %v18823_v52, %v18805_v24 }
 0x75f   : > { %v11606_v3 = vpop.trf.xlu1 }
 0x760   : > { %v12583_v62 = vrot.slane %v12576_v2, %v17469_v47  ;;  %v12510_v17 = vcombine.low %v11542_v46, %v11606_v3 }
 0x762   : > { %v19413_v39 = vcombine.high %v12575_v49, %v12583_v62  ;;  %v12517_v36 = vrot.slane %v12510_v17, %v17463_v29  ;;  %v19416_v30 = vcombine.low %v12575_v49, %v12583_v62  ;;  %v19999_v49 = vcombine.high %v18810_v25, %v18789_v40 }
 0x763   : > { %v9826_v17 = vrot.slane %v20001_v54, %v17469_v47  ;;  %v20002_v25 = vcombine.low %v18817_v37, %v18799_v19 }
 0x764   : > { %v12526_v22 = vcombine.low %v12509_v56, %v12517_v36  ;;  %v12762_v31 = vshrl.u32 %v19416_v30, 16  ;;  %v12768_v12 = vshrl.u32 %v19413_v39, 16  ;;  %v9817_v2 = vrot.slane %v19999_v49, %v17469_v47 }
 0x765   : > { %v20000_v56 = vcombine.high %v18793_v32, %v18786_v61  ;;  %v9836_v40 = vcombine.high %v9826_v17, %v19915_v20  ;;  %v20003_v61 = vcombine.high %v18823_v52, %v18805_v24 }
 0x766   : > { %v12533_v9 = vrot.slane %v12526_v22, %v17469_v47  ;;  %v9835_v3 = vcombine.high %v9817_v2, %v19915_v20  ;;  %v9758_v22 = vrot.slane %v20002_v25, %v17469_v47 }
 0x767   : > { %v9749_v62 = vrot.slane %v20000_v56, %v17469_v47  ;;  %v9833_v32 = vrot.slane %v20003_v61, %v17469_v47  ;;  %v12084_v61 = vcombine.low %v19143_v59, %v19149_v51 }
 0x768   : > { %v19420_v26 = vcombine.low %v12525_v57, %v12533_v9  ;;  %v19422_v14 = vcombine.high %v12525_v57, %v12533_v9  ;;  %v9768_v57 = vcombine.high %v9758_v22, %v19915_v20 }
 0x769   : > { %v9767_v36 = vcombine.high %v9749_v62, %v19915_v20  ;;  %v9837_v9 = vcombine.high %v9833_v32, %v19915_v20 }
 0x76a   : > { %v12761_v46 = vshrl.u32 %v19420_v26, 16  ;;  %v12760_v0 = vpack.i.b16 %v19416_v30, %v19420_v26  ;;  %v12766_v7 = vpack.i.b16 %v19413_v39, %v19422_v14  ;;  %v12767_v18 = vshrl.u32 %v19422_v14, 16 }
 0x76c   : > { %v19432_v13 = vpack.i.b16 %v12762_v31, %v12761_v46  ;;  %v19434_v28 = vpack.i.b16 %v12768_v12, %v12767_v18  ;;  %v20004_v31 = vcombine.high %v18817_v37, %v18799_v19  ;;  %v19467_v46 = vpop.trf.xlu1 }
 0x76e   : > { %v9765_v12 = vrot.slane %v20004_v31, %v17469_v47 }
 0x770   : > { %v19469_v18 = vpop.trf.xlu1 }
 0x775   : > { %11678 = vxpose.xlu0.c.b16.start.end [1/1] (short) (narrow) %v9834_v43, 16 }
 0x779   : > { %11710 = vxpose.xlu0.c.b16.start.end [1/1] (short) (narrow) %v9817_v2, 16 }
 0x77d   : > { %11742 = vxpose.xlu0.c.b16.start.end [1/1] (short) (narrow) %v9835_v3, 16 }
 0x77f   : > { %11694 = vxpose.xlu1.c.b16.start.end [1/1] (short) (narrow) %v9749_v62, 16 }
 0x781   : > { %11774 = vxpose.xlu0.c.b16.start.end [1/1] (short) (narrow) %v9826_v17, 16  ;;  %v9769_v17 = vcombine.high %v9765_v12, %v19915_v20 }
 0x783   : > { %11726 = vxpose.xlu1.c.b16.start.end [1/1] (short) (narrow) %v9767_v36, 16 }
 0x785   : > { %11806 = vxpose.xlu0.c.b16.start.end [1/1] (short) (narrow) %v9836_v40, 16 }
 0x787   : > { %11758 = vxpose.xlu1.c.b16.start.end [1/1] (short) (narrow) %v9758_v22, 16  ;;  %v12034_v22 = vcombine.low %v19161_v8, %v19165_v5  ;;  %v20005_v5 = vpack.i.b16 %v19219_v10, %v19232_v21  ;;  %v20008_v10 = vpack.i.b16 %v19367_v41, %v19378_v6 }
 0x789   : > { %11838 = vxpose.xlu0.c.b16.start.end [1/1] (short) (narrow) %v9833_v32, 16  ;;  %v12701_v20 = vshrl.u32 %v12034_v22, 16  ;;  %v12700_v51 = vpack.i.b16 %v12084_v61, %v12034_v22 }
 0x78b   : > { %11790 = vxpose.xlu1.c.b16.start.end [1/1] (short) (narrow) %v9768_v57, 16 }
 0x78d   : > { %11870 = vxpose.xlu0.c.b16.start.end [1/1] (short) (narrow) %v9837_v9, 16  ;;  %v12702_v9 = vshrl.u32 %v12084_v61, 16 }
 0x78f   : > { %11822 = vxpose.xlu1.c.b16.start.end [1/1] (short) (narrow) %v9765_v12, 16 }
 0x79b   : > { %v8314_v43 = vpop.xlane.xlu1 %8313 }
 0x79c   : > { %v8320_v24 = vsub.f32 %v19074_v1, %v8314_v43  ;;  %v11654_v1 = vpop.trf.xlu0 }
 0x79e   : > { %v8326_v52 = vmul.f32 1.442695, %v8320_v24 }
 0x79f   : > { %v8317_v49 = vpop.xlane.xlu1 %8316 }
 0x7a0   : > { %16507 = vpow2.f32 %v8326_v52  ;;  %v8321_v2 = vsub.f32 %v19087_v53, %v8317_v49 }
 0x7a2   : > { %v8328_v3 = vmul.f32 1.442695, %v8321_v2 }
 0x7a4   : > { %16509 = vpow2.f32 %v8328_v3 }
 0x7aa   : > { %v19473_v56 = vpop.eup %16507 }
 0x7ab   : > { %v8336_v19 = vsel %vm8305_vm1, %v19473_v56, 0.0 }
 0x7ac   : > { %8337 = vadd.xlane.f32.xlu1 %v8336_v19 }
 0x7ae   : > { %v19477_v37 = vpop.eup %16509 }
 0x7af   : > { %v8339_v62 = vsel %vm8305_vm1, %v19477_v37, 0.0 }
 0x7b0   : > { %8340 = vadd.xlane.f32.xlu1 %v8339_v62 }
 0x7d5   : > { %v8335_v54 = vpop.xlane.xlu0 %8334 }
 0x7d6   : > { %16511 = vrcp.f32 %v8335_v54 }
 0x7db   : > { %v11686_v21 = vpop.trf.xlu0 }
 0x7dd   : > { %11854 = vxpose.xlu1.c.b16.start.end [1/1] (short) (narrow) %v9769_v17, 16 }
 0x7df   : > { %v8332_v53 = vpop.xlane.xlu1 %8331 }
 0x7e0   : > { %v16512_v36 = vpop.eup %16511  ;;  %16513 = vrcp.f32 %v8332_v53 }
 0x7e1   : > { %v8347_v40 = vmul.f32 %v16512_v36, %v19396_v45  ;;  %v12703_v45 = vpack.i.b16 %v12702_v9, %v12701_v20 }
 0x7e3   : > { %v8351_v25 = vmul.f32 %v8347_v40, %v18967_v38 }
 0x7e5   : > { %v8355_v32 = vpack.c.bf16 %v8351_v25, %v8351_v25 }
 0x7e7   : > { %15561 = vmatprep.subr.msk.bf16.mxu1 %vm8305_vm1, %v8355_v32  ;;  %v12931_v57 = vsel %vm8305_vm1, %v8355_v32, 0 }
 0x7e8   : > { %15475 = vmatpush3.bf16.xpose.msra.mxu1 %v12931_v57 }
 0x7ea   : > { %v16514_v31 = vpop.eup %16513 }
 0x7eb   : > { %v8346_v12 = vmul.f32 %v16514_v31, %v19400_v60 }
 0x7ed   : > { %v8350_v43 = vmul.f32 %v8346_v12, %v18967_v38 }
 0x7ef   : > { %15477 = vmatmul.mubr.msk.bf16.vlgmr.msra.gmra.mrb[20].mxu1 %vm8305_vm1, %v12703_v45  ;;  %v8354_v8 = vpack.c.bf16 %v8350_v43, %v8350_v43 }
 0x7f0   : > { %15480 = vmatprep.mubr.msk.bf16.mxu1 %vm8305_vm1, %v19244_v34  ;;  %v20006_v34 = vpack.i.b16 %v19265_v4, %v19274_v35  ;;  %v11702_v4 = vpop.trf.xlu1 }
 0x7f1   : > { %15560 = vmatprep.subr.msk.bf16.mxu0 %vm8305_vm1, %v8354_v8  ;;  %v12807_v59 = vsel %vm8305_vm1, %v8354_v8, 0  ;;  %v12586_v53 = vcombine.low %v19467_v46, %v11702_v4 }
 0x7f2   : > { %15457 = vmatpush3.bf16.xpose.msra.mxu0 %v12807_v59 }
 0x7f3   : > { %v12593_v32 = vrot.slane %v12586_v53, %v17463_v29 }
 0x7f7   : > { %15481 = vmatmul.mubr.msk.bf16.gmra.mrb[24].mxu1 %vm8305_vm1, %v19287_v33  ;;  %v20007_v33 = vpack.i.b16 %v19317_v11, %v19333_v55 }
 0x7f8   : > { %15484 = vmatprep.mubr.msk.bf16.mxu1 %vm8305_vm1, %v19352_v48  ;;  %v11718_v48 = vpop.trf.xlu0 }
 0x7f9   : > { %15459 = vmatmul.mubr.msk.bf16.vlgmr.msra.gmra.mrb[20].mxu0 %vm8305_vm1, %v12700_v51  ;;  %v12636_v41 = vcombine.low %v11654_v1, %v11718_v48 }
 0x7fa   : > { %15462 = vmatprep.mubr.msk.bf16.mxu0 %vm8305_vm1, %v20005_v5 }
 0x7fb   : > { %v12643_v30 = vrot.slane %v12636_v41, %v17463_v29 }
 0x7fc   : > { %v11750_v35 = vpop.trf.xlu0 }
 0x7fd   : > { %v12644_v6 = vcombine.low %v11686_v21, %v11750_v35 }
 0x7ff   : > { %15485 = vmatmul.mubr.msk.bf16.gmra.mrb[28].mxu1 %vm8305_vm1, %v19390_v23  ;;  %v11734_v23 = vpop.trf.xlu1  ;;  %v12651_v26 = vrot.slane %v12644_v6, %v17463_v29  ;;  %v20021_v6 = vld [vmem:[#allocation54_spill] sm:$0xff] }
 0x800   : > { %15488 = vmatprep.mubr.msk.bf16.mxu1 %vm8305_vm1, %v19432_v13  ;;  %v11782_v60 = vpop.trf.xlu0  ;;  %v12594_v62 = vcombine.low %v19469_v18, %v11734_v23 }
 0x801   : > { %15463 = vmatmul.mubr.msk.bf16.gmra.mrb[24].mxu0 %vm8305_vm1, %v20006_v34  ;;  %v12668_v1 = vcombine.low %v12643_v30, %v12651_v26 }
 0x802   : > { %15466 = vmatprep.mubr.msk.bf16.mxu0 %vm8305_vm1, %v20007_v33  ;;  %v12601_v36 = vrot.slane %v12594_v62, %v17463_v29 }
 0x803   : > { %v11766_v13 = vpop.trf.xlu1  ;;  %v12675_v20 = vrot.slane %v12668_v1, %v17469_v47 }
 0x804   : > { %v11814_v11 = vpop.trf.xlu0  ;;  %v12618_v9 = vcombine.low %v12593_v32, %v12601_v36 }
 0x806   : > { %v12625_v5 = vrot.slane %v12618_v9, %v17469_v47 }
 0x807   : > { %v11798_v55 = vpop.trf.xlu1 }
 0x808   : > { %v11846_v24 = vpop.trf.xlu0 }
 0x809   : > { %15467 = vmatmul.mubr.msk.bf16.gmra.mrb[28].mxu0 %vm8305_vm1, %v20008_v10  ;;  %v12652_v3 = vcombine.low %v11782_v60, %v11846_v24 }
 0x80a   : > { %15470 = vmatprep.mubr.msk.bf16.mxu0 %vm8305_vm1, %v12760_v0 }
 0x80b   : > { %v11830_v52 = vpop.trf.xlu1  ;;  %v12659_v54 = vrot.slane %v12652_v3, %v17463_v29 }
 0x80c   : > { %v11878_v49 = vpop.trf.xlu0  ;;  %v12602_v25 = vcombine.low %v11766_v13, %v11830_v52  ;;  %v20009_v13 = vpack.i.b16 %v19048_v15, %v19025_v58  ;;  %v20014_v52 = vld [vmem:[#allocation61_spill] sm:$0xff]  ;;  %v20015_v58 = vld [vmem:[#allocation56_spill] sm:$0xff]  ;;  %v20016_v15 = vld [vmem:[#allocation42_spill] sm:$0xff] }
 0x80d   : > { %v12660_v19 = vcombine.low %v11814_v11, %v11878_v49  ;;  %v20011_v11 = vld [vmem:[#allocation59_spill] sm:$0xff]  ;;  %v20017_v49 = vld [vmem:[#allocation44_spill] sm:$0xff] }
 0x80e   : > { %v12609_v12 = vrot.slane %v12602_v25, %v17463_v29  ;;  %v20018_v41 = vpack.i.b16 %v20016_v15, %v20017_v49  ;;  %v16344_v15 = vld [vmem:[#allocation16 + $0xa8] ss:$16 sps:$4 sm:$0xff]   ;;  %v16349_v49 = vld [vmem:[#allocation16 + $0xc4] ss:$16 sps:$4 sm:$0xff]  }
 0x80f   : > { %v12667_v17 = vrot.slane %v12660_v19, %v17463_v29 }
 0x811   : > { %v12676_v40 = vcombine.low %v12659_v54, %v12667_v17 }
 0x813   : > { %v12683_v31 = vrot.slane %v12676_v40, %v17469_v47 }
 0x815   : > { %v12684_v34 = vcombine.low %v12675_v20, %v12683_v31 }
 0x817   : > { %v12774_v23 = vshrl.u32 %v12684_v34, 16 }
 0x839   : > { %v8338_v2 = vpop.xlane.xlu1 %8337 }
 0x83a   : > { %16515 = vrcp.f32 %v8338_v2  ;;  %v20022_v2 = vld [vmem:[#allocation63_spill] sm:$0xff] }
 0x83b   : > { %v20023_v3 = vpack.i.b16 %v20021_v6, %v20022_v2  ;;  %v16358_v6 = vld [vmem:[#allocation16 + $0xec] ss:$16 sps:$4 sm:$0xff]   ;;  %v16353_v2 = vld [vmem:[#allocation16 + $0xe0] ss:$16 sps:$4 sm:$0xff]  }
 0x83d   : > { %v8341_v0 = vpop.xlane.xlu1 %8340 }
 0x83e   : > { %16517 = vrcp.f32 %v8341_v0 }
 0x843   : > { %v11862_v22 = vpop.trf.xlu1 }
 0x844   : > { %v16516_v61 = vpop.eup %16515  ;;  %v12610_v57 = vcombine.low %v11798_v55, %v11862_v22  ;;  %v20012_v55 = vld [vmem:[#allocation52_spill] sm:$0xff] }
 0x845   : > { %v8348_v18 = vmul.f32 %v16516_v61, %v19473_v56  ;;  %v20013_v24 = vpack.i.b16 %v20011_v11, %v20012_v55  ;;  %v16335_v11 = vld [vmem:[#allocation16 + $0x80] ss:$16 sps:$4 sm:$0xff]   ;;  %v16338_v55 = vld [vmem:[#allocation16 + $0x88] ss:$16 sps:$4 sm:$0xff]  }
 0x846   : > { %v12617_v46 = vrot.slane %v12610_v57, %v17463_v29 }
 0x847   : > { %v8352_v45 = vmul.f32 %v8348_v18, %v18967_v38 }
 0x848   : > { %v16518_v43 = vpop.eup %16517  ;;  %v12626_v8 = vcombine.low %v12609_v12, %v12617_v46 }
 0x849   : > { %v8356_v59 = vpack.c.bf16 %v8352_v45, %v8352_v45  ;;  %v8349_v51 = vmul.f32 %v16518_v43, %v19477_v37  ;;  %v16311_v43 = vld [vmem:[#allocation16] ss:$16 sps:$4 sm:$0xff]  }
 0x84a   : > { %v12633_v33 = vrot.slane %v12626_v8, %v17469_v47  ;;  %v16313_v8 = vld [vmem:[#allocation16 + $0x4] ss:$16 sps:$4 sm:$0xff]  }
 0x84b   : > { %15562 = vmatprep.subr.msk.bf16.mxu0 %vm8305_vm1, %v8356_v59  ;;  %v13055_v56 = vsel %vm8305_vm1, %v8356_v59, 0  ;;  %v8353_v10 = vmul.f32 %v8349_v51, %v18967_v38  ;;  %v20010_v38 = vpack.i.b16 %v19155_v16, %v19172_v63  ;;  %v20020_v16 = vld [vmem:[#allocation50_spill] sm:$0xff]  ;;  %v16314_v59 = vld [vmem:[#allocation16 + $0x8] ss:$16 sps:$4 sm:$0xff]   ;;  %v16316_v51 = vld [vmem:[#allocation16 + $0xc] ss:$16 sps:$4 sm:$0xff]  }
 0x84c   : > { %v12634_v21 = vcombine.low %v12625_v5, %v12633_v33  ;;  %15493 = vmatpush3.bf16.xpose.msra.mxu0 %v13055_v56  ;;  %v12635_v63 = vcombine.high %v12625_v5, %v12633_v33  ;;  %v16319_v5 = vld [vmem:[#allocation16 + $0x24] ss:$16 sps:$4 sm:$0xff]   ;;  %v16317_v33 = vld [vmem:[#allocation16 + $0x20] ss:$16 sps:$4 sm:$0xff]   ;;  %v16320_v56 = vld [vmem:[#allocation16 + $0x28] ss:$16 sps:$4 sm:$0xff]  }
 0x84d   : > { %v8357_v48 = vpack.c.bf16 %v8353_v10, %v8353_v10  ;;  %14314 = vmatprep.subr.bf16.mxu0 %v16313_v8  ;;  %v16325_v10 = vld [vmem:[#allocation16 + $0x44] ss:$16 sps:$4 sm:$0xff]  }
 0x84e   : > { %v12772_v4 = vpack.i.b16 %v12684_v34, %v12634_v21  ;;  %v12773_v35 = vshrl.u32 %v12634_v21, 16  ;;  %v16322_v34 = vld [vmem:[#allocation16 + $0x2c] ss:$16 sps:$4 sm:$0xff]  }
 0x84f   : > { %15563 = vmatprep.subr.msk.bf16.mxu1 %vm8305_vm1, %v8357_v48  ;;  %v13179_v37 = vsel %vm8305_vm1, %v8357_v48, 0  ;;  %v16328_v21 = vld [vmem:[#allocation16 + $0x4c] ss:$16 sps:$4 sm:$0xff]   ;;  %v16323_v48 = vld [vmem:[#allocation16 + $0x40] ss:$16 sps:$4 sm:$0xff]  }
 0x850   : > { %15471 = vmatmul.mubr.msk.bf16.gmra.mrb[32].mxu0 %vm8305_vm1, %v12772_v4  ;;  %15511 = vmatpush3.bf16.xpose.msra.mxu1 %v13179_v37  ;;  %v12775_v60 = vpack.i.b16 %v12774_v23, %v12773_v35  ;;  %v16326_v4 = vld [vmem:[#allocation16 + $0x48] ss:$16 sps:$4 sm:$0xff]   ;;  %v16331_v35 = vld [vmem:[#allocation16 + $0x64] ss:$16 sps:$4 sm:$0xff]   ;;  %v16334_v23 = vld [vmem:[#allocation16 + $0x6c] ss:$16 sps:$4 sm:$0xff]  }
 0x851   : > { %15494 = vmatprep.mubr.msk.bf16.mxu0 %vm8305_vm1, %v20009_v13  ;;  %14396 = vmatprep.subr.bf16.mxu1 %v16316_v51  ;;  %v16329_v37 = vld [vmem:[#allocation16 + $0x60] ss:$16 sps:$4 sm:$0xff]   ;;  %v16337_v13 = vld [vmem:[#allocation16 + $0x84] ss:$16 sps:$4 sm:$0xff]  }
 0x852   : > { %15489 = vmatmul.mubr.msk.bf16.gmra.mrb[32].mxu1 %vm8305_vm1, %v12775_v60  ;;  %v16332_v60 = vld [vmem:[#allocation16 + $0x68] ss:$16 sps:$4 sm:$0xff]  }
 0x853   : > { %15512 = vmatprep.mubr.msk.bf16.mxu1 %vm8305_vm1, %v19082_v44  ;;  %v20019_v44 = vpack.i.b16 %v19319_v50, %v19335_v27  ;;  %v12685_v50 = vcombine.high %v12675_v20, %v12683_v31  ;;  %v20024_v27 = vld [vmem:[#allocation60_spill] sm:$0xff] }
 0x855   : > { %v12778_v19 = vpack.i.b16 %v12685_v50, %v12635_v63  ;;  %v12780_v30 = vshrl.u32 %v12685_v50, 16  ;;  %v16361_v50 = vld [vmem:[#allocation16 + $0x104] ss:$16 sps:$4 sm:$0xff]  }
 0x858   : > { %15495 = vmatmul.mubr.msk.bf16.vlgmr.msra.gmra.mrb[36].mxu0 %vm8305_vm1, %v20010_v38  ;;  %v16340_v38 = vld [vmem:[#allocation16 + $0x8c] ss:$16 sps:$4 sm:$0xff]  }
 0x859   : > { %15498 = vmatprep.mubr.msk.bf16.mxu0 %vm8305_vm1, %v20013_v24  ;;  %14315 = vmatpush1.bf16.msra.mxu0 %v16311_v43  ;;  %v16343_v24 = vld [vmem:[#allocation16 + $0xa4] ss:$16 sps:$4 sm:$0xff]  }
 0x85a   : > { %15513 = vmatmul.mubr.msk.bf16.vlgmr.msra.gmra.mrb[36].mxu1 %vm8305_vm1, %v20014_v52  ;;  %14316 = vmatprep.subr.bf16.mxu0 %v16319_v5  ;;  %v16346_v52 = vld [vmem:[#allocation16 + $0xac] ss:$16 sps:$4 sm:$0xff]  }
 0x85b   : > { %15516 = vmatprep.mubr.msk.bf16.mxu1 %vm8305_vm1, %v20015_v58  ;;  %14397 = vmatpush1.bf16.msra.mxu1 %v16314_v59  ;;  %v16341_v58 = vld [vmem:[#allocation16 + $0xa0] ss:$16 sps:$4 sm:$0xff]  }
 0x85c   : > { %14398 = vmatprep.subr.bf16.mxu1 %v16322_v34 }
 0x85d   : > { %14317 = vmatpush1.bf16.msra.mxu0 %v16317_v33 }
 0x85e   : > { %14318 = vmatprep.subr.bf16.mxu0 %v16325_v10 }
 0x85f   : > { %14399 = vmatpush1.bf16.msra.mxu1 %v16320_v56 }
 0x860   : > { %15499 = vmatmul.mubr.msk.bf16.gmra.mrb[40].mxu0 %vm8305_vm1, %v20018_v41  ;;  %14400 = vmatprep.subr.bf16.mxu1 %v16328_v21  ;;  %v16352_v41 = vld [vmem:[#allocation16 + $0xcc] ss:$16 sps:$4 sm:$0xff]  }
 0x861   : > { %15502 = vmatprep.mubr.msk.bf16.mxu0 %vm8305_vm1, %v20019_v44  ;;  %14319 = vmatpush1.bf16.msra.mxu0 %v16323_v48  ;;  %v16347_v44 = vld [vmem:[#allocation16 + $0xc0] ss:$16 sps:$4 sm:$0xff]  }
 0x862   : > { %15517 = vmatmul.mubr.msk.bf16.gmra.mrb[40].mxu1 %vm8305_vm1, %v19289_v42  ;;  %v12779_v42 = vshrl.u32 %v12635_v63, 16  ;;  %14320 = vmatprep.subr.bf16.mxu0 %v16331_v35  ;;  %v16355_v63 = vld [vmem:[#allocation16 + $0xe4] ss:$16 sps:$4 sm:$0xff]  }
 0x863   : > { %15520 = vmatprep.mubr.msk.bf16.mxu1 %vm8305_vm1, %v20020_v16  ;;  %14401 = vmatpush1.bf16.msra.mxu1 %v16326_v4  ;;  %v16350_v16 = vld [vmem:[#allocation16 + $0xc8] ss:$16 sps:$4 sm:$0xff]  }
 0x864   : > { %v12781_v26 = vpack.i.b16 %v12780_v30, %v12779_v42  ;;  %14402 = vmatprep.subr.bf16.mxu1 %v16334_v23  ;;  %v16359_v42 = vld [vmem:[#allocation16 + $0x100] ss:$16 sps:$4 sm:$0xff]   ;;  %v16367_v30 = vld [vmem:[#allocation16 + $0x124] ss:$16 sps:$4 sm:$0xff]  }
 0x865   : > { %14321 = vmatpush1.bf16.msra.mxu0 %v16329_v37  ;;  %v16377_v37 = vld [vmem:[#allocation16 + $0x160] ss:$16 sps:$4 sm:$0xff]  }
 0x866   : > { %14322 = vmatprep.subr.bf16.mxu0 %v16337_v13  ;;  %v16380_v13 = vld [vmem:[#allocation16 + $0x168] ss:$16 sps:$4 sm:$0xff]  }
 0x867   : > { %14403 = vmatpush1.bf16.msra.mxu1 %v16332_v60  ;;  %v16379_v60 = vld [vmem:[#allocation16 + $0x164] ss:$16 sps:$4 sm:$0xff]  }
 0x868   : > { %15503 = vmatmul.mubr.msk.bf16.gmra.mrb[44].mxu0 %vm8305_vm1, %v20023_v3  ;;  %14404 = vmatprep.subr.bf16.mxu1 %v16340_v38  ;;  %v16356_v3 = vld [vmem:[#allocation16 + $0xe8] ss:$16 sps:$4 sm:$0xff]   ;;  %v16382_v38 = vld [vmem:[#allocation16 + $0x16c] ss:$16 sps:$4 sm:$0xff]  }
 0x869   : > { %15506 = vmatprep.mubr.msk.bf16.mxu0 %vm8305_vm1, %v12766_v7  ;;  %14323 = vmatpush1.bf16.msra.mxu0 %v16335_v11  ;;  %v16385_v11 = vld [vmem:[#allocation16 + $0x184] ss:$16 sps:$4 sm:$0xff]  }
 0x86a   : > { %15521 = vmatmul.mubr.msk.bf16.gmra.mrb[44].mxu1 %vm8305_vm1, %v20024_v27  ;;  %14324 = vmatprep.subr.bf16.mxu0 %v16343_v24  ;;  %v16364_v27 = vld [vmem:[#allocation16 + $0x10c] ss:$16 sps:$4 sm:$0xff]  }
 0x86b   : > { %15524 = vmatprep.mubr.msk.bf16.mxu1 %vm8305_vm1, %v19434_v28  ;;  %14405 = vmatpush1.bf16.msra.mxu1 %v16338_v55  ;;  %v16388_v24 = vld [vmem:[#allocation16 + $0x18c] ss:$16 sps:$4 sm:$0xff]  }
 0x86c   : > { %14406 = vmatprep.subr.bf16.mxu1 %v16346_v52 }
 0x86d   : > { %14325 = vmatpush1.bf16.msra.mxu0 %v16341_v58  ;;  %v16383_v58 = vld [vmem:[#allocation16 + $0x180] ss:$16 sps:$4 sm:$0xff]  }
 0x86e   : > { %14326 = vmatprep.subr.bf16.mxu0 %v16349_v49 }
 0x86f   : > { %14407 = vmatpush1.bf16.msra.mxu1 %v16344_v15  ;;  %v16386_v15 = vld [vmem:[#allocation16 + $0x188] ss:$16 sps:$4 sm:$0xff]  }
 0x870   : > { %15507 = vmatmul.mubr.msk.bf16.gmra.mrb[48].mxu0 %vm8305_vm1, %v12778_v19  ;;  %14408 = vmatprep.subr.bf16.mxu1 %v16352_v41  ;;  %v16362_v19 = vld [vmem:[#allocation16 + $0x108] ss:$16 sps:$4 sm:$0xff]  }
 0x871   : > { %14327 = vmatpush1.bf16.msra.mxu0 %v16347_v44  ;;  %v16391_v44 = vld [vmem:[#allocation16 + $0x1a4] ss:$16 sps:$4 sm:$0xff]  }
 0x872   : > { %15525 = vmatmul.mubr.msk.bf16.gmra.mrb[48].mxu1 %vm8305_vm1, %v12781_v26  ;;  %14328 = vmatprep.subr.bf16.mxu0 %v16355_v63  ;;  %v16370_v26 = vld [vmem:[#allocation16 + $0x12c] ss:$16 sps:$4 sm:$0xff]  }
 0x873   : > { %14409 = vmatpush1.bf16.msra.mxu1 %v16350_v16 }
 0x874   : > { %14410 = vmatprep.subr.bf16.mxu1 %v16358_v6  ;;  %v16394_v6 = vld [vmem:[#allocation16 + $0x1ac] ss:$16 sps:$4 sm:$0xff]  }
 0x875   : > { %14329 = vmatpush1.bf16.msra.mxu0 %v16353_v2 }
 0x876   : > { %14330 = vmatprep.subr.bf16.mxu0 %v16361_v50  ;;  %v16389_v50 = vld [vmem:[#allocation16 + $0x1a0] ss:$16 sps:$4 sm:$0xff]  }
 0x877   : > { %14411 = vmatpush1.bf16.msra.mxu1 %v16356_v3 }
 0x878   : > { %14412 = vmatprep.subr.bf16.mxu1 %v16364_v27  ;;  %v16392_v27 = vld [vmem:[#allocation16 + $0x1a8] ss:$16 sps:$4 sm:$0xff]  }
 0x879   : > { %14331 = vmatpush1.bf16.msra.mxu0 %v16359_v42  ;;  %v16397_v42 = vld [vmem:[#allocation16 + $0x1c4] ss:$16 sps:$4 sm:$0xff]  }
 0x87a   : > { %14332 = vmatprep.subr.bf16.mxu0 %v16367_v30  ;;  %v16395_v30 = vld [vmem:[#allocation16 + $0x1c0] ss:$16 sps:$4 sm:$0xff]  }
 0x87b   : > { %14413 = vmatpush1.bf16.msra.mxu1 %v16362_v19  ;;  %v16400_v19 = vld [vmem:[#allocation16 + $0x1cc] ss:$16 sps:$4 sm:$0xff]  }
 0x87c   : > { %14414 = vmatprep.subr.bf16.mxu1 %v16370_v26  ;;  %v16398_v26 = vld [vmem:[#allocation16 + $0x1c8] ss:$16 sps:$4 sm:$0xff]  }
 0x8c2   : > { %v15478_v0 = vpop.f32.mrb[20].mxu1 }
 0x8c3   : > { %v12967_v62 = vpop.f32.mrb[21].mxu1 }
 0x8c4   : > { %13310 = vxpose.xlu0.b32.start [1/16] (narrow) %v12967_v62, 8  ;;  %v15479_v39 = vpop.f32.mrb[22].mxu1  ;;  %v16368_v62 = vld [vmem:[#allocation16 + $0x128] ss:$16 sps:$4 sm:$0xff]  }
 0x8c5   : > { %v12970_v14 = vpop.f32.mrb[23].mxu1  ;;  %14415 = vmatpush1.bf16.msra.mxu1 %v16368_v62  ;;  %v16406_v62 = vld [vmem:[#allocation16 + $0x1ec] ss:$16 sps:$4 sm:$0xff]  }
 0x8c8   : > { %13311 = vxpose.xlu0.b32.cont [2/16] (narrow) %v12970_v14, 8  ;;  %v16376_v14 = vld [vmem:[#allocation16 + $0x14c] ss:$16 sps:$4 sm:$0xff]  }
 0x8c9   : > { %14416 = vmatprep.subr.bf16.mxu1 %v16376_v14  ;;  %v16404_v14 = vld [vmem:[#allocation16 + $0x1e8] ss:$16 sps:$4 sm:$0xff]  }
 0x8ca   : > { %v15482_v7 = vpop.f32.mrb[24].mxu1 }
 0x8cb   : > { %v12983_v54 = vpop.f32.mrb[25].mxu1 }
 0x8cc   : > { %13312 = vxpose.xlu0.b32.cont [3/16] (narrow) %v15478_v0, 8  ;;  %v15460_v17 = vpop.f32.mrb[20].mxu0  ;;  %v15483_v53 = vpop.f32.mrb[26].mxu1  ;;  %v16365_v0 = vld [vmem:[#allocation16 + $0x120] ss:$16 sps:$4 sm:$0xff]  }
 0x8cd   : > { %v12843_v28 = vpop.f32.mrb[21].mxu0  ;;  %v12986_v1 = vpop.f32.mrb[27].mxu1  ;;  %14333 = vmatpush1.bf16.msra.mxu0 %v16365_v0  ;;  %v16403_v0 = vld [vmem:[#allocation16 + $0x1e4] ss:$16 sps:$4 sm:$0xff]  }
 0x8ce   : > { %13278 = vxpose.xlu1.b32.start [1/16] (narrow) %v12843_v28, 8  ;;  %v15461_v36 = vpop.f32.mrb[22].mxu0 }
 0x8cf   : > { %v12846_v40 = vpop.f32.mrb[23].mxu0 }
 0x8d0   : > { %13313 = vxpose.xlu0.b32.cont [4/16] (narrow) %v15479_v39, 8  ;;  %v16373_v39 = vld [vmem:[#allocation16 + $0x144] ss:$16 sps:$4 sm:$0xff]  }
 0x8d1   : > { %14334 = vmatprep.subr.bf16.mxu0 %v16373_v39  ;;  %v16401_v39 = vld [vmem:[#allocation16 + $0x1e0] ss:$16 sps:$4 sm:$0xff]  }
 0x8d2   : > { %v15486_v25 = vpop.f32.mrb[28].mxu1  ;;  %13279 = vxpose.xlu1.b32.cont [2/16] (narrow) %v12846_v40, 8 }
 0x8d3   : > { %v12999_v22 = vpop.f32.mrb[29].mxu1 }
 0x8d4   : > { %13314 = vxpose.xlu0.b32.cont [5/16] (narrow) %v12983_v54, 8  ;;  %v15464_v61 = vpop.f32.mrb[24].mxu0  ;;  %v15487_v32 = vpop.f32.mrb[30].mxu1  ;;  %v16374_v54 = vld [vmem:[#allocation16 + $0x148] ss:$16 sps:$4 sm:$0xff]  }
 0x8d5   : > { %v12859_v57 = vpop.f32.mrb[25].mxu0  ;;  %v13002_v20 = vpop.f32.mrb[31].mxu1  ;;  %14417 = vmatpush1.bf16.msra.mxu1 %v16374_v54  ;;  %v16412_v54 = vld [vmem:[#allocation16 + $0x20c] ss:$16 sps:$4 sm:$0xff]  }
 0x8d6   : > { %13280 = vxpose.xlu1.b32.cont [3/16] (narrow) %v15460_v17, 8  ;;  %v15465_v18 = vpop.f32.mrb[26].mxu0  ;;  %14418 = vmatprep.subr.bf16.mxu1 %v16382_v38 }
 0x8d7   : > { %v12862_v9 = vpop.f32.mrb[27].mxu0 }
 0x8d8   : > { %13315 = vxpose.xlu0.b32.cont [6/16] (narrow) %v12986_v1, 8 }
 0x8d9   : > { %14419 = vmatpush1.bf16.msra.mxu1 %v16380_v13 }
 0x8da   : > { %13281 = vxpose.xlu1.b32.cont [4/16] (narrow) %v15461_v36, 8  ;;  %14420 = vmatprep.subr.bf16.mxu1 %v16388_v24 }
 0x8dc   : > { %13316 = vxpose.xlu0.b32.cont [7/16] (narrow) %v15482_v7, 8  ;;  %v15468_v31 = vpop.f32.mrb[28].mxu0  ;;  %v16371_v7 = vld [vmem:[#allocation16 + $0x140] ss:$16 sps:$4 sm:$0xff]  }
 0x8dd   : > { %v12875_v12 = vpop.f32.mrb[29].mxu0  ;;  %14335 = vmatpush1.bf16.msra.mxu0 %v16371_v7  ;;  %14421 = vmatpush1.bf16.msra.mxu1 %v16386_v15  ;;  %v16409_v7 = vld [vmem:[#allocation16 + $0x204] ss:$16 sps:$4 sm:$0xff]  }
 0x8de   : > { %13282 = vxpose.xlu1.b32.cont [5/16] (narrow) %v12859_v57, 8  ;;  %v15469_v46 = vpop.f32.mrb[30].mxu0  ;;  %14336 = vmatprep.subr.bf16.mxu0 %v16379_v60 }
 0x8df   : > { %v12878_v45 = vpop.f32.mrb[31].mxu0  ;;  %14422 = vmatprep.subr.bf16.mxu1 %v16394_v6  ;;  %v16424_v6 = vld [vmem:[#allocation16 + $0x24c] ss:$16 sps:$4 sm:$0xff]  }
 0x8e0   : > { %13317 = vxpose.xlu0.b32.cont [8/16] (narrow) %v15483_v53, 8 }
 0x8e1   : > { %14337 = vmatpush1.bf16.msra.mxu0 %v16377_v37  ;;  %14423 = vmatpush1.bf16.msra.mxu1 %v16392_v27  ;;  %v16430_v27 = vld [vmem:[#allocation16 + $0x26c] ss:$16 sps:$4 sm:$0xff]  }
 0x8e2   : > { %13283 = vxpose.xlu1.b32.cont [6/16] (narrow) %v12862_v9, 8  ;;  %14338 = vmatprep.subr.bf16.mxu0 %v16385_v11 }
 0x8e3   : > { %14424 = vmatprep.subr.bf16.mxu1 %v16400_v19  ;;  %v16428_v19 = vld [vmem:[#allocation16 + $0x268] ss:$16 sps:$4 sm:$0xff]  }
 0x8e4   : > { %13318 = vxpose.xlu0.b32.cont [9/16] (narrow) %v12999_v22, 8 }
 0x8e5   : > { %14339 = vmatpush1.bf16.msra.mxu0 %v16383_v58  ;;  %14425 = vmatpush1.bf16.msra.mxu1 %v16398_v26  ;;  %v16407_v58 = vld [vmem:[#allocation16 + $0x200] ss:$16 sps:$4 sm:$0xff]   ;;  %v16436_v26 = vld [vmem:[#allocation16 + $0x28c] ss:$16 sps:$4 sm:$0xff]  }
 0x8e6   : > { %13284 = vxpose.xlu1.b32.cont [7/16] (narrow) %v15464_v61, 8  ;;  %14340 = vmatprep.subr.bf16.mxu0 %v16391_v44  ;;  %v16413_v44 = vld [vmem:[#allocation16 + $0x220] ss:$16 sps:$4 sm:$0xff]  }
 0x8e7   : > { %14426 = vmatprep.subr.bf16.mxu1 %v16406_v62  ;;  %v16434_v62 = vld [vmem:[#allocation16 + $0x288] ss:$16 sps:$4 sm:$0xff]  }
 0x8e8   : > { %13319 = vxpose.xlu0.b32.cont [10/16] (narrow) %v13002_v20, 8 }
 0x8e9   : > { %14341 = vmatpush1.bf16.msra.mxu0 %v16389_v50  ;;  %14427 = vmatpush1.bf16.msra.mxu1 %v16404_v14  ;;  %v16427_v50 = vld [vmem:[#allocation16 + $0x264] ss:$16 sps:$4 sm:$0xff]   ;;  %v16442_v14 = vld [vmem:[#allocation16 + $0x2ac] ss:$16 sps:$4 sm:$0xff]  }
 0x8ea   : > { %13285 = vxpose.xlu1.b32.cont [8/16] (narrow) %v15465_v18, 8  ;;  %14342 = vmatprep.subr.bf16.mxu0 %v16397_v42  ;;  %v16425_v42 = vld [vmem:[#allocation16 + $0x260] ss:$16 sps:$4 sm:$0xff]  }
 0x8eb   : > { %14437 = vmatprep.subr.bf16.mxu1 %v16412_v54  ;;  %v16440_v54 = vld [vmem:[#allocation16 + $0x2a8] ss:$16 sps:$4 sm:$0xff]  }
 0x8ec   : > { %13320 = vxpose.xlu0.b32.cont [11/16] (narrow) %v15486_v25, 8 }
 0x8ed   : > { %14343 = vmatpush1.bf16.msra.mxu0 %v16395_v30  ;;  %v16433_v30 = vld [vmem:[#allocation16 + $0x284] ss:$16 sps:$4 sm:$0xff]  }
 0x8ee   : > { %13286 = vxpose.xlu1.b32.cont [9/16] (narrow) %v12875_v12, 8  ;;  %14344 = vmatprep.subr.bf16.mxu0 %v16403_v0  ;;  %v16431_v0 = vld [vmem:[#allocation16 + $0x280] ss:$16 sps:$4 sm:$0xff]  }
 0x8f0   : > { %13321 = vxpose.xlu0.b32.cont [12/16] (narrow) %v15487_v32, 8 }
 0x8f1   : > { %14345 = vmatpush1.bf16.msra.mxu0 %v16401_v39  ;;  %v16439_v39 = vld [vmem:[#allocation16 + $0x2a4] ss:$16 sps:$4 sm:$0xff]  }
 0x8f2   : > { %13287 = vxpose.xlu1.b32.cont [10/16] (narrow) %v12878_v45, 8  ;;  %14355 = vmatprep.subr.bf16.mxu0 %v16409_v7  ;;  %v16437_v7 = vld [vmem:[#allocation16 + $0x2a0] ss:$16 sps:$4 sm:$0xff]  }
 0x8f6   : > { %13288 = vxpose.xlu1.b32.cont [11/16] (narrow) %v15468_v31, 8 }
 0x8fa   : > { %13289 = vxpose.xlu1.b32.cont [12/16] (narrow) %v15469_v46, 8 }
 0x923   : > { %v15472_v17 = vpop.f32.mrb[32].mxu0 }
 0x924   : > { %v12891_v53 = vpop.f32.mrb[33].mxu0 }
 0x925   : > { %v15490_v28 = vpop.f32.mrb[32].mxu1  ;;  %13290 = vxpose.xlu1.b32.cont [13/16] (narrow) %v12891_v53, 8  ;;  %v15473_v1 = vpop.f32.mrb[34].mxu0 }
 0x926   : > { %v12894_v36 = vpop.f32.mrb[35].mxu0  ;;  %v13015_v40 = vpop.f32.mrb[33].mxu1 }
 0x927   : > { %13322 = vxpose.xlu0.b32.cont [13/16] (narrow) %v13015_v40, 8  ;;  %v15491_v25 = vpop.f32.mrb[34].mxu1 }
 0x928   : > { %v13018_v22 = vpop.f32.mrb[35].mxu1 }
 0x929   : > { %13291 = vxpose.xlu1.b32.cont [14/16] (narrow) %v12894_v36, 8 }
 0x92b   : > { %13323 = vxpose.xlu0.b32.cont [14/16] (narrow) %v13018_v22, 8  ;;  %v15496_v61 = vpop.f32.mrb[36].mxu0 }
 0x92c   : > { %v13091_v32 = vpop.f32.mrb[37].mxu0 }
 0x92d   : > { %v15514_v57 = vpop.f32.mrb[36].mxu1  ;;  %13292 = vxpose.xlu1.b32.cont [15/16] (narrow) %v15472_v17, 8  ;;  %v15497_v20 = vpop.f32.mrb[38].mxu0 }
 0x92e   : > { %v13094_v18 = vpop.f32.mrb[39].mxu0  ;;  %v13215_v9 = vpop.f32.mrb[37].mxu1 }
 0x92f   : > { %13324 = vxpose.xlu0.b32.cont [15/16] (narrow) %v15490_v28, 8  ;;  %v15515_v31 = vpop.f32.mrb[38].mxu1 }
 0x930   : > { %v13218_v12 = vpop.f32.mrb[39].mxu1 }
 0x931   : > { %13293 = vxpose.xlu1.b32.end [16/16] (narrow) %v15473_v1, 8 }
 0x933   : > { %13325 = vxpose.xlu0.b32.end [16/16] (narrow) %v15491_v25, 8  ;;  %v19594_v46 = vpop.f32.mrb[40].mxu0 }
 0x934   : > { %v13107_v45 = vpop.f32.mrb[41].mxu0 }
 0x935   : > { %v15518_v43 = vpop.f32.mrb[40].mxu1  ;;  %13374 = vxpose.xlu1.b32.start [1/16] (narrow) %v13215_v9, 8  ;;  %v19596_v8 = vpop.f32.mrb[42].mxu0 }
 0x936   : > { %v13110_v59 = vpop.f32.mrb[43].mxu0  ;;  %v13231_v51 = vpop.f32.mrb[41].mxu1 }
 0x937   : > { %v19598_v5 = vpop.f32.mrb[42].mxu1  ;;  %13342 = vxpose.xlu0.b32.start [1/16] (narrow) %v13091_v32, 8 }
 0x938   : > { %v13234_v34 = vpop.f32.mrb[43].mxu1 }
 0x939   : > { %13375 = vxpose.xlu1.b32.cont [2/16] (narrow) %v13218_v12, 8 }
 0x93b   : > { %13343 = vxpose.xlu0.b32.cont [2/16] (narrow) %v13094_v18, 8  ;;  %v19600_v33 = vpop.f32.mrb[44].mxu0 }
 0x93c   : > { %v19602_v56 = vpop.f32.mrb[45].mxu0 }
 0x93d   : > { %v19604_v10 = vpop.f32.mrb[44].mxu1  ;;  %13376 = vxpose.xlu1.b32.cont [3/16] (narrow) %v15514_v57, 8  ;;  %v19606_v21 = vpop.f32.mrb[46].mxu0 }
 0x93e   : > { %v19608_v48 = vpop.f32.mrb[47].mxu0  ;;  %v19610_v4 = vpop.f32.mrb[45].mxu1 }
 0x93f   : > { %v19612_v35 = vpop.f32.mrb[46].mxu1  ;;  %13344 = vxpose.xlu0.b32.cont [3/16] (narrow) %v15496_v61, 8 }
 0x940   : > { %v19614_v23 = vpop.f32.mrb[47].mxu1 }
 0x941   : > { %13377 = vxpose.xlu1.b32.cont [4/16] (narrow) %v15515_v31, 8 }
 0x943   : > { %13345 = vxpose.xlu0.b32.cont [4/16] (narrow) %v15497_v20, 8  ;;  %v19616_v55 = vpop.f32.mrb[48].mxu0 }
 0x944   : > { %v13139_v52 = vpop.f32.mrb[49].mxu0 }
 0x945   : > { %v15526_v49 = vpop.f32.mrb[48].mxu1  ;;  %13378 = vxpose.xlu1.b32.cont [5/16] (narrow) %v13231_v51, 8  ;;  %v15509_v41 = vpop.f32.mrb[50].mxu0 }
 0x946   : > { %v13142_v16 = vpop.f32.mrb[51].mxu0  ;;  %v13263_v63 = vpop.f32.mrb[49].mxu1 }
 0x947   : > { %v15527_v2 = vpop.f32.mrb[50].mxu1  ;;  %13346 = vxpose.xlu0.b32.cont [5/16] (narrow) %v13107_v45, 8 }
 0x948   : > { %v13266_v3 = vpop.f32.mrb[51].mxu1 }
 0x949   : > { %13379 = vxpose.xlu1.b32.cont [6/16] (narrow) %v13234_v34, 8 }
 0x94b   : > { %13347 = vxpose.xlu0.b32.cont [6/16] (narrow) %v13110_v59, 8 }
 0x94d   : > { %13380 = vxpose.xlu1.b32.cont [7/16] (narrow) %v15518_v43, 8 }
 0x94f   : > { %13348 = vxpose.xlu0.b32.cont [7/16] (narrow) %v19594_v46, 8 }
 0x951   : > { %13381 = vxpose.xlu1.b32.cont [8/16] (narrow) %v19598_v5, 8 }
 0x953   : > { %13349 = vxpose.xlu0.b32.cont [8/16] (narrow) %v19596_v8, 8 }
 0x955   : > { %13382 = vxpose.xlu1.b32.cont [9/16] (narrow) %v19610_v4, 8 }
 0x957   : > { %13350 = vxpose.xlu0.b32.cont [9/16] (narrow) %v19602_v56, 8 }
 0x959   : > { %13383 = vxpose.xlu1.b32.cont [10/16] (narrow) %v19614_v23, 8 }
 0x95b   : > { %13351 = vxpose.xlu0.b32.cont [10/16] (narrow) %v19608_v48, 8 }
 0x95d   : > { %13384 = vxpose.xlu1.b32.cont [11/16] (narrow) %v19604_v10, 8 }
 0x95f   : > { %13352 = vxpose.xlu0.b32.cont [11/16] (narrow) %v19600_v33, 8 }
 0x961   : > { %13385 = vxpose.xlu1.b32.cont [12/16] (narrow) %v19612_v35, 8 }
 0x963   : > { %13353 = vxpose.xlu0.b32.cont [12/16] (narrow) %v19606_v21, 8 }
 0x965   : > { %13386 = vxpose.xlu1.b32.cont [13/16] (narrow) %v13263_v63, 8  ;;  %v16421_v63 = vld [vmem:[#allocation16 + $0x244] ss:$16 sps:$4 sm:$0xff]  }
 0x967   : > { %13354 = vxpose.xlu0.b32.cont [13/16] (narrow) %v13139_v52, 8 }
 0x969   : > { %13387 = vxpose.xlu1.b32.cont [14/16] (narrow) %v13266_v3, 8  ;;  %v16422_v3 = vld [vmem:[#allocation16 + $0x248] ss:$16 sps:$4 sm:$0xff]  }
 0x96b   : > { %13355 = vxpose.xlu0.b32.cont [14/16] (narrow) %v13142_v16, 8 }
 0x96d   : > { %13388 = vxpose.xlu1.b32.cont [15/16] (narrow) %v15526_v49, 8  ;;  %v16415_v49 = vld [vmem:[#allocation16 + $0x224] ss:$16 sps:$4 sm:$0xff]  }
 0x96f   : > { %13356 = vxpose.xlu0.b32.cont [15/16] (narrow) %v19616_v55, 8 }
 0x971   : > { %13389 = vxpose.xlu1.b32.end [16/16] (narrow) %v15527_v2, 8  ;;  %v16419_v2 = vld [vmem:[#allocation16 + $0x240] ss:$16 sps:$4 sm:$0xff]  }
 0x973   : > { %13357 = vxpose.xlu0.b32.end [16/16] (narrow) %v15509_v41, 8  ;;  %v16418_v41 = vld [vmem:[#allocation16 + $0x22c] ss:$16 sps:$4 sm:$0xff]  }
 0x975   : > { %v13294_v17 = vpop.trf.xlu1 }
 0x977   : > { %v13326_v53 = vpop.trf.xlu0 }
 0x9b5   : > { %v13390_v28 = vpop.trf.xlu1 }
 0x9b6   : > { %v13422_v1 = vcombine.low %v13326_v53, %v13390_v28  ;;  %v13423_v36 = vcombine.high %v13326_v53, %v13390_v28  ;;  %v16448_v53 = vld [vmem:[#allocation16 + $0x2cc] ss:$16 sps:$4 sm:$0xff]   ;;  %v16443_v28 = vld [vmem:[#allocation16 + $0x2c0] ss:$16 sps:$4 sm:$0xff]  }
 0x9b7   : > { %v13358_v40 = vpop.trf.xlu0 }
 0x9b8   : > { %v13406_v25 = vcombine.low %v13294_v17, %v13358_v40  ;;  %v13407_v22 = vcombine.high %v13294_v17, %v13358_v40  ;;  %v13430_v61 = vrot.slane %v13422_v1, %v17463_v29  ;;  %v13437_v32 = vrot.slane %v13423_v36, %v17463_v29  ;;  %v16445_v17 = vld [vmem:[#allocation16 + $0x2c4] ss:$16 sps:$4 sm:$0xff]   ;;  %v16446_v1 = vld [vmem:[#allocation16 + $0x2c8] ss:$16 sps:$4 sm:$0xff]   ;;  %v16454_v40 = vld [vmem:[#allocation16 + $0x2ec] ss:$16 sps:$4 sm:$0xff]  }
 0x9b9   : > { %v16451_v36 = vld [vmem:[#allocation16 + $0x2e4] ss:$16 sps:$4 sm:$0xff]  }
 0x9ba   : > { %v13414_v57 = vrot.slane %v13406_v25, %v17463_v29  ;;  %v13421_v20 = vrot.slane %v13407_v22, %v17463_v29  ;;  %v16449_v25 = vld [vmem:[#allocation16 + $0x2e0] ss:$16 sps:$4 sm:$0xff]   ;;  %v16452_v22 = vld [vmem:[#allocation16 + $0x2e8] ss:$16 sps:$4 sm:$0xff]  }
 0x9bc   : > { %v13438_v18 = vcombine.low %v13414_v57, %v13430_v61  ;;  %v13439_v9 = vcombine.high %v13414_v57, %v13430_v61  ;;  %v13454_v31 = vcombine.low %v13421_v20, %v13437_v32  ;;  %v13455_v12 = vcombine.high %v13421_v20, %v13437_v32  ;;  %v16457_v61 = vld [vmem:[#allocation16 + $0x304] ss:$16 sps:$4 sm:$0xff]   ;;  %v16460_v32 = vld [vmem:[#allocation16 + $0x30c] ss:$16 sps:$4 sm:$0xff]   ;;  %v16455_v57 = vld [vmem:[#allocation16 + $0x300] ss:$16 sps:$4 sm:$0xff]  }
 0x9bd   : > { %v16458_v20 = vld [vmem:[#allocation16 + $0x308] ss:$16 sps:$4 sm:$0xff]  }
 0x9be   : > { %v13446_v46 = vrot.slane %v13438_v18, %v17469_v47  ;;  %v13453_v45 = vrot.slane %v13439_v9, %v17469_v47  ;;  %v13462_v43 = vrot.slane %v13454_v31, %v17469_v47  ;;  %v13469_v8 = vrot.slane %v13455_v12, %v17469_v47  ;;  %v16463_v18 = vld [vmem:[#allocation16 + $0x324] ss:$16 sps:$4 sm:$0xff]   ;;  %v16466_v9 = vld [vmem:[#allocation16 + $0x32c] ss:$16 sps:$4 sm:$0xff]   ;;  %v16461_v31 = vld [vmem:[#allocation16 + $0x320] ss:$16 sps:$4 sm:$0xff]  }
 0x9bf   : > { %v16464_v12 = vld [vmem:[#allocation16 + $0x328] ss:$16 sps:$4 sm:$0xff]  }
 0x9c0   : > { %v13474_v59 = vcombine.low %v13446_v46, %v13453_v45  ;;  %v15166_v51 = vcombine.high %v13446_v46, %v13453_v45  ;;  %v13490_v5 = vcombine.low %v13462_v43, %v13469_v8  ;;  %v15167_v34 = vcombine.high %v13462_v43, %v13469_v8  ;;  %v16469_v46 = vld [vmem:[#allocation16 + $0x344] ss:$16 sps:$4 sm:$0xff]   ;;  %v16472_v45 = vld [vmem:[#allocation16 + $0x34c] ss:$16 sps:$4 sm:$0xff]   ;;  %v16467_v43 = vld [vmem:[#allocation16 + $0x340] ss:$16 sps:$4 sm:$0xff]  }
 0x9c1   : > { %v16470_v8 = vld [vmem:[#allocation16 + $0x348] ss:$16 sps:$4 sm:$0xff]  }
 0x9c2   : > { %v13481_v33 = vrot.slane %v13474_v59, %v17463_v29  ;;  %v13489_v56 = vrot.slane %v15166_v51, %v17463_v29  ;;  %v13497_v10 = vrot.slane %v13490_v5, %v17463_v29  ;;  %v13505_v21 = vrot.slane %v15167_v34, %v17463_v29  ;;  %v16410_v29 = vld [vmem:[#allocation16 + $0x208] ss:$16 sps:$4 sm:$0xff]   ;;  %v16475_v59 = vld [vmem:[#allocation16 + $0x364] ss:$16 sps:$4 sm:$0xff]   ;;  %v16478_v51 = vld [vmem:[#allocation16 + $0x36c] ss:$16 sps:$4 sm:$0xff]  }
 0x9c3   : > { %v16473_v5 = vld [vmem:[#allocation16 + $0x360] ss:$16 sps:$4 sm:$0xff]   ;;  %v16476_v34 = vld [vmem:[#allocation16 + $0x368] ss:$16 sps:$4 sm:$0xff]  }
 0x9c4   : > { %v13506_v48 = vcombine.low %v13481_v33, %v13489_v56  ;;  %v13522_v4 = vcombine.low %v13497_v10, %v13505_v21  ;;  %v13507_v35 = vcombine.high %v13481_v33, %v13489_v56  ;;  %v13523_v23 = vcombine.high %v13497_v10, %v13505_v21  ;;  %v16481_v33 = vld [vmem:[#allocation16 + $0x384] ss:$16 sps:$4 sm:$0xff]   ;;  %v16484_v56 = vld [vmem:[#allocation16 + $0x38c] ss:$16 sps:$4 sm:$0xff]   ;;  %v16479_v10 = vld [vmem:[#allocation16 + $0x380] ss:$16 sps:$4 sm:$0xff]  }
 0x9c5   : > { %v16482_v21 = vld [vmem:[#allocation16 + $0x388] ss:$16 sps:$4 sm:$0xff]  }
 0x9c6   : > { %v13514_v37 = vrot.slane %v13506_v48, %v17469_v47  ;;  %v13530_v60 = vrot.slane %v13522_v4, %v17469_v47  ;;  %v19645_v13 = vrot.slane %v13507_v35, %v17469_v47  ;;  %v19648_v38 = vrot.slane %v13523_v23, %v17469_v47  ;;  %v16416_v47 = vld [vmem:[#allocation16 + $0x228] ss:$16 sps:$4 sm:$0xff]   ;;  %v16487_v48 = vld [vmem:[#allocation16 + $0x3a4] ss:$16 sps:$4 sm:$0xff]   ;;  %v16490_v4 = vld [vmem:[#allocation16 + $0x3ac] ss:$16 sps:$4 sm:$0xff]  }
 0x9c7   : > { %v16485_v35 = vld [vmem:[#allocation16 + $0x3a0] ss:$16 sps:$4 sm:$0xff]   ;;  %v16488_v23 = vld [vmem:[#allocation16 + $0x3a8] ss:$16 sps:$4 sm:$0xff]  }
 0x9c8   : > { %v13538_v11 = vcombine.low %v13514_v37, %v13530_v60  ;;  %v13539_v55 = vcombine.high %v13514_v37, %v13530_v60  ;;  %v13541_v15 = vcombine.high %v19645_v13, %v19648_v38  ;;  %v16493_v37 = vld [vmem:[#allocation16 + $0x3c4] ss:$16 sps:$4 sm:$0xff]   ;;  %v16496_v60 = vld [vmem:[#allocation16 + $0x3cc] ss:$16 sps:$4 sm:$0xff]  }
 0x9ca   : > { %v13542_v24 = vpack.c.bf16 %v13538_v11, %v13538_v11  ;;  %v13543_v52 = vpack.c.bf16 %v13539_v55, %v13539_v55  ;;  %v13545_v16 = vpack.c.bf16 %v13541_v15, %v13541_v15  ;;  %v16491_v11 = vld [vmem:[#allocation16 + $0x3c0] ss:$16 sps:$4 sm:$0xff]   ;;  %v16494_v55 = vld [vmem:[#allocation16 + $0x3c8] ss:$16 sps:$4 sm:$0xff]   ;;  %v13540_v15 = vcombine.low %v19645_v13, %v19648_v38 }
 0x9cc   : > { %14346 = vmatprep.mubr.bf16.mxu0 %v13543_v52  ;;  %14428 = vmatprep.mubr.bf16.mxu1 %v13543_v52  ;;  %v16502_v52 = vld [vmem:[#allocation16 + $0x3ec] ss:$16 sps:$4 sm:$0xff]  }
 0x9cd   : > { %14347 = vmatmul.mubr.bf16.vlgmr.msra.gmra.mrb[52].mxu0 %v13542_v24  ;;  %14429 = vmatmul.mubr.bf16.vlgmr.msra.gmra.mrb[52].mxu1 %v13542_v24  ;;  %v16499_v24 = vld [vmem:[#allocation16 + $0x3e4] ss:$16 sps:$4 sm:$0xff]  }
 0x9ce   : > { %14356 = vmatpush1.bf16.msra.mxu0 %v16407_v58  ;;  %14438 = vmatpush1.bf16.msra.mxu1 %v16410_v29  ;;  %v16497_v58 = vld [vmem:[#allocation16 + $0x3e0] ss:$16 sps:$4 sm:$0xff]   ;;  %v16500_v29 = vld [vmem:[#allocation16 + $0x3e8] ss:$16 sps:$4 sm:$0xff]  }
 0x9cf   : > { %14357 = vmatprep.subr.bf16.mxu0 %v16415_v49  ;;  %14439 = vmatprep.subr.bf16.mxu1 %v16418_v41  ;;  %v13544_v49 = vpack.c.bf16 %v13540_v15, %v13540_v15 }
 0x9d0   : > { %14387 = vmatprep.mubr.bf16.mxu0 %v13545_v16  ;;  %14469 = vmatprep.mubr.bf16.mxu1 %v13545_v16 }
 0x9d2   : > { %14358 = vmatpush1.bf16.msra.mxu0 %v16413_v44  ;;  %14440 = vmatpush1.bf16.msra.mxu1 %v16416_v47  ;;  %v20027_v47 = vld [vmem:[#allocation46_spill] sm:$0xff] }
 0x9d3   : > { %14359 = vmatprep.subr.bf16.mxu0 %v16421_v63  ;;  %14441 = vmatprep.subr.bf16.mxu1 %v16424_v6 }
 0x9d6   : > { %14360 = vmatpush1.bf16.msra.mxu0 %v16419_v2  ;;  %14442 = vmatpush1.bf16.msra.mxu1 %v16422_v3 }
 0x9d7   : > { %14361 = vmatprep.subr.bf16.mxu0 %v16427_v50  ;;  %14443 = vmatprep.subr.bf16.mxu1 %v16430_v27 }
 0x9da   : > { %14362 = vmatpush1.bf16.msra.mxu0 %v16425_v42  ;;  %14444 = vmatpush1.bf16.msra.mxu1 %v16428_v19 }
 0x9db   : > { %14363 = vmatprep.subr.bf16.mxu0 %v16433_v30  ;;  %14445 = vmatprep.subr.bf16.mxu1 %v16436_v26 }
 0x9de   : > { %14364 = vmatpush1.bf16.msra.mxu0 %v16431_v0  ;;  %14446 = vmatpush1.bf16.msra.mxu1 %v16434_v62 }
 0x9df   : > { %14365 = vmatprep.subr.bf16.mxu0 %v16439_v39  ;;  %14447 = vmatprep.subr.bf16.mxu1 %v16442_v14 }
 0x9e2   : > { %14366 = vmatpush1.bf16.msra.mxu0 %v16437_v7  ;;  %14448 = vmatpush1.bf16.msra.mxu1 %v16440_v54 }
 0x9e3   : > { %14367 = vmatprep.subr.bf16.mxu0 %v16445_v17  ;;  %14449 = vmatprep.subr.bf16.mxu1 %v16448_v53 }
 0x9e6   : > { %14368 = vmatpush1.bf16.msra.mxu0 %v16443_v28  ;;  %14450 = vmatpush1.bf16.msra.mxu1 %v16446_v1 }
 0x9e7   : > { %14369 = vmatprep.subr.bf16.mxu0 %v16451_v36  ;;  %14451 = vmatprep.subr.bf16.mxu1 %v16454_v40 }
 0x9ea   : > { %14370 = vmatpush1.bf16.msra.mxu0 %v16449_v25  ;;  %14452 = vmatpush1.bf16.msra.mxu1 %v16452_v22 }
 0x9eb   : > { %14371 = vmatprep.subr.bf16.mxu0 %v16457_v61  ;;  %14453 = vmatprep.subr.bf16.mxu1 %v16460_v32 }
 0x9ee   : > { %14372 = vmatpush1.bf16.msra.mxu0 %v16455_v57  ;;  %14454 = vmatpush1.bf16.msra.mxu1 %v16458_v20 }
 0x9ef   : > { %14373 = vmatprep.subr.bf16.mxu0 %v16463_v18  ;;  %14455 = vmatprep.subr.bf16.mxu1 %v16466_v9 }
 0x9f2   : > { %14374 = vmatpush1.bf16.msra.mxu0 %v16461_v31  ;;  %14456 = vmatpush1.bf16.msra.mxu1 %v16464_v12 }
 0x9f3   : > { %14375 = vmatprep.subr.bf16.mxu0 %v16469_v46  ;;  %14457 = vmatprep.subr.bf16.mxu1 %v16472_v45 }
 0x9f6   : > { %14376 = vmatpush1.bf16.msra.mxu0 %v16467_v43  ;;  %14458 = vmatpush1.bf16.msra.mxu1 %v16470_v8 }
 0x9f7   : > { %14377 = vmatprep.subr.bf16.mxu0 %v16475_v59  ;;  %14459 = vmatprep.subr.bf16.mxu1 %v16478_v51 }
 0x9fa   : > { %14378 = vmatpush1.bf16.msra.mxu0 %v16473_v5  ;;  %14460 = vmatpush1.bf16.msra.mxu1 %v16476_v34 }
 0x9fb   : > { %14379 = vmatprep.subr.bf16.mxu0 %v16481_v33  ;;  %14461 = vmatprep.subr.bf16.mxu1 %v16484_v56 }
 0x9fe   : > { %14380 = vmatpush1.bf16.msra.mxu0 %v16479_v10  ;;  %14462 = vmatpush1.bf16.msra.mxu1 %v16482_v21 }
 0x9ff   : > { %14381 = vmatprep.subr.bf16.mxu0 %v16487_v48  ;;  %14463 = vmatprep.subr.bf16.mxu1 %v16490_v4 }
 0xa02   : > { %14382 = vmatpush1.bf16.msra.mxu0 %v16485_v35  ;;  %14464 = vmatpush1.bf16.msra.mxu1 %v16488_v23 }
 0xa03   : > { %14383 = vmatprep.subr.bf16.mxu0 %v16493_v37  ;;  %14465 = vmatprep.subr.bf16.mxu1 %v16496_v60 }
 0xa06   : > { %14384 = vmatpush1.bf16.msra.mxu0 %v16491_v11  ;;  %14466 = vmatpush1.bf16.msra.mxu1 %v16494_v55 }
 0xa07   : > { %14385 = vmatprep.subr.bf16.mxu0 %v16499_v24  ;;  %14467 = vmatprep.subr.bf16.mxu1 %v16502_v52 }
 0xa0a   : > { %14386 = vmatpush1.bf16.msra.mxu0 %v16497_v58  ;;  %14468 = vmatpush1.bf16.msra.mxu1 %v16500_v29 }
 0xa0d   : > { %14388 = vmatmul.mubr.bf16.vlgmr.msra.gmra.mrb[52].mxu0 %v13544_v49  ;;  %14470 = vmatmul.mubr.bf16.vlgmr.msra.gmra.mrb[52].mxu1 %v13544_v49 }
 0xae0   : > { %v14389_v41 = vpop.f32.mrb[52].mxu0  ;;  %v14471_v44 = vpop.f32.mrb[52].mxu1 }
 0xae1   : > { %v14478_v16 = vmul.f32 %v14389_v41, %v20027_v47  ;;  %v14480_v63 = vmul.f32 %v14471_v44, %v20027_v47  ;;  %v14391_v13 = vpop.f32.mrb[53].mxu0  ;;  %v14473_v38 = vpop.f32.mrb[53].mxu1 }
 0xae2   : > { %v14479_v6 = vmul.f32 %v14391_v13, %v20027_v47  ;;  %v14481_v2 = vmul.f32 %v14473_v38, %v20027_v47  ;;  %v14393_v3 = vpop.f32.mrb[54].mxu0  ;;  %v14475_v50 = vpop.f32.mrb[54].mxu1 }
 0xae3   : > { %14482 = vst [vmem:[%s569_s29] sm:$0xff] %v14478_v16  ;;  %14484 = vst [vmem:[%s569_s29 + $0x10] sm:$0xff] %v14480_v63  ;;  %v14394_v27 = vpop.f32.mrb[55].mxu0  ;;  %v14476_v42 = vpop.f32.mrb[55].mxu1 }
 0xae4   : > { %14483 = vst [vmem:[%s569_s29 + $0x8] sm:$0xff] %v14479_v6  ;;  %14485 = vst [vmem:[%s569_s29 + $0x18] sm:$0xff] %v14481_v2 }
 0xae5   : > { %16794 = shalt.err (!%p16791_p1)
}
 0xae6   : > { %s16795_s30 = scalar_lea.hbm %s19665_s1, 512  ;;  %s16799_s27 = scalar_lea.hbm %s20029_s28, 2048 }
 0xae7   : > { %p16796_p10 = scmp.ne.s32.totalorder %s19665_s1, %s16795_s30  ;;  %p16800_p4 = scmp.lt.u32.totalorder %s19665_s1, %s20029_s28 }
 0xae8   : > { %p16801_p3 = scmp.lt.u32.totalorder %s16799_s27, %s16795_s30  ;;  %p16803_p0 = scmp.lt.u32.totalorder %s16795_s30, %s19665_s1 }
 0xae9   : > { %p16797_p13 = pnand %p16796_p10, %p20030_p7 }
 0xaea   : > { %p16802_p6 = por %p16801_p3, %p16800_p4 }
 0xaeb   : > { %p16798_p2 = pneg %p16797_p13 }
 0xaec   : > { %p16804_p9 = por %p16803_p0, %p16802_p6 }
 0xaee   : > { %p16805_p8 = pnand %p16804_p9, %p16798_p2 }
 0xaf0   : > { %16808 = shalt.err (!%p16805_p8)
}
 0xaf1   : > { %15590 = dma.vmem_to_hbm [thread:$0]  (%p20030_p7), %s19667_s15, 512, %s19665_s1, %s14487_s5  }
 0xaf2 PF: > { %s20031_s20 = sld [smem:[#allocation30_spill]]  ;;  %s20032_s26 = sld [smem:[#allocation26_spill]] }
 0xaf3   : > { %s20033_s10 = sld [smem:[#allocation37_spill]] }
 0xaf8   : > { %p15634_p5 = scmp.ge.s32.totalorder %s20031_s20, 2  ;;  %s14515_s23 = sand.u32 1, %s20032_s26  }
 0xaf9   : > { %p20034_p11 = scmp.ne.s32.totalorder %s20033_s10, 0  ;;  %s14516_s29 = scalar_lea.sflag [#allocation4], %s14515_s23 }
 0xafb   : > { %p15622_p12 = pnand %p15634_p5, %p20034_p11 }
 0xafd   : > { %16878 = dma.done.wait (!%p15622_p12), %s14516_s29, 512  }
 0xafe   : > { %16880 = vsyncadd (!%p15622_p12), %s14516_s29, 4294966784  ;;  %s33_s19 = sadd.s32 1, %s20031_s20   ;;  %s20035_s30 = sld [smem:[#allocation25_spill]] }
 0xaff   : > { %p30_p1 = scmp.ge.s32.totalorder %s33_s19, 6   ;;  %s20036_s4 = sld [smem:[#allocation38_spill]] }
 0xb00   : > { %s20037_s16 = sld [smem:[#allocation27_spill]]  ;;  %s20038_s14 = sld [smem:[#allocation39_spill]] }
 0xb01   : > { %s20039_s24 = sld [smem:[#allocation34_spill]]  ;;  %s20040_s1 = sld [smem:[#allocation35_spill]] }
 0xb02   : > { %s20041_s10 = smov %s16891_s11  ;;  %s20043_s12 = smov %s16899_s13 }
 0xb03   : > { %s20045_s15 = smov %s16915_s17  ;;  %32 = sbr.rel (!%p30_p1) target bundleno = 24 (0x18), region = 165 }
 0xb05   : > { %s20042_s11 = smov %s20036_s4 }
 0xb06   : > { %s20044_s13 = smov %s20037_s16  ;;  %s20046_s16 = smov %s16919_s18 }
 0xb07   : > { %s20047_s17 = smov %s20039_s24  ;;  %s20048_s18 = smov %s20040_s1 }
 0xb0a   :  { %14521 = vsyncpa [#allocation3], 1 }
 0xb0b   :  { %14523 = vsyncpa [#allocation3 + $0x1], 1 }
 0xb0c   :  { %14524 = vsyncpa [#allocation6], 1 }
 0xb0d   :  { %14526 = vsyncpa [#allocation6 + $0x1], 1 }
 0xb0e   :  { %14527 = vsyncpa [#allocation9], 1 }
 0xb0f   :  { %14529 = vsyncpa [#allocation9 + $0x1], 1 }
 0xb10   :  { %14530 = vsyncpa [#allocation12], 1 }
 0xb11   :  { %14531 = vsyncpa [#allocation15], 1 }
 0xb12   :  { %14532 = vsyncpa [#allocation4], 1 }
 0xb13   :  { %14534 = vsyncpa [#allocation4 + $0x1], 1 }

</bundles_post_ra>
